<compile_context>
chip_gen: v5e
topology: v5e:2x2
jax: 0.10.0
libtpu: 0.0.40
codegen_flags: <defaults>
</compile_context>

<pallas_src>
import functools
import time

import numpy as np
import jax
import jax.numpy as jnp
from jax.experimental import pallas as pl
from jax.experimental.pallas import tpu as pltpu

# ----------------------------------------------------------------------------
# Physical constants for the (gt-mode) CTF, deterministic.
RESOLUTION = 3.2                                   # Angstrom / pixel
KV = 300.0
_V = KV * 1e3
WAVELENGTH = 12.2639 / (_V + 0.97845e-6 * _V * _V) ** 0.5   # Angstrom
CS = 2.7e7                                         # spherical aberration (A)
AMP_CONTRAST = 0.1
W0_FIRST = 30.0
W0_HIDDEN = 30.0   # standard SIREN omega_0 on hidden layers

C1 = 8    # stage-1 channels of the reduced VGG-style encoder
C2 = 16   # stage-2 channels


# ----------------------------------------------------------------------------
# Host-side (trace-time) constants for the fused encoder kernel.
# ----------------------------------------------------------------------------
@functools.lru_cache(maxsize=None)
def _conv_masks_np(H, W, B):
    """(9, B*H*W) border-validity masks for the 9 taps of a 'same' 3x3 conv."""
    HW = H * W
    L = B * HW
    idx = np.arange(L)
    ii = (idx % HW) // W
    jj = idx % W
    m = np.zeros((9, L), np.float32)
    for t in range(9):
        oy, ox = t // 3 - 1, t % 3 - 1
        m[t] = ((ii + oy >= 0) & (ii + oy < H) & (jj + ox >= 0) & (jj + ox < W))
    return m


@functools.lru_cache(maxsize=None)
def _pool_sel_np(H, W, B):
    """0/1 selection matrix (B*H*W, B*(H//2)*(W//2)) gathering 2x2-window
    top-left pixels (window max is computed in-kernel via lane rolls)."""
    HW = H * W
    Ho, Wo = H // 2, W // 2
    sel = np.zeros((B * HW, B * Ho * Wo), np.float32)
    for b in range(B):
        for io in range(Ho):
            for jo in range(Wo):
                k = b * Ho * Wo + io * Wo + jo
                src = b * HW + (2 * io) * W + (2 * jo)
                sel[src, k] = 1.0
    return sel


# ----------------------------------------------------------------------------
# Pallas kernel 1: fused CNN encoder
#   relu(conv3x3) x2 -> maxpool -> relu(conv3x3) x2 -> maxpool
# Layout: (C, B*H*W): pixels on the lane axis (lane-dense), channels on
# sublanes, the whole batch in one block (no grid).
# ----------------------------------------------------------------------------
def _encoder_kernel(x_ref, w1a_ref, w1b_ref, b1b_ref, w2a_ref, b2a_ref,
                    w2b_ref, b2b_ref, m1_ref, m2_ref, sel1_ref, sel2_ref,
                    feat_ref, taps_ref, *, H, W, B):
    H2, W2 = H // 2, W // 2
    L1 = B * H * W
    L2 = B * H2 * W2
    offs1 = [oy * W + ox for oy in (-1, 0, 1) for ox in (-1, 0, 1)]
    offs2 = [oy * W2 + ox for oy in (-1, 0, 1) for ox in (-1, 0, 1)]
    m1 = m1_ref[...]                       # (9, L1) -- masks shared by both stage-1 convs
    m2 = m2_ref[...]                       # (9, L2)

    def stack_taps(v, mask, offs, L, cin):
        # Build the stacked-tap operand (9*cin, L) in VMEM scratch via static
        # slice stores, then read it once -> one wide-K MXU matmul per conv.
        for t, d in enumerate(offs):
            vt = pltpu.roll(v, shift=(-d) % L, axis=1) if d != 0 else v
            taps_ref[t * cin:(t + 1) * cin, 0:L] = vt * mask[t:t + 1, :]
        return taps_ref[0:9 * cin, 0:L]

    def pool(v, L, w_img, sel_ref):
        # 2x2 max-pool: window max via lane rolls, then compact lanes with a
        # 0/1 selection matmul (also defines the pooled lane ordering).
        vmax = jnp.maximum(
            jnp.maximum(v, pltpu.roll(v, shift=L - 1, axis=1)),
            jnp.maximum(pltpu.roll(v, shift=L - w_img, axis=1),
                        pltpu.roll(v, shift=L - w_img - 1, axis=1)))
        return jnp.dot(vmax, sel_ref[...], preferred_element_type=jnp.float32)

    # ---- stage 1 -----------------------------------------------------------
    x = x_ref[...]                                         # (1, L1)
    # conv1a (Cin=1): pure-VPU broadcast FMAs over the 9 taps; bias in col 9.
    acc = None
    for t, d in enumerate(offs1):
        xt = pltpu.roll(x, shift=(-d) % L1, axis=1) if d != 0 else x
        term = w1a_ref[:, t:t + 1] * (xt * m1[t:t + 1, :])  # (C1,1)*(1,L1)
        acc = term if acc is None else acc + term
    y = jnp.maximum(acc + w1a_ref[:, 9:10], 0.0)            # (C1, L1)

    # conv1b: single (C1, 9*C1) @ (9*C1, L1) matmul.
    st = stack_taps(y, m1, offs1, L1, C1)
    y = jnp.maximum(
        jnp.dot(w1b_ref[...], st, preferred_element_type=jnp.float32)
        + b1b_ref[...], 0.0)
    y = pool(y, L1, W, sel1_ref)                            # (C1, L2)

    # ---- stage 2 -----------------------------------------------------------
    st = stack_taps(y, m2, offs2, L2, C1)
    y = jnp.maximum(
        jnp.dot(w2a_ref[...], st, preferred_element_type=jnp.float32)
        + b2a_ref[...], 0.0)
    st = stack_taps(y, m2, offs2, L2, C2)
    y = jnp.maximum(
        jnp.dot(w2b_ref[...], st, preferred_element_type=jnp.float32)
        + b2b_ref[...], 0.0)
    feat_ref[...] = pool(y, L2, W2, sel2_ref)               # (C2, B*(H//4)*(W//4))


def cnn_encoder(x_flat, p, *, B, S):
    """x_flat: (1, B*S*S) f32 -> pooled feature map (C2, B*(S//4)**2) f32."""
    S2 = S // 2
    L1 = B * S * S
    P2 = (S // 4) * (S // 4)
    m1 = _conv_masks_np(S, S, B)
    m2 = _conv_masks_np(S2, S2, B)
    sel1 = _pool_sel_np(S, S, B)
    sel2 = _pool_sel_np(S2, S2, B)
    vspec = lambda: pl.BlockSpec(memory_space=pltpu.MemorySpace.VMEM)
    kern = functools.partial(_encoder_kernel, H=S, W=S, B=B)
    return pl.pallas_call(
        kern,
        out_shape=jax.ShapeDtypeStruct((C2, B * P2), jnp.float32),
        in_specs=[vspec() for _ in range(12)],
        out_specs=vspec(),
        scratch_shapes=[pltpu.VMEM((9 * C2, L1), jnp.float32)],
    )(x_flat,
      p['conv1a_wb'],
      p['conv1b_w'], p['conv1b_b'].reshape(C1, 1),
      p['conv2a_w'], p['conv2a_b'].reshape(C2, 1),
      p['conv2b_w'], p['conv2b_b'].reshape(C2, 1),
      m1, m2, sel1, sel2)


# ----------------------------------------------------------------------------
# Pallas kernel 2: fused SIREN decoder (per-image rotation folded into the
# first-layer weights, B folded into lanes via block-diagonal coords) + CTF
# (gt params) + Fourier-domain shift.  One merged lane-dense (4, B*P) output:
# rows = [pre_ctf real, pre_ctf imag, post real, post imag].
# ----------------------------------------------------------------------------
def _decoder_kernel(w1_ref, cbd_ref, w2t_ref, b2_ref, w3b3_ref, aux_ref,
                    out_ref, *, w0_first, w0_hidden, wavelength, cs, amp):
    dh = w2t_ref.shape[0]

    # --- SIREN layer 1: K = 3B+1 is degenerate on the MXU -> VPU FMAs.
    nj = w1_ref.shape[1]
    z1 = w1_ref[:, 0:1] * cbd_ref[0:1, :]
    for j in range(1, nj):
        z1 = z1 + w1_ref[:, j:j + 1] * cbd_ref[j:j + 1, :]
    h1 = jnp.sin(w0_first * z1)                                  # (Dh, B*P)

    # --- SIREN layer 2: shared weights, one MXU matmul.
    z2 = jnp.dot(w2t_ref[...], h1,
                 preferred_element_type=jnp.float32) + b2_ref[...]
    h2 = jnp.sin(w0_hidden * z2)

    # --- SIREN layer 3 (2 output rows): VPU multiply + XLU sublane reduction.
    fr = jnp.sum(h2 * w3b3_ref[0:dh, 0:1], axis=0, keepdims=True) \
        + w3b3_ref[dh:dh + 1, 0:1]
    fi = jnp.sum(h2 * w3b3_ref[0:dh, 1:2], axis=0, keepdims=True) \
        + w3b3_ref[dh:dh + 1, 1:2]

    # --- auxiliary per-pixel planes / per-image lane-expanded scalars.
    s2 = aux_ref[0:1, :]
    c2ang = aux_ref[1:2, :]
    s2ang = aux_ref[2:3, :]
    fx = aux_ref[3:4, :]
    fy = aux_ref[4:5, :]
    dsum = aux_ref[5:6, :]
    ddif = aux_ref[6:7, :]
    c2aa = aux_ref[7:8, :]
    s2aa = aux_ref[8:9, :]
    sx = aux_ref[9:10, :]
    sy = aux_ref[10:11, :]

    # --- CTF (gt params). cos(2*(angfreq - astig)) via angle-addition so the
    # EUP only handles sin/cos(gamma) and the shift phase.
    cos2 = c2ang * c2aa + s2ang * s2aa
    defocus = 0.5 * (dsum + ddif * cos2)
    gamma = (2.0 * jnp.pi) * (-0.5 * defocus * wavelength * s2
                              + 0.25 * cs * wavelength ** 3 * s2 * s2)
    # TODO(synk): CTFRelion sign convention not verifiable from the given spec.
    hctf = (1.0 - amp * amp) ** 0.5 * jnp.sin(gamma) + amp * jnp.cos(gamma)

    # --- Fourier-domain translation: exp(-2*pi*i*(sx*fx + sy*fy)).
    phase = (-2.0 * jnp.pi) * (sx * fx + sy * fy)
    pr = jnp.cos(phase)
    pim = jnp.sin(phase)
    cr = hctf * fr
    ci = hctf * fi

    out_ref[0:1, :] = fr
    out_ref[1:2, :] = fi
    out_ref[2:3, :] = cr * pr - ci * pim
    out_ref[3:4, :] = cr * pim + ci * pr


def decoder_ctf_shift(w1catb, coordsbd1, w2t, b2col, w3b3, aux, *, BP):
    vspec = lambda: pl.BlockSpec(memory_space=pltpu.MemorySpace.VMEM)
    kern = functools.partial(_decoder_kernel, w0_first=W0_FIRST,
                             w0_hidden=W0_HIDDEN, wavelength=WAVELENGTH,
                             cs=CS, amp=AMP_CONTRAST)
    return pl.pallas_call(
        kern,
        out_shape=jax.ShapeDtypeStruct((4, BP), jnp.float32),
        in_specs=[vspec() for _ in range(6)],
        out_specs=vspec(),
    )(w1catb, coordsbd1, w2t, b2col, w3b3, aux)


# ----------------------------------------------------------------------------
# Plain-JAX glue (tiny XLA ops, all inside the single jit)
# ----------------------------------------------------------------------------
def rotation_6d_to_matrix(d6):
    """pytorch3d rotation_6d_to_matrix (s2s2 parameterization)."""
    a1, a2 = d6[..., :3], d6[..., 3:]
    b1 = a1 / (jnp.linalg.norm(a1, axis=-1, keepdims=True) + 1e-8)
    b2 = a2 - jnp.sum(b1 * a2, axis=-1, keepdims=True) * b1
    b2 = b2 / (jnp.linalg.norm(b2, axis=-1, keepdims=True) + 1e-8)
    b3 = jnp.cross(b1, b2)
    return jnp.stack([b1, b2, b3], axis=-2)


def fourier_to_primal_2D(f):
    # TODO(synk): no Pallas FFT primitive on TPU; inverse FFT stays in jnp.fft.
    f = jnp.fft.ifftshift(f, axes=(-2, -1))
    return jnp.fft.fftshift(
        jnp.fft.ifftn(f, s=(f.shape[-2], f.shape[-1]), axes=(-2, -1)),
        axes=(-2, -1))


# ----------------------------------------------------------------------------
# Deterministic parameter init (synthetic; shapes follow CryoAI.__init__)
# ----------------------------------------------------------------------------
def init_params(key, S):
    keys = jax.random.split(key, 12)

    def lin(k, fi, fo):
        kw, kb = jax.random.split(k)
        s = 1.0 / (fi ** 0.5)
        w = jax.random.uniform(kw, (fi, fo), jnp.float32, -s, s)
        b = jax.random.uniform(kb, (fo,), jnp.float32, -s, s)
        return w, b

    p = {}
    # Reduced VGG16-style encoder, in_channels = 1 (no gaussian pyramid).
    # Conv weights stored in stacked-tap layout: (Cout, 9*Cin), columns ordered
    # tap-major (t*Cin + cin) with tap order (dy, dx) row-major.
    w, b = lin(keys[0], 9 * 1, C1)
    p['conv1a_wb'] = jnp.concatenate([w.T, b.reshape(C1, 1)], axis=1)   # (8, 10)
    w, b = lin(keys[1], 9 * C1, C1)
    p['conv1b_w'], p['conv1b_b'] = w.T, b                               # (8, 72)
    w, b = lin(keys[2], 9 * C1, C2)
    p['conv2a_w'], p['conv2a_b'] = w.T, b                               # (16, 72)
    w, b = lin(keys[3], 9 * C2, C2)
    p['conv2b_w'], p['conv2b_b'] = w.T, b                               # (16, 144)
    latent = (S // 4) * (S // 4) * C2
    # orientation encoder / regressor (regressor_orientation_layers = [32, 32])
    p['ori_fc1_w'], p['ori_fc1_b'] = lin(keys[4], latent, 32)
    p['ori_fc2_w'], p['ori_fc2_b'] = lin(keys[5], 32, 32)
    p['ori_reg_w'], p['ori_reg_b'] = lin(keys[6], 32, 6)        # s2s2 -> 6 dims
    # shift encoder (regressor_shift_layers = [32])
    p['sh_fc1_w'], p['sh_fc1_b'] = lin(keys[7], latent, 32)
    p['sh_fc2_w'], p['sh_fc2_b'] = lin(keys[8], 32, 2)
    # Implicit Fourier volume: SIREN 3 -> 32 -> 32 -> 2 (real, imag)
    p['siren1_w'], p['siren1_b'] = lin(keys[9], 3, 32)
    p['siren2_w'], p['siren2_b'] = lin(keys[10], 32, 32)
    p['siren3_w'], p['siren3_b'] = lin(keys[11], 32, 2)

    # Static Fourier-plane coordinates / frequency buffers (lane-dense (1, S*S)).
    ax = jnp.linspace(-0.5, 0.5, S)
    gy, gx = jnp.meshgrid(ax, ax, indexing='ij')
    p['plane_coords_T'] = jnp.stack(
        [gx.reshape(-1), gy.reshape(-1), jnp.zeros(S * S)], axis=0
    ).astype(jnp.float32)                                        # (3, S*S)
    fax = (jnp.arange(S) - S // 2) / (S * RESOLUTION)
    fyg, fxg = jnp.meshgrid(fax, fax, indexing='ij')
    p['fx'] = fxg.reshape(1, S * S).astype(jnp.float32)
    p['fy'] = fyg.reshape(1, S * S).astype(jnp.float32)
    p['s2'] = (fxg ** 2 + fyg ** 2).reshape(1, S * S).astype(jnp.float32)
    ang = jnp.arctan2(fyg, fxg).reshape(1, S * S).astype(jnp.float32)
    # Pre-split 2*angfreq into cos/sin planes (angle-addition in-kernel).
    p['cos2ang'] = jnp.cos(2.0 * ang)
    p['sin2ang'] = jnp.sin(2.0 * ang)
    return p


# ----------------------------------------------------------------------------
# CryoAI.forward (single jitted core)
# ----------------------------------------------------------------------------
@jax.jit
def _forward_core(params, proj_input, fproj_gt, defocusU, defocusV,
                  angleAstigmatism):
    B = proj_input.shape[0]
    S = proj_input.shape[-1]
    P = S * S
    S4 = S // 4
    Dh = params['siren1_w'].shape[1]

    # --- CNN encoder: ONE fused Pallas kernel (convs + pools, B in lanes) ----
    x_flat = proj_input.reshape(1, B * P)
    feat = cnn_encoder(x_flat, params, B=B, S=S)            # (C2, B*S4*S4)
    # torch.flatten(start_dim=1) on an NCHW feature map:
    latent_code = feat.reshape(C2, B, S4 * S4).transpose(1, 0, 2).reshape(B, -1)

    # --- pose + shift heads (tiny dots; XLA inside the same jit) -------------
    h = jax.nn.relu(latent_code @ params['ori_fc1_w'] + params['ori_fc1_b'])
    h = jax.nn.relu(h @ params['ori_fc2_w'] + params['ori_fc2_b'])
    latent_code_prerot = h @ params['ori_reg_w'] + params['ori_reg_b']
    pred_rotmat = rotation_6d_to_matrix(latent_code_prerot)         # (B, 3, 3)
    hs = jax.nn.relu(latent_code @ params['sh_fc1_w'] + params['sh_fc1_b'])
    shift_params = hs @ params['sh_fc2_w'] + params['sh_fc2_b']
    shiftX = shift_params[:, 0].reshape(-1)
    shiftY = shift_params[:, 1].reshape(-1)

    # --- fold rotation into SIREN layer-1 weights; block-diag coords ---------
    w1e = jnp.einsum('bkl,ld->bkd', pred_rotmat, params['siren1_w'])  # (B,3,Dh)
    w1cat = jnp.transpose(w1e, (2, 0, 1)).reshape(Dh, 3 * B)         # (Dh, 3B)
    w1catb = jnp.concatenate(
        [w1cat, params['siren1_b'].reshape(Dh, 1)], axis=1)          # (Dh, 3B+1)
    coordsbd1 = jnp.concatenate(
        [jnp.kron(jnp.eye(B, dtype=jnp.float32), params['plane_coords_T']),
         jnp.ones((1, B * P), jnp.float32)], axis=0)                 # (3B+1, B*P)

    # --- CTF / shift per-image scalars expanded to lane vectors --------------
    du = defocusU.reshape(B).astype(jnp.float32)
    dv = defocusV.reshape(B).astype(jnp.float32)
    aa = angleAstigmatism.reshape(B).astype(jnp.float32)
    rep = lambda v: jnp.repeat(v.astype(jnp.float32), P).reshape(1, B * P)
    til = lambda v: jnp.tile(v, (1, B))
    aux = jnp.concatenate([
        til(params['s2']), til(params['cos2ang']), til(params['sin2ang']),
        til(params['fx']), til(params['fy']),
        rep(du + dv), rep(du - dv),
        rep(jnp.cos(2.0 * aa)), rep(jnp.sin(2.0 * aa)),
        rep(shiftX), rep(shiftY)], axis=0)                           # (11, B*P)

    w2t = params['siren2_w'].T
    b2col = params['siren2_b'].reshape(Dh, 1)
    w3b3 = jnp.concatenate(
        [params['siren3_w'], params['siren3_b'].reshape(1, 2)], axis=0)  # (Dh+1, 2)

    dec = decoder_ctf_shift(w1catb, coordsbd1, w2t, b2col, w3b3, aux, BP=B * P)
    dec = dec.reshape(4, B, 1, S, S)
    pred_fproj_prectf = (dec[0] + 1j * dec[1]).astype(jnp.complex64)
    pred_fproj = (dec[2] + 1j * dec[3]).astype(jnp.complex64)

    out = {
        'rotmat': pred_rotmat,
        'latent_code': latent_code,
        'latent_code_prerot': latent_code_prerot,
        'fproj': pred_fproj,
        'fproj_prectf': pred_fproj_prectf,
        'pred_ctf_params': {'defocusU': defocusU, 'defocusV': defocusV,
                            'angleAstigmatism': angleAstigmatism},
        'pred_shift_params': {'shiftX': shiftX, 'shiftY': shiftY},
        # data_loss_domain == 'primal'
        'proj': jnp.real(fourier_to_primal_2D(pred_fproj)),
        'fproj_gt': fproj_gt,                       # frequency_marcher disabled
        'proj_gt': jnp.real(fourier_to_primal_2D(fproj_gt)),
    }
    return out


def cryoai_forward(params, in_dict):
    # NOTE: intermediate time.time() checkpoints are meaningless under async
    # jitted dispatch; only coarse host-side times are recorded.
    start_time = time.time()
    out = _forward_core(params, in_dict['proj_input'], in_dict['fproj'],
                        in_dict['defocusU'], in_dict['defocusV'],
                        in_dict['angleAstigmatism'])
    end_time = time.time()
    out['times'] = {'start': start_time, 'encoder': start_time,
                    'ctf_shift_prep': start_time, 'decoder': start_time,
                    'end': end_time}
    return out


# ----------------------------------------------------------------------------
if __name__ == "__main__":
    key = jax.random.PRNGKey(0)
    B, S = 2, 16
    kp, k1, k2, k3, k4, k5, k6 = jax.random.split(key, 7)
    params = init_params(kp, S)

    in_dict = {
        'proj_input': jax.random.normal(k1, (B, 1, S, S), jnp.float32),
        'idx': jnp.arange(B, dtype=jnp.int32),
        'fproj': (jax.random.normal(k2, (B, 1, S, S))
                  + 1j * jax.random.normal(k3, (B, 1, S, S))).astype(jnp.complex64),
        'defocusU': 10000.0 + 500.0 * jax.random.uniform(k4, (B, 1, 1), jnp.float32),
        'defocusV': 10000.0 + 500.0 * jax.random.uniform(k5, (B, 1, 1), jnp.float32),
        'angleAstigmatism': 0.1 * jax.random.uniform(k6, (B, 1, 1), jnp.float32),
    }

    out = cryoai_forward(params, in_dict)
    for leaf in jax.tree_util.tree_leaves(out):
        if isinstance(leaf, jax.Array):
            jax.block_until_ready(leaf)
    print("KERNEL_OK")
</pallas_src>

<mosaic_0001>
module attributes {stable_mosaic.version = 11 : i64} {
  func.func @_encoder_kernel(%arg0: memref<1x512xf32, #tpu.memory_space<vmem>>, %arg1: memref<8x10xf32, #tpu.memory_space<vmem>>, %arg2: memref<8x72xf32, #tpu.memory_space<vmem>>, %arg3: memref<8x1xf32, #tpu.memory_space<vmem>>, %arg4: memref<16x72xf32, #tpu.memory_space<vmem>>, %arg5: memref<16x1xf32, #tpu.memory_space<vmem>>, %arg6: memref<16x144xf32, #tpu.memory_space<vmem>>, %arg7: memref<16x1xf32, #tpu.memory_space<vmem>>, %arg8: memref<9x512xf32, #tpu.memory_space<vmem>>, %arg9: memref<9x128xf32, #tpu.memory_space<vmem>>, %arg10: memref<512x128xf32, #tpu.memory_space<vmem>>, %arg11: memref<128x32xf32, #tpu.memory_space<vmem>>, %arg12: memref<16x32xf32, #tpu.memory_space<vmem>>, %arg13: memref<144x512xf32, #tpu.memory_space<vmem>>) attributes {dimension_semantics = [], scalar_prefetch = 0 : i64, scratch_operands = 1 : i64, tpu.core_type = #tpu.core_type<tc>} {
    %c0 = arith.constant 0 : index
    %c0_0 = arith.constant 0 : index
    %0 = vector.load %arg8[%c0, %c0_0] : memref<9x512xf32, #tpu.memory_space<vmem>>, vector<9x512xf32>
    %c0_1 = arith.constant 0 : index
    %c0_2 = arith.constant 0 : index
    %1 = vector.load %arg9[%c0_1, %c0_2] : memref<9x128xf32, #tpu.memory_space<vmem>>, vector<9x128xf32>
    %c0_3 = arith.constant 0 : index
    %c0_4 = arith.constant 0 : index
    %2 = vector.load %arg0[%c0_3, %c0_4] : memref<1x512xf32, #tpu.memory_space<vmem>>, vector<1x512xf32>
    %c17_i32 = arith.constant 17 : i32
    %3 = tpu.dynamic_rotate %2 by %c17_i32 dim 1 : vector<1x512xf32>, i32 -> vector<1x512xf32>
    %c0_5 = arith.constant 0 : index
    %c0_6 = arith.constant 0 : index
    %4 = vector.load %arg1[%c0_5, %c0_6] : memref<8x10xf32, #tpu.memory_space<vmem>>, vector<8x1xf32>
    %5 = vector.extract_strided_slice %0 {offsets = [0, 0], sizes = [1, 512], strides = [1, 1]} : vector<9x512xf32> to vector<1x512xf32>
    %6 = arith.mulf %3, %5 : vector<1x512xf32>
    %7 = vector.broadcast %4 : vector<8x1xf32> to vector<8x512xf32>
    %8 = vector.broadcast %6 : vector<1x512xf32> to vector<8x512xf32>
    %9 = arith.mulf %7, %8 : vector<8x512xf32>
    %c16_i32 = arith.constant 16 : i32
    %10 = tpu.dynamic_rotate %2 by %c16_i32 dim 1 : vector<1x512xf32>, i32 -> vector<1x512xf32>
    %c0_7 = arith.constant 0 : index
    %c1 = arith.constant 1 : index
    %11 = vector.load %arg1[%c0_7, %c1] : memref<8x10xf32, #tpu.memory_space<vmem>>, vector<8x1xf32>
    %12 = vector.extract_strided_slice %0 {offsets = [1, 0], sizes = [1, 512], strides = [1, 1]} : vector<9x512xf32> to vector<1x512xf32>
    %13 = arith.mulf %10, %12 : vector<1x512xf32>
    %14 = vector.broadcast %11 : vector<8x1xf32> to vector<8x512xf32>
    %15 = vector.broadcast %13 : vector<1x512xf32> to vector<8x512xf32>
    %16 = arith.mulf %14, %15 : vector<8x512xf32>
    %17 = arith.addf %9, %16 : vector<8x512xf32>
    %c15_i32 = arith.constant 15 : i32
    %18 = tpu.dynamic_rotate %2 by %c15_i32 dim 1 : vector<1x512xf32>, i32 -> vector<1x512xf32>
    %c0_8 = arith.constant 0 : index
    %c2 = arith.constant 2 : index
    %19 = vector.load %arg1[%c0_8, %c2] : memref<8x10xf32, #tpu.memory_space<vmem>>, vector<8x1xf32>
    %20 = vector.extract_strided_slice %0 {offsets = [2, 0], sizes = [1, 512], strides = [1, 1]} : vector<9x512xf32> to vector<1x512xf32>
    %21 = arith.mulf %18, %20 : vector<1x512xf32>
    %22 = vector.broadcast %19 : vector<8x1xf32> to vector<8x512xf32>
    %23 = vector.broadcast %21 : vector<1x512xf32> to vector<8x512xf32>
    %24 = arith.mulf %22, %23 : vector<8x512xf32>
    %25 = arith.addf %17, %24 : vector<8x512xf32>
    %c1_i32 = arith.constant 1 : i32
    %26 = tpu.dynamic_rotate %2 by %c1_i32 dim 1 : vector<1x512xf32>, i32 -> vector<1x512xf32>
    %c0_9 = arith.constant 0 : index
    %c3 = arith.constant 3 : index
    %27 = vector.load %arg1[%c0_9, %c3] : memref<8x10xf32, #tpu.memory_space<vmem>>, vector<8x1xf32>
    %28 = vector.extract_strided_slice %0 {offsets = [3, 0], sizes = [1, 512], strides = [1, 1]} : vector<9x512xf32> to vector<1x512xf32>
    %29 = arith.mulf %26, %28 : vector<1x512xf32>
    %30 = vector.broadcast %27 : vector<8x1xf32> to vector<8x512xf32>
    %31 = vector.broadcast %29 : vector<1x512xf32> to vector<8x512xf32>
    %32 = arith.mulf %30, %31 : vector<8x512xf32>
    %33 = arith.addf %25, %32 : vector<8x512xf32>
    %c0_10 = arith.constant 0 : index
    %c4 = arith.constant 4 : index
    %34 = vector.load %arg1[%c0_10, %c4] : memref<8x10xf32, #tpu.memory_space<vmem>>, vector<8x1xf32>
    %35 = vector.extract_strided_slice %0 {offsets = [4, 0], sizes = [1, 512], strides = [1, 1]} : vector<9x512xf32> to vector<1x512xf32>
    %36 = arith.mulf %2, %35 : vector<1x512xf32>
    %37 = vector.broadcast %34 : vector<8x1xf32> to vector<8x512xf32>
    %38 = vector.broadcast %36 : vector<1x512xf32> to vector<8x512xf32>
    %39 = arith.mulf %37, %38 : vector<8x512xf32>
    %40 = arith.addf %33, %39 : vector<8x512xf32>
    %c511_i32 = arith.constant 511 : i32
    %41 = tpu.dynamic_rotate %2 by %c511_i32 dim 1 : vector<1x512xf32>, i32 -> vector<1x512xf32>
    %c0_11 = arith.constant 0 : index
    %c5 = arith.constant 5 : index
    %42 = vector.load %arg1[%c0_11, %c5] : memref<8x10xf32, #tpu.memory_space<vmem>>, vector<8x1xf32>
    %43 = vector.extract_strided_slice %0 {offsets = [5, 0], sizes = [1, 512], strides = [1, 1]} : vector<9x512xf32> to vector<1x512xf32>
    %44 = arith.mulf %41, %43 : vector<1x512xf32>
    %45 = vector.broadcast %42 : vector<8x1xf32> to vector<8x512xf32>
    %46 = vector.broadcast %44 : vector<1x512xf32> to vector<8x512xf32>
    %47 = arith.mulf %45, %46 : vector<8x512xf32>
    %48 = arith.addf %40, %47 : vector<8x512xf32>
    %c497_i32 = arith.constant 497 : i32
    %49 = tpu.dynamic_rotate %2 by %c497_i32 dim 1 : vector<1x512xf32>, i32 -> vector<1x512xf32>
    %c0_12 = arith.constant 0 : index
    %c6 = arith.constant 6 : index
    %50 = vector.load %arg1[%c0_12, %c6] : memref<8x10xf32, #tpu.memory_space<vmem>>, vector<8x1xf32>
    %51 = vector.extract_strided_slice %0 {offsets = [6, 0], sizes = [1, 512], strides = [1, 1]} : vector<9x512xf32> to vector<1x512xf32>
    %52 = arith.mulf %49, %51 : vector<1x512xf32>
    %53 = vector.broadcast %50 : vector<8x1xf32> to vector<8x512xf32>
    %54 = vector.broadcast %52 : vector<1x512xf32> to vector<8x512xf32>
    %55 = arith.mulf %53, %54 : vector<8x512xf32>
    %56 = arith.addf %48, %55 : vector<8x512xf32>
    %c496_i32 = arith.constant 496 : i32
    %57 = tpu.dynamic_rotate %2 by %c496_i32 dim 1 : vector<1x512xf32>, i32 -> vector<1x512xf32>
    %c0_13 = arith.constant 0 : index
    %c7 = arith.constant 7 : index
    %58 = vector.load %arg1[%c0_13, %c7] : memref<8x10xf32, #tpu.memory_space<vmem>>, vector<8x1xf32>
    %59 = vector.extract_strided_slice %0 {offsets = [7, 0], sizes = [1, 512], strides = [1, 1]} : vector<9x512xf32> to vector<1x512xf32>
    %60 = arith.mulf %57, %59 : vector<1x512xf32>
    %61 = vector.broadcast %58 : vector<8x1xf32> to vector<8x512xf32>
    %62 = vector.broadcast %60 : vector<1x512xf32> to vector<8x512xf32>
    %63 = arith.mulf %61, %62 : vector<8x512xf32>
    %64 = arith.addf %56, %63 : vector<8x512xf32>
    %c495_i32 = arith.constant 495 : i32
    %65 = tpu.dynamic_rotate %2 by %c495_i32 dim 1 : vector<1x512xf32>, i32 -> vector<1x512xf32>
    %c0_14 = arith.constant 0 : index
    %c8 = arith.constant 8 : index
    %66 = vector.load %arg1[%c0_14, %c8] : memref<8x10xf32, #tpu.memory_space<vmem>>, vector<8x1xf32>
    %67 = vector.extract_strided_slice %0 {offsets = [8, 0], sizes = [1, 512], strides = [1, 1]} : vector<9x512xf32> to vector<1x512xf32>
    %68 = arith.mulf %65, %67 : vector<1x512xf32>
    %69 = vector.broadcast %66 : vector<8x1xf32> to vector<8x512xf32>
    %70 = vector.broadcast %68 : vector<1x512xf32> to vector<8x512xf32>
    %71 = arith.mulf %69, %70 : vector<8x512xf32>
    %72 = arith.addf %64, %71 : vector<8x512xf32>
    %c0_15 = arith.constant 0 : index
    %c9 = arith.constant 9 : index
    %73 = vector.load %arg1[%c0_15, %c9] : memref<8x10xf32, #tpu.memory_space<vmem>>, vector<8x1xf32>
    %74 = vector.broadcast %73 : vector<8x1xf32> to vector<8x512xf32>
    %75 = arith.addf %72, %74 : vector<8x512xf32>
    %cst = arith.constant 0.000000e+00 : f32
    %76 = vector.broadcast %cst : f32 to vector<8x512xf32>
    %77 = arith.maximumf %75, %76 : vector<8x512xf32>
    %c17_i32_16 = arith.constant 17 : i32
    %78 = tpu.dynamic_rotate %77 by %c17_i32_16 dim 1 : vector<8x512xf32>, i32 -> vector<8x512xf32>
    %79 = vector.extract_strided_slice %0 {offsets = [0, 0], sizes = [1, 512], strides = [1, 1]} : vector<9x512xf32> to vector<1x512xf32>
    %80 = vector.broadcast %79 : vector<1x512xf32> to vector<8x512xf32>
    %81 = arith.mulf %78, %80 : vector<8x512xf32>
    %c0_17 = arith.constant 0 : index
    %c0_18 = arith.constant 0 : index
    %82 = vector.load %arg13[%c0_17, %c0_18] : memref<144x512xf32, #tpu.memory_space<vmem>>, vector<8x512xf32>
    tpu.vector_store %arg13[%c0_17, %c0_18], %81 {strides = array<i32>} : memref<144x512xf32, #tpu.memory_space<vmem>>, vector<8x512xf32>,
    %c16_i32_19 = arith.constant 16 : i32
    %83 = tpu.dynamic_rotate %77 by %c16_i32_19 dim 1 : vector<8x512xf32>, i32 -> vector<8x512xf32>
    %84 = vector.extract_strided_slice %0 {offsets = [1, 0], sizes = [1, 512], strides = [1, 1]} : vector<9x512xf32> to vector<1x512xf32>
    %85 = vector.broadcast %84 : vector<1x512xf32> to vector<8x512xf32>
    %86 = arith.mulf %83, %85 : vector<8x512xf32>
    %c8_20 = arith.constant 8 : index
    %c0_21 = arith.constant 0 : index
    %87 = vector.load %arg13[%c8_20, %c0_21] : memref<144x512xf32, #tpu.memory_space<vmem>>, vector<8x512xf32>
    tpu.vector_store %arg13[%c8_20, %c0_21], %86 {strides = array<i32>} : memref<144x512xf32, #tpu.memory_space<vmem>>, vector<8x512xf32>,
    %c15_i32_22 = arith.constant 15 : i32
    %88 = tpu.dynamic_rotate %77 by %c15_i32_22 dim 1 : vector<8x512xf32>, i32 -> vector<8x512xf32>
    %89 = vector.extract_strided_slice %0 {offsets = [2, 0], sizes = [1, 512], strides = [1, 1]} : vector<9x512xf32> to vector<1x512xf32>
    %90 = vector.broadcast %89 : vector<1x512xf32> to vector<8x512xf32>
    %91 = arith.mulf %88, %90 : vector<8x512xf32>
    %c16 = arith.constant 16 : index
    %c0_23 = arith.constant 0 : index
    %92 = vector.load %arg13[%c16, %c0_23] : memref<144x512xf32, #tpu.memory_space<vmem>>, vector<8x512xf32>
    tpu.vector_store %arg13[%c16, %c0_23], %91 {strides = array<i32>} : memref<144x512xf32, #tpu.memory_space<vmem>>, vector<8x512xf32>,
    %c1_i32_24 = arith.constant 1 : i32
    %93 = tpu.dynamic_rotate %77 by %c1_i32_24 dim 1 : vector<8x512xf32>, i32 -> vector<8x512xf32>
    %94 = vector.extract_strided_slice %0 {offsets = [3, 0], sizes = [1, 512], strides = [1, 1]} : vector<9x512xf32> to vector<1x512xf32>
    %95 = vector.broadcast %94 : vector<1x512xf32> to vector<8x512xf32>
    %96 = arith.mulf %93, %95 : vector<8x512xf32>
    %c24 = arith.constant 24 : index
    %c0_25 = arith.constant 0 : index
    %97 = vector.load %arg13[%c24, %c0_25] : memref<144x512xf32, #tpu.memory_space<vmem>>, vector<8x512xf32>
    tpu.vector_store %arg13[%c24, %c0_25], %96 {strides = array<i32>} : memref<144x512xf32, #tpu.memory_space<vmem>>, vector<8x512xf32>,
    %98 = vector.extract_strided_slice %0 {offsets = [4, 0], sizes = [1, 512], strides = [1, 1]} : vector<9x512xf32> to vector<1x512xf32>
    %99 = vector.broadcast %98 : vector<1x512xf32> to vector<8x512xf32>
    %100 = arith.mulf %77, %99 : vector<8x512xf32>
    %c32 = arith.constant 32 : index
    %c0_26 = arith.constant 0 : index
    %101 = vector.load %arg13[%c32, %c0_26] : memref<144x512xf32, #tpu.memory_space<vmem>>, vector<8x512xf32>
    tpu.vector_store %arg13[%c32, %c0_26], %100 {strides = array<i32>} : memref<144x512xf32, #tpu.memory_space<vmem>>, vector<8x512xf32>,
    %c511_i32_27 = arith.constant 511 : i32
    %102 = tpu.dynamic_rotate %77 by %c511_i32_27 dim 1 : vector<8x512xf32>, i32 -> vector<8x512xf32>
    %103 = vector.extract_strided_slice %0 {offsets = [5, 0], sizes = [1, 512], strides = [1, 1]} : vector<9x512xf32> to vector<1x512xf32>
    %104 = vector.broadcast %103 : vector<1x512xf32> to vector<8x512xf32>
    %105 = arith.mulf %102, %104 : vector<8x512xf32>
    %c40 = arith.constant 40 : index
    %c0_28 = arith.constant 0 : index
    %106 = vector.load %arg13[%c40, %c0_28] : memref<144x512xf32, #tpu.memory_space<vmem>>, vector<8x512xf32>
    tpu.vector_store %arg13[%c40, %c0_28], %105 {strides = array<i32>} : memref<144x512xf32, #tpu.memory_space<vmem>>, vector<8x512xf32>,
    %c497_i32_29 = arith.constant 497 : i32
    %107 = tpu.dynamic_rotate %77 by %c497_i32_29 dim 1 : vector<8x512xf32>, i32 -> vector<8x512xf32>
    %108 = vector.extract_strided_slice %0 {offsets = [6, 0], sizes = [1, 512], strides = [1, 1]} : vector<9x512xf32> to vector<1x512xf32>
    %109 = vector.broadcast %108 : vector<1x512xf32> to vector<8x512xf32>
    %110 = arith.mulf %107, %109 : vector<8x512xf32>
    %c48 = arith.constant 48 : index
    %c0_30 = arith.constant 0 : index
    %111 = vector.load %arg13[%c48, %c0_30] : memref<144x512xf32, #tpu.memory_space<vmem>>, vector<8x512xf32>
    tpu.vector_store %arg13[%c48, %c0_30], %110 {strides = array<i32>} : memref<144x512xf32, #tpu.memory_space<vmem>>, vector<8x512xf32>,
    %c496_i32_31 = arith.constant 496 : i32
    %112 = tpu.dynamic_rotate %77 by %c496_i32_31 dim 1 : vector<8x512xf32>, i32 -> vector<8x512xf32>
    %113 = vector.extract_strided_slice %0 {offsets = [7, 0], sizes = [1, 512], strides = [1, 1]} : vector<9x512xf32> to vector<1x512xf32>
    %114 = vector.broadcast %113 : vector<1x512xf32> to vector<8x512xf32>
    %115 = arith.mulf %112, %114 : vector<8x512xf32>
    %c56 = arith.constant 56 : index
    %c0_32 = arith.constant 0 : index
    %116 = vector.load %arg13[%c56, %c0_32] : memref<144x512xf32, #tpu.memory_space<vmem>>, vector<8x512xf32>
    tpu.vector_store %arg13[%c56, %c0_32], %115 {strides = array<i32>} : memref<144x512xf32, #tpu.memory_space<vmem>>, vector<8x512xf32>,
    %c495_i32_33 = arith.constant 495 : i32
    %117 = tpu.dynamic_rotate %77 by %c495_i32_33 dim 1 : vector<8x512xf32>, i32 -> vector<8x512xf32>
    %118 = vector.extract_strided_slice %0 {offsets = [8, 0], sizes = [1, 512], strides = [1, 1]} : vector<9x512xf32> to vector<1x512xf32>
    %119 = vector.broadcast %118 : vector<1x512xf32> to vector<8x512xf32>
    %120 = arith.mulf %117, %119 : vector<8x512xf32>
    %c64 = arith.constant 64 : index
    %c0_34 = arith.constant 0 : index
    %121 = vector.load %arg13[%c64, %c0_34] : memref<144x512xf32, #tpu.memory_space<vmem>>, vector<8x512xf32>
    tpu.vector_store %arg13[%c64, %c0_34], %120 {strides = array<i32>} : memref<144x512xf32, #tpu.memory_space<vmem>>, vector<8x512xf32>,
    %c0_35 = arith.constant 0 : index
    %c0_36 = arith.constant 0 : index
    %122 = vector.load %arg13[%c0_35, %c0_36] : memref<144x512xf32, #tpu.memory_space<vmem>>, vector<72x512xf32>
    %c0_37 = arith.constant 0 : index
    %c0_38 = arith.constant 0 : index
    %123 = vector.load %arg2[%c0_37, %c0_38] : memref<8x72xf32, #tpu.memory_space<vmem>>, vector<8x72xf32>
    %cst_39 = arith.constant dense<0.000000e+00> : vector<8x512xf32>
    %124 = tpu.matmul %123, %122, %cst_39 {dimension_numbers = #tpu.dot_dimension_numbers<[1], [0], [0], [1], [0, 0, 1, 1], [], []>} : vector<8x72xf32>, vector<72x512xf32>, vector<8x512xf32> -> vector<8x512xf32>
    %c0_40 = arith.constant 0 : index
    %c0_41 = arith.constant 0 : index
    %125 = vector.load %arg3[%c0_40, %c0_41] : memref<8x1xf32, #tpu.memory_space<vmem>>, vector<8x1xf32>
    %126 = vector.broadcast %125 : vector<8x1xf32> to vector<8x512xf32>
    %127 = arith.addf %124, %126 : vector<8x512xf32>
    %cst_42 = arith.constant 0.000000e+00 : f32
    %128 = vector.broadcast %cst_42 : f32 to vector<8x512xf32>
    %129 = arith.maximumf %127, %128 : vector<8x512xf32>
    %c511_i32_43 = arith.constant 511 : i32
    %130 = tpu.dynamic_rotate %129 by %c511_i32_43 dim 1 : vector<8x512xf32>, i32 -> vector<8x512xf32>
    %131 = arith.maximumf %129, %130 : vector<8x512xf32>
    %c496_i32_44 = arith.constant 496 : i32
    %132 = tpu.dynamic_rotate %129 by %c496_i32_44 dim 1 : vector<8x512xf32>, i32 -> vector<8x512xf32>
    %c495_i32_45 = arith.constant 495 : i32
    %133 = tpu.dynamic_rotate %129 by %c495_i32_45 dim 1 : vector<8x512xf32>, i32 -> vector<8x512xf32>
    %134 = arith.maximumf %132, %133 : vector<8x512xf32>
    %135 = arith.maximumf %131, %134 : vector<8x512xf32>
    %c0_46 = arith.constant 0 : index
    %c0_47 = arith.constant 0 : index
    %136 = vector.load %arg10[%c0_46, %c0_47] : memref<512x128xf32, #tpu.memory_space<vmem>>, vector<512x128xf32>
    %cst_48 = arith.constant dense<0.000000e+00> : vector<8x128xf32>
    %137 = tpu.matmul %135, %136, %cst_48 {dimension_numbers = #tpu.dot_dimension_numbers<[1], [0], [0], [1], [0, 0, 1, 1], [], []>} : vector<8x512xf32>, vector<512x128xf32>, vector<8x128xf32> -> vector<8x128xf32>
    %c9_i32 = arith.constant 9 : i32
    %138 = tpu.dynamic_rotate %137 by %c9_i32 dim 1 : vector<8x128xf32>, i32 -> vector<8x128xf32>
    %139 = vector.extract_strided_slice %1 {offsets = [0, 0], sizes = [1, 128], strides = [1, 1]} : vector<9x128xf32> to vector<1x128xf32>
    %140 = vector.broadcast %139 : vector<1x128xf32> to vector<8x128xf32>
    %141 = arith.mulf %138, %140 : vector<8x128xf32>
    %c0_49 = arith.constant 0 : index
    %c0_50 = arith.constant 0 : index
    %142 = vector.load %arg13[%c0_49, %c0_50] : memref<144x512xf32, #tpu.memory_space<vmem>>, vector<8x128xf32>
    tpu.vector_store %arg13[%c0_49, %c0_50], %141 {strides = array<i32>} : memref<144x512xf32, #tpu.memory_space<vmem>>, vector<8x128xf32>,
    %c8_i32 = arith.constant 8 : i32
    %143 = tpu.dynamic_rotate %137 by %c8_i32 dim 1 : vector<8x128xf32>, i32 -> vector<8x128xf32>
    %144 = vector.extract_strided_slice %1 {offsets = [1, 0], sizes = [1, 128], strides = [1, 1]} : vector<9x128xf32> to vector<1x128xf32>
    %145 = vector.broadcast %144 : vector<1x128xf32> to vector<8x128xf32>
    %146 = arith.mulf %143, %145 : vector<8x128xf32>
    %c8_51 = arith.constant 8 : index
    %c0_52 = arith.constant 0 : index
    %147 = vector.load %arg13[%c8_51, %c0_52] : memref<144x512xf32, #tpu.memory_space<vmem>>, vector<8x128xf32>
    tpu.vector_store %arg13[%c8_51, %c0_52], %146 {strides = array<i32>} : memref<144x512xf32, #tpu.memory_space<vmem>>, vector<8x128xf32>,
    %c7_i32 = arith.constant 7 : i32
    %148 = tpu.dynamic_rotate %137 by %c7_i32 dim 1 : vector<8x128xf32>, i32 -> vector<8x128xf32>
    %149 = vector.extract_strided_slice %1 {offsets = [2, 0], sizes = [1, 128], strides = [1, 1]} : vector<9x128xf32> to vector<1x128xf32>
    %150 = vector.broadcast %149 : vector<1x128xf32> to vector<8x128xf32>
    %151 = arith.mulf %148, %150 : vector<8x128xf32>
    %c16_53 = arith.constant 16 : index
    %c0_54 = arith.constant 0 : index
    %152 = vector.load %arg13[%c16_53, %c0_54] : memref<144x512xf32, #tpu.memory_space<vmem>>, vector<8x128xf32>
    tpu.vector_store %arg13[%c16_53, %c0_54], %151 {strides = array<i32>} : memref<144x512xf32, #tpu.memory_space<vmem>>, vector<8x128xf32>,
    %c1_i32_55 = arith.constant 1 : i32
    %153 = tpu.dynamic_rotate %137 by %c1_i32_55 dim 1 : vector<8x128xf32>, i32 -> vector<8x128xf32>
    %154 = vector.extract_strided_slice %1 {offsets = [3, 0], sizes = [1, 128], strides = [1, 1]} : vector<9x128xf32> to vector<1x128xf32>
    %155 = vector.broadcast %154 : vector<1x128xf32> to vector<8x128xf32>
    %156 = arith.mulf %153, %155 : vector<8x128xf32>
    %c24_56 = arith.constant 24 : index
    %c0_57 = arith.constant 0 : index
    %157 = vector.load %arg13[%c24_56, %c0_57] : memref<144x512xf32, #tpu.memory_space<vmem>>, vector<8x128xf32>
    tpu.vector_store %arg13[%c24_56, %c0_57], %156 {strides = array<i32>} : memref<144x512xf32, #tpu.memory_space<vmem>>, vector<8x128xf32>,
    %158 = vector.extract_strided_slice %1 {offsets = [4, 0], sizes = [1, 128], strides = [1, 1]} : vector<9x128xf32> to vector<1x128xf32>
    %159 = vector.broadcast %158 : vector<1x128xf32> to vector<8x128xf32>
    %160 = arith.mulf %137, %159 : vector<8x128xf32>
    %c32_58 = arith.constant 32 : index
    %c0_59 = arith.constant 0 : index
    %161 = vector.load %arg13[%c32_58, %c0_59] : memref<144x512xf32, #tpu.memory_space<vmem>>, vector<8x128xf32>
    tpu.vector_store %arg13[%c32_58, %c0_59], %160 {strides = array<i32>} : memref<144x512xf32, #tpu.memory_space<vmem>>, vector<8x128xf32>,
    %c127_i32 = arith.constant 127 : i32
    %162 = tpu.dynamic_rotate %137 by %c127_i32 dim 1 : vector<8x128xf32>, i32 -> vector<8x128xf32>
    %163 = vector.extract_strided_slice %1 {offsets = [5, 0], sizes = [1, 128], strides = [1, 1]} : vector<9x128xf32> to vector<1x128xf32>
    %164 = vector.broadcast %163 : vector<1x128xf32> to vector<8x128xf32>
    %165 = arith.mulf %162, %164 : vector<8x128xf32>
    %c40_60 = arith.constant 40 : index
    %c0_61 = arith.constant 0 : index
    %166 = vector.load %arg13[%c40_60, %c0_61] : memref<144x512xf32, #tpu.memory_space<vmem>>, vector<8x128xf32>
    tpu.vector_store %arg13[%c40_60, %c0_61], %165 {strides = array<i32>} : memref<144x512xf32, #tpu.memory_space<vmem>>, vector<8x128xf32>,
    %c121_i32 = arith.constant 121 : i32
    %167 = tpu.dynamic_rotate %137 by %c121_i32 dim 1 : vector<8x128xf32>, i32 -> vector<8x128xf32>
    %168 = vector.extract_strided_slice %1 {offsets = [6, 0], sizes = [1, 128], strides = [1, 1]} : vector<9x128xf32> to vector<1x128xf32>
    %169 = vector.broadcast %168 : vector<1x128xf32> to vector<8x128xf32>
    %170 = arith.mulf %167, %169 : vector<8x128xf32>
    %c48_62 = arith.constant 48 : index
    %c0_63 = arith.constant 0 : index
    %171 = vector.load %arg13[%c48_62, %c0_63] : memref<144x512xf32, #tpu.memory_space<vmem>>, vector<8x128xf32>
    tpu.vector_store %arg13[%c48_62, %c0_63], %170 {strides = array<i32>} : memref<144x512xf32, #tpu.memory_space<vmem>>, vector<8x128xf32>,
    %c120_i32 = arith.constant 120 : i32
    %172 = tpu.dynamic_rotate %137 by %c120_i32 dim 1 : vector<8x128xf32>, i32 -> vector<8x128xf32>
    %173 = vector.extract_strided_slice %1 {offsets = [7, 0], sizes = [1, 128], strides = [1, 1]} : vector<9x128xf32> to vector<1x128xf32>
    %174 = vector.broadcast %173 : vector<1x128xf32> to vector<8x128xf32>
    %175 = arith.mulf %172, %174 : vector<8x128xf32>
    %c56_64 = arith.constant 56 : index
    %c0_65 = arith.constant 0 : index
    %176 = vector.load %arg13[%c56_64, %c0_65] : memref<144x512xf32, #tpu.memory_space<vmem>>, vector<8x128xf32>
    tpu.vector_store %arg13[%c56_64, %c0_65], %175 {strides = array<i32>} : memref<144x512xf32, #tpu.memory_space<vmem>>, vector<8x128xf32>,
    %c119_i32 = arith.constant 119 : i32
    %177 = tpu.dynamic_rotate %137 by %c119_i32 dim 1 : vector<8x128xf32>, i32 -> vector<8x128xf32>
    %178 = vector.extract_strided_slice %1 {offsets = [8, 0], sizes = [1, 128], strides = [1, 1]} : vector<9x128xf32> to vector<1x128xf32>
    %179 = vector.broadcast %178 : vector<1x128xf32> to vector<8x128xf32>
    %180 = arith.mulf %177, %179 : vector<8x128xf32>
    %c64_66 = arith.constant 64 : index
    %c0_67 = arith.constant 0 : index
    %181 = vector.load %arg13[%c64_66, %c0_67] : memref<144x512xf32, #tpu.memory_space<vmem>>, vector<8x128xf32>
    tpu.vector_store %arg13[%c64_66, %c0_67], %180 {strides = array<i32>} : memref<144x512xf32, #tpu.memory_space<vmem>>, vector<8x128xf32>,
    %c0_68 = arith.constant 0 : index
    %c0_69 = arith.constant 0 : index
    %182 = vector.load %arg13[%c0_68, %c0_69] : memref<144x512xf32, #tpu.memory_space<vmem>>, vector<72x128xf32>
    %c0_70 = arith.constant 0 : index
    %c0_71 = arith.constant 0 : index
    %183 = vector.load %arg4[%c0_70, %c0_71] : memref<16x72xf32, #tpu.memory_space<vmem>>, vector<16x72xf32>
    %cst_72 = arith.constant dense<0.000000e+00> : vector<16x128xf32>
    %184 = tpu.matmul %183, %182, %cst_72 {dimension_numbers = #tpu.dot_dimension_numbers<[1], [0], [0], [1], [0, 0, 1, 1], [], []>} : vector<16x72xf32>, vector<72x128xf32>, vector<16x128xf32> -> vector<16x128xf32>
    %c0_73 = arith.constant 0 : index
    %c0_74 = arith.constant 0 : index
    %185 = vector.load %arg5[%c0_73, %c0_74] : memref<16x1xf32, #tpu.memory_space<vmem>>, vector<16x1xf32>
    %186 = vector.broadcast %185 : vector<16x1xf32> to vector<16x128xf32>
    %187 = arith.addf %184, %186 : vector<16x128xf32>
    %cst_75 = arith.constant 0.000000e+00 : f32
    %188 = vector.broadcast %cst_75 : f32 to vector<16x128xf32>
    %189 = arith.maximumf %187, %188 : vector<16x128xf32>
    %c9_i32_76 = arith.constant 9 : i32
    %190 = tpu.dynamic_rotate %189 by %c9_i32_76 dim 1 : vector<16x128xf32>, i32 -> vector<16x128xf32>
    %191 = vector.extract_strided_slice %1 {offsets = [0, 0], sizes = [1, 128], strides = [1, 1]} : vector<9x128xf32> to vector<1x128xf32>
    %192 = vector.broadcast %191 : vector<1x128xf32> to vector<16x128xf32>
    %193 = arith.mulf %190, %192 : vector<16x128xf32>
    %c0_77 = arith.constant 0 : index
    %c0_78 = arith.constant 0 : index
    %194 = vector.load %arg13[%c0_77, %c0_78] : memref<144x512xf32, #tpu.memory_space<vmem>>, vector<16x128xf32>
    tpu.vector_store %arg13[%c0_77, %c0_78], %193 {strides = array<i32>} : memref<144x512xf32, #tpu.memory_space<vmem>>, vector<16x128xf32>,
    %c8_i32_79 = arith.constant 8 : i32
    %195 = tpu.dynamic_rotate %189 by %c8_i32_79 dim 1 : vector<16x128xf32>, i32 -> vector<16x128xf32>
    %196 = vector.extract_strided_slice %1 {offsets = [1, 0], sizes = [1, 128], strides = [1, 1]} : vector<9x128xf32> to vector<1x128xf32>
    %197 = vector.broadcast %196 : vector<1x128xf32> to vector<16x128xf32>
    %198 = arith.mulf %195, %197 : vector<16x128xf32>
    %c16_80 = arith.constant 16 : index
    %c0_81 = arith.constant 0 : index
    %199 = vector.load %arg13[%c16_80, %c0_81] : memref<144x512xf32, #tpu.memory_space<vmem>>, vector<16x128xf32>
    tpu.vector_store %arg13[%c16_80, %c0_81], %198 {strides = array<i32>} : memref<144x512xf32, #tpu.memory_space<vmem>>, vector<16x128xf32>,
    %c7_i32_82 = arith.constant 7 : i32
    %200 = tpu.dynamic_rotate %189 by %c7_i32_82 dim 1 : vector<16x128xf32>, i32 -> vector<16x128xf32>
    %201 = vector.extract_strided_slice %1 {offsets = [2, 0], sizes = [1, 128], strides = [1, 1]} : vector<9x128xf32> to vector<1x128xf32>
    %202 = vector.broadcast %201 : vector<1x128xf32> to vector<16x128xf32>
    %203 = arith.mulf %200, %202 : vector<16x128xf32>
    %c32_83 = arith.constant 32 : index
    %c0_84 = arith.constant 0 : index
    %204 = vector.load %arg13[%c32_83, %c0_84] : memref<144x512xf32, #tpu.memory_space<vmem>>, vector<16x128xf32>
    tpu.vector_store %arg13[%c32_83, %c0_84], %203 {strides = array<i32>} : memref<144x512xf32, #tpu.memory_space<vmem>>, vector<16x128xf32>,
    %c1_i32_85 = arith.constant 1 : i32
    %205 = tpu.dynamic_rotate %189 by %c1_i32_85 dim 1 : vector<16x128xf32>, i32 -> vector<16x128xf32>
    %206 = vector.extract_strided_slice %1 {offsets = [3, 0], sizes = [1, 128], strides = [1, 1]} : vector<9x128xf32> to vector<1x128xf32>
    %207 = vector.broadcast %206 : vector<1x128xf32> to vector<16x128xf32>
    %208 = arith.mulf %205, %207 : vector<16x128xf32>
    %c48_86 = arith.constant 48 : index
    %c0_87 = arith.constant 0 : index
    %209 = vector.load %arg13[%c48_86, %c0_87] : memref<144x512xf32, #tpu.memory_space<vmem>>, vector<16x128xf32>
    tpu.vector_store %arg13[%c48_86, %c0_87], %208 {strides = array<i32>} : memref<144x512xf32, #tpu.memory_space<vmem>>, vector<16x128xf32>,
    %210 = vector.extract_strided_slice %1 {offsets = [4, 0], sizes = [1, 128], strides = [1, 1]} : vector<9x128xf32> to vector<1x128xf32>
    %211 = vector.broadcast %210 : vector<1x128xf32> to vector<16x128xf32>
    %212 = arith.mulf %189, %211 : vector<16x128xf32>
    %c64_88 = arith.constant 64 : index
    %c0_89 = arith.constant 0 : index
    %213 = vector.load %arg13[%c64_88, %c0_89] : memref<144x512xf32, #tpu.memory_space<vmem>>, vector<16x128xf32>
    tpu.vector_store %arg13[%c64_88, %c0_89], %212 {strides = array<i32>} : memref<144x512xf32, #tpu.memory_space<vmem>>, vector<16x128xf32>,
    %c127_i32_90 = arith.constant 127 : i32
    %214 = tpu.dynamic_rotate %189 by %c127_i32_90 dim 1 : vector<16x128xf32>, i32 -> vector<16x128xf32>
    %215 = vector.extract_strided_slice %1 {offsets = [5, 0], sizes = [1, 128], strides = [1, 1]} : vector<9x128xf32> to vector<1x128xf32>
    %216 = vector.broadcast %215 : vector<1x128xf32> to vector<16x128xf32>
    %217 = arith.mulf %214, %216 : vector<16x128xf32>
    %c80 = arith.constant 80 : index
    %c0_91 = arith.constant 0 : index
    %218 = vector.load %arg13[%c80, %c0_91] : memref<144x512xf32, #tpu.memory_space<vmem>>, vector<16x128xf32>
    tpu.vector_store %arg13[%c80, %c0_91], %217 {strides = array<i32>} : memref<144x512xf32, #tpu.memory_space<vmem>>, vector<16x128xf32>,
    %c121_i32_92 = arith.constant 121 : i32
    %219 = tpu.dynamic_rotate %189 by %c121_i32_92 dim 1 : vector<16x128xf32>, i32 -> vector<16x128xf32>
    %220 = vector.extract_strided_slice %1 {offsets = [6, 0], sizes = [1, 128], strides = [1, 1]} : vector<9x128xf32> to vector<1x128xf32>
    %221 = vector.broadcast %220 : vector<1x128xf32> to vector<16x128xf32>
    %222 = arith.mulf %219, %221 : vector<16x128xf32>
    %c96 = arith.constant 96 : index
    %c0_93 = arith.constant 0 : index
    %223 = vector.load %arg13[%c96, %c0_93] : memref<144x512xf32, #tpu.memory_space<vmem>>, vector<16x128xf32>
    tpu.vector_store %arg13[%c96, %c0_93], %222 {strides = array<i32>} : memref<144x512xf32, #tpu.memory_space<vmem>>, vector<16x128xf32>,
    %c120_i32_94 = arith.constant 120 : i32
    %224 = tpu.dynamic_rotate %189 by %c120_i32_94 dim 1 : vector<16x128xf32>, i32 -> vector<16x128xf32>
    %225 = vector.extract_strided_slice %1 {offsets = [7, 0], sizes = [1, 128], strides = [1, 1]} : vector<9x128xf32> to vector<1x128xf32>
    %226 = vector.broadcast %225 : vector<1x128xf32> to vector<16x128xf32>
    %227 = arith.mulf %224, %226 : vector<16x128xf32>
    %c112 = arith.constant 112 : index
    %c0_95 = arith.constant 0 : index
    %228 = vector.load %arg13[%c112, %c0_95] : memref<144x512xf32, #tpu.memory_space<vmem>>, vector<16x128xf32>
    tpu.vector_store %arg13[%c112, %c0_95], %227 {strides = array<i32>} : memref<144x512xf32, #tpu.memory_space<vmem>>, vector<16x128xf32>,
    %c119_i32_96 = arith.constant 119 : i32
    %229 = tpu.dynamic_rotate %189 by %c119_i32_96 dim 1 : vector<16x128xf32>, i32 -> vector<16x128xf32>
    %230 = vector.extract_strided_slice %1 {offsets = [8, 0], sizes = [1, 128], strides = [1, 1]} : vector<9x128xf32> to vector<1x128xf32>
    %231 = vector.broadcast %230 : vector<1x128xf32> to vector<16x128xf32>
    %232 = arith.mulf %229, %231 : vector<16x128xf32>
    %c128 = arith.constant 128 : index
    %c0_97 = arith.constant 0 : index
    %233 = vector.load %arg13[%c128, %c0_97] : memref<144x512xf32, #tpu.memory_space<vmem>>, vector<16x128xf32>
    tpu.vector_store %arg13[%c128, %c0_97], %232 {strides = array<i32>} : memref<144x512xf32, #tpu.memory_space<vmem>>, vector<16x128xf32>,
    %c0_98 = arith.constant 0 : index
    %c0_99 = arith.constant 0 : index
    %234 = vector.load %arg13[%c0_98, %c0_99] : memref<144x512xf32, #tpu.memory_space<vmem>>, vector<144x128xf32>
    %c0_100 = arith.constant 0 : index
    %c0_101 = arith.constant 0 : index
    %235 = vector.load %arg6[%c0_100, %c0_101] : memref<16x144xf32, #tpu.memory_space<vmem>>, vector<16x144xf32>
    %cst_102 = arith.constant dense<0.000000e+00> : vector<16x128xf32>
    %236 = tpu.matmul %235, %234, %cst_102 {dimension_numbers = #tpu.dot_dimension_numbers<[1], [0], [0], [1], [0, 0, 1, 1], [], []>} : vector<16x144xf32>, vector<144x128xf32>, vector<16x128xf32> -> vector<16x128xf32>
    %c0_103 = arith.constant 0 : index
    %c0_104 = arith.constant 0 : index
    %237 = vector.load %arg7[%c0_103, %c0_104] : memref<16x1xf32, #tpu.memory_space<vmem>>, vector<16x1xf32>
    %238 = vector.broadcast %237 : vector<16x1xf32> to vector<16x128xf32>
    %239 = arith.addf %236, %238 : vector<16x128xf32>
    %cst_105 = arith.constant 0.000000e+00 : f32
    %240 = vector.broadcast %cst_105 : f32 to vector<16x128xf32>
    %241 = arith.maximumf %239, %240 : vector<16x128xf32>
    %c127_i32_106 = arith.constant 127 : i32
    %242 = tpu.dynamic_rotate %241 by %c127_i32_106 dim 1 : vector<16x128xf32>, i32 -> vector<16x128xf32>
    %243 = arith.maximumf %241, %242 : vector<16x128xf32>
    %c120_i32_107 = arith.constant 120 : i32
    %244 = tpu.dynamic_rotate %241 by %c120_i32_107 dim 1 : vector<16x128xf32>, i32 -> vector<16x128xf32>
    %c119_i32_108 = arith.constant 119 : i32
    %245 = tpu.dynamic_rotate %241 by %c119_i32_108 dim 1 : vector<16x128xf32>, i32 -> vector<16x128xf32>
    %246 = arith.maximumf %244, %245 : vector<16x128xf32>
    %247 = arith.maximumf %243, %246 : vector<16x128xf32>
    %c0_109 = arith.constant 0 : index
    %c0_110 = arith.constant 0 : index
    %248 = vector.load %arg11[%c0_109, %c0_110] : memref<128x32xf32, #tpu.memory_space<vmem>>, vector<128x32xf32>
    %cst_111 = arith.constant dense<0.000000e+00> : vector<16x32xf32>
    %249 = tpu.matmul %247, %248, %cst_111 {dimension_numbers = #tpu.dot_dimension_numbers<[1], [0], [0], [1], [0, 0, 1, 1], [], []>} : vector<16x128xf32>, vector<128x32xf32>, vector<16x32xf32> -> vector<16x32xf32>
    %c0_112 = arith.constant 0 : index
    %c0_113 = arith.constant 0 : index
    %250 = vector.load %arg12[%c0_112, %c0_113] : memref<16x32xf32, #tpu.memory_space<vmem>>, vector<16x32xf32>
    tpu.vector_store %arg12[%c0_112, %c0_113], %249 {strides = array<i32>} : memref<16x32xf32, #tpu.memory_space<vmem>>, vector<16x32xf32>,
    return
  }
}

module attributes {stable_mosaic.version = 11 : i64} {
  func.func @_decoder_kernel(%arg0: memref<32x7xf32, #tpu.memory_space<vmem>>, %arg1: memref<7x512xf32, #tpu.memory_space<vmem>>, %arg2: memref<32x32xf32, #tpu.memory_space<vmem>>, %arg3: memref<32x1xf32, #tpu.memory_space<vmem>>, %arg4: memref<33x2xf32, #tpu.memory_space<vmem>>, %arg5: memref<11x512xf32, #tpu.memory_space<vmem>>, %arg6: memref<4x512xf32, #tpu.memory_space<vmem>>) attributes {dimension_semantics = [], scalar_prefetch = 0 : i64, scratch_operands = 0 : i64, tpu.core_type = #tpu.core_type<tc>} {
    %c0 = arith.constant 0 : index
    %c0_0 = arith.constant 0 : index
    %0 = vector.load %arg0[%c0, %c0_0] : memref<32x7xf32, #tpu.memory_space<vmem>>, vector<32x1xf32>
    %c0_1 = arith.constant 0 : index
    %c0_2 = arith.constant 0 : index
    %1 = vector.load %arg1[%c0_1, %c0_2] : memref<7x512xf32, #tpu.memory_space<vmem>>, vector<1x512xf32>
    %2 = vector.broadcast %0 : vector<32x1xf32> to vector<32x512xf32>
    %3 = vector.broadcast %1 : vector<1x512xf32> to vector<32x512xf32>
    %4 = arith.mulf %2, %3 : vector<32x512xf32>
    %c0_3 = arith.constant 0 : index
    %c1 = arith.constant 1 : index
    %5 = vector.load %arg0[%c0_3, %c1] : memref<32x7xf32, #tpu.memory_space<vmem>>, vector<32x1xf32>
    %c1_4 = arith.constant 1 : index
    %c0_5 = arith.constant 0 : index
    %6 = vector.load %arg1[%c1_4, %c0_5] : memref<7x512xf32, #tpu.memory_space<vmem>>, vector<1x512xf32>
    %7 = vector.broadcast %5 : vector<32x1xf32> to vector<32x512xf32>
    %8 = vector.broadcast %6 : vector<1x512xf32> to vector<32x512xf32>
    %9 = arith.mulf %7, %8 : vector<32x512xf32>
    %10 = arith.addf %4, %9 : vector<32x512xf32>
    %c0_6 = arith.constant 0 : index
    %c2 = arith.constant 2 : index
    %11 = vector.load %arg0[%c0_6, %c2] : memref<32x7xf32, #tpu.memory_space<vmem>>, vector<32x1xf32>
    %c2_7 = arith.constant 2 : index
    %c0_8 = arith.constant 0 : index
    %12 = vector.load %arg1[%c2_7, %c0_8] : memref<7x512xf32, #tpu.memory_space<vmem>>, vector<1x512xf32>
    %13 = vector.broadcast %11 : vector<32x1xf32> to vector<32x512xf32>
    %14 = vector.broadcast %12 : vector<1x512xf32> to vector<32x512xf32>
    %15 = arith.mulf %13, %14 : vector<32x512xf32>
    %16 = arith.addf %10, %15 : vector<32x512xf32>
    %c0_9 = arith.constant 0 : index
    %c3 = arith.constant 3 : index
    %17 = vector.load %arg0[%c0_9, %c3] : memref<32x7xf32, #tpu.memory_space<vmem>>, vector<32x1xf32>
    %c3_10 = arith.constant 3 : index
    %c0_11 = arith.constant 0 : index
    %18 = vector.load %arg1[%c3_10, %c0_11] : memref<7x512xf32, #tpu.memory_space<vmem>>, vector<1x512xf32>
    %19 = vector.broadcast %17 : vector<32x1xf32> to vector<32x512xf32>
    %20 = vector.broadcast %18 : vector<1x512xf32> to vector<32x512xf32>
    %21 = arith.mulf %19, %20 : vector<32x512xf32>
    %22 = arith.addf %16, %21 : vector<32x512xf32>
    %c0_12 = arith.constant 0 : index
    %c4 = arith.constant 4 : index
    %23 = vector.load %arg0[%c0_12, %c4] : memref<32x7xf32, #tpu.memory_space<vmem>>, vector<32x1xf32>
    %c4_13 = arith.constant 4 : index
    %c0_14 = arith.constant 0 : index
    %24 = vector.load %arg1[%c4_13, %c0_14] : memref<7x512xf32, #tpu.memory_space<vmem>>, vector<1x512xf32>
    %25 = vector.broadcast %23 : vector<32x1xf32> to vector<32x512xf32>
    %26 = vector.broadcast %24 : vector<1x512xf32> to vector<32x512xf32>
    %27 = arith.mulf %25, %26 : vector<32x512xf32>
    %28 = arith.addf %22, %27 : vector<32x512xf32>
    %c0_15 = arith.constant 0 : index
    %c5 = arith.constant 5 : index
    %29 = vector.load %arg0[%c0_15, %c5] : memref<32x7xf32, #tpu.memory_space<vmem>>, vector<32x1xf32>
    %c5_16 = arith.constant 5 : index
    %c0_17 = arith.constant 0 : index
    %30 = vector.load %arg1[%c5_16, %c0_17] : memref<7x512xf32, #tpu.memory_space<vmem>>, vector<1x512xf32>
    %31 = vector.broadcast %29 : vector<32x1xf32> to vector<32x512xf32>
    %32 = vector.broadcast %30 : vector<1x512xf32> to vector<32x512xf32>
    %33 = arith.mulf %31, %32 : vector<32x512xf32>
    %34 = arith.addf %28, %33 : vector<32x512xf32>
    %c0_18 = arith.constant 0 : index
    %c6 = arith.constant 6 : index
    %35 = vector.load %arg0[%c0_18, %c6] : memref<32x7xf32, #tpu.memory_space<vmem>>, vector<32x1xf32>
    %c6_19 = arith.constant 6 : index
    %c0_20 = arith.constant 0 : index
    %36 = vector.load %arg1[%c6_19, %c0_20] : memref<7x512xf32, #tpu.memory_space<vmem>>, vector<1x512xf32>
    %37 = vector.broadcast %35 : vector<32x1xf32> to vector<32x512xf32>
    %38 = vector.broadcast %36 : vector<1x512xf32> to vector<32x512xf32>
    %39 = arith.mulf %37, %38 : vector<32x512xf32>
    %40 = arith.addf %34, %39 : vector<32x512xf32>
    %cst = arith.constant 3.000000e+01 : f32
    %41 = vector.broadcast %cst : f32 to vector<32x512xf32>
    %42 = arith.mulf %41, %40 : vector<32x512xf32>
    %43 = math.sin %42 : vector<32x512xf32>
    %c0_21 = arith.constant 0 : index
    %c0_22 = arith.constant 0 : index
    %44 = vector.load %arg2[%c0_21, %c0_22] : memref<32x32xf32, #tpu.memory_space<vmem>>, vector<32x32xf32>
    %cst_23 = arith.constant dense<0.000000e+00> : vector<32x512xf32>
    %45 = tpu.matmul %44, %43, %cst_23 {dimension_numbers = #tpu.dot_dimension_numbers<[1], [0], [0], [1], [0, 0, 1, 1], [], []>} : vector<32x32xf32>, vector<32x512xf32>, vector<32x512xf32> -> vector<32x512xf32>
    %c0_24 = arith.constant 0 : index
    %c0_25 = arith.constant 0 : index
    %46 = vector.load %arg3[%c0_24, %c0_25] : memref<32x1xf32, #tpu.memory_space<vmem>>, vector<32x1xf32>
    %47 = vector.broadcast %46 : vector<32x1xf32> to vector<32x512xf32>
    %48 = arith.addf %45, %47 : vector<32x512xf32>
    %cst_26 = arith.constant 3.000000e+01 : f32
    %49 = vector.broadcast %cst_26 : f32 to vector<32x512xf32>
    %50 = arith.mulf %49, %48 : vector<32x512xf32>
    %51 = math.sin %50 : vector<32x512xf32>
    %c0_27 = arith.constant 0 : index
    %c0_28 = arith.constant 0 : index
    %52 = vector.load %arg4[%c0_27, %c0_28] : memref<33x2xf32, #tpu.memory_space<vmem>>, vector<32x1xf32>
    %53 = vector.broadcast %52 : vector<32x1xf32> to vector<32x512xf32>
    %54 = arith.mulf %51, %53 : vector<32x512xf32>
    %cst_29 = arith.constant dense<0.000000e+00> : vector<512xf32>
    %55 = vector.multi_reduction <add>, %54, %cst_29 [0] : vector<32x512xf32> to vector<512xf32>
    %56 = vector.shape_cast %55 : vector<512xf32> to vector<1x512xf32>
    %c32 = arith.constant 32 : index
    %c0_30 = arith.constant 0 : index
    %57 = vector.load %arg4[%c32, %c0_30] : memref<33x2xf32, #tpu.memory_space<vmem>>, vector<1x1xf32>
    %58 = vector.broadcast %57 : vector<1x1xf32> to vector<1x512xf32>
    %59 = arith.addf %56, %58 : vector<1x512xf32>
    %c0_31 = arith.constant 0 : index
    %c1_32 = arith.constant 1 : index
    %60 = vector.load %arg4[%c0_31, %c1_32] : memref<33x2xf32, #tpu.memory_space<vmem>>, vector<32x1xf32>
    %61 = vector.broadcast %60 : vector<32x1xf32> to vector<32x512xf32>
    %62 = arith.mulf %51, %61 : vector<32x512xf32>
    %cst_33 = arith.constant dense<0.000000e+00> : vector<512xf32>
    %63 = vector.multi_reduction <add>, %62, %cst_33 [0] : vector<32x512xf32> to vector<512xf32>
    %64 = vector.shape_cast %63 : vector<512xf32> to vector<1x512xf32>
    %c32_34 = arith.constant 32 : index
    %c1_35 = arith.constant 1 : index
    %65 = vector.load %arg4[%c32_34, %c1_35] : memref<33x2xf32, #tpu.memory_space<vmem>>, vector<1x1xf32>
    %66 = vector.broadcast %65 : vector<1x1xf32> to vector<1x512xf32>
    %67 = arith.addf %64, %66 : vector<1x512xf32>
    %c0_36 = arith.constant 0 : index
    %c0_37 = arith.constant 0 : index
    %68 = vector.load %arg5[%c0_36, %c0_37] : memref<11x512xf32, #tpu.memory_space<vmem>>, vector<1x512xf32>
    %c1_38 = arith.constant 1 : index
    %c0_39 = arith.constant 0 : index
    %69 = vector.load %arg5[%c1_38, %c0_39] : memref<11x512xf32, #tpu.memory_space<vmem>>, vector<1x512xf32>
    %c2_40 = arith.constant 2 : index
    %c0_41 = arith.constant 0 : index
    %70 = vector.load %arg5[%c2_40, %c0_41] : memref<11x512xf32, #tpu.memory_space<vmem>>, vector<1x512xf32>
    %c3_42 = arith.constant 3 : index
    %c0_43 = arith.constant 0 : index
    %71 = vector.load %arg5[%c3_42, %c0_43] : memref<11x512xf32, #tpu.memory_space<vmem>>, vector<1x512xf32>
    %c4_44 = arith.constant 4 : index
    %c0_45 = arith.constant 0 : index
    %72 = vector.load %arg5[%c4_44, %c0_45] : memref<11x512xf32, #tpu.memory_space<vmem>>, vector<1x512xf32>
    %c5_46 = arith.constant 5 : index
    %c0_47 = arith.constant 0 : index
    %73 = vector.load %arg5[%c5_46, %c0_47] : memref<11x512xf32, #tpu.memory_space<vmem>>, vector<1x512xf32>
    %c6_48 = arith.constant 6 : index
    %c0_49 = arith.constant 0 : index
    %74 = vector.load %arg5[%c6_48, %c0_49] : memref<11x512xf32, #tpu.memory_space<vmem>>, vector<1x512xf32>
    %c7 = arith.constant 7 : index
    %c0_50 = arith.constant 0 : index
    %75 = vector.load %arg5[%c7, %c0_50] : memref<11x512xf32, #tpu.memory_space<vmem>>, vector<1x512xf32>
    %c8 = arith.constant 8 : index
    %c0_51 = arith.constant 0 : index
    %76 = vector.load %arg5[%c8, %c0_51] : memref<11x512xf32, #tpu.memory_space<vmem>>, vector<1x512xf32>
    %c9 = arith.constant 9 : index
    %c0_52 = arith.constant 0 : index
    %77 = vector.load %arg5[%c9, %c0_52] : memref<11x512xf32, #tpu.memory_space<vmem>>, vector<1x512xf32>
    %c10 = arith.constant 10 : index
    %c0_53 = arith.constant 0 : index
    %78 = vector.load %arg5[%c10, %c0_53] : memref<11x512xf32, #tpu.memory_space<vmem>>, vector<1x512xf32>
    %79 = arith.mulf %69, %75 : vector<1x512xf32>
    %80 = arith.mulf %70, %76 : vector<1x512xf32>
    %81 = arith.addf %79, %80 : vector<1x512xf32>
    %82 = arith.mulf %74, %81 : vector<1x512xf32>
    %83 = arith.addf %73, %82 : vector<1x512xf32>
    %cst_54 = arith.constant 5.000000e-01 : f32
    %84 = vector.broadcast %cst_54 : f32 to vector<1x512xf32>
    %85 = arith.mulf %84, %83 : vector<1x512xf32>
    %cst_55 = arith.constant -5.000000e-01 : f32
    %86 = vector.broadcast %cst_55 : f32 to vector<1x512xf32>
    %87 = arith.mulf %86, %85 : vector<1x512xf32>
    %cst_56 = arith.constant 0.0196869709 : f32
    %88 = vector.broadcast %cst_56 : f32 to vector<1x512xf32>
    %89 = arith.mulf %87, %88 : vector<1x512xf32>
    %90 = arith.mulf %89, %68 : vector<1x512xf32>
    %cst_57 = arith.constant 51.5039368 : f32
    %91 = vector.broadcast %cst_57 : f32 to vector<1x512xf32>
    %92 = arith.mulf %91, %68 : vector<1x512xf32>
    %93 = arith.mulf %92, %68 : vector<1x512xf32>
    %94 = arith.addf %90, %93 : vector<1x512xf32>
    %cst_58 = arith.constant 6.28318548 : f32
    %95 = vector.broadcast %cst_58 : f32 to vector<1x512xf32>
    %96 = arith.mulf %95, %94 : vector<1x512xf32>
    %97 = math.sin %96 : vector<1x512xf32>
    %cst_59 = arith.constant 0.994987428 : f32
    %98 = vector.broadcast %cst_59 : f32 to vector<1x512xf32>
    %99 = arith.mulf %98, %97 : vector<1x512xf32>
    %100 = math.cos %96 : vector<1x512xf32>
    %cst_60 = arith.constant 1.000000e-01 : f32
    %101 = vector.broadcast %cst_60 : f32 to vector<1x512xf32>
    %102 = arith.mulf %101, %100 : vector<1x512xf32>
    %103 = arith.addf %99, %102 : vector<1x512xf32>
    %104 = arith.mulf %77, %71 : vector<1x512xf32>
    %105 = arith.mulf %78, %72 : vector<1x512xf32>
    %106 = arith.addf %104, %105 : vector<1x512xf32>
    %cst_61 = arith.constant -6.28318548 : f32
    %107 = vector.broadcast %cst_61 : f32 to vector<1x512xf32>
    %108 = arith.mulf %107, %106 : vector<1x512xf32>
    %109 = math.cos %108 : vector<1x512xf32>
    %110 = math.sin %108 : vector<1x512xf32>
    %111 = arith.mulf %103, %59 : vector<1x512xf32>
    %112 = arith.mulf %103, %67 : vector<1x512xf32>
    %c0_62 = arith.constant 0 : index
    %c0_63 = arith.constant 0 : index
    %113 = vector.load %arg6[%c0_62, %c0_63] : memref<4x512xf32, #tpu.memory_space<vmem>>, vector<1x512xf32>
    tpu.vector_store %arg6[%c0_62, %c0_63], %59 {strides = array<i32>} : memref<4x512xf32, #tpu.memory_space<vmem>>, vector<1x512xf32>,
    %c1_64 = arith.constant 1 : index
    %c0_65 = arith.constant 0 : index
    %114 = vector.load %arg6[%c1_64, %c0_65] : memref<4x512xf32, #tpu.memory_space<vmem>>, vector<1x512xf32>
    tpu.vector_store %arg6[%c1_64, %c0_65], %67 {strides = array<i32>} : memref<4x512xf32, #tpu.memory_space<vmem>>, vector<1x512xf32>,
    %115 = arith.mulf %111, %109 : vector<1x512xf32>
    %116 = arith.mulf %112, %110 : vector<1x512xf32>
    %117 = arith.subf %115, %116 : vector<1x512xf32>
    %c2_66 = arith.constant 2 : index
    %c0_67 = arith.constant 0 : index
    %118 = vector.load %arg6[%c2_66, %c0_67] : memref<4x512xf32, #tpu.memory_space<vmem>>, vector<1x512xf32>
    tpu.vector_store %arg6[%c2_66, %c0_67], %117 {strides = array<i32>} : memref<4x512xf32, #tpu.memory_space<vmem>>, vector<1x512xf32>,
    %119 = arith.mulf %111, %110 : vector<1x512xf32>
    %120 = arith.mulf %112, %109 : vector<1x512xf32>
    %121 = arith.addf %119, %120 : vector<1x512xf32>
    %c3_68 = arith.constant 3 : index
    %c0_69 = arith.constant 0 : index
    %122 = vector.load %arg6[%c3_68, %c0_69] : memref<4x512xf32, #tpu.memory_space<vmem>>, vector<1x512xf32>
    tpu.vector_store %arg6[%c3_68, %c0_69], %121 {strides = array<i32>} : memref<4x512xf32, #tpu.memory_space<vmem>>, vector<1x512xf32>,
    return
  }
}

</mosaic_0001>

<bundles_post_ra>
// kernel: custom-call.1
= control target key start
LH: loop header
LB: loop body
LE: loop exit
PB: predicated region body
PF: predicated region fallthrough
CT: control target
= control target key end

     0   :  { %s61_s0 = inlined_call_operand.vmem [shape: c64[2,1,16,16], index: 0, kind: input, shape index: {}]   ;;  %s62_s1 = inlined_call_operand.vmem [shape: f32[2,1,16,16], index: 1, kind: output, shape index: {}]  }
   0x1   :  { %v20_v0 = vld [vmem:[%s61_s0 + $0x20] sm:$0xff]  ;;  %v21_v1 = vld [vmem:[%s61_s0 + $0x28] sm:$0xff]  ;;  %v23_v2 = vld [vmem:[%s61_s0 + $0x30] sm:$0xff] }
   0x2   :  { %4 = vst [vmem:[%s62_s1] sm:$0xff] %v20_v0  ;;  %v25_v3 = vld [vmem:[%s61_s0 + $0x38] sm:$0xff] }
   0x3   :  { %22 = vst [vmem:[%s62_s1 + $0x8] sm:$0xff] %v21_v1 }
   0x4   :  { %24 = vst [vmem:[%s62_s1 + $0x10] sm:$0xff] %v23_v2 }
   0x5   :  { %26 = vst [vmem:[%s62_s1 + $0x18] sm:$0xff] %v25_v3 }

// kernel: custom-call
= control target key start
LH: loop header
LB: loop body
LE: loop exit
PB: predicated region body
PF: predicated region fallthrough
CT: control target
= control target key end

     0   :  { %s56_s0 = inlined_call_operand.vmem [shape: c64[2,1,16,16], index: 0, kind: input, shape index: {}]   ;;  %s57_s1 = inlined_call_operand.vmem [shape: f32[2,1,16,16], index: 1, kind: output, shape index: {}]  }
   0x1   :  { %v2_v0 = vld [vmem:[%s56_s0] sm:$0xff]  ;;  %v16_v1 = vld [vmem:[%s56_s0 + $0x8] sm:$0xff]  ;;  %v18_v2 = vld [vmem:[%s56_s0 + $0x10] sm:$0xff] }
   0x2   :  { %3 = vst [vmem:[%s57_s1] sm:$0xff] %v2_v0  ;;  %v20_v3 = vld [vmem:[%s56_s0 + $0x18] sm:$0xff] }
   0x3   :  { %17 = vst [vmem:[%s57_s1 + $0x8] sm:$0xff] %v16_v1 }
   0x4   :  { %19 = vst [vmem:[%s57_s1 + $0x10] sm:$0xff] %v18_v2 }
   0x5   :  { %21 = vst [vmem:[%s57_s1 + $0x18] sm:$0xff] %v20_v3 }

// kernel: squeeze.20
= control target key start
LH: loop header
LB: loop body
LE: loop exit
PB: predicated region body
PF: predicated region fallthrough
CT: control target
= control target key end

     0   :  { %s66_s8 = smov 80   ;;  %s67_s9 = smov 48   ;;  %vm7_vm0 = vcmask 130048   ;;  %s117_s0 = inlined_call_operand.vmem [shape: f32[512], index: 0, kind: input, shape index: {}]   ;;  %s118_s1 = inlined_call_operand.vmem [shape: f32[2,1,16,16], index: 1, kind: output, shape index: {}]  }
   0x1   :  { %v4_v0 = vld [vmem:[%s117_s0] sm:$0xf]  ;;  %s65_s0 = smov 112   ;;  %s68_s10 = smov 96  }
   0x2   :  { %5 = vst [vmem:[#allocation0] sm:$0xf] %v4_v0  ;;  %s69_s11 = smov 64   ;;  %s70_s12 = smov 32  }
   0x3   :  { %s71_s13 = smov 16  }
   0x9   :  { %v9_v1 = vld [vmem:[#allocation0] sm:$0xf]  }
   0xa   :  { %v21_v2 = vld [vmem:[#allocation0] sm:$0xf]   ;;  %10 = vrot.lane.b32.xlu0 %v9_v1, %s65_s0 }
   0xb   :  { %22 = vrot.lane.b32.xlu1 %v21_v2, %s66_s8  ;;  %v33_v3 = vld [vmem:[#allocation0] sm:$0xf]  }
   0xc   :  { %34 = vrot.lane.b32.xlu2 %v33_v3, %s67_s9  ;;  %v15_v4 = vld [vmem:[#allocation0] sm:$0xf]  }
   0xd   :  { %v27_v5 = vld [vmem:[#allocation0] sm:$0xf]  }
   0xe   :  { %v39_v6 = vld [vmem:[#allocation0] sm:$0xf]  }
   0xf   :  { %v45_v7 = vld [vmem:[#allocation0] sm:$0xf]  }
  0x10   :  { %v6_v8 = vld [vmem:[#allocation0] sm:$0xf]  }
  0x11   :  { %8 = vst.msk [vmem:[%s118_s1] ss:$8 sm:$0xf] %vm7_vm0, %v6_v8  }
  0x12   :  { %16 = vrot.lane.b32.xlu0 %v15_v4, %s68_s10 }
  0x13   :  { %28 = vrot.lane.b32.xlu1 %v27_v5, %s69_s11 }
  0x14   :  { %40 = vrot.lane.b32.xlu2 %v39_v6, %s70_s12 }
  0x1a   :  { %46 = vrot.lane.b32.xlu0 %v45_v7, %s71_s13 }
  0x66   :  { %v35_v9 = vpop.permute.xlu2 %34  }
  0x67   :  { %55 = vst.msk [vmem:[%s118_s1 + $0x5] ss:$8 sm:$0xf] %vm7_vm0, %v35_v9  }
  0x6e   :  { %v41_v10 = vpop.permute.xlu2 %40  }
  0x6f   :  { %56 = vst.msk [vmem:[%s118_s1 + $0x6] ss:$8 sm:$0xf] %vm7_vm0, %v41_v10  }
  0x7c   :  { %v11_v11 = vpop.permute.xlu0 %10  }
  0x7d   :  { %v23_v12 = vpop.permute.xlu1 %22   ;;  %51 = vst.msk [vmem:[%s118_s1 + $0x1] ss:$8 sm:$0xf] %vm7_vm0, %v11_v11  }
  0x7e   :  { %53 = vst.msk [vmem:[%s118_s1 + $0x3] ss:$8 sm:$0xf] %vm7_vm0, %v23_v12  }
  0x84   :  { %v17_v13 = vpop.permute.xlu0 %16  }
  0x85   :  { %v29_v14 = vpop.permute.xlu1 %28   ;;  %52 = vst.msk [vmem:[%s118_s1 + $0x2] ss:$8 sm:$0xf] %vm7_vm0, %v17_v13  }
  0x86   :  { %54 = vst.msk [vmem:[%s118_s1 + $0x4] ss:$8 sm:$0xf] %vm7_vm0, %v29_v14  }
  0x8c   :  { %v47_v15 = vpop.permute.xlu0 %46  }
  0x8d   :  { %57 = vst.msk [vmem:[%s118_s1 + $0x7] ss:$8 sm:$0xf] %vm7_vm0, %v47_v15  }

// kernel: custom-call.4
= control target key start
LH: loop header
LB: loop body
LE: loop exit
PB: predicated region body
PF: predicated region fallthrough
CT: control target
= control target key end

     0   :  { %s111_s0 = inlined_call_operand.vmem [shape: f32[2,1,16,16], index: 0, kind: input, shape index: {}]   ;;  %s112_s1 = inlined_call_operand.vmem [shape: f32[2,1,16,16], index: 1, kind: input, shape index: {}]   ;;  %s113_s2 = inlined_call_operand.vmem [shape: c64[2,1,16,16], index: 2, kind: output, shape index: {}]  }
   0x1   :  { %v4_v0 = vld [vmem:[%s111_s0] sm:$0xff]  ;;  %v35_v1 = vld [vmem:[%s111_s0 + $0x8] sm:$0xff]  ;;  %v37_v2 = vld [vmem:[%s111_s0 + $0x10] sm:$0xff] }
   0x2   :  { %5 = vst [vmem:[%s113_s2] sm:$0xff] %v4_v0  ;;  %v39_v3 = vld [vmem:[%s111_s0 + $0x18] sm:$0xff]  ;;  %v18_v4 = vld [vmem:[%s112_s1] sm:$0xff]  ;;  %v42_v5 = vld [vmem:[%s112_s1 + $0x8] sm:$0xff] }
   0x3   :  { %36 = vst [vmem:[%s113_s2 + $0x8] sm:$0xff] %v35_v1  ;;  %v44_v6 = vld [vmem:[%s112_s1 + $0x10] sm:$0xff]  ;;  %v46_v7 = vld [vmem:[%s112_s1 + $0x18] sm:$0xff] }
   0x4   :  { %38 = vst [vmem:[%s113_s2 + $0x10] sm:$0xff] %v37_v2 }
   0x5   :  { %40 = vst [vmem:[%s113_s2 + $0x18] sm:$0xff] %v39_v3 }
   0x6   :  { %41 = vst [vmem:[%s113_s2 + $0x20] sm:$0xff] %v18_v4 }
   0x7   :  { %43 = vst [vmem:[%s113_s2 + $0x28] sm:$0xff] %v42_v5 }
   0x8   :  { %45 = vst [vmem:[%s113_s2 + $0x30] sm:$0xff] %v44_v6 }
   0x9   :  { %47 = vst [vmem:[%s113_s2 + $0x38] sm:$0xff] %v46_v7 }

// kernel: _forward_core.2
= control target key start
LH: loop header
LB: loop body
LE: loop exit
PB: predicated region body
PF: predicated region fallthrough
CT: control target
= control target key end

     0   :  { %v1350_v1 = vmov 2   ;;  %v1351_v2 = vmov 1   ;;  %v1352_v6 = vmov 0   ;;  %s1353_s23 = smov 17   ;;  %s1355_s24 = smov 15   ;;  %v1358_v9 = vmov 3   ;;  %s2450_s0 = inlined_call_operand.vmem [shape: f32[1,512], index: 0, kind: input, shape index: {}]   ;;  %s2451_s1 = inlined_call_operand.vmem [shape: f32[8,10], index: 1, kind: input, shape index: {}]   ;;  %s2452_s8 = inlined_call_operand.vmem [shape: f32[9,512], index: 8, kind: input, shape index: {}]   ;;  %s2453_s3 = inlined_call_operand.vmem [shape: f32[8,1], index: 3, kind: input, shape index: {}]   ;;  %s2454_s2 = inlined_call_operand.vmem [shape: f32[8,72], index: 2, kind: input, shape index: {}]   ;;  %s2455_s10 = inlined_call_operand.vmem [shape: f32[512,128], index: 10, kind: input, shape index: {}]   ;;  %s2456_s9 = inlined_call_operand.vmem [shape: f32[9,128], index: 9, kind: input, shape index: {}]   ;;  %s2457_s5 = inlined_call_operand.vmem [shape: f32[16,1], index: 5, kind: input, shape index: {}]   ;;  %s2458_s4 = inlined_call_operand.vmem [shape: f32[16,72], index: 4, kind: input, shape index: {}]   ;;  %s2459_s7 = inlined_call_operand.vmem [shape: f32[16,1], index: 7, kind: input, shape index: {}]   ;;  %s2460_s6 = inlined_call_operand.vmem [shape: f32[16,144], index: 6, kind: input, shape index: {}]   ;;  %s2461_s11 = inlined_call_operand.vmem [shape: f32[128,32], index: 11, kind: input, shape index: {}]   ;;  %s2462_s12 = inlined_call_operand.vmem [shape: f32[16,32], index: 12, kind: output, shape index: {}]  }
   0x1   :  { %v1442_v0 = vld [vmem:[%s2450_s0] sm:$0xf]  ;;  %1299 = vset.pattern.permute.xlu2 %v1350_v1  ;;  %1298 = vset.pattern.permute.xlu1 %v1351_v2  ;;  %s1354_s0 = smov 16   ;;  %s1356_s25 = smov 1   ;;  %v1360_v10 = vmov 4   ;;  %v1361_v11 = vmov 6   ;;  %v69_v17 = vlaneseq }
   0x2   :  { %v1445_v3 = vperm.slane %v1442_v0, 2  ;;  %v1448_v4 = vperm.slane %v1442_v0, 1  ;;  %v1451_v5 = vperm.slane %v1442_v0, 0  ;;  %1297 = vset.pattern.permute.xlu0 %v1352_v6  ;;  %v1481_v7 = vld [vmem:[%s2451_s1] sm:$0xff]  ;;  %v56_v8 = vperm.slane %v1442_v0, 3  ;;  %s1357_s28 = smov 127  }
   0x3   :  { %s1359_s1 = smov 113   ;;  %v1505_v12 = vld [vmem:[%s2452_s8 + $0x10] sm:$0xff]  ;;  %v1362_v13 = vmov 5   ;;  %v1363_v14 = vmov 7   ;;  %s1364_s13 = smov 112   ;;  %v1365_v15 = vmov 8  }
   0x4   :  { %65 = vrot.lane.b32.xlu1 %v1445_v3, %s1353_s23  ;;  %96 = vrot.lane.b32.xlu2 %v1448_v4, %s1354_s0  ;;  %223 = vst [vmem:[#allocation1 + $0x12] sm:$0xff] %v1505_v12  ;;  %s1366_s14 = smov 111   ;;  %v1525_v18 = vld [vmem:[%s2452_s8 + $0x8] sm:$0xff]  ;;  %v1529_v19 = vand.u32 127, %v69_v17  ;;  %v1534_v20 = vld [vmem:[%s2452_s8] sm:$0xff]  ;;  %v1367_v25 = vmov 9  }
   0x5   :  { %61 = vrot.lane.b32.xlu0 %v1451_v5, %s1353_s23  ;;  %222 = vst [vmem:[#allocation1 + $0x9] sm:$0xff] %v1525_v18  ;;  %v1541_v21 = vld [vmem:[%s2452_s8 + $0x18] sm:$0xff]  ;;  %v113_v38 = vrot.slane %v1505_v12, 1  ;;  %v112_v39 = vrot.slane %v1525_v18, 1  ;;  %v111_v41 = vrot.slane %v1534_v20, 1  ;;  %v154_v44 = vrot.slane %v1505_v12, 2 }
   0x6   :  { %221 = vst [vmem:[#allocation1] sm:$0xff] %v1534_v20  ;;  %vm102_vm0 = vcmp.lt.s32.totalorder %v1529_v19, 16  ;;  %vm147_vm1 = vcmp.lt.s32.totalorder %v1529_v19, 15  ;;  %vm71_vm2 = vcmp.lt.s32.totalorder %v1529_v19, 17  ;;  %v114_v42 = vrot.slane %v1541_v21, 1  ;;  %s1369_s27 = smov 120  }
   0x7   :  { %224 = vst [vmem:[#allocation1 + $0x1b] sm:$0xff] %v1541_v21  ;;  %v153_v45 = vrot.slane %v1525_v18, 2  ;;  %vm188_vm3 = vcmp.lt.s32.totalorder %v1529_v19, 1  ;;  %vm258_vm4 = vcmp.lt.s32.totalorder %v1529_v19, 127  ;;  %vm301_vm5 = vcmp.lt.s32.totalorder %v1529_v19, 113  ;;  %s1370_s29 = smov 119  }
   0x8   :  { %vm342_vm6 = vcmp.lt.s32.totalorder %v1529_v19, 112  ;;  %vm383_vm7 = vcmp.lt.s32.totalorder %v1529_v19, 111  ;;  %vm667_vm8 = vcmask 588800   ;;  %s1371_s30 = smov 7   ;;  %v1002_v19 = vld [vmem:[%s2457_s5 + $0x8] sm:$0xff]  ;;  %vm1146_vm9 = vcmask 130048  }
   0x9   :  { %vm1258_vm10 = vcmask 261120  }
   0xc   :  { %98 = vrot.lane.b32.xlu2 %v1445_v3, %s1354_s0  ;;  %94 = vrot.lane.b32.xlu1 %v1451_v5, %s1354_s0 }
   0xd   :  { %63 = vrot.lane.b32.xlu0 %v1448_v4, %s1353_s23 }
  0x14   :  { %143 = vrot.lane.b32.xlu2 %v1445_v3, %s1355_s24  ;;  %141 = vrot.lane.b32.xlu1 %v1448_v4, %s1355_s24 }
  0x15   :  { %139 = vrot.lane.b32.xlu0 %v1451_v5, %s1355_s24 }
  0x1c   :  { %184 = vrot.lane.b32.xlu2 %v1445_v3, %s1356_s25  ;;  %182 = vrot.lane.b32.xlu1 %v1448_v4, %s1356_s25 }
  0x1d   :  { %180 = vrot.lane.b32.xlu0 %v1451_v5, %s1356_s25 }
  0x24   :  { %165 = vperm.xlu2 %1299, %v1481_v7   ;;  %124 = vperm.xlu1 %1298, %v1481_v7  }
  0x25   :  { %83 = vperm.xlu0 %1297, %v1481_v7  }
  0x2c   :  { %100 = vrot.lane.b32.xlu2 %v56_v8, %s1354_s0  ;;  %67 = vrot.lane.b32.xlu1 %v56_v8, %s1353_s23 }
  0x2d   :  { %252 = vrot.lane.b32.xlu0 %v1448_v4, %s1357_s28  ;;  %1303 = vset.pattern.permute.xlu2 %v1361_v11 }
  0x2e   :  { %1300 = vset.pattern.permute.xlu0 %v1358_v9  ;;  %1304 = vset.pattern.permute.xlu1 %v1363_v14 }
  0x34   :  { %256 = vrot.lane.b32.xlu2 %v56_v8, %s1357_s28  ;;  %254 = vrot.lane.b32.xlu1 %v1445_v3, %s1357_s28 }
  0x35   :  { %206 = vperm.xlu0 %1300, %v1481_v7  }
  0x3c   :  { %295 = vrot.lane.b32.xlu2 %v1448_v4, %s1359_s1  ;;  %145 = vrot.lane.b32.xlu1 %v56_v8, %s1355_s24 }
  0x3d   :  { %1301 = vset.pattern.permute.xlu0 %v1360_v10 }
  0x3e   :  { %230 = vperm.xlu0 %1301, %v1481_v7  }
  0x44   :  { %299 = vrot.lane.b32.xlu2 %v56_v8, %s1359_s1  ;;  %297 = vrot.lane.b32.xlu1 %v1445_v3, %s1359_s1 }
  0x46   :  { %1302 = vset.pattern.permute.xlu0 %v1362_v13 }
  0x47   :  { %278 = vperm.xlu0 %1302, %v1481_v7  }
  0x4c   :  { %336 = vrot.lane.b32.xlu2 %v1448_v4, %s1364_s13  ;;  %186 = vrot.lane.b32.xlu1 %v56_v8, %s1356_s25 }
  0x4f   :  { %250 = vrot.lane.b32.xlu0 %v1451_v5, %s1357_s28 }
  0x50   :  { %1305 = vset.pattern.permute.xlu0 %v1365_v15 }
  0x54   :  { %340 = vrot.lane.b32.xlu2 %v56_v8, %s1364_s13  ;;  %338 = vrot.lane.b32.xlu1 %v1445_v3, %s1364_s13 }
  0x57   :  { %393 = vperm.xlu0 %1305, %v1481_v7  }
  0x5c   :  { %379 = vrot.lane.b32.xlu2 %v1445_v3, %s1366_s14  ;;  %377 = vrot.lane.b32.xlu1 %v1448_v4, %s1366_s14 }
  0x5e   :  { %v97_v16 = vpop.permute.xlu2 %96 }
  0x5f   :  { %1344 = vset.pattern.permute.xlu0 %v1352_v6 }
  0x64   :  { %319 = vperm.xlu2 %1303, %v1481_v7   ;;  %381 = vrot.lane.b32.xlu1 %v56_v8, %s1366_s14 }
  0x66   :  { %v99_v22 = vpop.permute.xlu2 %98 }
  0x67   :  { %v104_v23 = vsel %vm102_vm0, %v97_v16, %v99_v22 }
  0x68   :  { %v121_v51 = vmul.f32 %v113_v38, %v104_v23  ;;  %v195_v23 = vrot.slane %v1505_v12, 3 }
  0x6a   :  { %v129_v59 = vperm.slane %v121_v51, 0 }
  0x6c   :  { %293 = vrot.lane.b32.xlu2 %v1451_v5, %s1359_s1  ;;  %360 = vperm.xlu1 %1304, %v1481_v7  }
  0x6d   :  { %1338 = vset.pattern.permute.xlu2 %v1352_v6 }
  0x6e   :  { %v1552_v24 = vpop.permute.xlu2 %143 }
  0x74   :  { %375 = vrot.lane.b32.xlu2 %v1451_v5, %s1366_s14  ;;  %334 = vrot.lane.b32.xlu1 %v1451_v5, %s1364_s13 }
  0x75   :  { %1306 = vset.pattern.permute.xlu1 %v1367_v25  ;;  %v194_v25 = vrot.slane %v1525_v18, 3 }
  0x76   :  { %v1558_v26 = vpop.permute.xlu1 %65  ;;  %v1560_v27 = vpop.permute.xlu2 %184 }
  0x77   :  { %v1562_v28 = vpop.permute.xlu0 %61 }
  0x7c   :  { %409 = vperm.xlu1 %1306, %v1481_v7  }
  0x7e   :  { %v1565_v29 = vpop.permute.xlu2 %165  ;;  %v95_v30 = vpop.permute.xlu1 %94 }
  0x7f   :  { %v105_v31 = vsel %vm102_vm0, %v95_v30, %v97_v16  ;;  %v64_v32 = vpop.permute.xlu0 %63 }
  0x80   :  { %v74_v40 = vsel %vm71_vm2, %v1562_v28, %v64_v32  ;;  %v73_v47 = vsel %vm71_vm2, %v64_v32, %v1558_v26  ;;  %v120_v52 = vmul.f32 %v112_v39, %v105_v31 }
  0x81   :  { %v78_v50 = vmul.f32 %v74_v40, %v1525_v18  ;;  %v79_v55 = vmul.f32 %v73_v47, %v1505_v12 }
  0x82   :  { %v128_v60 = vperm.slane %v120_v52, 0 }
  0x83   :  { %v87_v58 = vperm.slane %v78_v50, 0  ;;  %v88_v63 = vperm.slane %v79_v55, 0  ;;  %v152_v55 = vrot.slane %v1534_v20, 2 }
  0x84   :  { %1307 = vset.pattern.permute.xlu1 %v1352_v6 }
  0x86   :  { %v101_v33 = vpop.permute.xlu2 %100  ;;  %v142_v34 = vpop.permute.xlu1 %141 }
  0x87   :  { %v103_v35 = vsel %vm102_vm0, %v99_v22, %v101_v33  ;;  %v149_v36 = vsel %vm147_vm1, %v142_v34, %v1552_v24  ;;  %v1576_v37 = vpop.permute.xlu0 %139  ;;  %v106_v43 = vsel %vm102_vm0, %v101_v33, %v95_v30 }
  0x88   :  { %v150_v48 = vsel %vm147_vm1, %v1576_v37, %v142_v34  ;;  %v119_v53 = vmul.f32 %v111_v41, %v106_v43  ;;  %v122_v54 = vmul.f32 %v114_v42, %v103_v35  ;;  %v162_v56 = vmul.f32 %v154_v44, %v149_v36 }
  0x89   :  { %v161_v57 = vmul.f32 %v153_v45, %v150_v48 }
  0x8a   :  { %v127_v61 = vperm.slane %v119_v53, 0  ;;  %v130_v62 = vperm.slane %v122_v54, 0  ;;  %v170_v1 = vperm.slane %v162_v56, 0  ;;  %v155_v56 = vrot.slane %v1541_v21, 2 }
  0x8b   :  { %v169_v2 = vperm.slane %v161_v57, 0 }
  0x8c   :  { %v174_v13 = vmul.f32 %v170_v1, %v1565_v29 }
  0x8d   :  { %v173_v14 = vmul.f32 %v169_v2, %v1565_v29 }
  0x8e   :  { %v183_v46 = vpop.permute.xlu1 %182  ;;  %v1600_v11 = vpop.permute.xlu2 %256 }
  0x8f   :  { %v1596_v49 = vpop.permute.xlu0 %180  ;;  %v190_v31 = vsel %vm188_vm3, %v183_v46, %v1560_v27 }
  0x90   :  { %v191_v32 = vsel %vm188_vm3, %v1596_v49, %v183_v46  ;;  %v203_v39 = vmul.f32 %v195_v23, %v190_v31 }
  0x91   :  { %v202_v40 = vmul.f32 %v194_v25, %v191_v32 }
  0x92   :  { %v211_v46 = vperm.slane %v203_v39, 0 }
  0x96   :  { %v125_v3 = vpop.permute.xlu1 %124  ;;  %v1623_v43 = vpop.permute.xlu2 %295 }
  0x97   :  { %v131_v4 = vmul.f32 %v127_v61, %v125_v3  ;;  %v132_v5 = vmul.f32 %v128_v60, %v125_v3  ;;  %v133_v6 = vmul.f32 %v129_v59, %v125_v3  ;;  %v134_v7 = vmul.f32 %v130_v62, %v125_v3  ;;  %v84_v8 = vpop.permute.xlu0 %83 }
  0x98   :  { %v91_v9 = vmul.f32 %v87_v58, %v84_v8  ;;  %v92_v10 = vmul.f32 %v88_v63, %v84_v8 }
  0x9a   :  { %v136_v15 = vadd.f32 %v132_v5, %v91_v9  ;;  %v137_v16 = vadd.f32 %v133_v6, %v92_v10  ;;  %v226_v9 = vld [vmem:[#allocation1 + $0x4] ss:$9 sm:$0xff] }
  0x9b   :  { %v1655_v10 = vmul.f32 %v226_v9, %v1442_v0 }
  0x9c   :  { %v177_v17 = vadd.f32 %v173_v14, %v136_v15  ;;  %v178_v22 = vadd.f32 %v174_v13, %v137_v16 }
  0x9d   :  { %v237_v15 = vperm.slane %v1655_v10, 3 }
  0x9e   :  { %v68_v30 = vpop.permute.xlu1 %67  ;;  %v1635_v57 = vpop.permute.xlu2 %299 }
  0x9f   :  { %v72_v33 = vsel %vm71_vm2, %v1558_v26, %v68_v30  ;;  %v75_v34 = vsel %vm71_vm2, %v68_v30, %v1562_v28  ;;  %v1619_v35 = vpop.permute.xlu0 %252  ;;  %v210_v26 = vperm.slane %v202_v40, 0 }
  0xa0   :  { %v77_v36 = vmul.f32 %v75_v34, %v1534_v20  ;;  %v80_v38 = vmul.f32 %v72_v33, %v1541_v21 }
  0xa2   :  { %v86_v41 = vperm.slane %v77_v36, 0  ;;  %v89_v42 = vperm.slane %v80_v38, 0 }
  0xa4   :  { %v90_v44 = vmul.f32 %v86_v41, %v84_v8  ;;  %v93_v45 = vmul.f32 %v89_v42, %v84_v8  ;;  %v265_v42 = vrot.slane %v1525_v18, 5 }
  0xa6   :  { %v135_v47 = vadd.f32 %v131_v4, %v90_v44  ;;  %v138_v48 = vadd.f32 %v134_v7, %v93_v45  ;;  %v255_v50 = vpop.permute.xlu1 %254  ;;  %v1649_v8 = vpop.permute.xlu2 %336  ;;  %v266_v44 = vrot.slane %v1505_v12, 5 }
  0xa7   :  { %v1625_v28 = vpop.permute.xlu0 %206 }
  0xa8   :  { %v214_v51 = vmul.f32 %v210_v26, %v1625_v28  ;;  %v215_v52 = vmul.f32 %v211_v46, %v1625_v28  ;;  %v259_v46 = vsel %vm258_vm4, %v255_v50, %v1600_v11  ;;  %v260_v26 = vsel %vm258_vm4, %v1619_v35, %v255_v50 }
  0xa9   :  { %v273_v50 = vmul.f32 %v265_v42, %v260_v26  ;;  %v306_v42 = vrot.slane %v1534_v20, 6 }
  0xaa   :  { %v1629_v53 = vadd.f32 %v214_v51, %v177_v17  ;;  %v1631_v54 = vadd.f32 %v215_v52, %v178_v22 }
  0xae   :  { %v146_v58 = vpop.permute.xlu1 %145  ;;  %v1663_v17 = vpop.permute.xlu2 %340 }
  0xaf   :  { %v148_v59 = vsel %vm147_vm1, %v1552_v24, %v146_v58  ;;  %v151_v60 = vsel %vm147_vm1, %v146_v58, %v1576_v37  ;;  %v196_v37 = vrot.slane %v1541_v21, 3  ;;  %v274_v58 = vmul.f32 %v266_v44, %v259_v46 }
  0xb0   :  { %v160_v61 = vmul.f32 %v152_v55, %v151_v60  ;;  %v163_v62 = vmul.f32 %v155_v56, %v148_v59  ;;  %v1643_v63 = vpop.permute.xlu0 %230  ;;  %v235_v55 = vperm.slane %v1655_v10, 1  ;;  %v193_v56 = vrot.slane %v1534_v20, 3 }
  0xb1   :  { %v283_v9 = vperm.slane %v274_v58, 0 }
  0xb2   :  { %v168_v1 = vperm.slane %v160_v61, 0  ;;  %v171_v2 = vperm.slane %v163_v62, 0  ;;  %v348_v62 = vrot.slane %v1525_v18, 7 }
  0xb4   :  { %v172_v3 = vmul.f32 %v168_v1, %v1565_v29  ;;  %v175_v4 = vmul.f32 %v171_v2, %v1565_v29  ;;  %v267_v29 = vrot.slane %v1541_v21, 5  ;;  %v349_v1 = vrot.slane %v1505_v12, 7 }
  0xb6   :  { %v1647_v5 = vadd.f32 %v172_v3, %v135_v47  ;;  %v179_v6 = vadd.f32 %v175_v4, %v138_v48  ;;  %v298_v7 = vpop.permute.xlu1 %297  ;;  %v380_v39 = vpop.permute.xlu2 %379  ;;  %v307_v47 = vrot.slane %v1525_v18, 6  ;;  %v308_v48 = vrot.slane %v1505_v12, 6 }
  0xb7   :  { %v302_v51 = vsel %vm301_vm5, %v298_v7, %v1635_v57  ;;  %v303_v52 = vsel %vm301_vm5, %v1623_v43, %v298_v7  ;;  %v243_v4 = vmul.f32 %v235_v55, %v1643_v63 }
  0xb8   :  { %v315_v60 = vmul.f32 %v307_v47, %v303_v52  ;;  %v316_v61 = vmul.f32 %v308_v48, %v302_v51  ;;  %v234_v51 = vperm.slane %v1655_v10, 0 }
  0xb9   :  { %v1651_v24 = vpop.permute.xlu0 %278 }
  0xbe   :  { %v187_v13 = vpop.permute.xlu1 %186  ;;  %v1679_v41 = vpop.permute.xlu2 %319 }
  0xbf   :  { %v189_v14 = vsel %vm188_vm3, %v1560_v27, %v187_v13  ;;  %v245_v27 = vmul.f32 %v237_v15, %v1643_v63  ;;  %v192_v59 = vsel %vm188_vm3, %v187_v13, %v1596_v49  ;;  %v282_v49 = vperm.slane %v273_v50, 0 }
  0xc0   :  { %v204_v16 = vmul.f32 %v196_v37, %v189_v14  ;;  %v201_v7 = vmul.f32 %v193_v56, %v192_v59  ;;  %v264_v37 = vrot.slane %v1534_v20, 5  ;;  %v323_v14 = vperm.slane %v315_v60, 0 }
  0xc1   :  { %v1665_v22 = vpop.permute.xlu0 %250 }
  0xc2   :  { %v212_v23 = vperm.slane %v204_v16, 0  ;;  %v262_v0 = vsel %vm258_vm4, %v1600_v11, %v1665_v22  ;;  %v236_v11 = vperm.slane %v1655_v10, 2  ;;  %v327_v44 = vmul.f32 %v323_v14, %v1679_v41 }
  0xc3   :  { %v275_v25 = vmul.f32 %v267_v29, %v262_v0  ;;  %v324_v29 = vperm.slane %v316_v61, 0  ;;  %v286_v0 = vmul.f32 %v282_v49, %v1651_v24  ;;  %v261_v26 = vsel %vm258_vm4, %v1665_v22, %v1619_v35 }
  0xc4   :  { %v216_v30 = vmul.f32 %v212_v23, %v1625_v28  ;;  %v347_v35 = vrot.slane %v1534_v20, 7  ;;  %v272_v58 = vmul.f32 %v264_v37, %v261_v26 }
  0xc5   :  { %v284_v31 = vperm.slane %v275_v25, 0  ;;  %v287_v25 = vmul.f32 %v283_v9, %v1651_v24  ;;  %v328_v46 = vmul.f32 %v324_v29, %v1679_v41  ;;  %v309_v29 = vrot.slane %v1541_v21, 6 }
  0xc6   :  { %v220_v32 = vadd.f32 %v216_v30, %v179_v6  ;;  %v339_v33 = vpop.permute.xlu1 %338  ;;  %v244_v6 = vmul.f32 %v236_v11, %v1643_v63  ;;  %v294_v15 = vpop.permute.xlu2 %293  ;;  %v281_v49 = vperm.slane %v272_v58, 0 }
  0xc7   :  { %v288_v36 = vmul.f32 %v284_v31, %v1651_v24  ;;  %v343_v2 = vsel %vm342_vm6, %v339_v33, %v1663_v17  ;;  %v344_v3 = vsel %vm342_vm6, %v1649_v8, %v339_v33  ;;  %v47_v31 = vld [vmem:[%s2452_s8 + $0x30] sm:$0x1]  ;;  %v247_v33 = vadd.f32 %v243_v4, %v1629_v53 }
  0xc8   :  { %v249_v34 = vadd.f32 %v245_v27, %v220_v32  ;;  %v356_v16 = vmul.f32 %v348_v62, %v344_v3  ;;  %v357_v23 = vmul.f32 %v349_v1, %v343_v2  ;;  %v46_v27 = vld [vmem:[%s2452_s8 + $0x28] sm:$0x1]  ;;  %v242_v1 = vmul.f32 %v234_v51, %v1643_v63  ;;  %v45_v63 = vld [vmem:[%s2452_s8 + $0x20] sm:$0x1] }
  0xc9   :  { %v290_v52 = vadd.f32 %v286_v0, %v247_v33 }
  0xca   :  { %v1674_v38 = vadd.f32 %v288_v36, %v249_v34  ;;  %v248_v34 = vadd.f32 %v244_v6, %v1631_v54  ;;  %v209_v36 = vperm.slane %v201_v7, 0  ;;  %v364_v47 = vperm.slane %v356_v16, 0 }
  0xcb   :  { %v365_v53 = vperm.slane %v357_v23, 0  ;;  %v331_v22 = vadd.f32 %v327_v44, %v290_v52  ;;  %v305_v16 = vsel %vm301_vm5, %v1635_v57, %v294_v15 }
  0xcc   :  { %v291_v55 = vadd.f32 %v287_v25, %v248_v34  ;;  %v213_v11 = vmul.f32 %v209_v36, %v1625_v28  ;;  %v394_v28 = vpop.permute.xlu0 %393  ;;  %v317_v36 = vmul.f32 %v309_v29, %v305_v16 }
  0xce   :  { %v1676_v40 = vpop.permute.xlu1 %377  ;;  %v332_v60 = vadd.f32 %v328_v46, %v291_v55  ;;  %v217_v2 = vadd.f32 %v213_v11, %v1647_v5  ;;  %v376_v3 = vpop.permute.xlu2 %375 }
  0xcf   :  { %v385_v30 = vsel %vm383_vm7, %v1676_v40, %v380_v39  ;;  %v386_v5 = vsel %vm383_vm7, %v376_v3, %v1676_v40 }
  0xd0   :  { %v389_v48 = vmul.f32 %v385_v30, %v46_v27  ;;  %v285_v27 = vmul.f32 %v281_v49, %v1651_v24  ;;  %v388_v57 = vmul.f32 %v386_v5, %v45_v63  ;;  %v565_v49 = vperm.slane %v1525_v18, 6  ;;  %v1346_v63 = vld [vmem:[%s2452_s8 + $0x20] ss:$0 sm:$0xff] }
  0xd1   :  { %v541_v5 = vperm.slane %v1525_v18, 5 }
  0xd2   :  { %v397_v61 = vperm.slane %v389_v48, 0 }
  0xd4   :  { %v401_v37 = vmul.f32 %v397_v61, %v394_v28 }
  0xd6   :  { %v1683_v45 = vpop.permute.xlu1 %381 }
  0xd7   :  { %v384_v32 = vsel %vm383_vm7, %v380_v39, %v1683_v45  ;;  %v304_v39 = vsel %vm301_vm5, %v294_v15, %v1623_v43 }
  0xd8   :  { %v390_v54 = vmul.f32 %v384_v32, %v47_v31  ;;  %v314_v59 = vmul.f32 %v306_v42, %v304_v39  ;;  %v350_v31 = vrot.slane %v1541_v21, 7  ;;  %v396_v39 = vperm.slane %v388_v57, 0 }
  0xda   :  { %v398_v62 = vperm.slane %v390_v54, 0  ;;  %v322_v9 = vperm.slane %v314_v59, 0  ;;  %v400_v51 = vmul.f32 %v396_v39, %v394_v28 }
  0xdc   :  { %v402_v14 = vmul.f32 %v398_v62, %v394_v28  ;;  %v326_v30 = vmul.f32 %v322_v9, %v1679_v41  ;;  %v1345_v62 = vld [vmem:[%s2452_s8 + $0x28] ss:$0 sm:$0xff] }
  0xde   :  { %v1718_v13 = vpop.permute.xlu1 %360 }
  0xdf   :  { %v368_v56 = vmul.f32 %v364_v47, %v1718_v13  ;;  %v369_v50 = vmul.f32 %v365_v53, %v1718_v13  ;;  %v48_v47 = vld [vmem:[%s2452_s8 + $0x38] sm:$0x1]  ;;  %v387_v53 = vsel %vm383_vm7, %v1683_v45, %v376_v3 }
  0xe0   :  { %v391_v55 = vmul.f32 %v387_v53, %v48_v47 }
  0xe1   :  { %v372_v4 = vadd.f32 %v368_v56, %v331_v22  ;;  %v373_v6 = vadd.f32 %v369_v50, %v332_v60 }
  0xe3   :  { %v405_v0 = vadd.f32 %v401_v37, %v372_v4  ;;  %v406_v25 = vadd.f32 %v402_v14, %v373_v6 }
  0xe6   :  { %v335_v43 = vpop.permute.xlu1 %334 }
  0xe7   :  { %v345_v10 = vsel %vm342_vm6, %v335_v43, %v1649_v8  ;;  %v246_v8 = vadd.f32 %v242_v1, %v217_v2  ;;  %v346_v15 = vsel %vm342_vm6, %v1663_v17, %v335_v43  ;;  %v325_v17 = vperm.slane %v317_v36, 0 }
  0xe8   :  { %v355_v7 = vmul.f32 %v347_v35, %v345_v10  ;;  %v358_v24 = vmul.f32 %v350_v31, %v346_v15  ;;  %v399_v35 = vperm.slane %v391_v55, 0 }
  0xe9   :  { %v289_v40 = vadd.f32 %v285_v27, %v246_v8  ;;  %v329_v52 = vmul.f32 %v325_v17, %v1679_v41  ;;  %v1347_v8 = vld [vmem:[%s2452_s8 + $0x38] ss:$0 sm:$0xff]  ;;  %v517_v27 = vperm.slane %v1525_v18, 4 }
  0xea   :  { %v363_v23 = vperm.slane %v355_v7, 0  ;;  %v366_v54 = vperm.slane %v358_v24, 0  ;;  %v403_v58 = vmul.f32 %v399_v35, %v394_v28  ;;  %v589_v28 = vperm.slane %v1525_v18, 7 }
  0xeb   :  { %v330_v26 = vadd.f32 %v326_v30, %v289_v40  ;;  %v333_v50 = vadd.f32 %v329_v52, %v1674_v38  ;;  %v505_v24 = vperm.slane %v1525_v18, 3  ;;  %v567_v35 = vperm.slane %v1541_v21, 6 }
  0xec   :  { %v367_v42 = vmul.f32 %v363_v23, %v1718_v13  ;;  %v370_v56 = vmul.f32 %v366_v54, %v1718_v13 }
  0xee   :  { %v410_v32 = vpop.permute.xlu1 %409  ;;  %v371_v48 = vadd.f32 %v367_v42, %v330_v26  ;;  %v374_v22 = vadd.f32 %v370_v56, %v333_v50  ;;  %v564_v50 = vperm.slane %v1534_v20, 6 }
  0xef   :  { %v413_v33 = vadd.f32 %v410_v32, %v405_v0  ;;  %v414_v34 = vadd.f32 %v410_v32, %v406_v25  ;;  %v588_v25 = vperm.slane %v1534_v20, 7 }
  0xf0   :  { %v404_v11 = vadd.f32 %v400_v51, %v371_v48  ;;  %v407_v59 = vadd.f32 %v403_v58, %v374_v22  ;;  %v591_v48 = vperm.slane %v1541_v21, 7 }
  0xf1   :  { %v1773_v44 = vmax.f32 %v413_v33, 0.0  ;;  %v1775_v46 = vmax.f32 %v414_v34, 0.0 }
  0xf2   :  { %v412_v45 = vadd.f32 %v410_v32, %v404_v11  ;;  %v415_v38 = vadd.f32 %v410_v32, %v407_v59 }
  0xf3   :  { %604 = vrot.lane.b32.xlu0 %v1775_v46, %s1366_s14  ;;  %578 = vrot.lane.b32.xlu1 %v1773_v44, %s1364_s13  ;;  %v521_v42 = vmul.f32 %v517_v27, %v1773_v44  ;;  %v433_v27 = vperm.slane %v1525_v18, 0 }
  0xf4   :  { %602 = vrot.lane.b32.xlu2 %v1773_v44, %s1366_s14  ;;  %v1798_v41 = vmax.f32 %v412_v45, 0.0  ;;  %v1806_v13 = vmax.f32 %v415_v38, 0.0 }
  0xfb   :  { %554 = vrot.lane.b32.xlu0 %v1773_v44, %s1359_s1  ;;  %556 = vrot.lane.b32.xlu1 %v1775_v46, %s1359_s1 }
  0xfc   :  { %580 = vrot.lane.b32.xlu2 %v1775_v46, %s1364_s13 }
 0x103   :  { %532 = vrot.lane.b32.xlu0 %v1775_v46, %s1357_s28  ;;  %600 = vrot.lane.b32.xlu1 %v1798_v41, %s1366_s14 }
 0x104   :  { %530 = vrot.lane.b32.xlu2 %v1773_v44, %s1357_s28 }
 0x10b   :  { %492 = vrot.lane.b32.xlu0 %v1798_v41, %s1356_s25  ;;  %494 = vrot.lane.b32.xlu1 %v1773_v44, %s1356_s25 }
 0x10c   :  { %606 = vrot.lane.b32.xlu2 %v1806_v13, %s1366_s14 }
 0x113   :  { %582 = vrot.lane.b32.xlu0 %v1806_v13, %s1364_s13  ;;  %468 = vrot.lane.b32.xlu1 %v1798_v41, %s1355_s24 }
 0x114   :  { %576 = vrot.lane.b32.xlu2 %v1798_v41, %s1364_s13 }
 0x11b   :  { %552 = vrot.lane.b32.xlu0 %v1798_v41, %s1359_s1  ;;  %558 = vrot.lane.b32.xlu1 %v1806_v13, %s1359_s1 }
 0x11c   :  { %470 = vrot.lane.b32.xlu2 %v1773_v44, %s1355_s24 }
 0x123   :  { %446 = vrot.lane.b32.xlu0 %v1773_v44, %s1354_s0  ;;  %528 = vrot.lane.b32.xlu1 %v1798_v41, %s1357_s28 }
 0x124   :  { %444 = vrot.lane.b32.xlu2 %v1798_v41, %s1354_s0 }
 0x12b   :  { %420 = vrot.lane.b32.xlu0 %v1798_v41, %s1353_s23  ;;  %422 = vrot.lane.b32.xlu1 %v1773_v44, %s1353_s23  ;;  %v481_v44 = vperm.slane %v1525_v18, 2 }
 0x12c   :  { %534 = vrot.lane.b32.xlu2 %v1806_v13, %s1357_s28 }
 0x133   :  { %498 = vrot.lane.b32.xlu0 %v1806_v13, %s1356_s25  ;;  %472 = vrot.lane.b32.xlu1 %v1775_v46, %s1355_s24 }
 0x134   :  { %496 = vrot.lane.b32.xlu2 %v1775_v46, %s1356_s25 }
 0x13b   :  { %448 = vrot.lane.b32.xlu0 %v1775_v46, %s1354_s0  ;;  %450 = vrot.lane.b32.xlu1 %v1806_v13, %s1354_s0 }
 0x13c   :  { %474 = vrot.lane.b32.xlu2 %v1806_v13, %s1355_s24 }
 0x143   :  { %426 = vrot.lane.b32.xlu0 %v1806_v13, %s1353_s23 }
 0x144   :  { %424 = vrot.lane.b32.xlu2 %v1775_v46, %s1353_s23 }
 0x14e   :  { %v603_v43 = vpop.permute.xlu2 %602 }
 0x156   :  { %v1854_v60 = vpop.permute.xlu2 %580 }
 0x15e   :  { %v1856_v61 = vpop.permute.xlu2 %530 }
 0x165   :  { %v1861_v10 = vpop.permute.xlu0 %604  ;;  %v579_v1 = vpop.permute.xlu1 %578 }
 0x166   :  { %v585_v2 = vsel %vm342_vm6, %v579_v1, %v1854_v60  ;;  %v1867_v3 = vpop.permute.xlu2 %606  ;;  %v609_v4 = vsel %vm383_vm7, %v603_v43, %v1861_v10 }
 0x167   :  { %v617_v6 = vmul.f32 %v1345_v62, %v609_v4  ;;  %v593_v7 = vmul.f32 %v589_v28, %v585_v2  ;;  %v457_v28 = vperm.slane %v1525_v18, 1  ;;  %v543_v2 = vperm.slane %v1541_v21, 5 }
 0x168   :  { %v590_v18 = vperm.slane %v1505_v12, 7 }
 0x169   :  { %698 = vmatpush.msra.mxu2 %v617_v6 }
 0x16b   :  { %699 = vmatpush.msra.mxu2 %v593_v7  ;;  %v516_v7 = vperm.slane %v1534_v20, 4 }
 0x16d   :  { %v555_v9 = vpop.permute.xlu0 %554  ;;  %v1873_v37 = vpop.permute.xlu1 %556 }
 0x16e   :  { %v561_v14 = vsel %vm301_vm5, %v555_v9, %v1873_v37  ;;  %v577_v29 = vpop.permute.xlu2 %576 }
 0x16f   :  { %v569_v16 = vmul.f32 %v565_v49, %v561_v14  ;;  %v586_v30 = vsel %vm342_vm6, %v577_v29, %v579_v1  ;;  %v540_v1 = vperm.slane %v1534_v20, 5 }
 0x170   :  { %v592_v40 = vmul.f32 %v588_v25, %v586_v30  ;;  %v1348_v30 = vld [vmem:[%s2452_s8 + $0x30] ss:$0 sm:$0xff] }
 0x171   :  { %700 = vmatpush.msra.mxu2 %v569_v16 }
 0x175   :  { %v1885_v23 = vpop.permute.xlu0 %532  ;;  %v601_v0 = vpop.permute.xlu1 %600 }
 0x176   :  { %v537_v31 = vsel %vm258_vm4, %v1856_v61, %v1885_v23  ;;  %v610_v32 = vsel %vm383_vm7, %v601_v0, %v603_v43  ;;  %v611_v57 = vsel %vm383_vm7, %v1867_v3, %v601_v0  ;;  %v1900_v36 = vpop.permute.xlu2 %470  ;;  %v520_v0 = vmul.f32 %v516_v7, %v1798_v41 }
 0x177   :  { %v616_v15 = vmul.f32 %v1346_v63, %v610_v32  ;;  %v545_v33 = vmul.f32 %v541_v5, %v537_v31  ;;  %v619_v34 = vmul.f32 %v1347_v8, %v611_v57  ;;  %v608_v41 = vsel %vm383_vm7, %v1861_v10, %v1867_v3  ;;  %v1972_v10 = vld [vmem:[%s2454_s2] sm:$0xff] }
 0x179   :  { %678 = vmatpush.msra.mxu0 %v616_v15  ;;  %701 = vmatpush.msra.mxu2 %v545_v33  ;;  %v618_v33 = vmul.f32 %v1348_v30, %v608_v41 }
 0x17a   :  { %738 = vmatpush.msra.mxu3 %v619_v34  ;;  %v566_v34 = vperm.slane %v1505_v12, 6 }
 0x17b   :  { %679 = vmatpush.msra.mxu0 %v592_v40  ;;  %702 = vmatpush.msra.mxu2 %v521_v42  ;;  %v542_v42 = vperm.slane %v1505_v12, 5 }
 0x17d   :  { %v1904_v26 = vpop.permute.xlu0 %492  ;;  %v1906_v39 = vpop.permute.xlu1 %494 }
 0x17e   :  { %v502_v17 = vsel %vm188_vm3, %v1904_v26, %v1906_v39  ;;  %v1912_v53 = vpop.permute.xlu2 %444 }
 0x17f   :  { %v509_v47 = vmul.f32 %v505_v24, %v502_v17  ;;  %v504_v17 = vperm.slane %v1534_v20, 3 }
 0x181   :  { %703 = vmatpush.msra.mxu2 %v509_v47  ;;  %v507_v47 = vperm.slane %v1541_v21, 3 }
 0x185   :  { %v583_v54 = vpop.permute.xlu0 %582  ;;  %v1916_v51 = vpop.permute.xlu1 %468 }
 0x186   :  { %v587_v52 = vsel %vm342_vm6, %v583_v54, %v577_v29  ;;  %v478_v55 = vsel %vm147_vm1, %v1916_v51, %v1900_v36  ;;  %v535_v45 = vpop.permute.xlu2 %534  ;;  %v519_v29 = vperm.slane %v1541_v21, 4  ;;  %v584_v57 = vsel %vm342_vm6, %v1854_v60, %v583_v54 }
 0x187   :  { %v485_v11 = vmul.f32 %v481_v44, %v478_v55  ;;  %v595_v56 = vmul.f32 %v591_v48, %v587_v52  ;;  %v536_v60 = vsel %vm258_vm4, %v1885_v23, %v535_v45  ;;  %v594_v24 = vmul.f32 %v590_v18, %v584_v57 }
 0x188   :  { %v523_v25 = vmul.f32 %v519_v29, %v1806_v13  ;;  %v546_v52 = vmul.f32 %v542_v42, %v536_v60  ;;  %v480_v55 = vperm.slane %v1534_v20, 2  ;;  %v483_v23 = vperm.slane %v1541_v21, 2  ;;  %v850_v60 = vld [vmem:[%s2455_s10 + $0x178] sm:$0xff] }
 0x189   :  { %704 = vmatpush.msra.mxu2 %v485_v11  ;;  %739 = vmatpush.msra.mxu3 %v595_v56  ;;  %v506_v11 = vperm.slane %v1505_v12, 3 }
 0x18d   :  { %v553_v22 = vpop.permute.xlu0 %552  ;;  %v559_v58 = vpop.permute.xlu1 %558 }
 0x18e   :  { %v562_v59 = vsel %vm301_vm5, %v553_v22, %v555_v9  ;;  %v563_v38 = vsel %vm301_vm5, %v559_v58, %v553_v22  ;;  %v497_v16 = vpop.permute.xlu2 %496  ;;  %v560_v3 = vsel %vm301_vm5, %v1873_v37, %v559_v58  ;;  %v518_v37 = vperm.slane %v1505_v12, 4 }
 0x18f   :  { %v568_v43 = vmul.f32 %v564_v50, %v562_v59  ;;  %v571_v62 = vmul.f32 %v567_v35, %v563_v38  ;;  %v570_v44 = vmul.f32 %v566_v34, %v560_v3  ;;  %v501_v22 = vsel %vm188_vm3, %v1906_v39, %v497_v16 }
 0x190   :  { %v482_v38 = vperm.slane %v1505_v12, 2  ;;  %v456_v39 = vperm.slane %v1534_v20, 1 }
 0x191   :  { %680 = vmatpush.msra.mxu0 %v568_v43  ;;  %740 = vmatpush.msra.mxu3 %v571_v62 }
 0x195   :  { %v1933_v4 = vpop.permute.xlu0 %446  ;;  %v529_v6 = vpop.permute.xlu1 %528 }
 0x196   :  { %v454_v49 = vsel %vm102_vm0, %v1912_v53, %v1933_v4  ;;  %v538_v9 = vsel %vm258_vm4, %v529_v6, %v1856_v61  ;;  %v539_v14 = vsel %vm258_vm4, %v535_v45, %v529_v6  ;;  %v661_v61 = vld [vmem:[%s2453_s3] sm:$0xff]  ;;  %v475_v40 = vpop.permute.xlu2 %474 }
 0x197   :  { %v544_v63 = vmul.f32 %v540_v1, %v538_v9  ;;  %v461_v5 = vmul.f32 %v457_v28, %v454_v49  ;;  %v547_v8 = vmul.f32 %v543_v2, %v539_v14  ;;  %664 = vperm.xlu1 %1307, %v661_v61   ;;  %v479_v56 = vsel %vm147_vm1, %v475_v40, %v1916_v51 }
 0x198   :  { %v522_v51 = vmul.f32 %v518_v37, %v1775_v46  ;;  %v510_v1 = vmul.f32 %v506_v11, %v501_v22  ;;  %v458_v2 = vperm.slane %v1505_v12, 1  ;;  %v459_v46 = vperm.slane %v1541_v21, 1  ;;  %v834_v37 = vld [vmem:[%s2455_s10 + $0xf8] sm:$0xff]  ;;  %v865_v11 = vld [vmem:[%s2455_s10 + $0x1f0] sm:$0xff]  ;;  %v815_v22 = vld [vmem:[%s2455_s10 + $0x60] sm:$0xff] }
 0x199   :  { %681 = vmatpush.msra.mxu0 %v544_v63  ;;  %705 = vmatpush.msra.mxu2 %v461_v5 }
 0x19a   :  { %741 = vmatpush.msra.mxu3 %v547_v8  ;;  %887 = vmatpush.msra.mxu1 %v834_v37  ;;  %v852_v37 = vld [vmem:[%s2455_s10 + $0x188] sm:$0xff] }
 0x19b   :  { %682 = vmatpush.msra.mxu0 %v520_v0  ;;  %v432_v0 = vperm.slane %v1534_v20, 0 }
 0x19c   :  { %742 = vmatpush.msra.mxu3 %v523_v25 }
 0x19d   :  { %v1959_v31 = vpop.permute.xlu0 %420  ;;  %v423_v13 = vpop.permute.xlu1 %422 }
 0x19e   :  { %v430_v32 = vsel %vm71_vm2, %v1959_v31, %v423_v13  ;;  %v425_v28 = vpop.permute.xlu2 %424 }
 0x19f   :  { %v437_v15 = vmul.f32 %v433_v27, %v430_v32  ;;  %v429_v9 = vsel %vm71_vm2, %v423_v13, %v425_v28 }
 0x1a1   :  { %706 = vmatpush.msra.mxu2 %v437_v15 }
 0x1a2   :  { %1266 = vmatmul.msk.f32.vlgmr.msra.gmra.mxu2 %vm667_vm8, %v1972_v10 }
 0x1a3   :  { %718 = vmatpush.msrb.mxu2 %v618_v33 }
 0x1a5   :  { %719 = vmatpush.msrb.mxu2 %v594_v24  ;;  %v499_v48 = vpop.permute.xlu0 %498  ;;  %v473_v54 = vpop.permute.xlu1 %472  ;;  %v849_v24 = vld [vmem:[%s2455_s10 + $0x170] sm:$0xff] }
 0x1a6   :  { %v500_v50 = vsel %vm188_vm3, %v497_v16, %v499_v48  ;;  %v503_v35 = vsel %vm188_vm3, %v499_v48, %v1904_v26  ;;  %v476_v45 = vsel %vm147_vm1, %v473_v54, %v475_v40  ;;  %v477_v43 = vsel %vm147_vm1, %v1900_v36, %v473_v54  ;;  %v846_v48 = vld [vmem:[%s2455_s10 + $0x158] sm:$0xff] }
 0x1a7   :  { %720 = vmatpush.msrb.mxu2 %v570_v44  ;;  %v508_v58 = vmul.f32 %v504_v17, %v503_v35  ;;  %v511_v59 = vmul.f32 %v507_v47, %v500_v50  ;;  %v484_v26 = vmul.f32 %v480_v55, %v479_v56  ;;  %v487_v62 = vmul.f32 %v483_v23, %v476_v45  ;;  %v848_v17 = vld [vmem:[%s2455_s10 + $0x168] sm:$0xff]  ;;  %v847_v47 = vld [vmem:[%s2455_s10 + $0x160] sm:$0xff]  ;;  %v818_v44 = vld [vmem:[%s2455_s10 + $0x78] sm:$0xff] }
 0x1a8   :  { %v486_v6 = vmul.f32 %v482_v38, %v477_v43  ;;  %v434_v36 = vperm.slane %v1505_v12, 0  ;;  %v866_v54 = vld [vmem:[%s2455_s10 + $0x1f8] sm:$0xff]  ;;  %v833_v55 = vld [vmem:[%s2455_s10 + $0xf0] sm:$0xff]  ;;  %v816_v56 = vld [vmem:[%s2455_s10 + $0x68] sm:$0xff] }
 0x1a9   :  { %721 = vmatpush.msrb.mxu2 %v546_v52  ;;  %683 = vmatpush.msra.mxu0 %v508_v58  ;;  %v817_v52 = vld [vmem:[%s2455_s10 + $0x70] sm:$0xff]  ;;  %v832_v50 = vld [vmem:[%s2455_s10 + $0xe8] sm:$0xff]  ;;  %v831_v58 = vld [vmem:[%s2455_s10 + $0xe0] sm:$0xff] }
 0x1aa   :  { %743 = vmatpush.msra.mxu3 %v511_v59  ;;  %v438_v12 = vmul.f32 %v434_v36, %v429_v9  ;;  %v845_v23 = vld [vmem:[%s2455_s10 + $0x150] sm:$0xff]  ;;  %888 = vmatpush.msra.mxu1 %v833_v55  ;;  %v844_v35 = vld [vmem:[%s2455_s10 + $0x148] sm:$0xff]  ;;  %v843_v59 = vld [vmem:[%s2455_s10 + $0x140] sm:$0xff] }
 0x1ab   :  { %722 = vmatpush.msrb.mxu2 %v522_v51  ;;  %684 = vmatpush.msra.mxu0 %v484_v26  ;;  %v864_v45 = vld [vmem:[%s2455_s10 + $0x1e8] sm:$0xff]  ;;  %v863_v51 = vld [vmem:[%s2455_s10 + $0x1e0] sm:$0xff]  ;;  %v814_v38 = vld [vmem:[%s2455_s10 + $0x58] sm:$0xff] }
 0x1ac   :  { %744 = vmatpush.msra.mxu3 %v487_v62  ;;  %889 = vmatpush.msra.mxu1 %v832_v50  ;;  %v830_v43 = vld [vmem:[%s2455_s10 + $0xd8] sm:$0xff]  ;;  %v811_v36 = vld [vmem:[%s2455_s10 + $0x40] sm:$0xff] }
 0x1ad   :  { %723 = vmatpush.msrb.mxu2 %v510_v1  ;;  %v449_v7 = vpop.permute.xlu0 %448  ;;  %v451_v49 = vpop.permute.xlu1 %450  ;;  %v842_v26 = vld [vmem:[%s2455_s10 + $0x138] sm:$0xff]  ;;  %v813_v1 = vld [vmem:[%s2455_s10 + $0x50] sm:$0xff]  ;;  %v827_v9 = vld [vmem:[%s2455_s10 + $0xc0] sm:$0xff] }
 0x1ae   :  { %v453_v14 = vsel %vm102_vm0, %v1933_v4, %v449_v7  ;;  %v452_v29 = vsel %vm102_vm0, %v449_v7, %v451_v49  ;;  %v455_v16 = vsel %vm102_vm0, %v451_v49, %v1912_v53  ;;  %v435_v4 = vperm.slane %v1541_v21, 0  ;;  %890 = vmatpush.msra.mxu1 %v831_v58  ;;  %v862_v62 = vld [vmem:[%s2455_s10 + $0x1d8] sm:$0xff]  ;;  %v840_v7 = vld [vmem:[%s2455_s10 + $0x128] sm:$0xff] }
 0x1af   :  { %724 = vmatpush.msrb.mxu2 %v486_v6  ;;  %v460_v63 = vmul.f32 %v456_v39, %v455_v16  ;;  %v462_v5 = vmul.f32 %v458_v2, %v453_v14  ;;  %v463_v8 = vmul.f32 %v459_v46, %v452_v29  ;;  %v841_v39 = vld [vmem:[%s2455_s10 + $0x130] sm:$0xff]  ;;  %v812_v46 = vld [vmem:[%s2455_s10 + $0x48] sm:$0xff]  ;;  %v839_v14 = vld [vmem:[%s2455_s10 + $0x120] sm:$0xff] }
 0x1b0   :  { %891 = vmatpush.msra.mxu1 %v830_v43  ;;  %v861_v2 = vld [vmem:[%s2455_s10 + $0x1d0] sm:$0xff]  ;;  %v828_v6 = vld [vmem:[%s2455_s10 + $0xc8] sm:$0xff]  ;;  %v859_v29 = vld [vmem:[%s2455_s10 + $0x1c0] sm:$0xff] }
 0x1b1   :  { %685 = vmatpush.msra.mxu0 %v460_v63  ;;  %725 = vmatpush.msrb.mxu2 %v462_v5  ;;  %v860_v49 = vld [vmem:[%s2455_s10 + $0x1c8] sm:$0xff]  ;;  %v810_v16 = vld [vmem:[%s2455_s10 + $0x38] sm:$0xff] }
 0x1b2   :  { %745 = vmatpush.msra.mxu3 %v463_v8  ;;  %v826_v63 = vld [vmem:[%s2455_s10 + $0xb8] sm:$0xff] }
 0x1b3   :  { %726 = vmatpush.msrb.mxu2 %v438_v12  ;;  %v838_v5 = vld [vmem:[%s2455_s10 + $0x118] sm:$0xff]  ;;  %v809_v12 = vld [vmem:[%s2455_s10 + $0x30] sm:$0xff] }
 0x1b4   :  { %1267 = vmatmul.msk.f32.vlgmr.msrb.gmra.mxu2 %vm667_vm8, %v1972_v10  ;;  %v858_v8 = vld [vmem:[%s2455_s10 + $0x1b8] sm:$0xff] }
 0x1b5   :  { %v427_v25 = vpop.permute.xlu0 %426  ;;  %907 = vmatpush.msra.mxu2 %v850_v60  ;;  %v805_v60 = vld [vmem:[%s2455_s10 + $0x10] sm:$0xff] }
 0x1b6   :  { %v428_v53 = vsel %vm71_vm2, %v425_v28, %v427_v25  ;;  %v431_v61 = vsel %vm71_vm2, %v427_v25, %v1959_v31  ;;  %v829_v28 = vld [vmem:[%s2455_s10 + $0xd0] sm:$0xff] }
 0x1b7   :  { %v436_v27 = vmul.f32 %v432_v0, %v431_v61  ;;  %v439_v30 = vmul.f32 %v435_v4, %v428_v53  ;;  %908 = vmatpush.msra.mxu2 %v849_v24  ;;  %892 = vmatpush.msra.mxu1 %v829_v28  ;;  %v825_v0 = vld [vmem:[%s2455_s10 + $0xb0] sm:$0xff]  ;;  %v808_v53 = vld [vmem:[%s2455_s10 + $0x28] sm:$0xff] }
 0x1b8   :  { %v837_v4 = vld [vmem:[%s2455_s10 + $0x110] sm:$0xff]  ;;  %v824_v61 = vld [vmem:[%s2455_s10 + $0xa8] sm:$0xff] }
 0x1b9   :  { %686 = vmatpush.msra.mxu0 %v436_v27  ;;  %746 = vmatpush.msra.mxu3 %v439_v30  ;;  %v857_v25 = vld [vmem:[%s2455_s10 + $0x1b0] sm:$0xff]  ;;  %v836_v27 = vld [vmem:[%s2455_s10 + $0x108] sm:$0xff] }
 0x1ba   :  { %1265 = vmatmul.msk.f32.vlgmr.msra.gmra.mxu0 %vm667_vm8, %v1972_v10  ;;  %1268 = vmatmul.msk.f32.vlgmr.msra.gmra.mxu3 %vm667_vm8, %v1972_v10  ;;  %v856_v30 = vld [vmem:[%s2455_s10 + $0x1a8] sm:$0xff]  ;;  %v821_v24 = vld [vmem:[%s2455_s10 + $0x90] sm:$0xff] }
 0x1bb   :  { %909 = vmatpush.msra.mxu2 %v848_v17  ;;  %867 = vmatpush.msrb.mxu0 %v818_v44  ;;  %v853_v17 = vld [vmem:[%s2455_s10 + $0x190] sm:$0xff]  ;;  %v820_v44 = vld [vmem:[%s2455_s10 + $0x88] sm:$0xff] }
 0x1bc   :  { %927 = vmatpush.msrb.mxu3 %v866_v54  ;;  %893 = vmatpush.msra.mxu1 %v828_v6  ;;  %v819_v54 = vld [vmem:[%s2455_s10 + $0x80] sm:$0xff] }
 0x1bd   :  { %910 = vmatpush.msra.mxu2 %v847_v47  ;;  %868 = vmatpush.msrb.mxu0 %v817_v52  ;;  %v804_v47 = vld [vmem:[%s2455_s10 + $0x8] sm:$0xff]  ;;  %v851_v52 = vld [vmem:[%s2455_s10 + $0x180] sm:$0xff] }
 0x1be   :  { %928 = vmatpush.msrb.mxu3 %v865_v11  ;;  %894 = vmatpush.msra.mxu1 %v827_v9 }
 0x1bf   :  { %911 = vmatpush.msra.mxu2 %v846_v48  ;;  %869 = vmatpush.msrb.mxu0 %v816_v56  ;;  %v803_v48 = vld [vmem:[%s2455_s10] sm:$0xff] }
 0x1c0   :  { %929 = vmatpush.msrb.mxu3 %v864_v45  ;;  %895 = vmatpush.msra.mxu1 %v826_v63 }
 0x1c1   :  { %912 = vmatpush.msra.mxu2 %v845_v23  ;;  %870 = vmatpush.msrb.mxu0 %v815_v22 }
 0x1c2   :  { %930 = vmatpush.msrb.mxu3 %v863_v51  ;;  %896 = vmatpush.msra.mxu1 %v825_v0 }
 0x1c3   :  { %913 = vmatpush.msra.mxu2 %v844_v35  ;;  %871 = vmatpush.msrb.mxu0 %v814_v38 }
 0x1c4   :  { %931 = vmatpush.msrb.mxu3 %v862_v62  ;;  %897 = vmatpush.msra.mxu1 %v824_v61 }
 0x1c5   :  { %914 = vmatpush.msra.mxu2 %v843_v59  ;;  %872 = vmatpush.msrb.mxu0 %v813_v1 }
 0x1c6   :  { %932 = vmatpush.msrb.mxu3 %v861_v2 }
 0x1c7   :  { %915 = vmatpush.msra.mxu2 %v842_v26  ;;  %873 = vmatpush.msrb.mxu0 %v812_v46 }
 0x1c8   :  { %933 = vmatpush.msrb.mxu3 %v860_v49 }
 0x1c9   :  { %916 = vmatpush.msra.mxu2 %v841_v39  ;;  %874 = vmatpush.msrb.mxu0 %v811_v36 }
 0x1ca   :  { %934 = vmatpush.msrb.mxu3 %v859_v29 }
 0x1cb   :  { %917 = vmatpush.msra.mxu2 %v840_v7  ;;  %875 = vmatpush.msrb.mxu0 %v810_v16 }
 0x1cc   :  { %935 = vmatpush.msrb.mxu3 %v858_v8 }
 0x1cd   :  { %918 = vmatpush.msra.mxu2 %v839_v14  ;;  %876 = vmatpush.msrb.mxu0 %v809_v12 }
 0x1ce   :  { %936 = vmatpush.msrb.mxu3 %v857_v25 }
 0x1cf   :  { %919 = vmatpush.msra.mxu2 %v838_v5  ;;  %877 = vmatpush.msrb.mxu0 %v808_v53 }
 0x1d0   :  { %937 = vmatpush.msrb.mxu3 %v856_v30 }
 0x1d1   :  { %920 = vmatpush.msra.mxu2 %v837_v4 }
 0x1d3   :  { %921 = vmatpush.msra.mxu2 %v836_v27 }
 0x209   :  { %v665_v41 = vpop.permute.xlu1 %664 }
 0x225   :  { %v708_v20 = vpop.f32.mrf.mxu2 }
 0x226   :  { %v2046_v10 = vadd.f32 %v708_v20, %v665_v41  ;;  %v807_v20 = vld [vmem:[%s2455_s10 + $0x20] sm:$0xff] }
 0x227   :  { %878 = vmatpush.msrb.mxu0 %v807_v20 }
 0x228   :  { %v752_v40 = vmax.f32 %v2046_v10, 0.0  ;;  %v2298_v10 = vld [vmem:[%s2456_s9 + $0x8] ss:$0 sm:$0xff] }
 0x237   :  { %v728_v21 = vpop.f32.mrf.mxu2  ;;  %v688_v31 = vpop.f32.mrf.mxu0 }
 0x238   :  { %v2034_v13 = vadd.f32 %v728_v21, %v665_v41  ;;  %v2040_v33 = vadd.f32 %v688_v31, %v665_v41  ;;  %v823_v21 = vld [vmem:[%s2455_s10 + $0xa0] sm:$0xff]  ;;  %v806_v31 = vld [vmem:[%s2455_s10 + $0x18] sm:$0xff] }
 0x239   :  { %898 = vmatpush.msra.mxu1 %v823_v21  ;;  %879 = vmatpush.msrb.mxu0 %v806_v31 }
 0x23a   :  { %v753_v18 = vmax.f32 %v2034_v13, 0.0  ;;  %v751_v3 = vmax.f32 %v2040_v33, 0.0 }
 0x23b   :  { %880 = vmatpush.msrb.mxu0 %v805_v60 }
 0x23c   :  { %v1333_v42 = vpack.i.bf16 %v752_v40, %v751_v3 }
 0x23d   :  { %v748_v32 = vpop.f32.mrf.mxu3  ;;  %881 = vmatpush.msrb.mxu0 %v804_v47 }
 0x23e   :  { %v2037_v57 = vadd.f32 %v748_v32, %v665_v41  ;;  %v835_v41 = vld [vmem:[%s2455_s10 + $0x100] sm:$0xff] }
 0x23f   :  { %v855_v32 = vld [vmem:[%s2455_s10 + $0x1a0] sm:$0xff]  ;;  %922 = vmatpush.msra.mxu2 %v835_v41  ;;  %882 = vmatpush.msrb.mxu0 %v803_v48 }
 0x240   :  { %v754_v15 = vmax.f32 %v2037_v57, 0.0  ;;  %938 = vmatpush.msrb.mxu3 %v855_v32 }
 0x242   :  { %v1328_v34 = vpack.i.bf16 %v754_v15, %v753_v18 }
 0x244   :  { %1329 = vrot.lane.b32.xlu1 %v1328_v34, %s1366_s14  ;;  %1319 = vrot.lane.b32.xlu0 %v1328_v34, %s1364_s13 }
 0x245   :  { %1309 = vrot.lane.b32.xlu2 %v1328_v34, %s1357_s28  ;;  %v822_v34 = vld [vmem:[%s2455_s10 + $0x98] sm:$0xff] }
 0x246   :  { %899 = vmatpush.msra.mxu1 %v822_v34  ;;  %v49_v34 = vld [vmem:[%s2456_s9] sm:$0xff] }
 0x247   :  { %v2307_v60 = vperm.slane %v49_v34, 7 }
 0x248   :  { %900 = vmatpush.msra.mxu1 %v821_v24 }
 0x24a   :  { %901 = vmatpush.msra.mxu1 %v820_v44 }
 0x24c   :  { %1334 = vrot.lane.b32.xlu1 %v1333_v42, %s1366_s14  ;;  %1324 = vrot.lane.b32.xlu0 %v1333_v42, %s1364_s13  ;;  %s1372_s14 = smov 9   ;;  %s1373_s13 = smov 8  }
 0x24d   :  { %1314 = vrot.lane.b32.xlu2 %v1333_v42, %s1357_s28  ;;  %v854_v42 = vld [vmem:[%s2455_s10 + $0x198] sm:$0xff]  ;;  %902 = vmatpush.msra.mxu1 %v819_v54  ;;  %s1368_s10 = smov 121  }
 0x24e   :  { %939 = vmatpush.msrb.mxu3 %v854_v42  ;;  %v1001_v42 = vld [vmem:[%s2457_s5] sm:$0xff] }
 0x250   :  { %940 = vmatpush.msrb.mxu3 %v853_v17  ;;  %v2309_v17 = vperm.slane %v49_v34, 6 }
 0x252   :  { %941 = vmatpush.msrb.mxu3 %v852_v37  ;;  %v2311_v37 = vperm.slane %v49_v34, 5 }
 0x254   :  { %942 = vmatpush.msrb.mxu3 %v851_v52  ;;  %v2315_v52 = vperm.slane %v49_v34, 4 }
 0x29f   :  { %v1310_v55 = vpop.permute.xlu2 %1309 }
 0x2a0   :  { %v1312_v23 = vunpack.i.h.bf16 %v1310_v55  ;;  %v1311_v11 = vunpack.i.l.bf16 %v1310_v55 }
 0x2a2   :  { %v763_v50 = vsel %vm258_vm4, %v1311_v11, %v1312_v23 }
 0x2a3   :  { %v769_v1 = vmax.f32 %v753_v18, %v763_v50 }
 0x2a7   :  { %v1315_v56 = vpop.permute.xlu2 %1314 }
 0x2a8   :  { %v1317_v38 = vunpack.i.h.bf16 %v1315_v56  ;;  %v1316_v43 = vunpack.i.l.bf16 %v1315_v56 }
 0x2aa   :  { %v765_v2 = vsel %vm258_vm4, %v1316_v43, %v1317_v38  ;;  %v766_v46 = vsel %vm258_vm4, %v1312_v23, %v1316_v43  ;;  %v764_v13 = vsel %vm258_vm4, %v1317_v38, %v1311_v11  ;;  %v2318_v23 = vperm.slane %v49_v34, 3 }
 0x2ab   :  { %v767_v29 = vmax.f32 %v751_v3, %v765_v2  ;;  %v770_v18 = vmax.f32 %v754_v15, %v766_v46  ;;  %v768_v12 = vmax.f32 %v752_v40, %v764_v13  ;;  %v2320_v11 = vperm.slane %v49_v34, 2 }
 0x2ac   :  { %v2328_v38 = vperm.slane %v49_v34, 0 }
 0x2b6   :  { %v1330_v35 = vpop.permute.xlu1 %1329  ;;  %v1320_v45 = vpop.permute.xlu0 %1319 }
 0x2b7   :  { %v1332_v22 = vunpack.i.h.bf16 %v1330_v35  ;;  %v1331_v58 = vunpack.i.l.bf16 %v1330_v35  ;;  %v1322_v59 = vunpack.i.h.bf16 %v1320_v45  ;;  %v1321_v51 = vunpack.i.l.bf16 %v1320_v45 }
 0x2b8   :  { %v2323_v45 = vperm.slane %v49_v34, 1 }
 0x2b9   :  { %v791_v26 = vsel %vm383_vm7, %v1331_v58, %v1332_v22  ;;  %v779_v62 = vsel %vm342_vm6, %v1321_v51, %v1322_v59 }
 0x2ba   :  { %v797_v28 = vmax.f32 %v779_v62, %v791_v26  ;;  %v999_v62 = vld [vmem:[%s2458_s4] sm:$0xff] }
 0x2bc   :  { %v801_v39 = vmax.f32 %v769_v1, %v797_v28  ;;  %v1000_v1 = vld [vmem:[%s2458_s4 + $0x8] sm:$0xff] }
 0x2be   :  { %923 = vmatmul.f32.vlgmr.msra.gmra.mxu2 %v801_v39  ;;  %v1335_v6 = vpop.permute.xlu1 %1334  ;;  %v1325_v7 = vpop.permute.xlu0 %1324 }
 0x2bf   :  { %v1337_v49 = vunpack.i.h.bf16 %v1335_v6  ;;  %v1336_v36 = vunpack.i.l.bf16 %v1335_v6  ;;  %v1327_v9 = vunpack.i.h.bf16 %v1325_v7  ;;  %v1326_v14 = vunpack.i.l.bf16 %v1325_v7 }
 0x2c1   :  { %v793_v16 = vsel %vm383_vm7, %v1336_v36, %v1337_v49  ;;  %v794_v63 = vsel %vm383_vm7, %v1332_v22, %v1336_v36  ;;  %v781_v5 = vsel %vm342_vm6, %v1326_v14, %v1327_v9  ;;  %v782_v8 = vsel %vm342_vm6, %v1322_v59, %v1326_v14  ;;  %v1134_v14 = vld [vmem:[%s2459_s7] sm:$0xff] }
 0x2c2   :  { %v795_v33 = vmax.f32 %v781_v5, %v793_v16  ;;  %v780_v3 = vsel %vm342_vm6, %v1327_v9, %v1321_v51  ;;  %v792_v57 = vsel %vm383_vm7, %v1337_v49, %v1331_v58  ;;  %v798_v15 = vmax.f32 %v782_v8, %v794_v63  ;;  %v1135_v9 = vld [vmem:[%s2459_s7 + $0x8] sm:$0xff] }
 0x2c3   :  { %v796_v0 = vmax.f32 %v780_v3, %v792_v57 }
 0x2c4   :  { %v799_v4 = vmax.f32 %v767_v29, %v795_v33  ;;  %v802_v25 = vmax.f32 %v770_v18, %v798_v15 }
 0x2c5   :  { %v800_v53 = vmax.f32 %v768_v12, %v796_v0 }
 0x2c6   :  { %883 = vmatmul.f32.vlgmr.msrb.gmra.mxu0 %v799_v4  ;;  %943 = vmatmul.f32.vlgmr.msrb.gmra.mxu3 %v802_v25 }
 0x2c7   :  { %903 = vmatmul.f32.vlgmr.msra.gmra.mxu1 %v800_v53 }
 0x341   :  { %v924_v20 = vpop.f32.mrf.mxu2 }
 0x343   :  { %v884_v61 = vpop.f32.mrf.mxu0 }
 0x344   :  { %v904_v27 = vpop.f32.mrf.mxu1 }
 0x345   :  { %v905_v30 = vadd.f32 %v904_v27, %v884_v61 }
 0x347   :  { %v925_v21 = vadd.f32 %v924_v20, %v905_v30 }
 0x349   :  { %v944_v41 = vpop.f32.mrf.mxu3 }
 0x34a   :  { %v945_v32 = vadd.f32 %v944_v41, %v925_v21 }
 0x34c   :  { %975 = vrot.lane.b32.xlu1 %v945_v32, %s1368_s10  ;;  %980 = vrot.lane.b32.xlu0 %v945_v32, %s1369_s27  ;;  %v968_v56 = vmul.f32 %v2315_v52, %v945_v32 }
 0x34d   :  { %985 = vrot.lane.b32.xlu2 %v945_v32, %s1370_s29 }
 0x354   :  { %957 = vrot.lane.b32.xlu1 %v945_v32, %s1371_s30  ;;  %962 = vrot.lane.b32.xlu0 %v945_v32, %s1356_s25 }
 0x355   :  { %970 = vrot.lane.b32.xlu2 %v945_v32, %s1357_s28 }
 0x35c   :  { %1010 = vperm.xlu1 %1307, %v1002_v19   ;;  %947 = vrot.lane.b32.xlu0 %v945_v32, %s1372_s14 }
 0x35d   :  { %952 = vrot.lane.b32.xlu2 %v945_v32, %s1373_s13 }
 0x365   :  { %1005 = vperm.xlu2 %1338, %v1001_v42  }
 0x3a7   :  { %v986_v40 = vpop.permute.xlu2 %985 }
 0x3a8   :  { %v988_v31 = vmul.f32 %v2298_v10, %v986_v40 }
 0x3aa   :  { %1026 = vmatpush.msra.mxu0 %v988_v31 }
 0x3af   :  { %v971_v24 = vpop.permute.xlu2 %970 }
 0x3b0   :  { %v973_v55 = vmul.f32 %v2311_v37, %v971_v24 }
 0x3b7   :  { %v953_v58 = vpop.permute.xlu2 %952 }
 0x3b8   :  { %v955_v51 = vmul.f32 %v2323_v45, %v953_v58 }
 0x3be   :  { %v976_v47 = vpop.permute.xlu1 %975  ;;  %v981_v44 = vpop.permute.xlu0 %980 }
 0x3bf   :  { %v983_v48 = vmul.f32 %v2307_v60, %v981_v44  ;;  %v978_v54 = vmul.f32 %v2309_v17, %v976_v47  ;;  %v1006_v28 = vpop.permute.xlu2 %1005 }
 0x3c1   :  { %1027 = vmatpush.msra.mxu0 %v983_v48 }
 0x3c3   :  { %1028 = vmatpush.msra.mxu0 %v978_v54  ;;  %v1133_v54 = vld [vmem:[%s2460_s6 + $0x18] sm:$0xff] }
 0x3c5   :  { %1029 = vmatpush.msra.mxu0 %v973_v55 }
 0x3c6   :  { %v958_v50 = vpop.permute.xlu1 %957  ;;  %v963_v35 = vpop.permute.xlu0 %962 }
 0x3c7   :  { %v965_v22 = vmul.f32 %v2318_v23, %v963_v35  ;;  %1030 = vmatpush.msra.mxu0 %v968_v56  ;;  %v960_v59 = vmul.f32 %v2320_v11, %v958_v50 }
 0x3c9   :  { %1031 = vmatpush.msra.mxu0 %v965_v22 }
 0x3cb   :  { %1032 = vmatpush.msra.mxu0 %v960_v59 }
 0x3cd   :  { %1033 = vmatpush.msra.mxu0 %v955_v51 }
 0x3ce   :  { %v948_v43 = vpop.permute.xlu0 %947  ;;  %v1011_v6 = vpop.permute.xlu1 %1010 }
 0x3cf   :  { %v950_v26 = vmul.f32 %v2328_v38, %v948_v43 }
 0x3d1   :  { %1034 = vmatpush.msra.mxu0 %v950_v26  ;;  %v1234_v26 = vld [vmem:[%s2461_s11 + $0x78] sm:$0xff] }
 0x3d2   :  { %1269 = vmatmul.msk.f32.vlgmr.msra.gmra.mxu0 %vm667_vm8, %v999_v62  ;;  %v1233_v62 = vld [vmem:[%s2461_s11 + $0x70] sm:$0xff]  ;;  %1235 = vmatpush.msra.mxu3 %v1234_v26 }
 0x3d4   :  { %1236 = vmatpush.msra.mxu3 %v1233_v62 }
 0x3da   :  { %1270 = vmatmul.msk.f32.gmra.mxu0 %vm667_vm8, %v1000_v1  ;;  %v1232_v1 = vld [vmem:[%s2461_s11 + $0x68] sm:$0xff] }
 0x3db   :  { %1237 = vmatpush.msra.mxu3 %v1232_v1 }
 0x44f   :  { %v1036_v39 = vpop.f32.mrf.mxu0 }
 0x450   :  { %v1037_v2 = vadd.f32 %v1036_v39, %v1006_v28  ;;  %v1231_v28 = vld [vmem:[%s2461_s11 + $0x60] sm:$0xff]  ;;  %v1230_v39 = vld [vmem:[%s2461_s11 + $0x58] sm:$0xff] }
 0x451   :  { %1238 = vmatpush.msra.mxu3 %v1231_v28 }
 0x452   :  { %v1042_v46 = vmax.f32 %v1037_v2, 0.0  ;;  %v1229_v2 = vld [vmem:[%s2461_s11 + $0x50] sm:$0xff] }
 0x453   :  { %1239 = vmatpush.msra.mxu3 %v1230_v39 }
 0x454   :  { %1080 = vrot.lane.b32.xlu2 %v1042_v46, %s1357_s28  ;;  %1088 = vrot.lane.b32.xlu0 %v1042_v46, %s1368_s10  ;;  %v1076_v30 = vmul.f32 %v1042_v46, %v2315_v52 }
 0x455   :  { %1096 = vrot.lane.b32.xlu1 %v1042_v46, %s1369_s27  ;;  %1240 = vmatpush.msra.mxu3 %v1229_v2 }
 0x457   :  { %v1039_v7 = vpop.f32.mrf.mxu0 }
 0x458   :  { %v1040_v49 = vadd.f32 %v1039_v7, %v1011_v6  ;;  %v1227_v6 = vld [vmem:[%s2461_s11 + $0x40] sm:$0xff]  ;;  %v1226_v7 = vld [vmem:[%s2461_s11 + $0x38] sm:$0xff] }
 0x45a   :  { %v1043_v36 = vmax.f32 %v1040_v49, 0.0  ;;  %v1225_v49 = vld [vmem:[%s2461_s11 + $0x30] sm:$0xff] }
 0x45c   :  { %1090 = vrot.lane.b32.xlu2 %v1043_v36, %s1368_s10  ;;  %1098 = vrot.lane.b32.xlu0 %v1043_v36, %s1369_s27  ;;  %v1077_v27 = vmul.f32 %v1043_v36, %v2315_v52  ;;  %v1132_v52 = vld [vmem:[%s2460_s6 + $0x10] sm:$0xff] }
 0x45d   :  { %1082 = vrot.lane.b32.xlu1 %v1043_v36, %s1357_s28 }
 0x464   :  { %1062 = vrot.lane.b32.xlu2 %v1043_v36, %s1371_s30  ;;  %1060 = vrot.lane.b32.xlu0 %v1042_v46, %s1371_s30 }
 0x465   :  { %1068 = vrot.lane.b32.xlu1 %v1042_v46, %s1356_s25 }
 0x46c   :  { %1106 = vrot.lane.b32.xlu2 %v1043_v36, %s1370_s29  ;;  %1070 = vrot.lane.b32.xlu0 %v1043_v36, %s1356_s25 }
 0x46d   :  { %1054 = vrot.lane.b32.xlu1 %v1043_v36, %s1373_s13 }
 0x474   :  { %1046 = vrot.lane.b32.xlu2 %v1043_v36, %s1372_s14  ;;  %1052 = vrot.lane.b32.xlu0 %v1042_v46, %s1373_s13  ;;  %v1224_v36 = vld [vmem:[%s2461_s11 + $0x28] sm:$0xff] }
 0x475   :  { %1104 = vrot.lane.b32.xlu1 %v1042_v46, %s1370_s29 }
 0x47c   :  { %1143 = vperm.xlu2 %1338, %v1135_v9   ;;  %1044 = vrot.lane.b32.xlu0 %v1042_v46, %s1372_s14  ;;  %v1228_v46 = vld [vmem:[%s2461_s11 + $0x48] sm:$0xff]  ;;  %v1223_v9 = vld [vmem:[%s2461_s11 + $0x20] sm:$0xff] }
 0x47d   :  { %1138 = vperm.xlu1 %1307, %v1134_v14   ;;  %1241 = vmatpush.msra.mxu3 %v1228_v46  ;;  %v1222_v14 = vld [vmem:[%s2461_s11 + $0x18] sm:$0xff] }
 0x47f   :  { %1242 = vmatpush.msra.mxu3 %v1227_v6 }
 0x481   :  { %1243 = vmatpush.msra.mxu3 %v1226_v7 }
 0x483   :  { %1244 = vmatpush.msra.mxu3 %v1225_v49 }
 0x485   :  { %1245 = vmatpush.msra.mxu3 %v1224_v36 }
 0x487   :  { %1246 = vmatpush.msra.mxu3 %v1223_v9 }
 0x489   :  { %1247 = vmatpush.msra.mxu3 %v1222_v14 }
 0x4ae   :  { %v1081_v29 = vpop.permute.xlu2 %1080 }
 0x4af   :  { %v1084_v61 = vmul.f32 %v1081_v29, %v2311_v37  ;;  %v1221_v29 = vld [vmem:[%s2461_s11 + $0x10] sm:$0xff] }
 0x4b0   :  { %1248 = vmatpush.msra.mxu3 %v1221_v29 }
 0x4b6   :  { %v1091_v13 = vpop.permute.xlu2 %1090 }
 0x4b7   :  { %v1093_v12 = vmul.f32 %v1091_v13, %v2309_v17  ;;  %v1220_v13 = vld [vmem:[%s2461_s11 + $0x8] sm:$0xff] }
 0x4b8   :  { %1249 = vmatpush.msra.mxu3 %v1220_v13 }
 0x4be   :  { %v1063_v18 = vpop.permute.xlu2 %1062 }
 0x4bf   :  { %v1065_v19 = vmul.f32 %v1063_v18, %v2320_v11  ;;  %v1219_v18 = vld [vmem:[%s2461_s11] sm:$0xff] }
 0x4c0   :  { %1250 = vmatpush.msra.mxu3 %v1219_v18 }
 0x4c6   :  { %v1107_v16 = vpop.permute.xlu2 %1106  ;;  %v1089_v63 = vpop.permute.xlu0 %1088 }
 0x4c7   :  { %v1109_v5 = vmul.f32 %v2298_v10, %v1107_v16  ;;  %v1097_v8 = vpop.permute.xlu1 %1096  ;;  %v1092_v0 = vmul.f32 %v1089_v63, %v2309_v17  ;;  %v1131_v17 = vld [vmem:[%s2460_s6 + $0x8] sm:$0xff] }
 0x4c8   :  { %v1100_v15 = vmul.f32 %v1097_v8, %v2307_v60 }
 0x4c9   :  { %1190 = vmatpush.msrb.mxu2 %v1109_v5 }
 0x4ce   :  { %v1099_v33 = vpop.permute.xlu0 %1098 }
 0x4cf   :  { %v1101_v3 = vmul.f32 %v1099_v33, %v2307_v60  ;;  %v1083_v57 = vpop.permute.xlu1 %1082  ;;  %v1047_v60 = vpop.permute.xlu2 %1046 }
 0x4d0   :  { %v1085_v25 = vmul.f32 %v1083_v57, %v2311_v37  ;;  %v1049_v44 = vmul.f32 %v1047_v60, %v2328_v38 }
 0x4d1   :  { %1153 = vmatpush.msrb.mxu1 %v1101_v3 }
 0x4d3   :  { %1154 = vmatpush.msrb.mxu1 %v1100_v15 }
 0x4d5   :  { %1155 = vmatpush.msrb.mxu1 %v1093_v12 }
 0x4d6   :  { %v1061_v4 = vpop.permute.xlu0 %1060 }
 0x4d7   :  { %v1069_v53 = vpop.permute.xlu1 %1068  ;;  %1156 = vmatpush.msrb.mxu1 %v1092_v0  ;;  %v1064_v40 = vmul.f32 %v1061_v4, %v2320_v11 }
 0x4d8   :  { %v1072_v32 = vmul.f32 %v1069_v53, %v2318_v23 }
 0x4d9   :  { %1157 = vmatpush.msrb.mxu1 %v1085_v25 }
 0x4db   :  { %1158 = vmatpush.msrb.mxu1 %v1084_v61 }
 0x4dd   :  { %1159 = vmatpush.msrb.mxu1 %v1077_v27 }
 0x4de   :  { %v1071_v20 = vpop.permute.xlu0 %1070 }
 0x4df   :  { %v1073_v21 = vmul.f32 %v1071_v20, %v2318_v23  ;;  %v1055_v41 = vpop.permute.xlu1 %1054  ;;  %1160 = vmatpush.msrb.mxu1 %v1076_v30 }
 0x4e0   :  { %v1057_v34 = vmul.f32 %v1055_v41, %v2323_v45 }
 0x4e1   :  { %1161 = vmatpush.msrb.mxu1 %v1073_v21 }
 0x4e3   :  { %1162 = vmatpush.msrb.mxu1 %v1072_v32 }
 0x4e5   :  { %1163 = vmatpush.msrb.mxu1 %v1065_v19 }
 0x4e6   :  { %v1053_v31 = vpop.permute.xlu0 %1052 }
 0x4e7   :  { %v1105_v42 = vpop.permute.xlu1 %1104  ;;  %1164 = vmatpush.msrb.mxu1 %v1064_v40  ;;  %v1056_v47 = vmul.f32 %v1053_v31, %v2323_v45  ;;  %v1144_v45 = vpop.permute.xlu2 %1143 }
 0x4e8   :  { %v1108_v24 = vmul.f32 %v2298_v10, %v1105_v42  ;;  %v1130_v10 = vld [vmem:[%s2460_s6] sm:$0xff] }
 0x4e9   :  { %1165 = vmatpush.msrb.mxu1 %v1057_v34 }
 0x4ea   :  { %1191 = vmatpush.msrb.mxu2 %v1108_v24 }
 0x4eb   :  { %1166 = vmatpush.msrb.mxu1 %v1056_v47  ;;  %1271 = vmatmul.msk.f32.vlgmr.msrb.gmra.mxu2 %vm1146_vm9, %v1131_v17 }
 0x4ed   :  { %1167 = vmatpush.msrb.mxu1 %v1049_v44 }
 0x4ee   :  { %v1045_v37 = vpop.permute.xlu0 %1044 }
 0x4ef   :  { %v1048_v48 = vmul.f32 %v1045_v37, %v2328_v38  ;;  %v1139_v23 = vpop.permute.xlu1 %1138 }
 0x4f1   :  { %1168 = vmatpush.msrb.mxu1 %v1048_v48 }
 0x4f2   :  { %1169 = vmatmul.f32.vlgmr.msrb.gmra.mxu1 %v1130_v10 }
 0x4f3   :  { %1272 = vmatmul.msk.f32.gmra.mxu2 %vm1146_vm9, %v1133_v54 }
 0x4fa   :  { %1172 = vmatmul.f32.gmra.mxu1 %v1132_v52 }
 0x56e   :  { %v1193_v55 = vpop.f32.mrf.mxu2 }
 0x56f   :  { %v1170_v11 = vpop.f32.mrf.mxu1 }
 0x570   :  { %v1171_v56 = vadd.f32 %v1170_v11, %v1139_v23 }
 0x572   :  { %v1194_v50 = vadd.f32 %v1193_v55, %v1171_v56 }
 0x574   :  { %v1199_v35 = vmax.f32 %v1194_v50, 0.0 }
 0x576   :  { %1211 = vrot.lane.b32.xlu2 %v1199_v35, %s1370_s29  ;;  %1207 = vrot.lane.b32.xlu1 %v1199_v35, %s1369_s27  ;;  %v1196_v58 = vpop.f32.mrf.mxu2 }
 0x577   :  { %v1173_v22 = vpop.f32.mrf.mxu1 }
 0x578   :  { %v1174_v59 = vadd.f32 %v1173_v22, %v1144_v45 }
 0x57a   :  { %v1197_v51 = vadd.f32 %v1196_v58, %v1174_v59 }
 0x57c   :  { %v1200_v38 = vmax.f32 %v1197_v51, 0.0 }
 0x57e   :  { %1213 = vrot.lane.b32.xlu1 %v1200_v38, %s1370_s29  ;;  %v1339_v43 = vpack.i.bf16 %v1200_v38, %v1199_v35 }
 0x580   :  { %1340 = vrot.lane.b32.xlu0 %v1339_v43, %s1357_s28 }
 0x588   :  { %1209 = vrot.lane.b32.xlu0 %v1200_v38, %s1369_s27 }
 0x5d0   :  { %v1212_v8 = vpop.permute.xlu2 %1211 }
 0x5e8   :  { %v1208_v16 = vpop.permute.xlu1 %1207 }
 0x5e9   :  { %v1215_v33 = vmax.f32 %v1208_v16, %v1212_v8 }
 0x5f0   :  { %v1214_v12 = vpop.permute.xlu1 %1213 }
 0x5f2   :  { %v1341_v63 = vpop.permute.xlu0 %1340 }
 0x5f3   :  { %v1342_v5 = vunpack.i.l.bf16 %v1341_v63  ;;  %v1343_v15 = vunpack.i.h.bf16 %v1341_v63 }
 0x5f5   :  { %v1205_v3 = vmax.f32 %v1199_v35, %v1342_v5  ;;  %v1206_v25 = vmax.f32 %v1200_v38, %v1343_v15 }
 0x5f7   :  { %v1217_v57 = vmax.f32 %v1205_v3, %v1215_v33 }
 0x5f9   :  { %1251 = vmatmul.f32.vlgmr.msra.gmra.mxu3 %v1217_v57 }
 0x5fa   :  { %v1210_v0 = vpop.permute.xlu0 %1209 }
 0x5fb   :  { %v1216_v4 = vmax.f32 %v1210_v0, %v1214_v12 }
 0x5fd   :  { %v1218_v53 = vmax.f32 %v1206_v25, %v1216_v4 }
 0x601   :  { %1254 = vmatmul.f32.gmra.mxu3 %v1218_v53 }
 0x67c   :  { %v1252_v61 = vpop.f32.mrf.mxu3 }
 0x67d   :  { %1259 = vst.msk [vmem:[%s2462_s12] sm:$0xff] %vm1258_vm10, %v1252_v61 }
 0x684   :  { %v1255_v27 = vpop.f32.mrf.mxu3 }
 0x685   :  { %1260 = vst.msk [vmem:[%s2462_s12 + $0x8] sm:$0xff] %vm1258_vm10, %v1255_v27 }

// kernel: _forward_core.3
= control target key start
LH: loop header
LB: loop body
LE: loop exit
PB: predicated region body
PF: predicated region fallthrough
CT: control target
= control target key end

     0   :  { %v6630_v0 = vmov 2   ;;  %v12734_v1 = vmov 0   ;;  %v12719_v5 = vmov 1   ;;  %v6633_v6 = vmov 4   ;;  %s12712_s0 = inlined_call_operand.vmem [shape: f32[32,7], index: 0, kind: input, shape index: {}]   ;;  %s12713_s1 = inlined_call_operand.vmem [shape: f32[7,512], index: 1, kind: input, shape index: {}]   ;;  %s12714_s2 = inlined_call_operand.vmem [shape: f32[32,32], index: 2, kind: input, shape index: {}]   ;;  %s12715_s3 = inlined_call_operand.vmem [shape: f32[32,1], index: 3, kind: input, shape index: {}]   ;;  %s12716_s4 = inlined_call_operand.vmem [shape: f32[33,2], index: 4, kind: input, shape index: {}]   ;;  %s12717_s5 = inlined_call_operand.vmem [shape: f32[11,512], index: 5, kind: input, shape index: {}]   ;;  %s12718_s6 = inlined_call_operand.vmem [shape: f32[4,512], index: 6, kind: output, shape index: {}]  }
   0x1   :  { %6605 = vset.pattern.permute.xlu2 %v6630_v0  ;;  %6603 = vset.pattern.permute.xlu1 %v12734_v1  ;;  %v26_v2 = vld [vmem:[%s12712_s0 + $0x18] sm:$0xff]  ;;  %v25_v3 = vld [vmem:[%s12712_s0 + $0x10] sm:$0xff]  ;;  %v24_v4 = vld [vmem:[%s12712_s0 + $0x8] sm:$0xff]  ;;  %v6634_v8 = vmov 3   ;;  %v6635_v9 = vmov 5   ;;  %v6636_v10 = vmov 6  }
   0x2   :  { %6601 = vset.pattern.permute.xlu0 %v12734_v1  ;;  %147 = vperm.xlu2 %6605, %v26_v2   ;;  %v23_v7 = vld [vmem:[%s12712_s0] sm:$0xff] }
   0x3   :  { %45 = vperm.xlu0 %6601, %v26_v2   ;;  %40 = vperm.xlu1 %6603, %v25_v3   ;;  %v27_v12 = vld [vmem:[%s12713_s1] ss:$8 sm:$0xf]  ;;  %v6445_v25 = vld [vmem:[%s12713_s1 + $0x1] ss:$8 sm:$0xf] }
   0x4   :  { %v6705_v13 = vperm.slane %v27_v12, 0  ;;  %v6707_v14 = vperm.slane %v27_v12, 1  ;;  %v6709_v15 = vperm.slane %v27_v12, 2  ;;  %v6711_v16 = vperm.slane %v27_v12, 3 }
   0x5   :  { %v6446_v26 = vld [vmem:[%s12713_s1 + $0x2] ss:$8 sm:$0xf]  ;;  %v6739_v32 = vperm.slane %v6445_v25, 0  ;;  %v6741_v33 = vperm.slane %v6445_v25, 1  ;;  %v94_v34 = vperm.slane %v6445_v25, 2 }
   0x6   :  { %v95_v35 = vperm.slane %v6445_v25, 3  ;;  %v6743_v36 = vperm.slane %v6446_v26, 2  ;;  %v6447_v42 = vld [vmem:[%s12713_s1 + $0x3] ss:$8 sm:$0xf]  ;;  %v6758_v43 = vperm.slane %v6446_v26, 0 }
   0x7   :  { %v6760_v44 = vperm.slane %v6446_v26, 1  ;;  %v6762_v45 = vperm.slane %v6446_v26, 3  ;;  %v6768_v48 = vperm.slane %v6447_v42, 0  ;;  %v6770_v49 = vperm.slane %v6447_v42, 1 }
   0x8   :  { %v6776_v54 = vperm.slane %v6447_v42, 2  ;;  %v6778_v55 = vperm.slane %v6447_v42, 3  ;;  %v6783_v56 = vld [vmem:[%s12713_s1 + $0x4] ss:$8 sm:$0xf] }
   0xa   :  { %6606 = vset.pattern.permute.xlu2 %v12734_v1 }
   0xb   :  { %6602 = vset.pattern.permute.xlu0 %v12719_v5  ;;  %6604 = vset.pattern.permute.xlu1 %v12719_v5 }
   0xc   :  { %88 = vperm.xlu0 %6602, %v26_v2   ;;  %84 = vperm.xlu1 %6604, %v25_v3  }
   0xd   :  { %35 = vperm.xlu2 %6606, %v24_v4  }
  0x14   :  { %6612 = vset.pattern.permute.xlu0 %v6633_v6  ;;  %80 = vperm.xlu1 %6604, %v24_v4  }
  0x15   :  { %6607 = vset.pattern.permute.xlu2 %v6630_v0  ;;  %265 = vperm.xlu0 %6612, %v26_v2  }
  0x16   :  { %143 = vperm.xlu2 %6607, %v25_v3  }
  0x1c   :  { %6608 = vset.pattern.permute.xlu1 %v12734_v1 }
  0x1d   :  { %6613 = vset.pattern.permute.xlu0 %v6634_v8  ;;  %30 = vperm.xlu1 %6608, %v23_v7  }
  0x1e   :  { %6609 = vset.pattern.permute.xlu2 %v12719_v5  ;;  %206 = vperm.xlu0 %6613, %v26_v2  }
  0x1f   :  { %76 = vperm.xlu2 %6609, %v23_v7  }
  0x25   :  { %6610 = vset.pattern.permute.xlu1 %v6630_v0 }
  0x26   :  { %139 = vperm.xlu1 %6610, %v24_v4   ;;  %194 = vperm.xlu0 %6613, %v23_v7  }
  0x27   :  { %6611 = vset.pattern.permute.xlu2 %v6634_v8 }
  0x28   :  { %202 = vperm.xlu2 %6611, %v25_v3  }
  0x2e   :  { %135 = vperm.xlu1 %6610, %v23_v7   ;;  %6618 = vset.pattern.permute.xlu0 %v6635_v9 }
  0x2f   :  { %316 = vperm.xlu0 %6618, %v24_v4  }
  0x30   :  { %198 = vperm.xlu2 %6611, %v24_v4  }
  0x36   :  { %6614 = vset.pattern.permute.xlu1 %v6633_v6 }
  0x37   :  { %261 = vperm.xlu1 %6614, %v25_v3   ;;  %6621 = vset.pattern.permute.xlu0 %v12734_v1 }
  0x38   :  { %6615 = vset.pattern.permute.xlu2 %v6635_v9 }
  0x39   :  { %324 = vperm.xlu2 %6615, %v26_v2  }
  0x3f   :  { %257 = vperm.xlu1 %6614, %v24_v4  }
  0x41   :  { %320 = vperm.xlu2 %6615, %v25_v3  }
  0x47   :  { %6616 = vset.pattern.permute.xlu1 %v6636_v10 }
  0x48   :  { %383 = vperm.xlu1 %6616, %v26_v2  }
  0x49   :  { %6617 = vset.pattern.permute.xlu2 %v6633_v6  ;;  %v6794_v6 = vperm.slane %v6783_v56, 3 }
  0x4a   :  { %253 = vperm.xlu2 %6617, %v23_v7  }
  0x50   :  { %379 = vperm.xlu1 %6616, %v25_v3  }
  0x52   :  { %6619 = vset.pattern.permute.xlu2 %v6635_v9 }
  0x53   :  { %312 = vperm.xlu2 %6619, %v23_v7  }
  0x58   :  { %375 = vperm.xlu1 %6616, %v24_v4  }
  0x5b   :  { %6620 = vset.pattern.permute.xlu2 %v6636_v10 }
  0x5c   :  { %371 = vperm.xlu2 %6620, %v23_v7   ;;  %v6698_v11 = vpop.permute.xlu2 %147 }
  0x5d   :  { %v173_v46 = vmul.f32 %v6743_v36, %v6698_v11  ;;  %v174_v2 = vmul.f32 %v6762_v45, %v6698_v11 }
  0x60   :  { %6622 = vset.pattern.permute.xlu1 %v12734_v1 }
  0x64   :  { %6623 = vset.pattern.permute.xlu2 %v12734_v1 }
  0x67   :  { %v36_v17 = vpop.permute.xlu2 %35 }
  0x68   :  { %v6714_v18 = vmul.f32 %v6705_v13, %v36_v17  ;;  %v6717_v19 = vmul.f32 %v6707_v14, %v36_v17  ;;  %v6720_v20 = vmul.f32 %v6709_v15, %v36_v17  ;;  %v6723_v21 = vmul.f32 %v6711_v16, %v36_v17 }
  0x70   :  { %v144_v22 = vpop.permute.xlu2 %143 }
  0x71   :  { %v167_v50 = vmul.f32 %v6758_v43, %v144_v22  ;;  %v168_v51 = vmul.f32 %v6760_v44, %v144_v22  ;;  %v169_v57 = vmul.f32 %v6743_v36, %v144_v22  ;;  %v170_v58 = vmul.f32 %v6762_v45, %v144_v22 }
  0x75   :  { %v41_v23 = vpop.permute.xlu1 %40  ;;  %v6725_v24 = vpop.permute.xlu0 %45 }
  0x76   :  { %v65_v27 = vmul.f32 %v6705_v13, %v41_v23  ;;  %v66_v28 = vmul.f32 %v6707_v14, %v41_v23  ;;  %v67_v29 = vmul.f32 %v6709_v15, %v41_v23  ;;  %v68_v30 = vmul.f32 %v6711_v16, %v41_v23 }
  0x77   :  { %v72_v31 = vmul.f32 %v6711_v16, %v6725_v24  ;;  %v71_v47 = vmul.f32 %v6709_v15, %v6725_v24 }
  0x79   :  { %v77_v37 = vpop.permute.xlu2 %76 }
  0x7a   :  { %v6746_v38 = vmul.f32 %v6739_v32, %v77_v37  ;;  %v6749_v39 = vmul.f32 %v6741_v33, %v77_v37  ;;  %v6751_v40 = vmul.f32 %v94_v34, %v77_v37  ;;  %v6753_v41 = vmul.f32 %v95_v35, %v77_v37 }
  0x7e   :  { %v6774_v52 = vpop.permute.xlu0 %88  ;;  %v85_v53 = vpop.permute.xlu1 %84 }
  0x7f   :  { %v114_v59 = vmul.f32 %v94_v34, %v6774_v52  ;;  %v115_v60 = vmul.f32 %v95_v35, %v6774_v52  ;;  %v108_v61 = vmul.f32 %v6739_v32, %v85_v53  ;;  %v109_v62 = vmul.f32 %v6741_v33, %v85_v53 }
  0x80   :  { %v110_v63 = vmul.f32 %v94_v34, %v85_v53  ;;  %v111_v0 = vmul.f32 %v95_v35, %v85_v53 }
  0x81   :  { %v130_v3 = vadd.f32 %v114_v59, %v71_v47  ;;  %v131_v4 = vadd.f32 %v115_v60, %v72_v31  ;;  %v124_v7 = vadd.f32 %v108_v61, %v65_v27  ;;  %v125_v8 = vadd.f32 %v109_v62, %v66_v28 }
  0x82   :  { %v126_v9 = vadd.f32 %v110_v63, %v67_v29  ;;  %v127_v10 = vadd.f32 %v111_v0, %v68_v30  ;;  %v203_v12 = vpop.permute.xlu2 %202 }
  0x83   :  { %v226_v17 = vmul.f32 %v6768_v48, %v203_v12  ;;  %v227_v22 = vmul.f32 %v6770_v49, %v203_v12  ;;  %v228_v23 = vmul.f32 %v6776_v54, %v203_v12  ;;  %v229_v25 = vmul.f32 %v6778_v55, %v203_v12 }
  0x84   :  { %v183_v26 = vadd.f32 %v167_v50, %v124_v7  ;;  %v184_v37 = vadd.f32 %v168_v51, %v125_v8  ;;  %v185_v42 = vadd.f32 %v169_v57, %v126_v9  ;;  %v186_v31 = vadd.f32 %v170_v58, %v127_v10  ;;  %v6825_v7 = vld [vmem:[%s12713_s1 + $0x5] ss:$8 sm:$0xf] }
  0x85   :  { %v189_v47 = vadd.f32 %v173_v46, %v130_v3  ;;  %v190_v53 = vadd.f32 %v174_v2, %v131_v4 }
  0x86   :  { %v6800_v59 = vadd.f32 %v226_v17, %v183_v26  ;;  %v6802_v27 = vadd.f32 %v227_v22, %v184_v37  ;;  %v6804_v28 = vadd.f32 %v228_v23, %v185_v42  ;;  %v6806_v29 = vadd.f32 %v229_v25, %v186_v31  ;;  %v81_v30 = vpop.permute.xlu1 %80 }
  0x87   :  { %v104_v60 = vmul.f32 %v6739_v32, %v81_v30  ;;  %v105_v61 = vmul.f32 %v6741_v33, %v81_v30  ;;  %v106_v62 = vmul.f32 %v94_v34, %v81_v30  ;;  %v107_v50 = vmul.f32 %v95_v35, %v81_v30  ;;  %v6810_v51 = vpop.permute.xlu0 %265 }
  0x88   :  { %v292_v46 = vmul.f32 %v6794_v6, %v6810_v51 }
  0x89   :  { %v120_v57 = vadd.f32 %v104_v60, %v6714_v18  ;;  %v121_v58 = vadd.f32 %v105_v61, %v6717_v19  ;;  %v122_v63 = vadd.f32 %v106_v62, %v6720_v20  ;;  %v123_v0 = vadd.f32 %v107_v50, %v6723_v21 }
  0x8a   :  { %v199_v2 = vpop.permute.xlu2 %198  ;;  %v6828_v18 = vperm.slane %v6783_v56, 2  ;;  %v6831_v20 = vperm.slane %v6825_v7, 3 }
  0x8b   :  { %v222_v3 = vmul.f32 %v6768_v48, %v199_v2  ;;  %v223_v4 = vmul.f32 %v6770_v49, %v199_v2  ;;  %v224_v34 = vmul.f32 %v6776_v54, %v199_v2  ;;  %v225_v35 = vmul.f32 %v6778_v55, %v199_v2 }
  0x8c   :  { %v291_v17 = vmul.f32 %v6828_v18, %v6810_v51 }
  0x8f   :  { %v31_v19 = vpop.permute.xlu1 %30 }
  0x90   :  { %v57_v21 = vmul.f32 %v6705_v13, %v31_v19  ;;  %v58_v8 = vmul.f32 %v6707_v14, %v31_v19  ;;  %v59_v9 = vmul.f32 %v6709_v15, %v31_v19  ;;  %v60_v10 = vmul.f32 %v6711_v16, %v31_v19  ;;  %v6837_v12 = vpop.permute.xlu0 %206 }
  0x91   :  { %v232_v22 = vmul.f32 %v6776_v54, %v6837_v12  ;;  %v233_v23 = vmul.f32 %v6778_v55, %v6837_v12 }
  0x92   :  { %v116_v25 = vadd.f32 %v6746_v38, %v57_v21  ;;  %v117_v26 = vadd.f32 %v6749_v39, %v58_v8  ;;  %v118_v37 = vadd.f32 %v6751_v40, %v59_v9  ;;  %v119_v15 = vadd.f32 %v6753_v41, %v60_v10 }
  0x93   :  { %v248_v16 = vadd.f32 %v232_v22, %v189_v47  ;;  %v249_v42 = vadd.f32 %v233_v23, %v190_v53  ;;  %v6849_v31 = vpop.permute.xlu2 %324  ;;  %v6858_v38 = vperm.slane %v6825_v7, 2 }
  0x94   :  { %v351_v30 = vmul.f32 %v6831_v20, %v6849_v31 }
  0x95   :  { %v6853_v60 = vadd.f32 %v291_v17, %v248_v16  ;;  %v308_v61 = vadd.f32 %v292_v46, %v249_v42 }
  0x97   :  { %v6855_v62 = vadd.f32 %v351_v30, %v308_v61 }
  0x98   :  { %v140_v39 = vpop.permute.xlu1 %139  ;;  %v195_v50 = vpop.permute.xlu0 %194 }
  0x99   :  { %v163_v40 = vmul.f32 %v6758_v43, %v140_v39  ;;  %v164_v41 = vmul.f32 %v6760_v44, %v140_v39  ;;  %v165_v47 = vmul.f32 %v6743_v36, %v140_v39  ;;  %v166_v53 = vmul.f32 %v6762_v45, %v140_v39 }
  0x9a   :  { %v218_v2 = vmul.f32 %v6768_v48, %v195_v50  ;;  %v219_v19 = vmul.f32 %v6770_v49, %v195_v50  ;;  %v220_v46 = vmul.f32 %v6776_v54, %v195_v50  ;;  %v221_v21 = vmul.f32 %v6778_v55, %v195_v50 }
  0x9b   :  { %v179_v8 = vadd.f32 %v163_v40, %v120_v57  ;;  %v180_v9 = vadd.f32 %v164_v41, %v121_v58  ;;  %v181_v10 = vadd.f32 %v165_v47, %v122_v63  ;;  %v182_v17 = vadd.f32 %v166_v53, %v123_v0  ;;  %v321_v22 = vpop.permute.xlu2 %320 }
  0x9c   :  { %v346_v23 = vmul.f32 %v6858_v38, %v321_v22  ;;  %v347_v16 = vmul.f32 %v6831_v20, %v321_v22 }
  0x9d   :  { %v6870_v42 = vadd.f32 %v222_v3, %v179_v8  ;;  %v6872_v30 = vadd.f32 %v223_v4, %v180_v9  ;;  %v6874_v61 = vadd.f32 %v224_v34, %v181_v10  ;;  %v6876_v39 = vadd.f32 %v225_v35, %v182_v17 }
  0x9e   :  { %v6883_v4 = vperm.slane %v6783_v56, 0  ;;  %v6886_v34 = vperm.slane %v6783_v56, 1  ;;  %v112_v56 = vmul.f32 %v6739_v32, %v6774_v52  ;;  %v171_v32 = vmul.f32 %v6758_v43, %v6698_v11 }
  0xa0   :  { %v136_v54 = vpop.permute.xlu1 %135 }
  0xa1   :  { %v159_v55 = vmul.f32 %v6758_v43, %v136_v54  ;;  %v160_v57 = vmul.f32 %v6760_v44, %v136_v54  ;;  %v161_v58 = vmul.f32 %v6743_v36, %v136_v54  ;;  %v162_v63 = vmul.f32 %v6762_v45, %v136_v54 }
  0xa3   :  { %v175_v0 = vadd.f32 %v159_v55, %v116_v25  ;;  %v176_v50 = vadd.f32 %v160_v57, %v117_v26  ;;  %v177_v40 = vadd.f32 %v161_v58, %v118_v37  ;;  %v178_v3 = vadd.f32 %v162_v63, %v119_v15 }
  0xa4   :  { %v254_v35 = vpop.permute.xlu2 %253  ;;  %v69_v26 = vmul.f32 %v6705_v13, %v6725_v24  ;;  %v6907_v58 = vperm.slane %v6825_v7, 0 }
  0xa5   :  { %v234_v41 = vadd.f32 %v218_v2, %v175_v0  ;;  %v235_v47 = vadd.f32 %v219_v19, %v176_v50  ;;  %v236_v53 = vadd.f32 %v220_v46, %v177_v40  ;;  %v237_v8 = vadd.f32 %v221_v21, %v178_v3 }
  0xa6   :  { %v277_v9 = vmul.f32 %v6883_v4, %v254_v35  ;;  %v278_v36 = vmul.f32 %v6886_v34, %v254_v35  ;;  %v279_v45 = vmul.f32 %v6828_v18, %v254_v35  ;;  %v280_v25 = vmul.f32 %v6794_v6, %v254_v35 }
  0xa7   :  { %v70_v46 = vmul.f32 %v6707_v14, %v6725_v24  ;;  %v113_v21 = vmul.f32 %v6741_v33, %v6774_v52  ;;  %v128_v57 = vadd.f32 %v112_v56, %v69_v26  ;;  %v6910_v14 = vperm.slane %v6825_v7, 1 }
  0xa8   :  { %v293_v37 = vadd.f32 %v277_v9, %v234_v41  ;;  %v294_v15 = vadd.f32 %v278_v36, %v235_v47  ;;  %v295_v2 = vadd.f32 %v279_v45, %v236_v53  ;;  %v296_v19 = vadd.f32 %v280_v25, %v237_v8  ;;  %v6450_v36 = vld [vmem:[%s12713_s1 + $0x6] ss:$8 sm:$0xf] }
  0xa9   :  { %v262_v10 = vpop.permute.xlu1 %261  ;;  %v129_v0 = vadd.f32 %v113_v21, %v70_v46  ;;  %v230_v50 = vmul.f32 %v6768_v48, %v6837_v12  ;;  %v344_v43 = vmul.f32 %v6907_v58, %v321_v22  ;;  %v345_v40 = vmul.f32 %v6910_v14, %v321_v22 }
  0xaa   :  { %v285_v17 = vmul.f32 %v6883_v4, %v262_v10  ;;  %v286_v54 = vmul.f32 %v6886_v34, %v262_v10  ;;  %v287_v13 = vmul.f32 %v6828_v18, %v262_v10  ;;  %v288_v55 = vmul.f32 %v6794_v6, %v262_v10 }
  0xab   :  { %v6945_v46 = vperm.slane %v6450_v36, 1  ;;  %v6947_v21 = vperm.slane %v6450_v36, 2  ;;  %v6949_v10 = vperm.slane %v6450_v36, 3 }
  0xac   :  { %v301_v24 = vadd.f32 %v285_v17, %v6800_v59  ;;  %v302_v33 = vadd.f32 %v286_v54, %v6802_v27  ;;  %v303_v52 = vadd.f32 %v287_v13, %v6804_v28  ;;  %v304_v63 = vadd.f32 %v288_v55, %v6806_v29  ;;  %v317_v28 = vpop.permute.xlu0 %316 }
  0xad   :  { %v313_v3 = vpop.permute.xlu2 %312  ;;  %v340_v25 = vmul.f32 %v6907_v58, %v317_v28  ;;  %v341_v26 = vmul.f32 %v6910_v14, %v317_v28  ;;  %v342_v56 = vmul.f32 %v6858_v38, %v317_v28  ;;  %v231_v55 = vmul.f32 %v6770_v49, %v6837_v12 }
  0xae   :  { %v336_v7 = vmul.f32 %v6907_v58, %v313_v3  ;;  %v337_v35 = vmul.f32 %v6910_v14, %v313_v3  ;;  %v338_v59 = vmul.f32 %v6858_v38, %v313_v3  ;;  %v339_v27 = vmul.f32 %v6831_v20, %v313_v3 }
  0xaf   :  { %v6924_v41 = vadd.f32 %v344_v43, %v301_v24  ;;  %v6926_v29 = vadd.f32 %v345_v40, %v302_v33  ;;  %v6928_v47 = vadd.f32 %v346_v23, %v303_v52  ;;  %v6930_v48 = vadd.f32 %v347_v16, %v304_v63 }
  0xb0   :  { %v352_v53 = vadd.f32 %v336_v7, %v293_v37  ;;  %v353_v22 = vadd.f32 %v337_v35, %v294_v15  ;;  %v354_v8 = vadd.f32 %v338_v59, %v295_v2  ;;  %v355_v9 = vadd.f32 %v339_v27, %v296_v19 }
  0xb1   :  { %v258_v45 = vpop.permute.xlu1 %257  ;;  %v343_v23 = vmul.f32 %v6831_v20, %v317_v28  ;;  %v6943_v19 = vperm.slane %v6450_v36, 0  ;;  %v290_v3 = vmul.f32 %v6886_v34, %v6810_v51  ;;  %v348_v27 = vmul.f32 %v6907_v58, %v6849_v31 }
  0xb2   :  { %v281_v16 = vmul.f32 %v6883_v4, %v258_v45  ;;  %v282_v37 = vmul.f32 %v6886_v34, %v258_v45  ;;  %v283_v15 = vmul.f32 %v6828_v18, %v258_v45  ;;  %v284_v2 = vmul.f32 %v6794_v6, %v258_v45 }
  0xb3   :  { %v172_v18 = vmul.f32 %v6760_v44, %v6698_v11  ;;  %v187_v6 = vadd.f32 %v171_v32, %v128_v57  ;;  %v289_v44 = vmul.f32 %v6883_v4, %v6810_v51  ;;  %v349_v4 = vmul.f32 %v6910_v14, %v6849_v31 }
  0xb4   :  { %v297_v17 = vadd.f32 %v281_v16, %v6870_v42  ;;  %v298_v20 = vadd.f32 %v282_v37, %v6872_v30  ;;  %v299_v54 = vadd.f32 %v283_v15, %v6874_v61  ;;  %v300_v13 = vadd.f32 %v284_v2, %v6876_v39 }
  0xb5   :  { %v188_v49 = vadd.f32 %v172_v18, %v129_v0  ;;  %v246_v12 = vadd.f32 %v230_v50, %v187_v6 }
  0xb6   :  { %v6959_v24 = vadd.f32 %v340_v25, %v297_v17  ;;  %v6961_v33 = vadd.f32 %v341_v26, %v298_v20  ;;  %v6963_v52 = vadd.f32 %v342_v56, %v299_v54  ;;  %v6965_v42 = vadd.f32 %v343_v23, %v300_v13  ;;  %v372_v30 = vpop.permute.xlu2 %371 }
  0xb7   :  { %v395_v61 = vmul.f32 %v6943_v19, %v372_v30  ;;  %v396_v39 = vmul.f32 %v6945_v46, %v372_v30  ;;  %v397_v63 = vmul.f32 %v6947_v21, %v372_v30  ;;  %v398_v11 = vmul.f32 %v6949_v10, %v372_v30 }
  0xb8   :  { %v247_v7 = vadd.f32 %v231_v55, %v188_v49  ;;  %v305_v59 = vadd.f32 %v289_v44, %v246_v12 }
  0xb9   :  { %v411_v32 = vadd.f32 %v395_v61, %v352_v53  ;;  %v412_v57 = vadd.f32 %v396_v39, %v353_v22  ;;  %v413_v43 = vadd.f32 %v397_v63, %v354_v8  ;;  %v6973_v40 = vadd.f32 %v398_v11, %v355_v9 }
  0xba   :  { %v384_v35 = vpop.permute.xlu1 %383  ;;  %v306_v36 = vadd.f32 %v290_v3, %v247_v7  ;;  %v350_v53 = vmul.f32 %v6858_v38, %v6849_v31  ;;  %v364_v51 = vadd.f32 %v348_v27, %v305_v59 }
  0xbb   :  { %v410_v28 = vmul.f32 %v6949_v10, %v384_v35  ;;  %v407_v0 = vmul.f32 %v6943_v19, %v384_v35  ;;  %v408_v34 = vmul.f32 %v6945_v46, %v384_v35  ;;  %v409_v22 = vmul.f32 %v6947_v21, %v384_v35 }
  0xbc   :  { %v365_v8 = vadd.f32 %v349_v4, %v306_v36  ;;  %v366_v9 = vadd.f32 %v350_v53, %v6853_v60  ;;  %v7010_v44 = vmul.f32 30.0, %v411_v32  ;;  %v7012_v49 = vmul.f32 30.0, %v412_v57 }
  0xbd   :  { %v426_v50 = vadd.f32 %v410_v28, %v6855_v62  ;;  %v423_v58 = vadd.f32 %v407_v0, %v364_v51  ;;  %v7019_v27 = vmul.f32 30.0, %v413_v43 }
  0xbe   :  { %v424_v45 = vadd.f32 %v408_v34, %v365_v8  ;;  %v425_v25 = vadd.f32 %v409_v22, %v366_v9  ;;  %12882 = vst [vmem:[#allocation2_spill] sm:$0xff] %v7010_v44 }
  0xbf   :  { %v6989_v26 = vmul.f32 30.0, %v423_v58  ;;  %v6995_v23 = vmul.f32 30.0, %v426_v50  ;;  %12883 = vst [vmem:[#allocation3_spill] sm:$0xff] %v7012_v49 }
  0xc0   :  { %v6991_v56 = vmul.f32 30.0, %v424_v45  ;;  %v6993_v62 = vmul.f32 30.0, %v425_v25  ;;  %12884 = vst [vmem:[#allocation4_spill] sm:$0xff] %v7019_v27 }
  0xc1   :  { %v2306_v31 = vand.u32 2139095040, %v6989_v26  ;;  %v2771_v17 = vand.u32 2139095040, %v6995_v23 }
  0xc2   :  { %v380_v14 = vpop.permute.xlu1 %379  ;;  %v2461_v37 = vand.u32 2139095040, %v6991_v56  ;;  %v2616_v2 = vand.u32 2139095040, %v6993_v62 }
  0xc3   :  { %v403_v38 = vmul.f32 %v6943_v19, %v380_v14  ;;  %v404_v16 = vmul.f32 %v6945_v46, %v380_v14  ;;  %v405_v60 = vmul.f32 %v6947_v21, %v380_v14  ;;  %v406_v15 = vmul.f32 %v6949_v10, %v380_v14 }
  0xc4   :  { %v2307_v13 = vshrl.u32 %v2306_v31, 23  ;;  %v2462_v18 = vshrl.u32 %v2461_v37, 23  ;;  %v2617_v61 = vshrl.u32 %v2616_v2, 23  ;;  %v2772_v39 = vshrl.u32 %v2771_v17, 23 }
  0xc5   :  { %v419_v20 = vadd.f32 %v403_v38, %v6924_v41  ;;  %v420_v54 = vadd.f32 %v404_v16, %v6926_v29  ;;  %v421_v6 = vadd.f32 %v405_v60, %v6928_v47  ;;  %v422_v55 = vadd.f32 %v406_v15, %v6930_v48 }
  0xc6   :  { %v6487_v63 = vadd.s32 4294967169, %v2307_v13  ;;  %v6490_v12 = vadd.s32 4294967169, %v2462_v18  ;;  %v6493_v29 = vadd.s32 4294967169, %v2617_v61  ;;  %v6496_v3 = vadd.s32 4294967169, %v2772_v39 }
  0xc7   :  { %v7033_v43 = vmul.f32 30.0, %v419_v20  ;;  %v7035_v36 = vmul.f32 30.0, %v420_v54  ;;  %v7037_v0 = vmul.f32 30.0, %v421_v6  ;;  %v7039_v50 = vmul.f32 30.0, %v422_v55 }
  0xc8   :  { %v2313_v48 = vadd.s32 1, %v6487_v63  ;;  %v2468_v57 = vadd.s32 1, %v6490_v12  ;;  %v2623_v28 = vadd.s32 1, %v6493_v29  ;;  %v12721_v54 = vand.u32 2147483647, %v6989_v26 }
  0xc9   :  { %12886 = vst [vmem:[#allocation6_spill] sm:$0xff] %v7037_v0  ;;  %v1686_v34 = vand.u32 2139095040, %v7033_v43  ;;  %v1841_v9 = vand.u32 2139095040, %v7035_v36  ;;  %v1996_v31 = vand.u32 2139095040, %v7037_v0  ;;  %v2151_v38 = vand.u32 2139095040, %v7039_v50 }
  0xca   :  { %v376_v30 = vpop.permute.xlu1 %375  ;;  %vm2314_vm0 = vcmp.gt.s32.totalorder %v2313_v48, 0  ;;  %vm2469_vm1 = vcmp.gt.s32.totalorder %v2468_v57, 0  ;;  %vm2624_vm2 = vcmp.gt.s32.totalorder %v2623_v28, 0  ;;  %12887 = vst [vmem:[#allocation7_spill] sm:$0xff] %v7039_v50 }
  0xcb   :  { %v399_v11 = vmul.f32 %v6943_v19, %v376_v30  ;;  %v400_v41 = vmul.f32 %v6945_v46, %v376_v30  ;;  %v401_v7 = vmul.f32 %v6947_v21, %v376_v30  ;;  %v402_v47 = vmul.f32 %v6949_v10, %v376_v30 }
  0xcc   :  { %v446_v46 = vand.u32 2139095040, %v7010_v44  ;;  %v601_v21 = vand.u32 2139095040, %v7012_v49  ;;  %v2778_v10 = vadd.s32 1, %v6496_v3  ;;  %v2315_v4 = vsel %vm2314_vm0, %v2313_v48, 0 }
  0xcd   :  { %v415_v35 = vadd.f32 %v399_v11, %v6959_v24  ;;  %v416_v59 = vadd.f32 %v400_v41, %v6961_v33  ;;  %v7022_v19 = vadd.f32 %v401_v7, %v6963_v52  ;;  %v7025_v32 = vadd.f32 %v402_v47, %v6965_v42 }
  0xce   :  { %v7030_v24 = vmul.f32 30.0, %v6973_v40  ;;  %v756_v33 = vand.u32 2139095040, %v7019_v27  ;;  %v447_v52 = vshrl.u32 %v446_v46, 23  ;;  %v602_v42 = vshrl.u32 %v601_v21, 23 }
  0xcf   :  { %vm2779_vm3 = vcmp.gt.s32.totalorder %v2778_v10, 0  ;;  %v2470_v51 = vsel %vm2469_vm1, %v2468_v57, 0  ;;  %v2317_v22 = vand.u32 31, %v2315_v4  ;;  %v2625_v8 = vsel %vm2624_vm2, %v2623_v28, 0 }
  0xd0   :  { %12885 = vst [vmem:[#allocation5_spill] sm:$0xff] %v7030_v24  ;;  %v757_v53 = vshrl.u32 %v756_v33, 23  ;;  %v911_v40 = vand.u32 2139095040, %v7030_v24  ;;  %v2780_v58 = vsel %vm2779_vm3, %v2778_v10, 0  ;;  %v6451_v45 = vadd.s32 4294967169, %v447_v52 }
  0xd1   :  { %v6454_v25 = vadd.s32 4294967169, %v602_v42  ;;  %v7044_v14 = vand.u32 31, %v2470_v51  ;;  %v7050_v37 = vand.u32 31, %v2625_v8  ;;  %v7052_v60 = vand.u32 31, %v2780_v58 }
  0xd2   :  { %v7048_v16 = vshrl.u32 %v911_v40, 23  ;;  %v1687_v15 = vshrl.u32 %v1686_v34, 23  ;;  %v7054_v2 = vadd.s32 4294967169, %v757_v53  ;;  %v2318_v17 = vsub.s32 32, %v2317_v22 }
  0xd3   :  { %v1842_v20 = vshrl.u32 %v1841_v9, 23  ;;  %v7057_v13 = vadd.s32 1, %v6451_v45  ;;  %v7059_v18 = vadd.s32 1, %v6454_v25  ;;  %v7061_v6 = vshrl.u32 %v2315_v4, 5 }
  0xd4   :  { %12888 = vst [vmem:[#allocation8_spill] sm:$0xff] %v7048_v16  ;;  %v7063_v55 = vshrl.u32 %v2470_v51, 5  ;;  %v7066_v30 = vsub.s32 32, %v7044_v14  ;;  %v7068_v61 = vshrl.u32 %v2625_v8, 5  ;;  %v1997_v39 = vshrl.u32 %v1996_v31, 23 }
  0xd5   :  { %12889 = vst [vmem:[#allocation9_spill] sm:$0xff] %v7054_v2  ;;  %v2152_v63 = vshrl.u32 %v2151_v38, 23  ;;  %v7071_v11 = vsub.s32 32, %v7050_v37  ;;  %v7073_v12 = vshrl.u32 %v2780_v58, 5  ;;  %v7076_v41 = vsub.s32 32, %v7052_v60 }
  0xd6   :  { %12890 = vst [vmem:[#allocation10_spill] sm:$0xff] %v7057_v13  ;;  %v6475_v29 = vadd.s32 4294967169, %v1687_v15  ;;  %v6478_v3 = vadd.s32 4294967169, %v1842_v20  ;;  %v7078_v7 = vmul.f32 30.0, %v415_v35  ;;  %v2310_v47 = vand.u32 8388607, %v12721_v54 }
  0xd7   :  { %12891 = vst [vmem:[#allocation11_spill] sm:$0xff] %v7059_v18  ;;  %v12730_v48 = vmov 2475754826   ;;  %v7083_v57 = vmul.f32 30.0, %v416_v59  ;;  %v12732_v21 = vmov 683565275  }
  0xd8   :  { %12892 = vst [vmem:[#allocation12_spill] sm:$0xff] %v7078_v7  ;;  %v2321_v46 = vshrl.u32 %v12730_v48, %v2318_v17  ;;  %v2320_v28 = vshll.u32 %v12732_v21, %v2317_v22  ;;  %v2323_v10 = vshll.u32 %v12730_v48, %v2317_v22  ;;  %v12728_v33 = vmov 2131351028  }
  0xd9   :  { %12893 = vst [vmem:[#allocation13_spill] sm:$0xff] %v7083_v57  ;;  %v2324_v52 = vshrl.u32 %v12728_v33, %v2318_v17  ;;  %v6481_v42 = vadd.s32 4294967169, %v1997_v39  ;;  %v6484_v4 = vadd.s32 4294967169, %v2152_v63  ;;  %v7089_v35 = vmul.f32 30.0, %v7022_v19 }
  0xda   :  { %v7092_v53 = vmul.f32 30.0, %v7025_v32  ;;  %v2322_v40 = vor.u32 %v2321_v46, %v2320_v28  ;;  %v2326_v59 = vshll.u32 %v12728_v33, %v2317_v22  ;;  %v12726_v34 = vmov 2102212464  }
  0xdb   :  { %12894 = vst [vmem:[#allocation14_spill] sm:$0xff] %v7089_v35  ;;  %v2325_v51 = vor.u32 %v2324_v52, %v2323_v10  ;;  %v2327_v8 = vshrl.u32 %v12726_v34, %v2318_v17  ;;  %v7096_v58 = vadd.s32 1, %v6475_v29  ;;  %v2311_v9 = vor.u32 8388608, %v2310_v47 }
  0xdc   :  { %12895 = vst [vmem:[#allocation15_spill] sm:$0xff] %v7092_v53  ;;  %v2329_v45 = vshll.u32 %v12726_v34, %v2317_v22  ;;  %v12724_v25 = vmov 920167782   ;;  %v7100_v19 = vadd.s32 1, %v6478_v3  ;;  %v12722_v15 = vmov 1326507024  }
  0xdd   :  { %v2330_v31 = vshrl.u32 %v12724_v25, %v2318_v17  ;;  %v2328_v38 = vor.u32 %v2327_v8, %v2326_v59  ;;  %v2332_v32 = vshll.u32 %v12724_v25, %v2317_v22  ;;  %v2333_v20 = vshrl.u32 %v12722_v15, %v2318_v17 }
  0xde   :  { %vm2335_vm4 = vcmp.lt.s32.totalorder %v7061_v6, 1  ;;  %vm2338_vm5 = vcmp.lt.s32.totalorder %v7061_v6, 4  ;;  %v2319_v29 = vshrl.u32 %v12732_v21, %v2318_v17  ;;  %vm2337_vm6 = vcmp.lt.s32.totalorder %v7061_v6, 3 }
  0xdf   :  { %v2331_v63 = vor.u32 %v2330_v31, %v2329_v45  ;;  %v2334_v47 = vor.u32 %v2333_v20, %v2332_v32  ;;  %v2340_v46 = vsel %vm2338_vm5, %v2328_v38, 2102212464  ;;  %v2343_v28 = vsel %vm2335_vm4, %v2322_v40, %v2325_v51 }
  0xe0   :  { %v2347_v10 = vsel %vm2335_vm4, %v2325_v51, %v2328_v38  ;;  %v7109_v22 = vshll.u32 %v2311_v9, 8  ;;  %vm2336_vm7 = vcmp.lt.s32.totalorder %v7061_v6, 2  ;;  %v2339_v52 = vsel %vm2335_vm4, %v2319_v29, %v2322_v40 }
  0xe1   :  { %v2344_v3 = vsel %vm2338_vm5, %v2331_v63, 920167782  ;;  %v2348_v8 = vsel %vm2338_vm5, %v2334_v47, 1326507024  ;;  %v2341_v45 = vsel %vm2337_vm6, %v2325_v51, %v2340_v46  ;;  %v7118_v39 = vadd.s32 1, %v6481_v42 }
  0xe2   :  { %v2345_v59 = vsel %vm2337_vm6, %v2328_v38, %v2344_v3  ;;  %v2349_v5 = vsel %vm2337_vm6, %v2331_v63, %v2348_v8  ;;  %v2352_v17 = vand.u32 65535, %v7109_v22  ;;  %v2353_v20 = vshrl.u32 %v7109_v22, 16 }
  0xe3   :  { %v2346_v31 = vsel %vm2336_vm7, %v2343_v28, %v2345_v59  ;;  %v2350_v32 = vsel %vm2336_vm7, %v2347_v10, %v2349_v5  ;;  %v7121_v51 = vadd.s32 1, %v6484_v4  ;;  %v7127_v5 = vsel %vm2336_vm7, %v2339_v52, %v2341_v45 }
  0xe4   :  { %v2376_v54 = vand.u32 65535, %v2346_v31  ;;  %v2377_v9 = vshrl.u32 %v2346_v31, 16  ;;  %v2354_v38 = vand.u32 65535, %v2350_v32  ;;  %v2355_v29 = vshrl.u32 %v2350_v32, 16 }
  0xe5   :  { %vm1694_vm12 = vcmp.gt.s32.totalorder %v7096_v58, 0  ;;  %vm2490_vm13 = vcmp.lt.s32.totalorder %v7063_v55, 1  ;;  %vm2493_vm15 = vcmp.lt.s32.totalorder %v7063_v55, 4  ;;  %vm2492_vm0 = vcmp.lt.s32.totalorder %v7063_v55, 3 }
  0xe6   :  { %v2379_v63 = vmul.u32 %v2377_v9, %v2352_v17  ;;  %v2380_v46 = vmul.u32 %v2376_v54, %v2353_v20  ;;  %v2357_v3 = vmul.u32 %v2355_v29, %v2352_v17  ;;  %v2358_v10 = vmul.u32 %v2354_v38, %v2353_v20 }
  0xe7   :  { %v2378_v42 = vmul.u32 %v2376_v54, %v2352_v17  ;;  %v2381_v59 = vmul.u32 %v2377_v9, %v2353_v20  ;;  %v2356_v32 = vmul.u32 %v2354_v38, %v2352_v17  ;;  %v2359_v4 = vmul.u32 %v2355_v29, %v2353_v20 }
  0xe8   :  { %v2382_v8 = vshll.u32 %v2379_v63, 16  ;;  %v2360_v40 = vshll.u32 %v2357_v3, 16  ;;  %v2383_v15 = vshrl.u32 %v2379_v63, 16  ;;  %v2384_v47 = vshll.u32 %v2380_v46, 16 }
  0xe9   :  { %v2385_v25 = vshrl.u32 %v2380_v46, 16  ;;  %v2362_v28 = vshll.u32 %v2358_v10, 16  ;;  %v2361_v45 = vshrl.u32 %v2357_v3, 16  ;;  %v2363_v33 = vshrl.u32 %v2358_v10, 16 }
  0xea   :  { %vm2386_vm8 = vc.u32 %v2378_v42, %v2382_v8  ;;  %v2388_v34 = vadd.s32 %v2382_v8, %v2378_v42  ;;  %vm2364_vm9 = vc.u32 %v2356_v32, %v2360_v40  ;;  %v2366_v6 = vadd.s32 %v2360_v40, %v2356_v32 }
  0xeb   :  { %v2387_v52 = vsel %vm2386_vm8, 1, %v12734_v1  ;;  %v2365_v54 = vsel %vm2364_vm9, 1, %v12734_v1  ;;  %v2475_v29 = vshll.u32 %v12732_v21, %v7044_v14  ;;  %v2476_v40 = vshrl.u32 %v12730_v48, %v7066_v30 }
  0xec   :  { %v2389_v9 = vadd.s32 %v2387_v52, %v2381_v59  ;;  %vm2390_vm10 = vc.u32 %v2388_v34, %v2384_v47  ;;  %v2367_v31 = vadd.s32 %v2365_v54, %v2359_v4  ;;  %vm2368_vm11 = vc.u32 %v2366_v6, %v2362_v28 }
  0xed   :  { %v2391_v17 = vsel %vm2390_vm10, 1, %v12734_v1  ;;  %v2369_v20 = vsel %vm2368_vm11, 1, %v12734_v1  ;;  %v12896_v46 = vand.u32 2147483647, %v6991_v56  ;;  %v2478_v10 = vshll.u32 %v12730_v48, %v7044_v14 }
  0xee   :  { %v2393_v38 = vadd.s32 %v2391_v17, %v2389_v9  ;;  %v2371_v63 = vadd.s32 %v2369_v20, %v2367_v31  ;;  %v12897_v28 = vmov 2131351028   ;;  %v2477_v8 = vor.u32 %v2476_v40, %v2475_v29 }
  0xef   :  { %v2465_v3 = vand.u32 8388607, %v12896_v46  ;;  %v2479_v42 = vshrl.u32 %v12897_v28, %v7066_v30  ;;  %v2481_v32 = vshll.u32 %v12897_v28, %v7044_v14  ;;  %v12898_v4 = vmov 2102212464  }
  0xf0   :  { %v2394_v59 = vadd.s32 %v2393_v38, %v2383_v15  ;;  %v2482_v6 = vshrl.u32 %v12898_v4, %v7066_v30  ;;  %v2372_v52 = vadd.s32 %v2371_v63, %v2361_v45  ;;  %v2484_v31 = vshll.u32 %v12898_v4, %v7044_v14 }
  0xf1   :  { %v2480_v54 = vor.u32 %v2479_v42, %v2478_v10  ;;  %v12899_v9 = vmov 920167782   ;;  %v12900_v38 = vmov 1326507024   ;;  %v7159_v45 = vadd.s32 %v2388_v34, %v2384_v47 }
  0xf2   :  { %v2485_v17 = vshrl.u32 %v12899_v9, %v7066_v30  ;;  %v2395_v20 = vadd.s32 %v2394_v59, %v2385_v25  ;;  %v2483_v46 = vor.u32 %v2482_v6, %v2481_v32  ;;  %v2487_v15 = vshll.u32 %v12899_v9, %v7044_v14 }
  0xf3   :  { %v2488_v29 = vshrl.u32 %v12900_v38, %v7066_v30  ;;  %v7157_v40 = vadd.s32 %v2372_v52, %v2363_v33  ;;  %v2466_v42 = vor.u32 8388608, %v2465_v3  ;;  %v2396_v25 = vmul.u32 %v7109_v22, %v7127_v5 }
  0xf4   :  { %v2486_v63 = vor.u32 %v2485_v17, %v2484_v31  ;;  %v2399_v10 = vadd.s32 1, %v2395_v20  ;;  %v2498_v14 = vsel %vm2490_vm13, %v2477_v8, %v2480_v54  ;;  %v2502_v47 = vsel %vm2490_vm13, %v2480_v54, %v2483_v46 }
  0xf5   :  { %v2489_v48 = vor.u32 %v2488_v29, %v2487_v15  ;;  %vm2398_vm14 = vc.u32 %v7157_v40, %v7159_v45  ;;  %vm2491_vm1 = vcmp.lt.s32.totalorder %v7063_v55, 2  ;;  %vm1849_vm2 = vcmp.gt.s32.totalorder %v7100_v19, 0 }
  0xf6   :  { %v2400_v33 = vsel %vm2398_vm14, %v2399_v10, %v2395_v20  ;;  %v2499_v34 = vsel %vm2493_vm15, %v2486_v63, 920167782  ;;  %v7184_v6 = vshll.u32 %v2466_v42, 8  ;;  %v7189_v52 = vsel %vm1694_vm12, %v7096_v58, 0 }
  0xf7   :  { %v2401_v3 = vadd.s32 %v2400_v33, %v2396_v25  ;;  %v2500_v22 = vsel %vm2492_vm0, %v2483_v46, %v2499_v34  ;;  %v2503_v5 = vsel %vm2493_vm15, %v2489_v48, 1326507024  ;;  %v12902_v25 = vand.u32 2139095040, %v7083_v57 }
  0xf8   :  { %v2501_v59 = vsel %vm2491_vm1, %v2498_v14, %v2500_v22  ;;  %v2504_v32 = vsel %vm2492_vm0, %v2486_v63, %v2503_v5  ;;  %v2507_v20 = vand.u32 65535, %v7184_v6  ;;  %v2508_v15 = vshrl.u32 %v7184_v6, 16 }
  0xf9   :  { %v2402_v31 = vadd.s32 536870912, %v2401_v3  ;;  %v2505_v17 = vsel %vm2491_vm1, %v2502_v47, %v2504_v32  ;;  %v2532_v48 = vshrl.u32 %v2501_v59, 16  ;;  %v12901_v63 = vand.u32 2139095040, %v7078_v7 }
  0xfa   :  { %v2509_v29 = vand.u32 65535, %v2505_v17  ;;  %v2510_v10 = vshrl.u32 %v2505_v17, 16  ;;  %v7201_v14 = vshrl.u32 %v12902_v25, 23  ;;  %v2531_v33 = vand.u32 65535, %v2501_v59 }
  0xfb   :  { %v7197_v42 = vshrl.u32 %v12901_v63, 23  ;;  %v2403_v58 = vshrl.u32 %v2402_v31, 30  ;;  %v2474_v34 = vshrl.u32 %v12732_v21, %v7066_v30  ;;  %v2495_v47 = vsel %vm2493_vm15, %v2483_v46, 2102212464 }
  0xfc   :  { %v2512_v22 = vmul.u32 %v2510_v10, %v2507_v20  ;;  %v2513_v5 = vmul.u32 %v2509_v29, %v2508_v15  ;;  %v7208_v32 = vshrl.u32 %v7189_v52, 5  ;;  %v7213_v17 = vsel %vm1849_vm2, %v7100_v19, 0 }
  0xfd   :  { %v2404_v63 = vshll.u32 %v2403_v58, 30  ;;  %v2534_v25 = vmul.u32 %v2532_v48, %v2507_v20  ;;  %vm2305_vm3 = vcmp.lt.s32.totalorder %v6989_v26, 0  ;;  %v2494_v30 = vsel %vm2490_vm13, %v2474_v34, %v2477_v8 }
  0xfe   :  { %v2511_v59 = vmul.u32 %v2509_v29, %v2507_v20  ;;  %v2515_v31 = vshll.u32 %v2512_v22, 16  ;;  %v2496_v21 = vsel %vm2492_vm0, %v2480_v54, %v2495_v47  ;;  %v2514_v1 = vmul.u32 %v2510_v10, %v2508_v15 }
  0xff   :  { %v2405_v46 = vsub.s32 %v2401_v3, %v2404_v63  ;;  %v2535_v24 = vmul.u32 %v2531_v33, %v2508_v15  ;;  %v2517_v27 = vshll.u32 %v2513_v5, 16  ;;  %v2537_v19 = vshll.u32 %v2534_v25, 16 }
 0x100   :  { %vm2519_vm4 = vc.u32 %v2511_v59, %v2515_v31  ;;  %v2521_v49 = vadd.s32 %v2515_v31, %v2511_v59  ;;  %v2427_v44 = vsub.s32 4, %v2403_v58  ;;  %v12903_v18 = vmov 0  }
 0x101   :  { %vm2406_vm5 = vcmp.lt.s32.totalorder %v2405_v46, 0  ;;  %v2407_v16 = vsub.s32 0, %v2405_v46  ;;  %v2520_v13 = vsel %vm2519_vm4, 1, %v12903_v18  ;;  %v2516_v2 = vshrl.u32 %v2512_v22, 16 }
 0x102   :  { %v2522_v57 = vadd.s32 %v2520_v13, %v2514_v1  ;;  %vm2523_vm6 = vc.u32 %v2521_v49, %v2517_v27  ;;  %v2533_v8 = vmul.u32 %v2531_v33, %v2507_v20  ;;  %v2536_v34 = vmul.u32 %v2532_v48, %v2508_v15 }
 0x103   :  { %v2408_v29 = vsel %vm2406_vm5, %v2407_v16, %v2405_v46  ;;  %v2524_v3 = vsel %vm2523_vm6, 1, %v12903_v18  ;;  %v2539_v54 = vshll.u32 %v2535_v24, 16  ;;  %v2428_v59 = vsel %vm2305_vm3, %v2427_v44, %v2403_v58 }
 0x104   :  { %v2409_v10 = vclz %v2408_v29  ;;  %v2526_v47 = vadd.s32 %v2524_v3, %v2522_v57  ;;  %vm2541_vm7 = vc.u32 %v2533_v8, %v2537_v19  ;;  %v2543_v63 = vadd.s32 %v2537_v19, %v2533_v8 }
 0x105   :  { %v2497_v31 = vsel %vm2491_vm1, %v2494_v30, %v2496_v21  ;;  %v2518_v7 = vshrl.u32 %v2513_v5, 16  ;;  %v2542_v1 = vsel %vm2541_vm7, 1, %v12903_v18  ;;  %v12904_v13 = vand.u32 2147483647, %v6989_v26 }
 0x106   :  { %v6488_v49 = vadd.s32 4294967294, %v2409_v10  ;;  %v2527_v27 = vadd.s32 %v2526_v47, %v2516_v2  ;;  %v2544_v16 = vadd.s32 %v2542_v1, %v2536_v34  ;;  %vm2545_vm8 = vc.u32 %v2543_v63, %v2539_v54 }
 0x107   :  { %vm7229_vm9 = vcmp.le.f32.partialorder %v12904_v13, 0.7853982  ;;  %v2397_v57 = vadd.s32 %v7159_v45, %v7157_v40  ;;  %v2546_v44 = vsel %vm2545_vm8, 1, %v12903_v18  ;;  %v12750_v55 = vand.u32 2147483647, %v6993_v62 }
 0x108   :  { %vm6489_vm10 = vcmp.lt.s32.totalorder %v6488_v49, 0  ;;  %v7237_v21 = vadd.s32 %v2527_v27, %v2518_v7  ;;  %v2538_v20 = vshrl.u32 %v2534_v25, 16  ;;  %v2548_v2 = vadd.s32 %v2546_v44, %v2544_v16 }
 0x109   :  { %v2412_v15 = vsel %vm6489_vm10, 0, %v6488_v49  ;;  %v2430_v58 = vsel %vm7229_vm9, 0, %v2428_v59  ;;  %v7241_v33 = vadd.s32 %v2543_v63, %v2539_v54  ;;  %v2551_v22 = vmul.u32 %v7184_v6, %v2497_v31 }
 0x10a   :  { %v2413_v5 = vsub.s32 32, %v2412_v15  ;;  %v2417_v30 = vsub.s32 4294967266, %v2412_v15  ;;  %v2540_v40 = vshrl.u32 %v2535_v24, 16  ;;  %v2549_v45 = vadd.s32 %v2548_v2, %v2538_v20 }
 0x10b   :  { %v2414_v19 = vshll.u32 %v2405_v46, %v2412_v15  ;;  %vm2553_vm11 = vc.u32 %v7237_v21, %v7241_v33  ;;  %v2620_v7 = vand.u32 8388607, %v12750_v55  ;;  %v12907_v25 = vmov 2475754826  }
 0x10c   :  { %v2631_v8 = vshrl.u32 %v12907_v25, %v7071_v11  ;;  %v2415_v29 = vshrl.u32 %v2397_v57, %v2413_v5  ;;  %v2418_v3 = vadd.s32 127, %v2417_v30  ;;  %v2550_v34 = vadd.s32 %v2549_v45, %v2540_v40 }
 0x10d   :  { %v2634_v6 = vshrl.u32 %v12897_v28, %v7071_v11  ;;  %v2633_v24 = vshll.u32 %v12907_v25, %v7050_v37  ;;  %v2636_v46 = vshll.u32 %v12897_v28, %v7050_v37  ;;  %v2637_v54 = vshrl.u32 %v12898_v4, %v7071_v11 }
 0x10e   :  { %v2640_v10 = vshrl.u32 %v12899_v9, %v7071_v11  ;;  %v2416_v47 = vor.u32 %v2415_v29, %v2414_v19  ;;  %v2419_v63 = vshll.u32 %v2418_v3, 23  ;;  %v2554_v59 = vadd.s32 1, %v2550_v34 }
 0x10f   :  { %v2639_v31 = vshll.u32 %v12898_v4, %v7050_v37  ;;  %v7262_v1 = vor.u32 %v2634_v6, %v2633_v24  ;;  %v2638_v49 = vor.u32 %v2637_v54, %v2636_v46  ;;  %v2642_v27 = vshll.u32 %v12899_v9, %v7050_v37 }
 0x110   :  { %v2643_v16 = vshrl.u32 %v12900_v38, %v7071_v11  ;;  %v7269_v13 = vand.u32 31, %v7189_v52  ;;  %v2420_v57 = vor.u32 4788187, %v2419_v63  ;;  %v2555_v44 = vsel %vm2553_vm11, %v2554_v59, %v2550_v34 }
 0x111   :  { %v2641_v20 = vor.u32 %v2640_v10, %v2639_v31  ;;  %v2447_v2 = vadd.s32 3, %v2430_v58  ;;  %v2556_v15 = vadd.s32 %v2555_v44, %v2551_v22  ;;  %v12908_v5 = vmov 683565275  }
 0x112   :  { %v2630_v30 = vshll.u32 %v12908_v5, %v7050_v37  ;;  %v2644_v40 = vor.u32 %v2643_v16, %v2642_v27  ;;  %v2421_v45 = vand.u32 2147483647, %v2420_v57  ;;  %v2423_v19 = vcvt.s32.f32 %v2416_v47 }
 0x113   :  { %v2621_v29 = vor.u32 8388608, %v2620_v7  ;;  %vm2645_vm12 = vcmp.lt.s32.totalorder %v7068_v61, 1  ;;  %v2557_v3 = vadd.s32 536870912, %v2556_v15  ;;  %vm2648_vm13 = vcmp.lt.s32.totalorder %v7068_v61, 4 }
 0x114   :  { %v2632_v52 = vor.u32 %v2631_v8, %v2630_v30  ;;  %v2657_v34 = vsel %vm2645_vm12, %v7262_v1, %v2638_v49  ;;  %v2424_v6 = vmul.f32 %v2423_v19, %v2421_v45  ;;  %vm2647_vm14 = vcmp.lt.s32.totalorder %v7068_v61, 3 }
 0x115   :  { %v2654_v37 = vsel %vm2648_vm13, %v2641_v20, 920167782  ;;  %v2658_v58 = vsel %vm2648_vm13, %v2644_v40, 1326507024  ;;  %v7287_v22 = vshrl.u32 %v7213_v17, 5  ;;  %v2558_v7 = vshrl.u32 %v2557_v3, 30 }
 0x116   :  { %vm2646_vm15 = vcmp.lt.s32.totalorder %v7068_v61, 2  ;;  %v2659_v8 = vsel %vm2647_vm14, %v2641_v20, %v2658_v58  ;;  %v7293_v24 = vand.u32 31, %v7213_v17  ;;  %v2425_v46 = vxor.u32 2147483648, %v2424_v6 }
 0x117   :  { %12909 = vst [vmem:[#allocation16_spill] sm:$0xff] %v7287_v22  ;;  %v2660_v54 = vsel %vm2646_vm15, %v2657_v34, %v2659_v8  ;;  %v7297_v10 = vshll.u32 %v2621_v29, 8  ;;  %v2559_v47 = vshll.u32 %v2558_v7, 30  ;;  %v2653_v63 = vsel %vm2645_vm12, %v2632_v52, %v7262_v1 }
 0x118   :  { %v2655_v59 = vsel %vm2647_vm14, %v2638_v49, %v2654_v37  ;;  %v2665_v31 = vshrl.u32 %v2660_v54, 16  ;;  %v2426_v27 = vsel %vm2305_vm3, %v2425_v46, %v2424_v6  ;;  %v7306_v17 = vand.u32 3, %v2447_v2 }
 0x119   :  { %vm2460_vm0 = vcmp.lt.s32.totalorder %v6991_v56, 0  ;;  %v2662_v16 = vand.u32 65535, %v7297_v10  ;;  %v7313_v57 = vsel %vm7229_vm9, %v6989_v26, %v2426_v27  ;;  %v7315_v44 = vsub.s32 %v2556_v15, %v2559_v47 }
 0x11a   :  { %v2629_v20 = vshrl.u32 %v12908_v5, %v7071_v11  ;;  %v2664_v30 = vand.u32 65535, %v2660_v54  ;;  %v2431_v40 = vmul.f32 %v7313_v57, %v7313_v57  ;;  %v2552_v2 = vadd.s32 %v7241_v33, %v7237_v21 }
 0x11b   :  { %v7325_v45 = vsel %vm2646_vm15, %v2653_v63, %v2655_v59  ;;  %v7327_v19 = vmul.u32 %v2665_v31, %v2662_v16  ;;  %vm2561_vm1 = vcmp.lt.s32.totalorder %v7315_v44, 0  ;;  %v2562_v48 = vsub.s32 0, %v7315_v44 }
 0x11c   :  { %v2650_v11 = vsel %vm2648_vm13, %v2638_v49, 2102212464  ;;  %v2663_v15 = vshrl.u32 %v7297_v10, 16  ;;  %v2432_v29 = vmul.f32 -0.001358992, %v2431_v40  ;;  %v2582_v34 = vsub.s32 4, %v2558_v7 }
 0x11d   :  { %v2439_v3 = vmul.f32 -0.00019511016, %v2431_v40  ;;  %v2670_v21 = vshll.u32 %v7327_v19, 16  ;;  %v2563_v33 = vsel %vm2561_vm1, %v2562_v48, %v7315_v44  ;;  %v2666_v6 = vmul.u32 %v2664_v30, %v2662_v16 }
 0x11e   :  { %v7336_v37 = vmul.u32 %v2664_v30, %v2663_v15  ;;  %v2687_v58 = vshrl.u32 %v7325_v45, 16  ;;  %v2433_v8 = vadd.f32 0.041655596, %v2432_v29  ;;  %v2564_v54 = vclz %v2563_v33 }
 0x11f   :  { %v2440_v46 = vadd.f32 0.008332121, %v2439_v3  ;;  %v2649_v49 = vsel %vm2645_vm12, %v2629_v20, %v2632_v52  ;;  %v2651_v47 = vsel %vm2647_vm14, %v7262_v1, %v2650_v11  ;;  %v2669_v63 = vmul.u32 %v2665_v31, %v2663_v15 }
 0x120   :  { %vm2674_vm2 = vc.u32 %v2666_v6, %v2670_v21  ;;  %v2686_v59 = vand.u32 65535, %v7325_v45  ;;  %v2434_v27 = vmul.f32 %v2433_v8, %v2431_v40  ;;  %v6491_v30 = vadd.s32 4294967294, %v2564_v54 }
 0x121   :  { %v2441_v48 = vmul.f32 %v2440_v46, %v2431_v40  ;;  %v2675_v55 = vsel %vm2674_vm2, 1, %v12903_v18  ;;  %v12910_v29 = vand.u32 2147483647, %v6991_v56  ;;  %v7354_v52 = vsel %vm2460_vm0, %v2582_v34, %v2558_v7 }
 0x122   :  { %v2672_v1 = vshll.u32 %v7336_v37, 16  ;;  %v2676_v31 = vadd.s32 %v2670_v21, %v2666_v6  ;;  %v7357_v20 = vmul.u32 %v2687_v58, %v2662_v16  ;;  %v2435_v45 = vadd.f32 -0.4999988, %v2434_v27 }
 0x123   :  { %vm7348_vm3 = vcmp.le.f32.partialorder %v12910_v29, 0.7853982  ;;  %v2442_v11 = vadd.f32 -0.16666654, %v2441_v48  ;;  %vm6492_vm4 = vcmp.lt.s32.totalorder %v6491_v30, 0  ;;  %v2677_v33 = vadd.s32 %v2675_v55, %v2669_v63 }
 0x124   :  { %vm2004_vm5 = vcmp.gt.s32.totalorder %v7118_v39, 0  ;;  %vm2159_vm6 = vcmp.gt.s32.totalorder %v7121_v51, 0  ;;  %vm2450_vm7 = vcmp.eq.s32.totalorder %v7306_v17, 0  ;;  %vm2453_vm8 = vcmp.eq.s32.totalorder %v7306_v17, 2 }
 0x125   :  { %v2567_v8 = vsel %vm6492_vm4, 0, %v6491_v30  ;;  %vm2678_vm9 = vc.u32 %v2676_v31, %v2672_v1  ;;  %v2690_v7 = vmul.u32 %v2686_v59, %v2663_v15  ;;  %v2692_v34 = vshll.u32 %v7357_v20, 16 }
 0x126   :  { %v2436_v21 = vmul.f32 %v2435_v45, %v2431_v40  ;;  %v2443_v6 = vmul.f32 %v2442_v11, %v2431_v40  ;;  %vm2449_vm10 = vcmp.lt.s32.totalorder %v7306_v17, 2  ;;  %v2568_v46 = vsub.s32 32, %v2567_v8 }
 0x127   :  { %v2671_v55 = vshrl.u32 %v7327_v19, 16  ;;  %vm2446_vm11 = vweird.f32 %v6989_v26  ;;  %v2569_v54 = vshll.u32 %v7315_v44, %v2567_v8  ;;  %v2572_v63 = vsub.s32 4294967266, %v2567_v8 }
 0x128   :  { %v2679_v27 = vsel %vm2678_vm9, 1, %v12903_v18  ;;  %v2688_v48 = vmul.u32 %v2686_v59, %v2662_v16  ;;  %v2437_v30 = vadd.f32 1.0, %v2436_v21  ;;  %v2444_v29 = vadd.f32 1.0, %v2443_v6 }
 0x129   :  { %v2570_v1 = vshrl.u32 %v2552_v2, %v2568_v46  ;;  %v2681_v31 = vadd.s32 %v2679_v27, %v2677_v33  ;;  %v2573_v50 = vadd.s32 127, %v2572_v63  ;;  %v2694_v45 = vshll.u32 %v2690_v7, 16 }
 0x12a   :  { %vm2696_vm12 = vc.u32 %v2688_v48, %v2692_v34  ;;  %v2698_v40 = vadd.s32 %v2692_v34, %v2688_v48  ;;  %v2445_v11 = vmul.f32 %v2444_v29, %v7313_v57  ;;  %v2454_v53 = vxor.u32 2147483648, %v2437_v30 }
 0x12b   :  { %v2682_v19 = vadd.s32 %v2681_v31, %v2671_v55  ;;  %v2691_v0 = vmul.u32 %v2687_v58, %v2663_v15  ;;  %v2571_v35 = vor.u32 %v2570_v1, %v2569_v54  ;;  %v2574_v22 = vshll.u32 %v2573_v50, 23 }
 0x12c   :  { %v2697_v44 = vsel %vm2696_vm12, 1, %v12903_v18  ;;  %vm2700_vm13 = vc.u32 %v2698_v40, %v2694_v45  ;;  %v2451_v8 = vxor.u32 2147483648, %v2445_v11  ;;  %v2585_v16 = vsel %vm7348_vm3, 0, %v7354_v52 }
 0x12d   :  { %v2652_v2 = vsel %vm2646_vm15, %v2649_v49, %v2651_v47  ;;  %v2673_v59 = vshrl.u32 %v7336_v37, 16  ;;  %v2575_v33 = vor.u32 4788187, %v2574_v22  ;;  %v2693_v57 = vshrl.u32 %v7357_v20, 16 }
 0x12e   :  { %v2699_v34 = vadd.s32 %v2697_v44, %v2691_v0  ;;  %v2701_v15 = vsel %vm2700_vm13, 1, %v12903_v18  ;;  %v2452_v50 = vsel %vm2450_vm7, %v2437_v30, %v2451_v8  ;;  %v2455_v58 = vsel %vm2453_vm8, %v2454_v53, %v2445_v11 }
 0x12f   :  { %v7383_v21 = vadd.s32 %v2682_v19, %v2673_v59  ;;  %v2768_v52 = vand.u32 2147483647, %v6995_v23  ;;  %v2456_v61 = vsel %vm2449_vm10, %v2452_v50, %v2455_v58  ;;  %v2576_v37 = vand.u32 2147483647, %v2575_v33 }
 0x130   :  { %v2578_v22 = vcvt.s32.f32 %v2571_v35  ;;  %v2703_v49 = vadd.s32 %v2701_v15, %v2699_v34  ;;  %v7391_v0 = vsel %vm2004_vm5, %v7118_v39, 0  ;;  %v7396_v47 = vsel %vm2159_vm6, %v7121_v51, 0 }
 0x131   :  { %v2457_v53 = vsel %vm2446_vm11, nan, %v2456_v61  ;;  %v7400_v20 = vadd.s32 %v2698_v40, %v2694_v45  ;;  %v2695_v6 = vshrl.u32 %v2690_v7, 16  ;;  %v2706_v46 = vmul.u32 %v7297_v10, %v2652_v2 }
 0x132   :  { %2976 = vmatpush.msra.mxu0 %v2457_v53  ;;  %v2579_v17 = vmul.f32 %v2578_v22, %v2576_v37  ;;  %v2704_v35 = vadd.s32 %v2703_v49, %v2693_v57  ;;  %v2602_v55 = vadd.s32 3, %v2585_v16  ;;  %v2775_v39 = vand.u32 8388607, %v2768_v52 }
 0x133   :  { %vm2708_vm14 = vc.u32 %v7383_v21, %v7400_v20  ;;  %v2789_v51 = vshrl.u32 %v12897_v28, %v7076_v41  ;;  %v2786_v63 = vshrl.u32 %v12907_v25, %v7076_v41  ;;  %v2792_v7 = vshrl.u32 %v12898_v4, %v7076_v41 }
 0x134   :  { %v2580_v26 = vxor.u32 2147483648, %v2579_v17  ;;  %v2705_v54 = vadd.s32 %v2704_v35, %v2695_v6  ;;  %v2788_v10 = vshll.u32 %v12907_v25, %v7052_v60  ;;  %v2791_v27 = vshll.u32 %v12897_v28, %v7052_v60 }
 0x135   :  { %v2794_v48 = vshll.u32 %v12898_v4, %v7052_v60  ;;  %v2795_v30 = vshrl.u32 %v12899_v9, %v7076_v41  ;;  %v2797_v31 = vshll.u32 %v12899_v9, %v7052_v60  ;;  %v2798_v45 = vshrl.u32 %v12900_v38, %v7076_v41 }
 0x136   :  { %v2581_v29 = vsel %vm2460_vm0, %v2580_v26, %v2579_v17  ;;  %v2709_v1 = vadd.s32 1, %v2705_v54  ;;  %v2785_v11 = vshll.u32 %v12908_v5, %v7052_v60  ;;  %v7432_v19 = vor.u32 %v2789_v51, %v2788_v10 }
 0x137   :  { %v2584_v40 = vsel %vm7348_vm3, %v6991_v56, %v2581_v29  ;;  %v7434_v44 = vor.u32 %v2792_v7, %v2791_v27  ;;  %v2796_v2 = vor.u32 %v2795_v30, %v2794_v48  ;;  %v2799_v59 = vor.u32 %v2798_v45, %v2797_v31 }
 0x138   :  { %v2586_v8 = vmul.f32 %v2584_v40, %v2584_v40  ;;  %v2710_v16 = vsel %vm2708_vm14, %v2709_v1, %v2705_v54  ;;  %v7439_v33 = vand.u32 3, %v2602_v55  ;;  %v2776_v34 = vor.u32 8388608, %v2775_v39 }
 0x139   :  { %v2711_v57 = vadd.s32 %v2710_v16, %v2706_v46  ;;  %v2787_v3 = vor.u32 %v2786_v63, %v2785_v11  ;;  %vm2800_vm15 = vcmp.lt.s32.totalorder %v7073_v12, 1  ;;  %vm2803_vm0 = vcmp.lt.s32.totalorder %v7073_v12, 4 }
 0x13a   :  { %v2587_v15 = vmul.f32 -0.001358992, %v2586_v8  ;;  %v2594_v50 = vmul.f32 -0.00019511016, %v2586_v8  ;;  %vm2802_vm1 = vcmp.lt.s32.totalorder %v7073_v12, 3  ;;  %v2812_v58 = vsel %vm2800_vm15, %v7432_v19, %v7434_v44 }
 0x13b   :  { %v2712_v60 = vadd.s32 536870912, %v2711_v57  ;;  %v2813_v61 = vsel %vm2803_vm0, %v2799_v59, 1326507024  ;;  %v2809_v49 = vsel %vm2803_vm0, %v2796_v2, 920167782  ;;  %vm2801_vm2 = vcmp.lt.s32.totalorder %v7073_v12, 2 }
 0x13c   :  { %v2588_v37 = vadd.f32 0.041655596, %v2587_v15  ;;  %v2595_v22 = vadd.f32 0.008332121, %v2594_v50  ;;  %v2814_v17 = vsel %vm2802_vm1, %v2796_v2, %v2813_v61  ;;  %v7455_v6 = vshll.u32 %v2776_v34, 8 }
 0x13d   :  { %v2713_v53 = vshrl.u32 %v2712_v60, 30  ;;  %v7458_v35 = vadd.s32 4294967169, %v7197_v42  ;;  %v2815_v39 = vsel %vm2801_vm2, %v2812_v58, %v2814_v17  ;;  %vm2615_vm3 = vcmp.lt.s32.totalorder %v6993_v62, 0 }
 0x13e   :  { %v2589_v46 = vmul.f32 %v2588_v37, %v2586_v8  ;;  %v2596_v55 = vmul.f32 %v2595_v22, %v2586_v8  ;;  %v2808_v26 = vsel %vm2800_vm15, %v2787_v3, %v7432_v19  ;;  %v2810_v54 = vsel %vm2802_vm1, %v7434_v44, %v2809_v49 }
 0x13f   :  { %v2714_v51 = vshll.u32 %v2713_v53, 30  ;;  %v2819_v42 = vand.u32 65535, %v2815_v39  ;;  %v2820_v10 = vshrl.u32 %v2815_v39, 16  ;;  %vm2605_vm4 = vcmp.eq.s32.totalorder %v7439_v33, 0 }
 0x140   :  { %v2590_v63 = vadd.f32 -0.4999988, %v2589_v46  ;;  %v2597_v7 = vadd.f32 -0.16666654, %v2596_v55  ;;  %vm2608_vm5 = vcmp.eq.s32.totalorder %v7439_v33, 2  ;;  %v2707_v27 = vadd.s32 %v7400_v20, %v7383_v21 }
 0x141   :  { %v7473_v48 = vsub.s32 %v2711_v57, %v2714_v51  ;;  %v2817_v30 = vand.u32 65535, %v7455_v6  ;;  %vm2604_vm6 = vcmp.lt.s32.totalorder %v7439_v33, 2  ;;  %v2811_v31 = vsel %vm2801_vm2, %v2808_v26, %v2810_v54 }
 0x142   :  { %v2591_v29 = vmul.f32 %v2590_v63, %v2586_v8  ;;  %v2598_v1 = vmul.f32 %v2597_v7, %v2586_v8  ;;  %v2818_v45 = vshrl.u32 %v7455_v6, 16  ;;  %vm2601_vm7 = vweird.f32 %v6991_v56 }
 0x143   :  { %vm2716_vm8 = vcmp.lt.s32.totalorder %v7473_v48, 0  ;;  %v2717_v11 = vsub.s32 0, %v7473_v48  ;;  %v2737_v21 = vsub.s32 4, %v2713_v53  ;;  %v2822_v20 = vmul.u32 %v2820_v10, %v2817_v30 }
 0x144   :  { %v2592_v16 = vadd.f32 1.0, %v2591_v29  ;;  %v2599_v2 = vadd.f32 1.0, %v2598_v1  ;;  %v2784_v8 = vshrl.u32 %v12908_v5, %v7076_v41  ;;  %v2823_v59 = vmul.u32 %v2819_v42, %v2818_v45 }
 0x145   :  { %v2718_v57 = vsel %vm2716_vm8, %v2717_v11, %v7473_v48  ;;  %v2825_v34 = vshll.u32 %v2822_v20, 16  ;;  %v2841_v15 = vand.u32 65535, %v2811_v31  ;;  %v2842_v50 = vshrl.u32 %v2811_v31, 16 }
 0x146   :  { %v2600_v60 = vmul.f32 %v2599_v2, %v2584_v40  ;;  %v2609_v58 = vxor.u32 2147483648, %v2592_v16  ;;  %v2719_v61 = vclz %v2718_v57  ;;  %v2821_v37 = vmul.u32 %v2819_v42, %v2817_v30 }
 0x147   :  { %v2738_v22 = vsel %vm2615_vm3, %v2737_v21, %v2713_v53  ;;  %v2804_v49 = vsel %vm2800_vm15, %v2784_v8, %v2787_v3  ;;  %v2805_v41 = vsel %vm2803_vm0, %v7434_v44, 2102212464  ;;  %v2824_v17 = vmul.u32 %v2820_v10, %v2818_v45 }
 0x148   :  { %v2606_v46 = vxor.u32 2147483648, %v2600_v60  ;;  %v12913_v55 = vand.u32 2147483647, %v6993_v62  ;;  %v6494_v40 = vadd.s32 4294967294, %v2719_v61  ;;  %v2827_v51 = vshll.u32 %v2823_v59, 16 }
 0x149   :  { %vm2829_vm10 = vc.u32 %v2821_v37, %v2825_v34  ;;  %v2610_v53 = vsel %vm2608_vm5, %v2609_v58, %v2600_v60  ;;  %v2831_v26 = vadd.s32 %v2825_v34, %v2821_v37  ;;  %v2844_v54 = vmul.u32 %v2842_v50, %v2817_v30 }
 0x14a   :  { %vm7495_vm9 = vcmp.le.f32.partialorder %v12913_v55, 0.7853982  ;;  %v2830_v3 = vsel %vm2829_vm10, 1, %v12903_v18  ;;  %v2607_v44 = vsel %vm2605_vm4, %v2592_v16, %v2606_v46  ;;  %vm6495_vm11 = vcmp.lt.s32.totalorder %v6494_v40, 0 }
 0x14b   :  { %v2832_v63 = vadd.s32 %v2830_v3, %v2824_v17  ;;  %v2845_v7 = vmul.u32 %v2841_v15, %v2818_v45  ;;  %v2611_v42 = vsel %vm2604_vm6, %v2607_v44, %v2610_v53  ;;  %v2722_v10 = vsel %vm6495_vm11, 0, %v6494_v40 }
 0x14c   :  { %vm2833_vm12 = vc.u32 %v2831_v26, %v2827_v51  ;;  %v2847_v29 = vshll.u32 %v2844_v54, 16  ;;  %v2612_v1 = vsel %vm2601_vm7, nan, %v2611_v42  ;;  %v2723_v31 = vsub.s32 32, %v2722_v10 }
 0x14d   :  { %v2727_v11 = vsub.s32 4294967266, %v2722_v10  ;;  %v2843_v21 = vmul.u32 %v2841_v15, %v2817_v30  ;;  %3005 = vmatpush.msra.mxu1 %v2612_v1  ;;  %v2724_v2 = vshll.u32 %v7473_v48, %v2722_v10  ;;  %v2826_v8 = vshrl.u32 %v2822_v20, 16 }
 0x14e   :  { %v2834_v16 = vsel %vm2833_vm12, 1, %v12903_v18  ;;  %v2846_v57 = vmul.u32 %v2842_v50, %v2818_v45  ;;  %v2725_v34 = vshrl.u32 %v2707_v27, %v2723_v31  ;;  %v2806_v58 = vsel %vm2802_vm1, %v7432_v19, %v2805_v41 }
 0x14f   :  { %v2728_v60 = vadd.s32 127, %v2727_v11  ;;  %v2836_v33 = vadd.s32 %v2834_v16, %v2832_v63  ;;  %vm2851_vm13 = vc.u32 %v2843_v21, %v2847_v29  ;;  %v2849_v56 = vshll.u32 %v2845_v7, 16 }
 0x150   :  { %v2852_v61 = vsel %vm2851_vm13, 1, %v12903_v18  ;;  %v2853_v37 = vadd.s32 %v2847_v29, %v2843_v21  ;;  %v2726_v30 = vor.u32 %v2725_v34, %v2724_v2  ;;  %v7515_v20 = vsub.s32 32, %v7269_v13 }
 0x151   :  { %v2729_v15 = vshll.u32 %v2728_v60, 23  ;;  %v2837_v17 = vadd.s32 %v2836_v33, %v2826_v8  ;;  %v2854_v48 = vadd.s32 %v2852_v61, %v2846_v57  ;;  %v2740_v27 = vsel %vm7495_vm9, 0, %v2738_v22 }
 0x152   :  { %v2828_v45 = vshrl.u32 %v2823_v59, 16  ;;  %vm2855_vm14 = vc.u32 %v2853_v37, %v2849_v56  ;;  %v2807_v19 = vsel %vm2801_vm2, %v2804_v49, %v2806_v58  ;;  %v1683_v46 = vand.u32 2147483647, %v7033_v43 }
 0x153   :  { %v2730_v50 = vor.u32 4788187, %v2729_v15  ;;  %v2856_v41 = vsel %vm2855_vm14, 1, %v12903_v18  ;;  %v7524_v55 = vadd.s32 4294967169, %v7201_v14  ;;  %v2848_v51 = vshrl.u32 %v2844_v54, 16 }
 0x154   :  { %v7526_v40 = vadd.s32 %v2837_v17, %v2828_v45  ;;  %v2858_v53 = vadd.s32 %v2856_v41, %v2854_v48  ;;  %v7529_v3 = vsub.s32 32, %v7293_v24  ;;  %v2733_v22 = vcvt.s32.f32 %v2726_v30 }
 0x155   :  { %v2731_v59 = vand.u32 2147483647, %v2730_v50  ;;  %v2757_v26 = vadd.s32 3, %v2740_v27  ;;  %v2850_v44 = vshrl.u32 %v2845_v7, 16  ;;  %v7531_v12 = vadd.s32 %v2853_v37, %v2849_v56 }
 0x156   :  { %v2859_v49 = vadd.s32 %v2858_v53, %v2848_v51  ;;  %v2861_v63 = vmul.u32 %v7455_v6, %v2807_v19  ;;  %v1690_v14 = vand.u32 8388607, %v1683_v46  ;;  %v1704_v54 = vshrl.u32 %v12897_v28, %v7515_v20 }
 0x157   :  { %v2734_v42 = vmul.f32 %v2733_v22, %v2731_v59  ;;  %v1707_v10 = vshrl.u32 %v12898_v4, %v7515_v20  ;;  %vm2863_vm15 = vc.u32 %v7526_v40, %v7531_v12  ;;  %v1709_v7 = vshll.u32 %v12898_v4, %v7269_v13 }
 0x158   :  { %v2860_v29 = vadd.s32 %v2859_v49, %v2850_v44  ;;  %v1710_v6 = vshrl.u32 %v12899_v9, %v7515_v20  ;;  %v1701_v31 = vshrl.u32 %v12907_v25, %v7515_v20  ;;  %v1703_v11 = vshll.u32 %v12907_v25, %v7269_v13 }
 0x159   :  { %v2735_v1 = vxor.u32 2147483648, %v2734_v42  ;;  %v1706_v21 = vshll.u32 %v12897_v28, %v7269_v13  ;;  %v1712_v16 = vshll.u32 %v12899_v9, %v7269_v13  ;;  %v1713_v57 = vshrl.u32 %v12900_v38, %v7515_v20 }
 0x15a   :  { %v2864_v2 = vadd.s32 1, %v2860_v29  ;;  %v1711_v8 = vor.u32 %v1710_v6, %v1709_v7  ;;  %v1700_v60 = vshll.u32 %v12908_v5, %v7269_v13  ;;  %v7560_v33 = vor.u32 %v1704_v54, %v1703_v11 }
 0x15b   :  { %v2736_v34 = vsel %vm2615_vm3, %v2735_v1, %v2734_v42  ;;  %v7562_v58 = vor.u32 %v1707_v10, %v1706_v21  ;;  %v1691_v37 = vor.u32 8388608, %v1690_v14  ;;  %v1714_v30 = vor.u32 %v1713_v57, %v1712_v16 }
 0x15c   :  { %v7567_v56 = vsel %vm7495_vm9, %v6993_v62, %v2736_v34  ;;  %v2865_v61 = vsel %vm2863_vm15, %v2864_v2, %v2860_v29  ;;  %v7574_v13 = vor.u32 %v1701_v31, %v1700_v60  ;;  %vm1718_vm0 = vcmp.lt.s32.totalorder %v7208_v32, 4 }
 0x15d   :  { %v2741_v15 = vmul.f32 %v7567_v56, %v7567_v56  ;;  %v2866_v17 = vadd.s32 %v2865_v61, %v2861_v63  ;;  %vm1715_vm1 = vcmp.lt.s32.totalorder %v7208_v32, 1  ;;  %vm1717_vm2 = vcmp.lt.s32.totalorder %v7208_v32, 3 }
 0x15e   :  { %v1724_v39 = vsel %vm1718_vm0, %v1711_v8, 920167782  ;;  %v1728_v48 = vsel %vm1718_vm0, %v1714_v30, 1326507024  ;;  %v1727_v19 = vsel %vm1715_vm1, %v7560_v33, %v7562_v58  ;;  %v7588_v41 = vshrl.u32 %v7391_v0, 5 }
 0x15f   :  { %v2742_v27 = vmul.f32 -0.001358992, %v2741_v15  ;;  %v2749_v45 = vmul.f32 -0.00019511016, %v2741_v15  ;;  %v2867_v50 = vadd.s32 536870912, %v2866_v17  ;;  %v7591_v51 = vand.u32 31, %v7391_v0 }
 0x160   :  { %v1729_v53 = vsel %vm1717_vm2, %v1711_v8, %v1728_v48  ;;  %v7595_v59 = vshll.u32 %v1691_v37, 8  ;;  %vm1716_vm3 = vcmp.lt.s32.totalorder %v7208_v32, 2  ;;  %v7600_v63 = vand.u32 3, %v2757_v26 }
 0x161   :  { %v2743_v22 = vadd.f32 0.041655596, %v2742_v27  ;;  %v2750_v44 = vadd.f32 0.008332121, %v2749_v45  ;;  %v7597_v49 = vshrl.u32 %v2867_v50, 30  ;;  %v1723_v42 = vsel %vm1715_vm1, %v7574_v13, %v7560_v33 }
 0x162   :  { %v1725_v0 = vsel %vm1717_vm2, %v7562_v58, %v1724_v39  ;;  %v1730_v14 = vsel %vm1716_vm3, %v1727_v19, %v1729_v53  ;;  %v7612_v54 = vshrl.u32 %v7396_v47, 5  ;;  %v1732_v7 = vand.u32 65535, %v7595_v59 }
 0x163   :  { %v2744_v10 = vmul.f32 %v2743_v22, %v2741_v15  ;;  %v2751_v29 = vmul.f32 %v2750_v44, %v2741_v15  ;;  %v2869_v26 = vshll.u32 %v7597_v49, 30  ;;  %v7617_v6 = vshrl.u32 %v7595_v59, 16 }
 0x164   :  { %v1734_v1 = vand.u32 65535, %v1730_v14  ;;  %v1735_v31 = vshrl.u32 %v1730_v14, 16  ;;  %v1726_v8 = vsel %vm1716_vm3, %v1723_v42, %v1725_v0  ;;  %vm2760_vm4 = vcmp.eq.s32.totalorder %v7600_v63, 0 }
 0x165   :  { %v2745_v11 = vadd.f32 -0.4999988, %v2744_v10  ;;  %v2752_v21 = vadd.f32 -0.16666654, %v2751_v29  ;;  %v7619_v2 = vsub.s32 %v2866_v17, %v2869_v26  ;;  %vm2763_vm5 = vcmp.eq.s32.totalorder %v7600_v63, 2 }
 0x166   :  { %v1699_v16 = vshrl.u32 %v12908_v5, %v7515_v20  ;;  %v1737_v57 = vmul.u32 %v1735_v31, %v1732_v7  ;;  %v7628_v34 = vmul.u32 %v1734_v1, %v7617_v6  ;;  %vm2759_vm6 = vcmp.lt.s32.totalorder %v7600_v63, 2 }
 0x167   :  { %v2746_v60 = vmul.f32 %v2745_v11, %v2741_v15  ;;  %v2753_v61 = vmul.f32 %v2752_v21, %v2741_v15  ;;  %vm2871_vm7 = vcmp.lt.s32.totalorder %v7619_v2, 0  ;;  %v2872_v37 = vsub.s32 0, %v7619_v2 }
 0x168   :  { %vm2756_vm8 = vweird.f32 %v6993_v62  ;;  %vm2770_vm9 = vcmp.lt.s32.totalorder %v6995_v23, 0  ;;  %v2862_v30 = vadd.s32 %v7531_v12, %v7526_v40  ;;  %v1736_v20 = vmul.u32 %v1734_v1, %v1732_v7 }
 0x169   :  { %v1740_v17 = vshll.u32 %v1737_v57, 16  ;;  %v1756_v39 = vand.u32 65535, %v1726_v8  ;;  %v2747_v48 = vadd.f32 1.0, %v2746_v60  ;;  %v2754_v27 = vadd.f32 1.0, %v2753_v61 }
 0x16a   :  { %v2873_v15 = vsel %vm2871_vm7, %v2872_v37, %v7619_v2  ;;  %v1757_v45 = vshrl.u32 %v1726_v8, 16  ;;  %v1739_v19 = vmul.u32 %v1735_v31, %v7617_v6  ;;  %v1742_v53 = vshll.u32 %v7628_v34, 16 }
 0x16b   :  { %v2874_v50 = vclz %v2873_v15  ;;  %vm1744_vm10 = vc.u32 %v1736_v20, %v1740_v17  ;;  %v2755_v22 = vmul.f32 %v2754_v27, %v7567_v56  ;;  %v2764_v44 = vxor.u32 2147483648, %v2747_v48 }
 0x16c   :  { %v1745_v42 = vsel %vm1744_vm10, 1, %v12903_v18  ;;  %v1746_v40 = vadd.s32 %v1740_v17, %v1736_v20  ;;  %vm7644_vm11 = vcmp.le.f32.partialorder %v2768_v52, 0.7853982  ;;  %v2892_v14 = vsub.s32 4, %v7597_v49 }
 0x16d   :  { %v6497_v0 = vadd.s32 4294967294, %v2874_v50  ;;  %v1719_v10 = vsel %vm1715_vm1, %v1699_v16, %v7574_v13  ;;  %v1720_v56 = vsel %vm1718_vm0, %v7562_v58, 2102212464  ;;  %v2761_v29 = vxor.u32 2147483648, %v2755_v22 }
 0x16e   :  { %v1741_v26 = vshrl.u32 %v1737_v57, 16  ;;  %v1747_v1 = vadd.s32 %v1745_v42, %v1739_v19  ;;  %vm1748_vm12 = vc.u32 %v1746_v40, %v1742_v53  ;;  %v2765_v52 = vsel %vm2763_vm5, %v2764_v44, %v2755_v22 }
 0x16f   :  { %vm6498_vm13 = vcmp.lt.s32.totalorder %v6497_v0, 0  ;;  %v1749_v31 = vsel %vm1748_vm12, 1, %v12903_v18  ;;  %v1759_v11 = vmul.u32 %v1757_v45, %v1732_v7  ;;  %v2762_v21 = vsel %vm2760_vm4, %v2747_v48, %v2761_v29 }
 0x170   :  { %v2877_v8 = vsel %vm6498_vm13, 0, %v6497_v0  ;;  %v1751_v13 = vadd.s32 %v1749_v31, %v1747_v1  ;;  %v1760_v16 = vmul.u32 %v1756_v39, %v7617_v6  ;;  %v2766_v58 = vsel %vm2759_vm6, %v2762_v21, %v2765_v52 }
 0x171   :  { %v2878_v57 = vsub.s32 32, %v2877_v8  ;;  %v2882_v60 = vsub.s32 4294967266, %v2877_v8  ;;  %v1758_v61 = vmul.u32 %v1756_v39, %v1732_v7  ;;  %v2767_v37 = vsel %vm2756_vm8, nan, %v2766_v58 }
 0x172   :  { %v2893_v20 = vsel %vm2770_vm9, %v2892_v14, %v7597_v49  ;;  %v1752_v17 = vadd.s32 %v1751_v13, %v1741_v26  ;;  %v1762_v27 = vshll.u32 %v1759_v11, 16  ;;  %3034 = vmatpush.msra.mxu2 %v2767_v37  ;;  %v2879_v48 = vshll.u32 %v7619_v2, %v2877_v8 }
 0x173   :  { %v2880_v15 = vshrl.u32 %v2862_v30, %v2878_v57  ;;  %v2883_v50 = vadd.s32 127, %v2882_v60  ;;  %v1743_v63 = vshrl.u32 %v7628_v34, 16  ;;  %v1761_v19 = vmul.u32 %v1757_v45, %v7617_v6 }
 0x174   :  { %v1764_v53 = vshll.u32 %v1760_v16, 16  ;;  %vm1766_vm14 = vc.u32 %v1758_v61, %v1762_v27  ;;  %v1768_v7 = vadd.s32 %v1762_v27, %v1758_v61  ;;  %v1721_v49 = vsel %vm1717_vm2, %v7560_v33, %v1720_v56 }
 0x175   :  { %v2881_v62 = vor.u32 %v2880_v15, %v2879_v48  ;;  %v2884_v39 = vshll.u32 %v2883_v50, 23  ;;  %v1767_v22 = vsel %vm1766_vm14, 1, %v12903_v18  ;;  %v2895_v2 = vsel %vm7644_vm11, 0, %v2893_v20 }
 0x176   :  { %v7677_v30 = vadd.s32 %v1752_v17, %v1743_v63  ;;  %v1769_v44 = vadd.s32 %v1767_v22, %v1761_v19  ;;  %vm1770_vm15 = vc.u32 %v1768_v7, %v1764_v53  ;;  %v7680_v6 = vand.u32 31, %v7396_v47 }
 0x177   :  { %v2885_v34 = vor.u32 4788187, %v2884_v39  ;;  %v1771_v45 = vsel %vm1770_vm15, 1, %v12903_v18  ;;  %v1838_v42 = vand.u32 2147483647, %v7035_v36  ;;  %v7685_v40 = vadd.s32 1, %v7458_v35 }
 0x178   :  { %v1763_v33 = vshrl.u32 %v1759_v11, 16  ;;  %v7687_v0 = vadd.s32 %v1768_v7, %v1764_v53  ;;  %v1773_v14 = vadd.s32 %v1771_v45, %v1769_v44  ;;  %v2888_v29 = vcvt.s32.f32 %v2881_v62 }
 0x179   :  { %v2886_v56 = vand.u32 2147483647, %v2885_v34  ;;  %v2912_v26 = vadd.s32 3, %v2895_v2  ;;  %v1722_v1 = vsel %vm1716_vm3, %v1719_v10, %v1721_v49  ;;  %v1765_v47 = vshrl.u32 %v1760_v16, 16  ;;  %v12918_v49 = vld [vmem:[#allocation16_spill] sm:$0xff] }
 0x17a   :  { %v1774_v52 = vadd.s32 %v1773_v14, %v1763_v33  ;;  %vm1778_vm0 = vc.u32 %v7677_v30, %v7687_v0  ;;  %v1859_v31 = vshrl.u32 %v12897_v28, %v7529_v3  ;;  %v1845_v11 = vand.u32 8388607, %v1838_v42 }
 0x17b   :  { %v2889_v35 = vmul.f32 %v2888_v29, %v2886_v56  ;;  %v1856_v21 = vshrl.u32 %v12907_v25, %v7529_v3  ;;  %v1862_v8 = vshrl.u32 %v12898_v4, %v7529_v3  ;;  %v1858_v10 = vshll.u32 %v12907_v25, %v7293_v24 }
 0x17c   :  { %v1775_v32 = vadd.s32 %v1774_v52, %v1765_v47  ;;  %v1861_v13 = vshll.u32 %v12897_v28, %v7293_v24  ;;  %v1865_v16 = vshrl.u32 %v12899_v9, %v7529_v3  ;;  %v1855_v57 = vshll.u32 %v12908_v5, %v7293_v24 }
 0x17d   :  { %v2890_v58 = vxor.u32 2147483648, %v2889_v35  ;;  %v1867_v60 = vshll.u32 %v12899_v9, %v7293_v24  ;;  %v1868_v61 = vshrl.u32 %v12900_v38, %v7529_v3  ;;  %v7713_v20 = vor.u32 %v1859_v31, %v1858_v10 }
 0x17e   :  { %v1779_v37 = vadd.s32 1, %v1775_v32  ;;  %v7715_v17 = vor.u32 %v1862_v8, %v1861_v13  ;;  %v1864_v27 = vshll.u32 %v12898_v4, %v7293_v24  ;;  %v1776_v15 = vmul.u32 %v7595_v59, %v1722_v1 }
 0x17f   :  { %v2891_v48 = vsel %vm2770_vm9, %v2890_v58, %v2889_v35  ;;  %v1846_v50 = vor.u32 8388608, %v1845_v11  ;;  %v1869_v63 = vor.u32 %v1868_v61, %v1867_v60  ;;  %v7730_v7 = vor.u32 %v1856_v21, %v1855_v57  ;;  %v12919_v60 = vld [vmem:[#allocation14_spill] sm:$0xff] }
 0x180   :  { %v7725_v19 = vsel %vm7644_vm11, %v6995_v23, %v2891_v48  ;;  %v1780_v53 = vsel %vm1778_vm0, %v1779_v37, %v1775_v32  ;;  %v1866_v62 = vor.u32 %v1865_v16, %v1864_v27  ;;  %vm1870_vm1 = vcmp.lt.s32.totalorder %v12918_v49, 1 }
 0x181   :  { %v2896_v24 = vmul.f32 %v7725_v19, %v7725_v19  ;;  %v1781_v39 = vadd.s32 %v1780_v53, %v1776_v15  ;;  %vm1873_vm2 = vcmp.lt.s32.totalorder %v12918_v49, 4  ;;  %v7736_v59 = vand.u32 3, %v2912_v26 }
 0x182   :  { %vm1871_vm3 = vcmp.lt.s32.totalorder %v12918_v49, 2  ;;  %v1882_v12 = vsel %vm1870_vm1, %v7713_v20, %v7715_v17  ;;  %v1883_v22 = vsel %vm1873_vm2, %v1869_v63, 1326507024  ;;  %vm1872_vm4 = vcmp.lt.s32.totalorder %v12918_v49, 3 }
 0x183   :  { %v2897_v2 = vmul.f32 -0.001358992, %v2896_v24  ;;  %v2904_v44 = vmul.f32 -0.00019511016, %v2896_v24  ;;  %v1782_v34 = vadd.s32 536870912, %v1781_v39  ;;  %v1878_v45 = vsel %vm1870_vm1, %v7730_v7, %v7713_v20 }
 0x184   :  { %v1879_v33 = vsel %vm1873_vm2, %v1866_v62, 920167782  ;;  %v1884_v14 = vsel %vm1872_vm4, %v1866_v62, %v1883_v22  ;;  %v7754_v56 = vshll.u32 %v1846_v50, 8  ;;  %v7771_v13 = vsub.s32 32, %v7591_v51 }
 0x185   :  { %v2898_v29 = vadd.f32 0.041655596, %v2897_v2  ;;  %v2905_v26 = vadd.f32 0.008332121, %v2904_v44  ;;  %v7756_v1 = vshrl.u32 %v1782_v34, 30  ;;  %v1885_v47 = vsel %vm1871_vm3, %v1882_v12, %v1884_v14 }
 0x186   :  { %v7761_v52 = vand.u32 65535, %v7754_v56  ;;  %v7764_v31 = vshrl.u32 %v7754_v56, 16  ;;  %v1889_v35 = vand.u32 65535, %v1885_v47  ;;  %v1890_v11 = vshrl.u32 %v1885_v47, 16 }
 0x187   :  { %v2899_v21 = vmul.f32 %v2898_v29, %v2896_v24  ;;  %v2906_v8 = vmul.f32 %v2905_v26, %v2896_v24  ;;  %v1784_v32 = vshll.u32 %v7756_v1, 30  ;;  %v1880_v10 = vsel %vm1872_vm4, %v7715_v17, %v1879_v33 }
 0x188   :  { %v7774_v16 = vadd.s32 1, %v7524_v55  ;;  %v1892_v58 = vmul.u32 %v1890_v11, %v7761_v52  ;;  %v7778_v57 = vmul.u32 %v1889_v35, %v7764_v31  ;;  %v12920_v61 = vand.u32 2139095040, %v12919_v60 }
 0x189   :  { %v2900_v27 = vadd.f32 -0.4999988, %v2899_v21  ;;  %v2907_v48 = vadd.f32 -0.16666654, %v2906_v8  ;;  %v7784_v15 = vsub.s32 %v1781_v39, %v1784_v32  ;;  %vm2915_vm5 = vcmp.eq.s32.totalorder %v7736_v59, 0 }
 0x18a   :  { %v7782_v37 = vshrl.u32 %v12920_v61, 23  ;;  %v1854_v50 = vshrl.u32 %v12908_v5, %v7529_v3  ;;  %v1881_v55 = vsel %vm1871_vm3, %v1878_v45, %v1880_v10  ;;  %v1891_v63 = vmul.u32 %v1889_v35, %v7761_v52 }
 0x18b   :  { %v1895_v53 = vshll.u32 %v1892_v58, 16  ;;  %v2901_v62 = vmul.f32 %v2900_v27, %v2896_v24  ;;  %v2908_v12 = vmul.f32 %v2907_v48, %v2896_v24  ;;  %vm2914_vm6 = vcmp.lt.s32.totalorder %v7736_v59, 2 }
 0x18c   :  { %vm1685_vm7 = vcmp.lt.s32.totalorder %v7033_v43, 0  ;;  %vm1786_vm8 = vcmp.lt.s32.totalorder %v7784_v15, 0  ;;  %v1787_v39 = vsub.s32 0, %v7784_v15  ;;  %vm2911_vm9 = vweird.f32 %v6995_v23 }
 0x18d   :  { %v1894_v3 = vmul.u32 %v1890_v11, %v7764_v31  ;;  %v1897_v22 = vshll.u32 %v7778_v57, 16  ;;  %vm1899_vm10 = vc.u32 %v1891_v63, %v1895_v53  ;;  %v1901_v2 = vadd.s32 %v1895_v53, %v1891_v63 }
 0x18e   :  { %v2902_v44 = vadd.f32 1.0, %v2901_v62  ;;  %v2909_v34 = vadd.f32 1.0, %v2908_v12  ;;  %v1788_v24 = vsel %vm1786_vm8, %v1787_v39, %v7784_v15  ;;  %v1900_v45 = vsel %vm1899_vm10, 1, %v12903_v18 }
 0x18f   :  { %v1789_v33 = vclz %v1788_v24  ;;  %v1875_v14 = vsel %vm1873_vm2, %v7715_v17, 2102212464  ;;  %v1902_v29 = vadd.s32 %v1900_v45, %v1894_v3  ;;  %vm1903_vm11 = vc.u32 %v1901_v2, %v1897_v22 }
 0x190   :  { %v2910_v26 = vmul.f32 %v2909_v34, %v7725_v19  ;;  %v2919_v47 = vxor.u32 2147483648, %v2902_v44  ;;  %vm7807_vm12 = vcmp.le.f32.partialorder %v1683_v46, 0.7853982  ;;  %v1904_v11 = vsel %vm1903_vm11, 1, %v12903_v18 }
 0x191   :  { %v1911_v21 = vand.u32 65535, %v1881_v55  ;;  %vm2918_vm13 = vcmp.eq.s32.totalorder %v7736_v59, 2  ;;  %v1777_v8 = vadd.s32 %v7687_v0, %v7677_v30  ;;  %v6476_v17 = vadd.s32 4294967294, %v1789_v33 }
 0x192   :  { %v1807_v32 = vsub.s32 4, %v7756_v1  ;;  %v2916_v10 = vxor.u32 2147483648, %v2910_v26  ;;  %v1874_v19 = vsel %vm1870_vm1, %v1854_v50, %v7730_v7  ;;  %v1906_v46 = vadd.s32 %v1904_v11, %v1902_v29 }
 0x193   :  { %v1912_v61 = vshrl.u32 %v1881_v55, 16  ;;  %v2920_v27 = vsel %vm2918_vm13, %v2919_v47, %v2910_v26  ;;  %vm6477_vm14 = vcmp.lt.s32.totalorder %v6476_v17, 0  ;;  %v1876_v48 = vsel %vm1872_vm4, %v7713_v20, %v1875_v14 }
 0x194   :  { %v1896_v63 = vshrl.u32 %v1892_v58, 16  ;;  %v2917_v30 = vsel %vm2915_vm5, %v2902_v44, %v2916_v10  ;;  %v1792_v0 = vsel %vm6477_vm14, 0, %v6476_v17  ;;  %v1915_v62 = vmul.u32 %v1911_v21, %v7764_v31 }
 0x195   :  { %v1914_v53 = vmul.u32 %v1912_v61, %v7761_v52  ;;  %v2921_v7 = vsel %vm2914_vm6, %v2917_v30, %v2920_v27  ;;  %v1793_v50 = vsub.s32 32, %v1792_v0  ;;  %v1797_v55 = vsub.s32 4294967266, %v1792_v0 }
 0x196   :  { %v1808_v12 = vsel %vm1685_vm7, %v1807_v32, %v7756_v1  ;;  %v2922_v20 = vsel %vm2911_vm9, nan, %v2921_v7  ;;  %v1907_v58 = vadd.s32 %v1906_v46, %v1896_v63  ;;  %v1913_v39 = vmul.u32 %v1911_v21, %v7761_v52 }
 0x197   :  { %v1917_v3 = vshll.u32 %v1914_v53, 16  ;;  %3063 = vmatpush.msra.mxu3 %v2922_v20  ;;  %v1794_v22 = vshll.u32 %v7784_v15, %v1792_v0  ;;  %v1795_v2 = vshrl.u32 %v1777_v8, %v1793_v50  ;;  %v1798_v44 = vadd.s32 127, %v1797_v55  ;;  %v12923_v15 = vld [vmem:[#allocation6_spill] sm:$0xff] }
 0x198   :  { %v1898_v59 = vshrl.u32 %v7778_v57, 16  ;;  %v1916_v34 = vmul.u32 %v1912_v61, %v7764_v31  ;;  %v1919_v24 = vshll.u32 %v1915_v62, 16  ;;  %v1810_v23 = vsel %vm7807_vm12, 0, %v1808_v12  ;;  %v12924_v31 = vld [vmem:[#allocation15_spill] sm:$0xff] }
 0x199   :  { %vm1921_vm15 = vc.u32 %v1913_v39, %v1917_v3  ;;  %v1923_v45 = vadd.s32 %v1917_v3, %v1913_v39  ;;  %v1796_v1 = vor.u32 %v1795_v2, %v1794_v22  ;;  %v1799_v33 = vshll.u32 %v1798_v44, 23 }
 0x19a   :  { %v1922_v52 = vsel %vm1921_vm15, 1, %v12903_v18  ;;  %v7840_v14 = vadd.s32 %v1907_v58, %v1898_v59  ;;  %v1993_v26 = vand.u32 2147483647, %v12923_v15  ;;  %v7844_v57 = vsub.s32 32, %v7680_v6 }
 0x19b   :  { %v1924_v29 = vadd.s32 %v1922_v52, %v1916_v34  ;;  %vm1925_vm0 = vc.u32 %v1923_v45, %v1919_v24  ;;  %v12925_v47 = vand.u32 2139095040, %v12924_v31  ;;  %v1800_v21 = vor.u32 4788187, %v1799_v33 }
 0x19c   :  { %v1926_v8 = vsel %vm1925_vm0, 1, %v12903_v18  ;;  %v1877_v17 = vsel %vm1871_vm3, %v1874_v19, %v1876_v48  ;;  %v1918_v32 = vshrl.u32 %v1914_v53, 16  ;;  %v7853_v10 = vadd.s32 %v1923_v45, %v1919_v24 }
 0x19d   :  { %v7848_v11 = vshrl.u32 %v12925_v47, 23  ;;  %v1928_v46 = vadd.s32 %v1926_v8, %v1924_v29  ;;  %v1801_v61 = vand.u32 2147483647, %v1800_v21  ;;  %v1803_v27 = vcvt.s32.f32 %v1796_v1 }
 0x19e   :  { %v1827_v63 = vadd.s32 3, %v1810_v23  ;;  %v1920_v30 = vshrl.u32 %v1915_v62, 16  ;;  %vm1933_vm1 = vc.u32 %v7840_v14, %v7853_v10  ;;  %v2000_v7 = vand.u32 8388607, %v1993_v26 }
 0x19f   :  { %v1929_v0 = vadd.s32 %v1928_v46, %v1918_v32  ;;  %v2014_v50 = vshrl.u32 %v12897_v28, %v7771_v13  ;;  %v1804_v49 = vmul.f32 %v1803_v27, %v1801_v61  ;;  %v2011_v19 = vshrl.u32 %v12907_v25, %v7771_v13 }
 0x1a0   :  { %v2013_v48 = vshll.u32 %v12907_v25, %v7591_v51  ;;  %v2017_v53 = vshrl.u32 %v12898_v4, %v7771_v13  ;;  %v2016_v55 = vshll.u32 %v12897_v28, %v7591_v51  ;;  %v2019_v12 = vshll.u32 %v12898_v4, %v7591_v51 }
 0x1a1   :  { %v1930_v62 = vadd.s32 %v1929_v0, %v1920_v30  ;;  %v2020_v20 = vshrl.u32 %v12899_v9, %v7771_v13  ;;  %vm1074_vm2 = vcmp.gt.s32.totalorder %v7685_v40, 0  ;;  %vm1229_vm3 = vcmp.gt.s32.totalorder %v7774_v16, 0 }
 0x1a2   :  { %v1805_v58 = vxor.u32 2147483648, %v1804_v49  ;;  %v2010_v39 = vshll.u32 %v12908_v5, %v7591_v51  ;;  %v2022_v3 = vshll.u32 %v12899_v9, %v7591_v51  ;;  %v2023_v22 = vshrl.u32 %v12900_v38, %v7771_v13 }
 0x1a3   :  { %v1934_v2 = vadd.s32 1, %v1930_v62  ;;  %v7881_v44 = vor.u32 %v2014_v50, %v2013_v48  ;;  %v7883_v59 = vor.u32 %v2017_v53, %v2016_v55  ;;  %v2021_v34 = vor.u32 %v2020_v20, %v2019_v12 }
 0x1a4   :  { %v1806_v24 = vsel %vm1685_vm7, %v1805_v58, %v1804_v49  ;;  %v1931_v45 = vmul.u32 %v7754_v56, %v1877_v17  ;;  %v2001_v1 = vor.u32 8388608, %v2000_v7  ;;  %v2024_v33 = vor.u32 %v2023_v22, %v2022_v3 }
 0x1a5   :  { %v7891_v51 = vsel %vm7807_vm12, %v7033_v43, %v1806_v24  ;;  %v1935_v23 = vsel %vm1933_vm1, %v1934_v2, %v1930_v62  ;;  %v7896_v52 = vor.u32 %v2011_v19, %v2010_v39  ;;  %vm2028_vm4 = vcmp.lt.s32.totalorder %v7588_v41, 4 }
 0x1a6   :  { %v1811_v29 = vmul.f32 %v7891_v51, %v7891_v51  ;;  %v1936_v47 = vadd.s32 %v1935_v23, %v1931_v45  ;;  %vm2025_vm5 = vcmp.lt.s32.totalorder %v7588_v41, 1  ;;  %v2034_v56 = vsel %vm2028_vm4, %v2021_v34, 920167782 }
 0x1a7   :  { %v7904_v35 = vand.u32 3, %v1827_v63  ;;  %vm2026_vm6 = vcmp.lt.s32.totalorder %v7588_v41, 2  ;;  %v2037_v21 = vsel %vm2025_vm5, %v7881_v44, %v7883_v59  ;;  %v2038_v8 = vsel %vm2028_vm4, %v2024_v33, 1326507024 }
 0x1a8   :  { %v1812_v17 = vmul.f32 -0.001358992, %v1811_v29  ;;  %v1819_v32 = vmul.f32 -0.00019511016, %v1811_v29  ;;  %v1937_v46 = vadd.s32 536870912, %v1936_v47  ;;  %vm2027_vm7 = vcmp.lt.s32.totalorder %v7588_v41, 3 }
 0x1a9   :  { %v2033_v61 = vsel %vm2025_vm5, %v7896_v52, %v7881_v44  ;;  %v2035_v27 = vsel %vm2027_vm7, %v7883_v59, %v2034_v56  ;;  %v2039_v63 = vsel %vm2027_vm7, %v2021_v34, %v2038_v8  ;;  %v7923_v30 = vshll.u32 %v2001_v1, 8 }
 0x1aa   :  { %v1813_v0 = vadd.f32 0.041655596, %v1812_v17  ;;  %v1820_v7 = vadd.f32 0.008332121, %v1819_v32  ;;  %v1938_v50 = vshrl.u32 %v1937_v46, 30  ;;  %v2040_v49 = vsel %vm2026_vm6, %v2037_v21, %v2039_v63 }
 0x1ab   :  { %v7928_v19 = vand.u32 65535, %v7923_v30  ;;  %v7931_v48 = vshrl.u32 %v7923_v30, 16  ;;  %v2044_v53 = vand.u32 65535, %v2040_v49  ;;  %v2045_v62 = vshrl.u32 %v2040_v49, 16 }
 0x1ac   :  { %v1814_v55 = vmul.f32 %v1813_v0, %v1811_v29  ;;  %v1821_v12 = vmul.f32 %v1820_v7, %v1811_v29  ;;  %v1939_v20 = vshll.u32 %v1938_v50, 30  ;;  %v2036_v58 = vsel %vm2026_vm6, %v2033_v61, %v2035_v27 }
 0x1ad   :  { %v7938_v39 = vsel %vm1074_vm2, %v7685_v40, 0  ;;  %v7943_v3 = vsel %vm1229_vm3, %v7774_v16, 0  ;;  %v2047_v22 = vmul.u32 %v2045_v62, %v7928_v19  ;;  %v7947_v2 = vmul.u32 %v2044_v53, %v7931_v48 }
 0x1ae   :  { %v1815_v34 = vadd.f32 -0.4999988, %v1814_v55  ;;  %v1822_v24 = vadd.f32 -0.16666654, %v1821_v12  ;;  %vm1840_vm8 = vcmp.lt.s32.totalorder %v7035_v36, 0  ;;  %v7950_v45 = vsub.s32 %v1936_v47, %v1939_v20 }
 0x1af   :  { %vm1830_vm9 = vcmp.eq.s32.totalorder %v7904_v35, 0  ;;  %v2009_v40 = vshrl.u32 %v12908_v5, %v7771_v13  ;;  %v2046_v1 = vmul.u32 %v2044_v53, %v7928_v19  ;;  %v2050_v16 = vshll.u32 %v2047_v22, 16 }
 0x1b0   :  { %v2067_v33 = vshrl.u32 %v2036_v58, 16  ;;  %v1816_v23 = vmul.f32 %v1815_v34, %v1811_v29  ;;  %v1823_v56 = vmul.f32 %v1822_v24, %v1811_v29  ;;  %vm1829_vm10 = vcmp.lt.s32.totalorder %v7904_v35, 2 }
 0x1b1   :  { %vm1941_vm11 = vcmp.lt.s32.totalorder %v7950_v45, 0  ;;  %v1942_v21 = vsub.s32 0, %v7950_v45  ;;  %vm1826_vm12 = vweird.f32 %v7033_v43  ;;  %v2049_v47 = vmul.u32 %v2045_v62, %v7931_v48 }
 0x1b2   :  { %v2052_v8 = vshll.u32 %v7947_v2, 16  ;;  %vm2054_vm13 = vc.u32 %v2046_v1, %v2050_v16  ;;  %v2056_v13 = vadd.s32 %v2050_v16, %v2046_v1  ;;  %v1817_v17 = vadd.f32 1.0, %v1816_v23 }
 0x1b3   :  { %v1824_v32 = vadd.f32 1.0, %v1823_v56  ;;  %v1943_v46 = vsel %vm1941_vm11, %v1942_v21, %v7950_v45  ;;  %v2055_v29 = vsel %vm2054_vm13, 1, %v12903_v18  ;;  %v1962_v27 = vsub.s32 4, %v1938_v50 }
 0x1b4   :  { %v1944_v61 = vclz %v1943_v46  ;;  %v2057_v63 = vadd.s32 %v2055_v29, %v2049_v47  ;;  %vm2058_vm14 = vc.u32 %v2056_v13, %v2052_v8  ;;  %v1834_v7 = vxor.u32 2147483648, %v1817_v17 }
 0x1b5   :  { %v1825_v0 = vmul.f32 %v1824_v32, %v7891_v51  ;;  %v2059_v49 = vsel %vm2058_vm14, 1, %v12903_v18  ;;  %v2066_v53 = vand.u32 65535, %v2036_v58  ;;  %vm1833_vm15 = vcmp.eq.s32.totalorder %v7904_v35, 2 }
 0x1b6   :  { %vm7969_vm0 = vcmp.le.f32.partialorder %v1838_v42, 0.7853982  ;;  %v1932_v55 = vadd.s32 %v7853_v10, %v7840_v14  ;;  %v6479_v12 = vadd.s32 4294967294, %v1944_v61  ;;  %v2029_v51 = vsel %vm2025_vm5, %v2009_v40, %v7896_v52  ;;  %v12928_v61 = vld [vmem:[#allocation7_spill] sm:$0xff] }
 0x1b7   :  { %v1831_v20 = vxor.u32 2147483648, %v1825_v0  ;;  %v2030_v58 = vsel %vm2028_vm4, %v7883_v59, 2102212464  ;;  %v2061_v34 = vadd.s32 %v2059_v49, %v2057_v63  ;;  %v2069_v24 = vmul.u32 %v2067_v33, %v7928_v19 }
 0x1b8   :  { %v1835_v42 = vsel %vm1833_vm15, %v1834_v7, %v1825_v0  ;;  %vm6480_vm1 = vcmp.lt.s32.totalorder %v6479_v12, 0  ;;  %v1963_v1 = vsel %vm1840_vm8, %v1962_v27, %v1938_v50  ;;  %v2051_v16 = vshrl.u32 %v2047_v22, 16 }
 0x1b9   :  { %v1832_v14 = vsel %vm1830_vm9, %v1817_v17, %v1831_v20  ;;  %v1947_v10 = vsel %vm6480_vm1, 0, %v6479_v12  ;;  %v2070_v52 = vmul.u32 %v2066_v53, %v7931_v48  ;;  %v2072_v40 = vshll.u32 %v2069_v24, 16 }
 0x1ba   :  { %v1836_v23 = vsel %vm1829_vm10, %v1832_v14, %v1835_v42  ;;  %v1948_v59 = vsub.s32 32, %v1947_v10  ;;  %v1952_v56 = vsub.s32 4294967266, %v1947_v10  ;;  %v2068_v21 = vmul.u32 %v2066_v53, %v7928_v19 }
 0x1bb   :  { %v1837_v47 = vsel %vm1826_vm12, nan, %v1836_v23  ;;  %v2053_v50 = vshrl.u32 %v7947_v2, 16  ;;  %v2062_v22 = vadd.s32 %v2061_v34, %v2051_v16  ;;  %v2071_v8 = vmul.u32 %v2067_v33, %v7931_v48 }
 0x1bc   :  { %2977 = vmatpush.msra.mxu0 %v1837_v47  ;;  %v1949_v13 = vshll.u32 %v7950_v45, %v1947_v10  ;;  %v1950_v17 = vshrl.u32 %v1932_v55, %v1948_v59  ;;  %v1953_v32 = vadd.s32 127, %v1952_v56  ;;  %vm2076_vm2 = vc.u32 %v2068_v21, %v2072_v40 }
 0x1bd   :  { %v2074_v35 = vshll.u32 %v2070_v52, 16  ;;  %v2077_v46 = vsel %vm2076_vm2, 1, %v12903_v18  ;;  %v2078_v29 = vadd.s32 %v2072_v40, %v2068_v21  ;;  %v2148_v19 = vand.u32 2147483647, %v12928_v61 }
 0x1be   :  { %v1951_v27 = vor.u32 %v1950_v17, %v1949_v13  ;;  %v1954_v43 = vshll.u32 %v1953_v32, 23  ;;  %v2031_v2 = vsel %vm2027_vm7, %v7881_v44, %v2030_v58  ;;  %v2079_v63 = vadd.s32 %v2077_v46, %v2071_v8 }
 0x1bf   :  { %v8001_v48 = vadd.s32 4294967169, %v7782_v37  ;;  %v1965_v45 = vsel %vm7969_vm0, 0, %v1963_v1  ;;  %v8005_v33 = vadd.s32 %v2062_v22, %v2053_v50  ;;  %vm2080_vm3 = vc.u32 %v2078_v29, %v2074_v35 }
 0x1c0   :  { %v8008_v0 = vshrl.u32 %v7938_v39, 5  ;;  %v1955_v7 = vor.u32 4788187, %v1954_v43  ;;  %v2081_v49 = vsel %vm2080_vm3, 1, %v12903_v18  ;;  %v2155_v53 = vand.u32 8388607, %v2148_v19 }
 0x1c1   :  { %v2032_v44 = vsel %vm2026_vm6, %v2029_v51, %v2031_v2  ;;  %v2073_v37 = vshrl.u32 %v2069_v24, 16  ;;  %v8015_v55 = vadd.s32 %v2078_v29, %v2074_v35  ;;  %v2083_v12 = vadd.s32 %v2081_v49, %v2079_v63 }
 0x1c2   :  { %v1956_v20 = vand.u32 2147483647, %v1955_v7  ;;  %v1958_v58 = vcvt.s32.f32 %v1951_v27  ;;  %v1982_v34 = vadd.s32 3, %v1965_v45  ;;  %v2075_v42 = vshrl.u32 %v2070_v52, 16 }
 0x1c3   :  { %v2084_v1 = vadd.s32 %v2083_v12, %v2073_v37  ;;  %vm2088_vm4 = vc.u32 %v8005_v33, %v8015_v55  ;;  %v2169_v16 = vshrl.u32 %v12897_v28, %v7844_v57  ;;  %v2172_v14 = vshrl.u32 %v12898_v4, %v7844_v57 }
 0x1c4   :  { %v1959_v41 = vmul.f32 %v1958_v58, %v1956_v20  ;;  %v2156_v51 = vor.u32 8388608, %v2155_v53  ;;  %v2174_v24 = vshll.u32 %v12898_v4, %v7680_v6  ;;  %v2175_v10 = vshrl.u32 %v12899_v9, %v7844_v57 }
 0x1c5   :  { %v2085_v40 = vadd.s32 %v2084_v1, %v2075_v42  ;;  %v2166_v52 = vshrl.u32 %v12907_v25, %v7844_v57  ;;  %v2168_v23 = vshll.u32 %v12907_v25, %v7680_v6  ;;  %v2171_v59 = vshll.u32 %v12897_v28, %v7680_v6 }
 0x1c6   :  { %v1960_v56 = vxor.u32 2147483648, %v1959_v41  ;;  %v2176_v21 = vor.u32 %v2175_v10, %v2174_v24  ;;  %v2177_v47 = vshll.u32 %v12899_v9, %v7680_v6  ;;  %v2178_v50 = vshrl.u32 %v12900_v38, %v7844_v57 }
 0x1c7   :  { %v2089_v22 = vadd.s32 1, %v2085_v40  ;;  %v2165_v8 = vshll.u32 %v12908_v5, %v7680_v6  ;;  %v8039_v13 = vor.u32 %v2169_v16, %v2168_v23  ;;  %v2173_v17 = vor.u32 %v2172_v14, %v2171_v59 }
 0x1c8   :  { %v8042_v32 = vand.u32 31, %v7938_v39  ;;  %v1961_v35 = vsel %vm1840_vm8, %v1960_v56, %v1959_v41  ;;  %v2086_v46 = vmul.u32 %v7923_v30, %v2032_v44  ;;  %v2179_v29 = vor.u32 %v2178_v50, %v2177_v47 }
 0x1c9   :  { %v8050_v27 = vsel %vm7969_vm0, %v7035_v36, %v1961_v35  ;;  %v2090_v6 = vsel %vm2088_vm4, %v2089_v22, %v2085_v40  ;;  %v8055_v43 = vor.u32 %v2166_v52, %v2165_v8  ;;  %vm2183_vm5 = vcmp.lt.s32.totalorder %v7612_v54, 4 }
 0x1ca   :  { %v1966_v39 = vmul.f32 %v8050_v27, %v8050_v27  ;;  %v2091_v2 = vadd.s32 %v2090_v6, %v2086_v46  ;;  %vm2180_vm6 = vcmp.lt.s32.totalorder %v7612_v54, 1  ;;  %v2189_v30 = vsel %vm2183_vm5, %v2176_v21, 920167782 }
 0x1cb   :  { %v8063_v62 = vand.u32 3, %v1982_v34  ;;  %v2192_v63 = vsel %vm2180_vm6, %v8039_v13, %v2173_v17  ;;  %v2193_v45 = vsel %vm2183_vm5, %v2179_v29, 1326507024  ;;  %v8070_v7 = vshll.u32 %v2156_v51, 8 }
 0x1cc   :  { %v1967_v49 = vmul.f32 -0.001358992, %v1966_v39  ;;  %v1974_v53 = vmul.f32 -0.00019511016, %v1966_v39  ;;  %v2092_v44 = vadd.s32 536870912, %v2091_v2  ;;  %vm2182_vm7 = vcmp.lt.s32.totalorder %v7612_v54, 3 }
 0x1cd   :  { %vm2181_vm8 = vcmp.lt.s32.totalorder %v7612_v54, 2  ;;  %v2188_v37 = vsel %vm2180_vm6, %v8055_v43, %v8039_v13  ;;  %v2190_v12 = vsel %vm2182_vm7, %v2173_v17, %v2189_v30  ;;  %v2194_v20 = vsel %vm2182_vm7, %v2176_v21, %v2193_v45 }
 0x1ce   :  { %v1968_v58 = vadd.f32 0.041655596, %v1967_v49  ;;  %v1975_v34 = vadd.f32 0.008332121, %v1974_v53  ;;  %v8082_v42 = vshrl.u32 %v2092_v44, 30  ;;  %v2195_v1 = vsel %vm2181_vm8, %v2192_v63, %v2194_v20 }
 0x1cf   :  { %v2197_v16 = vand.u32 65535, %v8070_v7  ;;  %v2198_v14 = vshrl.u32 %v8070_v7, 16  ;;  %v2199_v41 = vand.u32 65535, %v2195_v1  ;;  %v2200_v51 = vshrl.u32 %v2195_v1, 16 }
 0x1d0   :  { %v1969_v24 = vmul.f32 %v1968_v58, %v1966_v39  ;;  %v1976_v10 = vmul.f32 %v1975_v34, %v1966_v39  ;;  %v2094_v40 = vshll.u32 %v8082_v42, 30  ;;  %v2191_v52 = vsel %vm2181_vm8, %v2188_v37, %v2190_v12 }
 0x1d1   :  { %v8092_v23 = vand.u32 31, %v7943_v3  ;;  %v2164_v59 = vshrl.u32 %v12908_v5, %v7844_v57  ;;  %v2202_v56 = vmul.u32 %v2200_v51, %v2197_v16  ;;  %v8096_v21 = vmul.u32 %v2199_v41, %v2198_v14 }
 0x1d2   :  { %v1970_v47 = vadd.f32 -0.4999988, %v1969_v24  ;;  %v1977_v50 = vadd.f32 -0.16666654, %v1976_v10  ;;  %v8098_v22 = vsub.s32 %v2091_v2, %v2094_v40  ;;  %v2185_v8 = vsel %vm2183_vm5, %v2173_v17, 2102212464 }
 0x1d3   :  { %vm1985_vm9 = vcmp.eq.s32.totalorder %v8063_v62, 0  ;;  %vm1988_vm10 = vcmp.eq.s32.totalorder %v8063_v62, 2  ;;  %v2201_v35 = vmul.u32 %v2199_v41, %v2197_v16  ;;  %v2205_v46 = vshll.u32 %v2202_v56, 16 }
 0x1d4   :  { %v2221_v29 = vand.u32 65535, %v2191_v52  ;;  %v2222_v6 = vshrl.u32 %v2191_v52, 16  ;;  %v1971_v30 = vmul.f32 %v1970_v47, %v1966_v39  ;;  %v1978_v57 = vmul.f32 %v1977_v50, %v1966_v39 }
 0x1d5   :  { %vm1984_vm11 = vcmp.lt.s32.totalorder %v8063_v62, 2  ;;  %vm2096_vm12 = vcmp.lt.s32.totalorder %v8098_v22, 0  ;;  %v2097_v2 = vsub.s32 0, %v8098_v22  ;;  %vm1981_vm13 = vweird.f32 %v7035_v36  ;;  %v12929_v36 = vld [vmem:[#allocation12_spill] sm:$0xff] }
 0x1d6   :  { %v2204_v63 = vmul.u32 %v2200_v51, %v2198_v14  ;;  %v2207_v17 = vshll.u32 %v8096_v21, 16  ;;  %vm2209_vm14 = vc.u32 %v2201_v35, %v2205_v46  ;;  %v2211_v45 = vadd.s32 %v2205_v46, %v2201_v35 }
 0x1d7   :  { %v1972_v49 = vadd.f32 1.0, %v1971_v30  ;;  %v1979_v53 = vadd.f32 1.0, %v1978_v57  ;;  %v2098_v44 = vsel %vm2096_vm12, %v2097_v2, %v8098_v22  ;;  %v2210_v37 = vsel %vm2209_vm14, 1, %v12903_v18 }
 0x1d8   :  { %vm1995_vm15 = vcmp.lt.s32.totalorder %v12923_v15, 0  ;;  %v2087_v39 = vadd.s32 %v8015_v55, %v8005_v33  ;;  %v2099_v12 = vclz %v2098_v44  ;;  %v2212_v20 = vadd.s32 %v2210_v37, %v2204_v63 }
 0x1d9   :  { %vm2213_vm0 = vc.u32 %v2211_v45, %v2207_v17  ;;  %v1980_v58 = vmul.f32 %v1979_v53, %v8050_v27  ;;  %v1989_v34 = vxor.u32 2147483648, %v1972_v49  ;;  %v2224_v41 = vmul.u32 %v2222_v6, %v2197_v16 }
 0x1da   :  { %v2214_v1 = vsel %vm2213_vm0, 1, %v12903_v18  ;;  %v6482_v51 = vadd.s32 4294967294, %v2099_v12  ;;  %v2184_v24 = vsel %vm2180_vm6, %v2164_v59, %v8055_v43  ;;  %v2186_v10 = vsel %vm2182_vm7, %v8039_v13, %v2185_v8 }
 0x1db   :  { %v2223_v40 = vmul.u32 %v2221_v29, %v2197_v16  ;;  %v1986_v33 = vxor.u32 2147483648, %v1980_v58  ;;  %v2117_v55 = vsub.s32 4, %v8082_v42  ;;  %v2216_v52 = vadd.s32 %v2214_v1, %v2212_v20 }
 0x1dc   :  { %v2225_v47 = vmul.u32 %v2221_v29, %v2198_v14  ;;  %vm6483_vm1 = vcmp.lt.s32.totalorder %v6482_v51, 0  ;;  %v2206_v27 = vshrl.u32 %v2202_v56, 16  ;;  %v2208_v50 = vshrl.u32 %v8096_v21, 16 }
 0x1dd   :  { %v2227_v35 = vshll.u32 %v2224_v41, 16  ;;  %v1987_v46 = vsel %vm1985_vm9, %v1972_v49, %v1986_v33  ;;  %v1990_v43 = vsel %vm1988_vm10, %v1989_v34, %v1980_v58  ;;  %v2102_v59 = vsel %vm6483_vm1, 0, %v6482_v51 }
 0x1de   :  { %v2226_v30 = vmul.u32 %v2222_v6, %v2198_v14  ;;  %v1991_v13 = vsel %vm1984_vm11, %v1987_v46, %v1990_v43  ;;  %v2103_v16 = vsub.s32 32, %v2102_v59  ;;  %v2107_v8 = vsub.s32 4294967266, %v2102_v59 }
 0x1df   :  { %v2217_v57 = vadd.s32 %v2216_v52, %v2206_v27  ;;  %v1992_v56 = vsel %vm1981_vm13, nan, %v1991_v13  ;;  %v2104_v21 = vshll.u32 %v8098_v22, %v2102_v59  ;;  %v2229_v29 = vshll.u32 %v2225_v47, 16 }
 0x1e0   :  { %vm2231_vm2 = vc.u32 %v2223_v40, %v2227_v35  ;;  %3006 = vmatpush.msra.mxu1 %v1992_v56  ;;  %v2105_v2 = vshrl.u32 %v2087_v39, %v2103_v16  ;;  %v2108_v63 = vadd.s32 127, %v2107_v8  ;;  %v2233_v45 = vadd.s32 %v2227_v35, %v2223_v40 }
 0x1e1   :  { %v2232_v17 = vsel %vm2231_vm2, 1, %v12903_v18  ;;  %v8135_v14 = vsub.s32 32, %v8042_v32  ;;  %v2118_v62 = vsel %vm1995_vm15, %v2117_v55, %v8082_v42  ;;  %v1063_v49 = vand.u32 2147483647, %v12929_v36 }
 0x1e2   :  { %v2234_v6 = vadd.s32 %v2232_v17, %v2226_v30  ;;  %v2106_v53 = vor.u32 %v2105_v2, %v2104_v21  ;;  %v2109_v22 = vshll.u32 %v2108_v63, 23  ;;  %v8141_v44 = vadd.s32 %v2217_v57, %v2208_v50 }
 0x1e3   :  { %vm2235_vm3 = vc.u32 %v2233_v45, %v2229_v29  ;;  %v8144_v37 = vadd.s32 1, %v8001_v48  ;;  %vm8148_vm4 = vcmp.le.f32.partialorder %v1993_v26, 0.7853982  ;;  %v2187_v42 = vsel %vm2181_vm8, %v2184_v24, %v2186_v10 }
 0x1e4   :  { %v2236_v12 = vsel %vm2235_vm3, 1, %v12903_v18  ;;  %v2110_v20 = vor.u32 4788187, %v2109_v22  ;;  %v2228_v58 = vshrl.u32 %v2224_v41, 16  ;;  %v8155_v34 = vadd.s32 %v2233_v45, %v2229_v29 }
 0x1e5   :  { %v2238_v1 = vadd.s32 %v2236_v12, %v2234_v6  ;;  %v2113_v51 = vcvt.s32.f32 %v2106_v53  ;;  %v2120_v48 = vsel %vm8148_vm4, 0, %v2118_v62  ;;  %v2230_v40 = vshrl.u32 %v2225_v47, 16 }
 0x1e6   :  { %v1070_v26 = vand.u32 8388607, %v1063_v49  ;;  %v2111_v33 = vand.u32 2147483647, %v2110_v20  ;;  %vm2243_vm5 = vc.u32 %v8141_v44, %v8155_v34  ;;  %v1081_v54 = vshrl.u32 %v12907_v25, %v8135_v14 }
 0x1e7   :  { %v2239_v55 = vadd.s32 %v2238_v1, %v2228_v58  ;;  %v1083_v41 = vshll.u32 %v12907_v25, %v8042_v32  ;;  %v1084_v24 = vshrl.u32 %v12897_v28, %v8135_v14  ;;  %v1086_v10 = vshll.u32 %v12897_v28, %v8042_v32 }
 0x1e8   :  { %v1087_v52 = vshrl.u32 %v12898_v4, %v8135_v14  ;;  %v2114_v47 = vmul.f32 %v2113_v51, %v2111_v33  ;;  %v1089_v50 = vshll.u32 %v12898_v4, %v8042_v32  ;;  %v1090_v35 = vshrl.u32 %v12899_v9, %v8135_v14 }
 0x1e9   :  { %v2240_v27 = vadd.s32 %v2239_v55, %v2230_v40  ;;  %v1080_v46 = vshll.u32 %v12908_v5, %v8042_v32  ;;  %v8179_v43 = vor.u32 %v1084_v24, %v1083_v41  ;;  %v1092_v59 = vshll.u32 %v12899_v9, %v8042_v32 }
 0x1ea   :  { %v1093_v30 = vshrl.u32 %v12900_v38, %v8135_v14  ;;  %v2115_v13 = vxor.u32 2147483648, %v2114_v47  ;;  %v8185_v8 = vor.u32 %v1087_v52, %v1086_v10  ;;  %v1091_v57 = vor.u32 %v1090_v35, %v1089_v50 }
 0x1eb   :  { %v2244_v16 = vadd.s32 1, %v2240_v27  ;;  %vm1384_vm6 = vcmp.gt.s32.totalorder %v8144_v37, 0  ;;  %v2241_v56 = vmul.u32 %v8070_v7, %v2187_v42  ;;  %v1071_v21 = vor.u32 8388608, %v1070_v26 }
 0x1ec   :  { %v1094_v29 = vor.u32 %v1093_v30, %v1092_v59  ;;  %v2116_v2 = vsel %vm1995_vm15, %v2115_v13, %v2114_v47  ;;  %v2137_v63 = vadd.s32 3, %v2120_v48  ;;  %v8194_v17 = vor.u32 %v1081_v54, %v1080_v46 }
 0x1ed   :  { %v2245_v32 = vsel %vm2243_vm5, %v2244_v16, %v2240_v27  ;;  %v8199_v45 = vsel %vm8148_vm4, %v12923_v15, %v2116_v2  ;;  %vm1095_vm7 = vcmp.lt.s32.totalorder %v8008_v0, 1  ;;  %vm1098_vm8 = vcmp.lt.s32.totalorder %v8008_v0, 4 }
 0x1ee   :  { %v2246_v62 = vadd.s32 %v2245_v32, %v2241_v56  ;;  %v2121_v7 = vmul.f32 %v8199_v45, %v8199_v45  ;;  %vm1096_vm9 = vcmp.lt.s32.totalorder %v8008_v0, 2  ;;  %v1104_v6 = vsel %vm1098_vm8, %v1091_v57, 920167782 }
 0x1ef   :  { %v1107_v53 = vsel %vm1095_vm7, %v8179_v43, %v8185_v8  ;;  %vm1097_vm10 = vcmp.lt.s32.totalorder %v8008_v0, 3  ;;  %v1108_v39 = vsel %vm1098_vm8, %v1094_v29, 1326507024  ;;  %v8215_v42 = vshll.u32 %v1071_v21, 8 }
 0x1f0   :  { %v2247_v22 = vadd.s32 536870912, %v2246_v62  ;;  %v2122_v12 = vmul.f32 -0.001358992, %v2121_v7  ;;  %v2129_v20 = vmul.f32 -0.00019511016, %v2121_v7  ;;  %v1103_v58 = vsel %vm1095_vm7, %v8194_v17, %v8179_v43 }
 0x1f1   :  { %v1109_v1 = vsel %vm1097_vm10, %v1091_v57, %v1108_v39  ;;  %v1105_v48 = vsel %vm1097_vm10, %v8185_v8, %v1104_v6  ;;  %v1112_v26 = vand.u32 65535, %v8215_v42  ;;  %v8230_v24 = vadd.s32 4294967169, %v7848_v11 }
 0x1f2   :  { %v2248_v51 = vshrl.u32 %v2247_v22, 30  ;;  %v1110_v40 = vsel %vm1096_vm9, %v1107_v53, %v1109_v1  ;;  %v2123_v33 = vadd.f32 0.041655596, %v2122_v12  ;;  %v2130_v55 = vadd.f32 0.008332121, %v2129_v20 }
 0x1f3   :  { %v1114_v54 = vand.u32 65535, %v1110_v40  ;;  %v1115_v41 = vshrl.u32 %v1110_v40, 16  ;;  %v2138_v10 = vand.u32 3, %v2137_v63  ;;  %v1113_v47 = vshrl.u32 %v8215_v42, 16 }
 0x1f4   :  { %v2249_v52 = vshll.u32 %v2248_v51, 30  ;;  %v8234_v27 = vsub.s32 32, %v8092_v23  ;;  %v2124_v50 = vmul.f32 %v2123_v33, %v2121_v7  ;;  %v2131_v35 = vmul.f32 %v2130_v55, %v2121_v7 }
 0x1f5   :  { %v1117_v46 = vmul.u32 %v1115_v41, %v1112_v26  ;;  %v8239_v59 = vsel %vm1384_vm6, %v8144_v37, 0  ;;  %v1106_v11 = vsel %vm1096_vm9, %v1103_v58, %v1105_v48  ;;  %v8245_v13 = vmul.u32 %v1114_v54, %v1113_v47 }
 0x1f6   :  { %v8241_v30 = vsub.s32 %v2246_v62, %v2249_v52  ;;  %v2125_v16 = vadd.f32 -0.4999988, %v2124_v50  ;;  %v2132_v57 = vadd.f32 -0.16666654, %v2131_v35  ;;  %vm2150_vm11 = vcmp.lt.s32.totalorder %v12928_v61, 0 }
 0x1f7   :  { %v1120_v56 = vshll.u32 %v1117_v46, 16  ;;  %vm2140_vm12 = vcmp.eq.s32.totalorder %v2138_v10, 0  ;;  %vm2143_vm13 = vcmp.eq.s32.totalorder %v2138_v10, 2  ;;  %v2272_v37 = vsub.s32 4, %v2248_v51 }
 0x1f8   :  { %vm2251_vm14 = vcmp.lt.s32.totalorder %v8241_v30, 0  ;;  %v2252_v21 = vsub.s32 0, %v8241_v30  ;;  %v1116_v29 = vmul.u32 %v1114_v54, %v1112_v26  ;;  %v2126_v2 = vmul.f32 %v2125_v16, %v2121_v7 }
 0x1f9   :  { %v2133_v63 = vmul.f32 %v2132_v57, %v2121_v7  ;;  %vm2139_vm15 = vcmp.lt.s32.totalorder %v2138_v10, 2  ;;  %v1119_v32 = vmul.u32 %v1115_v41, %v1113_v47  ;;  %v1137_v62 = vshrl.u32 %v1106_v11, 16 }
 0x1fa   :  { %vm2136_vm0 = vweird.f32 %v12923_v15  ;;  %v2253_v6 = vsel %vm2251_vm14, %v2252_v21, %v8241_v30  ;;  %v1122_v53 = vshll.u32 %v8245_v13, 16  ;;  %vm1124_vm1 = vc.u32 %v1116_v29, %v1120_v56 }
 0x1fb   :  { %v1126_v22 = vadd.s32 %v1120_v56, %v1116_v29  ;;  %v2127_v39 = vadd.f32 1.0, %v2126_v2  ;;  %v2134_v12 = vadd.f32 1.0, %v2133_v63  ;;  %v2254_v20 = vclz %v2253_v6 }
 0x1fc   :  { %v1125_v58 = vsel %vm1124_vm1, 1, %v12903_v18  ;;  %v2242_v1 = vadd.s32 %v8155_v34, %v8141_v44  ;;  %v1079_v7 = vshrl.u32 %v12908_v5, %v8135_v14  ;;  %v1136_v40 = vand.u32 65535, %v1106_v11 }
 0x1fd   :  { %v1127_v48 = vadd.s32 %v1125_v58, %v1119_v32  ;;  %v2135_v33 = vmul.f32 %v2134_v12, %v8199_v45  ;;  %v2144_v55 = vxor.u32 2147483648, %v2127_v39  ;;  %vm8261_vm2 = vcmp.le.f32.partialorder %v2148_v19, 0.7853982 }
 0x1fe   :  { %v6485_v41 = vadd.s32 4294967294, %v2254_v20  ;;  %vm1128_vm3 = vc.u32 %v1126_v22, %v1122_v53  ;;  %v2273_v52 = vsel %vm2150_vm11, %v2272_v37, %v2248_v51  ;;  %v1100_v14 = vsel %vm1098_vm8, %v8185_v8, 2102212464 }
 0x1ff   :  { %v1129_v44 = vsel %vm1128_vm3, 1, %v12903_v18  ;;  %v1139_v34 = vmul.u32 %v1137_v62, %v1112_v26  ;;  %v2141_v45 = vxor.u32 2147483648, %v2135_v33  ;;  %v1121_v50 = vshrl.u32 %v1117_v46, 16 }
 0x200   :  { %vm6486_vm4 = vcmp.lt.s32.totalorder %v6485_v41, 0  ;;  %v1131_v35 = vadd.s32 %v1129_v44, %v1127_v48  ;;  %v1138_v11 = vmul.u32 %v1136_v40, %v1112_v26  ;;  %v1140_v16 = vmul.u32 %v1136_v40, %v1113_v47  ;;  %v12934_v48 = vld [vmem:[#allocation13_spill] sm:$0xff] }
 0x201   :  { %v2257_v19 = vsel %vm6486_vm4, 0, %v6485_v41  ;;  %v1142_v57 = vshll.u32 %v1139_v34, 16  ;;  %v2142_v56 = vsel %vm2140_vm12, %v2127_v39, %v2141_v45  ;;  %v2145_v21 = vsel %vm2143_vm13, %v2144_v55, %v2135_v33 }
 0x202   :  { %v2258_v51 = vsub.s32 32, %v2257_v19  ;;  %v2262_v37 = vsub.s32 4294967266, %v2257_v19  ;;  %v2146_v29 = vsel %vm2139_vm15, %v2142_v56, %v2145_v21  ;;  %v2259_v8 = vshll.u32 %v8241_v30, %v2257_v19 }
 0x203   :  { %v1132_v2 = vadd.s32 %v1131_v35, %v1121_v50  ;;  %v1141_v63 = vmul.u32 %v1137_v62, %v1113_v47  ;;  %v2147_v46 = vsel %vm2136_vm0, nan, %v2146_v29  ;;  %vm1146_vm5 = vc.u32 %v1138_v11, %v1142_v57 }
 0x204   :  { %v2260_v32 = vshrl.u32 %v2242_v1, %v2258_v51  ;;  %v2263_v6 = vadd.s32 127, %v2262_v37  ;;  %3035 = vmatpush.msra.mxu2 %v2147_v46  ;;  %v1123_v26 = vshrl.u32 %v8245_v13, 16  ;;  %v1144_v53 = vshll.u32 %v1140_v16, 16 }
 0x205   :  { %v1147_v22 = vsel %vm1146_vm5, 1, %v12903_v18  ;;  %v1148_v39 = vadd.s32 %v1142_v57, %v1138_v11  ;;  %v1099_v30 = vsel %vm1095_vm7, %v1079_v7, %v8194_v17  ;;  %v2275_v15 = vsel %vm8261_vm2, 0, %v2273_v52 }
 0x206   :  { %v2261_v12 = vor.u32 %v2260_v32, %v2259_v8  ;;  %v2264_v10 = vshll.u32 %v2263_v6, 23  ;;  %v1149_v47 = vadd.s32 %v1147_v22, %v1141_v63  ;;  %v1101_v62 = vsel %vm1097_vm10, %v8179_v43, %v1100_v14 }
 0x207   :  { %v8287_v20 = vadd.s32 %v1132_v2, %v1123_v26  ;;  %vm1150_vm6 = vc.u32 %v1148_v39, %v1144_v53  ;;  %v8290_v13 = vshrl.u32 %v7943_v3, 5  ;;  %v1218_v40 = vand.u32 2147483647, %v12934_v48 }
 0x208   :  { %v2265_v58 = vor.u32 4788187, %v2264_v10  ;;  %v1151_v1 = vsel %vm1150_vm6, 1, %v12903_v18  ;;  %v8295_v17 = vand.u32 31, %v8239_v59  ;;  %v1143_v7 = vshrl.u32 %v1139_v34, 16 }
 0x209   :  { %v8297_v33 = vadd.s32 %v1148_v39, %v1144_v53  ;;  %v1153_v55 = vadd.s32 %v1151_v1, %v1149_v47  ;;  %v2268_v43 = vcvt.s32.f32 %v2261_v12  ;;  %v2292_v52 = vadd.s32 3, %v2275_v15 }
 0x20a   :  { %v2266_v41 = vand.u32 2147483647, %v2265_v58  ;;  %v1102_v14 = vsel %vm1096_vm9, %v1099_v30, %v1101_v62  ;;  %v1145_v3 = vshrl.u32 %v1140_v16, 16  ;;  %v1239_v45 = vshrl.u32 %v12897_v28, %v8234_v27 }
 0x20b   :  { %v1154_v44 = vadd.s32 %v1153_v55, %v1143_v7  ;;  %vm1158_vm7 = vc.u32 %v8287_v20, %v8297_v33  ;;  %v1225_v34 = vand.u32 8388607, %v1218_v40  ;;  %v1236_v35 = vshrl.u32 %v12907_v25, %v8234_v27 }
 0x20c   :  { %v2269_v50 = vmul.f32 %v2268_v43, %v2266_v41  ;;  %v1242_v19 = vshrl.u32 %v12898_v4, %v8234_v27  ;;  %v1238_v11 = vshll.u32 %v12907_v25, %v8092_v23  ;;  %v1241_v16 = vshll.u32 %v12897_v28, %v8092_v23 }
 0x20d   :  { %v1155_v0 = vadd.s32 %v1154_v44, %v1145_v3  ;;  %v1245_v57 = vshrl.u32 %v12899_v9, %v8234_v27  ;;  %v1235_v21 = vshll.u32 %v12908_v5, %v8092_v23  ;;  %v1247_v51 = vshll.u32 %v12899_v9, %v8092_v23 }
 0x20e   :  { %v2270_v56 = vxor.u32 2147483648, %v2269_v50  ;;  %v1248_v37 = vshrl.u32 %v12900_v38, %v8234_v27  ;;  %v8323_v8 = vor.u32 %v1239_v45, %v1238_v11  ;;  %v8325_v2 = vor.u32 %v1242_v19, %v1241_v16  ;;  %v12935_v11 = vld [vmem:[#allocation9_spill] sm:$0xff] }
 0x20f   :  { %v1159_v29 = vadd.s32 1, %v1155_v0  ;;  %v1244_v63 = vshll.u32 %v12898_v4, %v8092_v23  ;;  %v1156_v32 = vmul.u32 %v8215_v42, %v1102_v14  ;;  %v1226_v6 = vor.u32 8388608, %v1225_v34 }
 0x210   :  { %v2271_v46 = vsel %vm2150_vm11, %v2270_v56, %v2269_v50  ;;  %v1249_v26 = vor.u32 %v1248_v37, %v1247_v51  ;;  %v8340_v39 = vor.u32 %v1236_v35, %v1235_v21  ;;  %vm1250_vm8 = vcmp.lt.s32.totalorder %v8290_v13, 1 }
 0x211   :  { %v8335_v53 = vsel %vm8261_vm2, %v12928_v61, %v2271_v46  ;;  %v1160_v22 = vsel %vm1158_vm7, %v1159_v29, %v1155_v0  ;;  %v1246_v12 = vor.u32 %v1245_v57, %v1244_v63  ;;  %vm1253_vm9 = vcmp.lt.s32.totalorder %v8290_v13, 4 }
 0x212   :  { %v2276_v23 = vmul.f32 %v8335_v53, %v8335_v53  ;;  %v1161_v10 = vadd.s32 %v1160_v22, %v1156_v32  ;;  %v8346_v42 = vand.u32 3, %v2292_v52  ;;  %vm1251_vm10 = vcmp.lt.s32.totalorder %v8290_v13, 2 }
 0x213   :  { %v1262_v54 = vsel %vm1250_vm8, %v8323_v8, %v8325_v2  ;;  %v1263_v30 = vsel %vm1253_vm9, %v1249_v26, 1326507024  ;;  %vm1252_vm11 = vcmp.lt.s32.totalorder %v8290_v13, 3  ;;  %v1258_v58 = vsel %vm1250_vm8, %v8340_v39, %v8323_v8 }
 0x214   :  { %v2277_v47 = vmul.f32 -0.001358992, %v2276_v23  ;;  %v2284_v15 = vmul.f32 -0.00019511016, %v2276_v23  ;;  %v1162_v62 = vadd.s32 536870912, %v1161_v10  ;;  %v1264_v7 = vsel %vm1252_vm11, %v1246_v12, %v1263_v30 }
 0x215   :  { %v1259_v1 = vsel %vm1253_vm9, %v1246_v12, 920167782  ;;  %v8364_v55 = vshll.u32 %v1226_v6, 8  ;;  %v1265_v14 = vsel %vm1251_vm10, %v1262_v54, %v1264_v7  ;;  %v8381_v16 = vadd.s32 1, %v12935_v11 }
 0x216   :  { %v2278_v41 = vadd.f32 0.041655596, %v2277_v47  ;;  %v2285_v43 = vadd.f32 0.008332121, %v2284_v15  ;;  %v8366_v52 = vshrl.u32 %v1162_v62, 30  ;;  %v1269_v45 = vand.u32 65535, %v1265_v14 }
 0x217   :  { %v8371_v3 = vand.u32 65535, %v8364_v55  ;;  %v8374_v44 = vshrl.u32 %v8364_v55, 16  ;;  %v1270_v50 = vshrl.u32 %v1265_v14, 16  ;;  %v1260_v0 = vsel %vm1252_vm11, %v8325_v2, %v1259_v1 }
 0x218   :  { %v2279_v34 = vmul.f32 %v2278_v41, %v2276_v23  ;;  %v2286_v35 = vmul.f32 %v2285_v43, %v2276_v23  ;;  %v1164_v19 = vshll.u32 %v8366_v52, 30  ;;  %v8384_v57 = vadd.s32 1, %v8230_v24 }
 0x219   :  { %v1272_v56 = vmul.u32 %v1270_v50, %v8371_v3  ;;  %v8388_v21 = vmul.u32 %v1269_v45, %v8374_v44  ;;  %v8391_v51 = vsub.s32 32, %v8295_v17  ;;  %vm2295_vm12 = vcmp.eq.s32.totalorder %v8346_v42, 0 }
 0x21a   :  { %v2280_v37 = vadd.f32 -0.4999988, %v2279_v34  ;;  %v2287_v29 = vadd.f32 -0.16666654, %v2286_v35  ;;  %v8393_v63 = vsub.s32 %v1161_v10, %v1164_v19  ;;  %v1234_v46 = vshrl.u32 %v12908_v5, %v8234_v27 }
 0x21b   :  { %v1261_v24 = vsel %vm1251_vm10, %v1258_v58, %v1260_v0  ;;  %v1271_v32 = vmul.u32 %v1269_v45, %v8371_v3  ;;  %v1275_v6 = vshll.u32 %v1272_v56, 16  ;;  %vm2294_vm13 = vcmp.lt.s32.totalorder %v8346_v42, 2 }
 0x21c   :  { %v2281_v26 = vmul.f32 %v2280_v37, %v2276_v23  ;;  %v2288_v22 = vmul.f32 %v2287_v29, %v2276_v23  ;;  %vm1065_vm14 = vcmp.lt.s32.totalorder %v12929_v36, 0  ;;  %vm1166_vm15 = vcmp.lt.s32.totalorder %v8393_v63, 0 }
 0x21d   :  { %v1167_v12 = vsub.s32 0, %v8393_v63  ;;  %vm2291_vm0 = vweird.f32 %v12928_v61  ;;  %v1274_v27 = vmul.u32 %v1270_v50, %v8374_v44  ;;  %v1277_v10 = vshll.u32 %v8388_v21, 16 }
 0x21e   :  { %vm1279_vm1 = vc.u32 %v1271_v32, %v1275_v6  ;;  %v1281_v54 = vadd.s32 %v1275_v6, %v1271_v32  ;;  %v2282_v30 = vadd.f32 1.0, %v2281_v26  ;;  %v2289_v47 = vadd.f32 1.0, %v2288_v22 }
 0x21f   :  { %v1168_v23 = vsel %vm1166_vm15, %v1167_v12, %v8393_v63  ;;  %v1280_v15 = vsel %vm1279_vm1, 1, %v12903_v18  ;;  %v1255_v58 = vsel %vm1253_vm9, %v8325_v2, 2102212464  ;;  %vm1539_vm3 = vcmp.gt.s32.totalorder %v8384_v57, 0 }
 0x220   :  { %v1169_v62 = vclz %v1168_v23  ;;  %v1282_v1 = vadd.s32 %v1280_v15, %v1274_v27  ;;  %vm1283_vm2 = vc.u32 %v1281_v54, %v1277_v10  ;;  %v2290_v7 = vmul.f32 %v2289_v47, %v8335_v53 }
 0x221   :  { %v2299_v41 = vxor.u32 2147483648, %v2282_v30  ;;  %vm8417_vm4 = vcmp.le.f32.partialorder %v1063_v49, 0.7853982  ;;  %v1284_v14 = vsel %vm1283_vm2, 1, %v12903_v18  ;;  %v1291_v45 = vand.u32 65535, %v1261_v24 }
 0x222   :  { %vm2298_vm5 = vcmp.eq.s32.totalorder %v8346_v42, 2  ;;  %v1157_v2 = vadd.s32 %v8297_v33, %v8287_v20  ;;  %v6464_v50 = vadd.s32 4294967294, %v1169_v62  ;;  %v1187_v34 = vsub.s32 4, %v8366_v52 }
 0x223   :  { %v2296_v35 = vxor.u32 2147483648, %v2290_v7  ;;  %v1254_v53 = vsel %vm1250_vm8, %v1234_v46, %v8340_v39  ;;  %v1286_v49 = vadd.s32 %v1284_v14, %v1282_v1  ;;  %v1292_v19 = vshrl.u32 %v1261_v24, 16 }
 0x224   :  { %v2300_v0 = vsel %vm2298_vm5, %v2299_v41, %v2290_v7  ;;  %vm6465_vm6 = vcmp.lt.s32.totalorder %v6464_v50, 0  ;;  %v1256_v11 = vsel %vm1252_vm11, %v8323_v8, %v1255_v58  ;;  %v1276_v37 = vshrl.u32 %v1272_v56, 16 }
 0x225   :  { %v2297_v20 = vsel %vm2295_vm12, %v2282_v30, %v2296_v35  ;;  %v1172_v33 = vsel %vm6465_vm6, 0, %v6464_v50  ;;  %v1294_v29 = vmul.u32 %v1292_v19, %v8371_v3  ;;  %v1295_v32 = vmul.u32 %v1291_v45, %v8374_v44 }
 0x226   :  { %v2301_v39 = vsel %vm2294_vm13, %v2297_v20, %v2300_v0  ;;  %v1173_v46 = vsub.s32 32, %v1172_v33  ;;  %v1177_v24 = vsub.s32 4294967266, %v1172_v33  ;;  %v1188_v6 = vsel %vm1065_vm14, %v1187_v34, %v8366_v52 }
 0x227   :  { %v2302_v8 = vsel %vm2291_vm0, nan, %v2301_v39  ;;  %v1287_v56 = vadd.s32 %v1286_v49, %v1276_v37  ;;  %v1293_v26 = vmul.u32 %v1291_v45, %v8371_v3  ;;  %v1297_v22 = vshll.u32 %v1294_v29, 16 }
 0x228   :  { %3064 = vmatpush.msra.mxu3 %v2302_v8  ;;  %v1174_v12 = vshll.u32 %v8393_v63, %v1172_v33  ;;  %v1175_v27 = vshrl.u32 %v1157_v2, %v1173_v46  ;;  %v1178_v10 = vadd.s32 127, %v1177_v24  ;;  %v1278_v42 = vshrl.u32 %v8388_v21, 16 }
 0x229   :  { %v1296_v54 = vmul.u32 %v1292_v19, %v8374_v44  ;;  %v1299_v30 = vshll.u32 %v1295_v32, 16  ;;  %vm1301_vm7 = vc.u32 %v1293_v26, %v1297_v22  ;;  %v1303_v47 = vadd.s32 %v1297_v22, %v1293_v26 }
 0x22a   :  { %v1176_v52 = vor.u32 %v1175_v27, %v1174_v12  ;;  %v1179_v23 = vshll.u32 %v1178_v10, 23  ;;  %v1190_v61 = vsel %vm8417_vm4, 0, %v1188_v6  ;;  %v1302_v3 = vsel %vm1301_vm7, 1, %v12903_v18 }
 0x22b   :  { %v8450_v15 = vadd.s32 %v1287_v56, %v1278_v42  ;;  %v1304_v62 = vadd.s32 %v1302_v3, %v1296_v54  ;;  %vm1305_vm8 = vc.u32 %v1303_v47, %v1299_v30  ;;  %v1373_v63 = vand.u32 2147483647, %v12919_v60 }
 0x22c   :  { %v8454_v21 = vshrl.u32 %v8239_v59, 5  ;;  %v8459_v44 = vsel %vm1539_vm3, %v8384_v57, 0  ;;  %v1180_v58 = vor.u32 4788187, %v1179_v23  ;;  %v1306_v1 = vsel %vm1305_vm8, 1, %v12903_v18 }
 0x22d   :  { %v1257_v7 = vsel %vm1251_vm10, %v1254_v53, %v1256_v11  ;;  %v1298_v41 = vshrl.u32 %v1294_v29, 16  ;;  %v8464_v14 = vadd.s32 %v1303_v47, %v1299_v30  ;;  %v1308_v45 = vadd.s32 %v1306_v1, %v1304_v62  ;;  %v12938_v29 = vld [vmem:[#allocation10_spill] sm:$0xff] }
 0x22e   :  { %v1181_v2 = vand.u32 2147483647, %v1180_v58  ;;  %v1183_v50 = vcvt.s32.f32 %v1176_v52  ;;  %v1207_v34 = vadd.s32 3, %v1190_v61  ;;  %v1300_v59 = vshrl.u32 %v1295_v32, 16 }
 0x22f   :  { %v1309_v35 = vadd.s32 %v1308_v45, %v1298_v41  ;;  %vm1313_vm9 = vc.u32 %v8450_v15, %v8464_v14  ;;  %v1380_v57 = vand.u32 8388607, %v1373_v63  ;;  %v1394_v49 = vshrl.u32 %v12897_v28, %v8391_v51 }
 0x230   :  { %v1184_v13 = vmul.f32 %v1183_v50, %v1181_v2  ;;  %v1391_v53 = vshrl.u32 %v12907_v25, %v8391_v51  ;;  %v1393_v19 = vshll.u32 %v12907_v25, %v8295_v17  ;;  %v1397_v0 = vshrl.u32 %v12898_v4, %v8391_v51 }
 0x231   :  { %v1310_v11 = vadd.s32 %v1309_v35, %v1300_v59  ;;  %v1396_v37 = vshll.u32 %v12897_v28, %v8295_v17  ;;  %v1399_v20 = vshll.u32 %v12898_v4, %v8295_v17  ;;  %v1400_v33 = vshrl.u32 %v12899_v9, %v8391_v51 }
 0x232   :  { %vm454_vm10 = vcmp.gt.s32.totalorder %v12938_v29, 0  ;;  %v1185_v32 = vxor.u32 2147483648, %v1184_v13  ;;  %v1390_v39 = vshll.u32 %v12908_v5, %v8295_v17  ;;  %v1402_v46 = vshll.u32 %v12899_v9, %v8295_v17 }
 0x233   :  { %v1403_v24 = vshrl.u32 %v12900_v38, %v8391_v51  ;;  %v1314_v6 = vadd.s32 1, %v1310_v11  ;;  %v8491_v8 = vor.u32 %v1394_v49, %v1393_v19  ;;  %v8493_v56 = vor.u32 %v1397_v0, %v1396_v37 }
 0x234   :  { %v1401_v26 = vor.u32 %v1400_v33, %v1399_v20  ;;  %v1186_v22 = vsel %vm1065_vm14, %v1185_v32, %v1184_v13  ;;  %v1311_v12 = vmul.u32 %v8364_v55, %v1257_v7  ;;  %v1381_v27 = vor.u32 8388608, %v1380_v57 }
 0x235   :  { %v1404_v10 = vor.u32 %v1403_v24, %v1402_v46  ;;  %v8501_v17 = vsel %vm8417_vm4, %v12929_v36, %v1186_v22  ;;  %v1315_v42 = vsel %vm1313_vm9, %v1314_v6, %v1310_v11  ;;  %v8506_v54 = vor.u32 %v1391_v53, %v1390_v39 }
 0x236   :  { %vm1408_vm11 = vcmp.lt.s32.totalorder %v8454_v21, 4  ;;  %v1191_v30 = vmul.f32 %v8501_v17, %v8501_v17  ;;  %v1316_v47 = vadd.s32 %v1315_v42, %v1311_v12  ;;  %vm1405_vm12 = vcmp.lt.s32.totalorder %v8454_v21, 1 }
 0x237   :  { %v1414_v55 = vsel %vm1408_vm11, %v1401_v26, 920167782  ;;  %v8514_v43 = vand.u32 3, %v1207_v34  ;;  %vm1406_vm13 = vcmp.lt.s32.totalorder %v8454_v21, 2  ;;  %v1417_v52 = vsel %vm1405_vm12, %v8491_v8, %v8493_v56 }
 0x238   :  { %v1418_v23 = vsel %vm1408_vm11, %v1404_v10, 1326507024  ;;  %v1192_v61 = vmul.f32 -0.001358992, %v1191_v30  ;;  %v1199_v3 = vmul.f32 -0.00019511016, %v1191_v30  ;;  %v1413_v58 = vsel %vm1405_vm12, %v8506_v54, %v8491_v8 }
 0x239   :  { %v1317_v62 = vadd.s32 536870912, %v1316_v47  ;;  %vm1407_vm14 = vcmp.lt.s32.totalorder %v8454_v21, 3  ;;  %v8533_v41 = vshll.u32 %v1381_v27, 8  ;;  %v8548_v11 = vsel %vm454_vm10, %v12938_v29, 0 }
 0x23a   :  { %v1415_v1 = vsel %vm1407_vm14, %v8493_v56, %v1414_v55  ;;  %v1419_v7 = vsel %vm1407_vm14, %v1401_v26, %v1418_v23  ;;  %v1193_v45 = vadd.f32 0.041655596, %v1192_v61  ;;  %v1200_v2 = vadd.f32 0.008332121, %v1199_v3 }
 0x23b   :  { %v1318_v50 = vshrl.u32 %v1317_v62, 30  ;;  %v1420_v34 = vsel %vm1406_vm13, %v1417_v52, %v1419_v7  ;;  %v8538_v59 = vand.u32 65535, %v8533_v41  ;;  %v8541_v35 = vshrl.u32 %v8533_v41, 16 }
 0x23c   :  { %v1424_v57 = vand.u32 65535, %v1420_v34  ;;  %v1425_v49 = vshrl.u32 %v1420_v34, 16  ;;  %v1194_v13 = vmul.f32 %v1193_v45, %v1191_v30  ;;  %v1201_v53 = vmul.f32 %v1200_v2, %v1191_v30 }
 0x23d   :  { %v1319_v19 = vshll.u32 %v1318_v50, 30  ;;  %v1416_v0 = vsel %vm1406_vm13, %v1413_v58, %v1415_v1  ;;  %v8551_v37 = vand.u32 31, %v8459_v44  ;;  %vm1220_vm15 = vcmp.lt.s32.totalorder %v12934_v48, 0 }
 0x23e   :  { %v1427_v20 = vmul.u32 %v1425_v49, %v8538_v59  ;;  %v8555_v33 = vmul.u32 %v1424_v57, %v8541_v35  ;;  %v1195_v32 = vadd.f32 -0.4999988, %v1194_v13  ;;  %v1202_v39 = vadd.f32 -0.16666654, %v1201_v53 }
 0x23f   :  { %v8558_v46 = vsub.s32 %v1316_v47, %v1319_v19  ;;  %vm1210_vm0 = vcmp.eq.s32.totalorder %v8514_v43, 0  ;;  %v1389_v29 = vshrl.u32 %v12908_v5, %v8391_v51  ;;  %v1426_v24 = vmul.u32 %v1424_v57, %v8538_v59 }
 0x240   :  { %v1430_v6 = vshll.u32 %v1427_v20, 16  ;;  %v1447_v26 = vshrl.u32 %v1416_v0, 16  ;;  %v1196_v22 = vmul.f32 %v1195_v32, %v1191_v30  ;;  %v1203_v12 = vmul.f32 %v1202_v39, %v1191_v30 }
 0x241   :  { %vm1209_vm1 = vcmp.lt.s32.totalorder %v8514_v43, 2  ;;  %vm1321_vm2 = vcmp.lt.s32.totalorder %v8558_v46, 0  ;;  %v1322_v27 = vsub.s32 0, %v8558_v46  ;;  %vm1206_vm3 = vweird.f32 %v12929_v36 }
 0x242   :  { %v1429_v10 = vmul.u32 %v1425_v49, %v8541_v35  ;;  %v1432_v42 = vshll.u32 %v8555_v33, 16  ;;  %vm1434_vm4 = vc.u32 %v1426_v24, %v1430_v6  ;;  %v1436_v51 = vadd.s32 %v1430_v6, %v1426_v24 }
 0x243   :  { %v1197_v47 = vadd.f32 1.0, %v1196_v22  ;;  %v1204_v55 = vadd.f32 1.0, %v1203_v12  ;;  %v1323_v52 = vsel %vm1321_vm2, %v1322_v27, %v8558_v46  ;;  %v1435_v30 = vsel %vm1434_vm4, 1, %v12903_v18 }
 0x244   :  { %v1324_v23 = vclz %v1323_v52  ;;  %v1342_v61 = vsub.s32 4, %v1318_v50  ;;  %v1437_v3 = vadd.s32 %v1435_v30, %v1429_v10  ;;  %vm1438_vm5 = vc.u32 %v1436_v51, %v1432_v42 }
 0x245   :  { %v1205_v62 = vmul.f32 %v1204_v55, %v8501_v17  ;;  %v1214_v58 = vxor.u32 2147483648, %v1197_v47  ;;  %v1439_v1 = vsel %vm1438_vm5, 1, %v12903_v18  ;;  %v1446_v7 = vand.u32 65535, %v1416_v0 }
 0x246   :  { %vm1213_vm6 = vcmp.eq.s32.totalorder %v8514_v43, 2  ;;  %vm8577_vm7 = vcmp.le.f32.partialorder %v1218_v40, 0.7853982  ;;  %v1312_v2 = vadd.s32 %v8464_v14, %v8450_v15  ;;  %v6467_v34 = vadd.s32 4294967294, %v1324_v23  ;;  %v12941_v43 = vld [vmem:[#allocation11_spill] sm:$0xff] }
 0x247   :  { %v1409_v17 = vsel %vm1405_vm12, %v1389_v29, %v8506_v54  ;;  %v1211_v57 = vxor.u32 2147483648, %v1205_v62  ;;  %v1410_v49 = vsel %vm1408_vm11, %v8493_v56, 2102212464  ;;  %v1441_v13 = vadd.s32 %v1439_v1, %v1437_v3 }
 0x248   :  { %v1449_v53 = vmul.u32 %v1447_v26, %v8538_v59  ;;  %v1215_v40 = vsel %vm1213_vm6, %v1214_v58, %v1205_v62  ;;  %vm6468_vm8 = vcmp.lt.s32.totalorder %v6467_v34, 0  ;;  %v1343_v19 = vsel %vm1220_vm15, %v1342_v61, %v1318_v50 }
 0x249   :  { %v1431_v0 = vshrl.u32 %v1427_v20, 16  ;;  %v1212_v15 = vsel %vm1210_vm0, %v1197_v47, %v1211_v57  ;;  %v1327_v14 = vsel %vm6468_vm8, 0, %v6467_v34  ;;  %v1450_v54 = vmul.u32 %v1446_v7, %v8541_v35 }
 0x24a   :  { %v1452_v32 = vshll.u32 %v1449_v53, 16  ;;  %v1216_v39 = vsel %vm1209_vm1, %v1212_v15, %v1215_v40  ;;  %v1328_v56 = vsub.s32 32, %v1327_v14  ;;  %v1332_v29 = vsub.s32 4294967266, %v1327_v14 }
 0x24b   :  { %v1448_v24 = vmul.u32 %v1446_v7, %v8538_v59  ;;  %v1217_v6 = vsel %vm1206_vm3, nan, %v1216_v39  ;;  %v1433_v50 = vshrl.u32 %v8555_v33, 16  ;;  %v1442_v20 = vadd.s32 %v1441_v13, %v1431_v0 }
 0x24c   :  { %v1451_v22 = vmul.u32 %v1447_v26, %v8541_v35  ;;  %2978 = vmatpush.msra.mxu0 %v1217_v6  ;;  %v1329_v12 = vshll.u32 %v8558_v46, %v1327_v14  ;;  %v1330_v27 = vshrl.u32 %v1312_v2, %v1328_v56  ;;  %v1333_v10 = vadd.s32 127, %v1332_v29 }
 0x24d   :  { %vm1456_vm9 = vc.u32 %v1448_v24, %v1452_v32  ;;  %vm609_vm10 = vcmp.gt.s32.totalorder %v12941_v43, 0  ;;  %v1454_v42 = vshll.u32 %v1450_v54, 16  ;;  %v1458_v59 = vadd.s32 %v1452_v32, %v1448_v24 }
 0x24e   :  { %v1457_v51 = vsel %vm1456_vm9, 1, %v12903_v18  ;;  %v1528_v36 = vand.u32 2147483647, %v12924_v31  ;;  %v1331_v47 = vor.u32 %v1330_v27, %v1329_v12  ;;  %v1334_v55 = vshll.u32 %v1333_v10, 23 }
 0x24f   :  { %v1411_v35 = vsel %vm1407_vm14, %v8491_v8, %v1410_v49  ;;  %v1459_v33 = vadd.s32 %v1457_v51, %v1451_v22  ;;  %v8610_v46 = vsub.s32 32, %v8551_v37  ;;  %v1345_v26 = vsel %vm8577_vm7, 0, %v1343_v19 }
 0x250   :  { %v8614_v52 = vadd.s32 %v1442_v20, %v1433_v50  ;;  %vm1460_vm11 = vc.u32 %v1458_v59, %v1454_v42  ;;  %v8617_v30 = vshrl.u32 %v8459_v44, 5  ;;  %v1335_v23 = vor.u32 4788187, %v1334_v55 }
 0x251   :  { %v1461_v61 = vsel %vm1460_vm11, 1, %v12903_v18  ;;  %v1535_v3 = vand.u32 8388607, %v1528_v36  ;;  %v1412_v8 = vsel %vm1406_vm13, %v1409_v17, %v1411_v35  ;;  %v1453_v62 = vshrl.u32 %v1449_v53, 16 }
 0x252   :  { %v8624_v58 = vadd.s32 %v1458_v59, %v1454_v42  ;;  %v1463_v1 = vadd.s32 %v1461_v61, %v1459_v33  ;;  %v1336_v7 = vand.u32 2147483647, %v1335_v23  ;;  %v1338_v2 = vcvt.s32.f32 %v1331_v47 }
 0x253   :  { %v1362_v34 = vadd.s32 3, %v1345_v26  ;;  %v1455_v57 = vshrl.u32 %v1450_v54, 16  ;;  %v1549_v44 = vshrl.u32 %v12897_v28, %v8610_v46  ;;  %v1552_v13 = vshrl.u32 %v12898_v4, %v8610_v46 }
 0x254   :  { %v1464_v49 = vadd.s32 %v1463_v1, %v1453_v62  ;;  %vm1468_vm12 = vc.u32 %v8614_v52, %v8624_v58  ;;  %v1339_v21 = vmul.f32 %v1338_v2, %v1336_v7  ;;  %v1536_v17 = vor.u32 8388608, %v1535_v3 }
 0x255   :  { %v1554_v53 = vshll.u32 %v12898_v4, %v8551_v37  ;;  %v1555_v40 = vshrl.u32 %v12899_v9, %v8610_v46  ;;  %v1546_v0 = vshrl.u32 %v12907_v25, %v8610_v46  ;;  %v1548_v15 = vshll.u32 %v12907_v25, %v8551_v37 }
 0x256   :  { %v1465_v19 = vadd.s32 %v1464_v49, %v1455_v57  ;;  %v1551_v14 = vshll.u32 %v12897_v28, %v8551_v37  ;;  %v1340_v54 = vxor.u32 2147483648, %v1339_v21  ;;  %v1557_v39 = vshll.u32 %v12899_v9, %v8551_v37 }
 0x257   :  { %v1556_v32 = vor.u32 %v1555_v40, %v1554_v53  ;;  %v1558_v56 = vshrl.u32 %v12900_v38, %v8610_v46  ;;  %v1545_v24 = vshll.u32 %v12908_v5, %v8551_v37  ;;  %v8648_v6 = vor.u32 %v1549_v44, %v1548_v15 }
 0x258   :  { %v1469_v29 = vadd.s32 1, %v1465_v19  ;;  %v1553_v50 = vor.u32 %v1552_v13, %v1551_v14  ;;  %v8653_v20 = vsel %vm609_vm10, %v12941_v43, 0  ;;  %v1341_v22 = vsel %vm1220_vm15, %v1340_v54, %v1339_v21 }
 0x259   :  { %v1466_v12 = vmul.u32 %v8533_v41, %v1412_v8  ;;  %v1559_v27 = vor.u32 %v1558_v56, %v1557_v39  ;;  %v8661_v10 = vsel %vm8577_vm7, %v12934_v48, %v1341_v22  ;;  %v8666_v42 = vor.u32 %v1546_v0, %v1545_v24 }
 0x25a   :  { %v1470_v37 = vsel %vm1468_vm12, %v1469_v29, %v1465_v19  ;;  %vm1563_vm13 = vcmp.lt.s32.totalorder %v8617_v30, 4  ;;  %v1346_v43 = vmul.f32 %v8661_v10, %v8661_v10  ;;  %vm1560_vm14 = vcmp.lt.s32.totalorder %v8617_v30, 1 }
 0x25b   :  { %v1471_v51 = vadd.s32 %v1470_v37, %v1466_v12  ;;  %v1569_v41 = vsel %vm1563_vm13, %v1556_v32, 920167782  ;;  %v8674_v45 = vand.u32 3, %v1362_v34  ;;  %v1572_v59 = vsel %vm1560_vm14, %v8648_v6, %v1553_v50 }
 0x25c   :  { %v1573_v47 = vsel %vm1563_vm13, %v1559_v27, 1326507024  ;;  %v8681_v55 = vshll.u32 %v1536_v17, 8  ;;  %v1347_v35 = vmul.f32 -0.001358992, %v1346_v43  ;;  %vm1562_vm15 = vcmp.lt.s32.totalorder %v8617_v30, 3 }
 0x25d   :  { %v1354_v33 = vmul.f32 -0.00019511016, %v1346_v43  ;;  %v1472_v26 = vadd.s32 536870912, %v1471_v51  ;;  %vm1561_vm0 = vcmp.lt.s32.totalorder %v8617_v30, 2  ;;  %v1568_v23 = vsel %vm1560_vm14, %v8666_v42, %v8648_v6 }
 0x25e   :  { %v1570_v61 = vsel %vm1562_vm15, %v1553_v50, %v1569_v41  ;;  %v1574_v3 = vsel %vm1562_vm15, %v1556_v32, %v1573_v47  ;;  %v1348_v8 = vadd.f32 0.041655596, %v1347_v35  ;;  %v1577_v2 = vand.u32 65535, %v8681_v55 }
 0x25f   :  { %v1355_v62 = vadd.f32 0.008332121, %v1354_v33  ;;  %v8693_v1 = vshrl.u32 %v1472_v26, 30  ;;  %v1575_v7 = vsel %vm1561_vm0, %v1572_v59, %v1574_v3  ;;  %v1578_v34 = vshrl.u32 %v8681_v55, 16 }
 0x260   :  { %v1579_v57 = vand.u32 65535, %v1575_v7  ;;  %v1580_v49 = vshrl.u32 %v1575_v7, 16  ;;  %v1349_v44 = vmul.f32 %v1348_v8, %v1346_v43  ;;  %v1571_v17 = vsel %vm1561_vm0, %v1568_v23, %v1570_v61 }
 0x261   :  { %v1356_v13 = vmul.f32 %v1355_v62, %v1346_v43  ;;  %v1474_v21 = vshll.u32 %v8693_v1, 30  ;;  %v8703_v53 = vand.u32 31, %v8548_v11  ;;  %v1544_v40 = vshrl.u32 %v12908_v5, %v8610_v46 }
 0x262   :  { %v1582_v19 = vmul.u32 %v1580_v49, %v1577_v2  ;;  %v8707_v0 = vmul.u32 %v1579_v57, %v1578_v34  ;;  %v1350_v15 = vadd.f32 -0.4999988, %v1349_v44  ;;  %v1565_v32 = vsel %vm1563_vm13, %v1553_v50, 2102212464 }
 0x263   :  { %v1357_v14 = vadd.f32 -0.16666654, %v1356_v13  ;;  %v8709_v54 = vsub.s32 %v1471_v51, %v1474_v21  ;;  %vm1365_vm1 = vcmp.eq.s32.totalorder %v8674_v45, 0  ;;  %vm1368_vm2 = vcmp.eq.s32.totalorder %v8674_v45, 2 }
 0x264   :  { %v1581_v39 = vmul.u32 %v1579_v57, %v1577_v2  ;;  %v1585_v56 = vshll.u32 %v1582_v19, 16  ;;  %v1601_v29 = vand.u32 65535, %v1571_v17  ;;  %v1602_v24 = vshrl.u32 %v1571_v17, 16 }
 0x265   :  { %v1351_v22 = vmul.f32 %v1350_v15, %v1346_v43  ;;  %v1358_v46 = vmul.f32 %v1357_v14, %v1346_v43  ;;  %vm1364_vm3 = vcmp.lt.s32.totalorder %v8674_v45, 2  ;;  %vm1476_vm4 = vcmp.lt.s32.totalorder %v8709_v54, 0 }
 0x266   :  { %v1477_v12 = vsub.s32 0, %v8709_v54  ;;  %vm1361_vm5 = vweird.f32 %v12934_v48  ;;  %v1584_v27 = vmul.u32 %v1580_v49, %v1578_v34  ;;  %v1587_v50 = vshll.u32 %v8707_v0, 16  ;;  %v12942_v48 = vld [vmem:[#allocation2_spill] sm:$0xff] }
 0x267   :  { %vm1589_vm6 = vc.u32 %v1581_v39, %v1585_v56  ;;  %v1591_v37 = vadd.s32 %v1585_v56, %v1581_v39  ;;  %v1352_v51 = vadd.f32 1.0, %v1351_v22  ;;  %v1359_v41 = vadd.f32 1.0, %v1358_v46 }
 0x268   :  { %v1478_v59 = vsel %vm1476_vm4, %v1477_v12, %v8709_v54  ;;  %v1590_v47 = vsel %vm1589_vm6, 1, %v12903_v18  ;;  %vm1375_vm7 = vcmp.lt.s32.totalorder %v12919_v60, 0  ;;  %v1467_v43 = vadd.s32 %v8624_v58, %v8614_v52 }
 0x269   :  { %v1479_v35 = vclz %v1478_v59  ;;  %v1592_v33 = vadd.s32 %v1590_v47, %v1584_v27  ;;  %vm1593_vm8 = vc.u32 %v1591_v37, %v1587_v50  ;;  %v1360_v26 = vmul.f32 %v1359_v41, %v8661_v10 }
 0x26a   :  { %v1369_v23 = vxor.u32 2147483648, %v1352_v51  ;;  %v1594_v61 = vsel %vm1593_vm8, 1, %v12903_v18  ;;  %v1604_v3 = vmul.u32 %v1602_v24, %v1577_v2  ;;  %v1564_v62 = vsel %vm1560_vm14, %v1544_v40, %v8666_v42 }
 0x26b   :  { %v6470_v8 = vadd.s32 4294967294, %v1479_v35  ;;  %v1566_v7 = vsel %vm1562_vm15, %v8648_v6, %v1565_v32  ;;  %v1603_v57 = vmul.u32 %v1601_v29, %v1577_v2  ;;  %v1366_v52 = vxor.u32 2147483648, %v1360_v26 }
 0x26c   :  { %v1497_v58 = vsub.s32 4, %v8693_v1  ;;  %v1596_v49 = vadd.s32 %v1594_v61, %v1592_v33  ;;  %v1605_v44 = vmul.u32 %v1601_v29, %v1578_v34  ;;  %v1586_v10 = vshrl.u32 %v1582_v19, 16 }
 0x26d   :  { %vm6471_vm9 = vcmp.lt.s32.totalorder %v6470_v8, 0  ;;  %v1588_v13 = vshrl.u32 %v8707_v0, 16  ;;  %v1607_v21 = vshll.u32 %v1604_v3, 16  ;;  %v1367_v17 = vsel %vm1365_vm1, %v1352_v51, %v1366_v52 }
 0x26e   :  { %v1370_v42 = vsel %vm1368_vm2, %v1369_v23, %v1360_v26  ;;  %v1482_v40 = vsel %vm6471_vm9, 0, %v6470_v8  ;;  %v1606_v15 = vmul.u32 %v1602_v24, %v1578_v34  ;;  %v1597_v32 = vadd.s32 %v1596_v49, %v1586_v10 }
 0x26f   :  { %v1371_v6 = vsel %vm1364_vm3, %v1367_v17, %v1370_v42  ;;  %v1483_v2 = vsub.s32 32, %v1482_v40  ;;  %v1487_v14 = vsub.s32 4294967266, %v1482_v40  ;;  %v1484_v0 = vshll.u32 %v8709_v54, %v1482_v40 }
 0x270   :  { %v1372_v19 = vsel %vm1361_vm5, nan, %v1371_v6  ;;  %v1609_v39 = vshll.u32 %v1605_v44, 16  ;;  %vm1611_vm10 = vc.u32 %v1603_v57, %v1607_v21  ;;  %v1613_v46 = vadd.s32 %v1607_v21, %v1603_v57 }
 0x271   :  { %3007 = vmatpush.msra.mxu1 %v1372_v19  ;;  %v1485_v56 = vshrl.u32 %v1467_v43, %v1483_v2  ;;  %v1488_v29 = vadd.s32 127, %v1487_v14  ;;  %v1612_v22 = vsel %vm1611_vm10, 1, %v12903_v18  ;;  %v8746_v34 = vsub.s32 32, %v8703_v53 }
 0x272   :  { %v1498_v45 = vsel %vm1375_vm7, %v1497_v58, %v8693_v1  ;;  %v1614_v24 = vadd.s32 %v1612_v22, %v1606_v15  ;;  %v443_v12 = vand.u32 2147483647, %v12942_v48  ;;  %v8752_v50 = vadd.s32 %v1597_v32, %v1588_v13 }
 0x273   :  { %v1486_v27 = vor.u32 %v1485_v56, %v1484_v0  ;;  %v1489_v54 = vshll.u32 %v1488_v29, 23  ;;  %vm1615_vm11 = vc.u32 %v1613_v46, %v1609_v39  ;;  %v8755_v37 = vshrl.u32 %v8548_v11, 5 }
 0x274   :  { %vm8759_vm12 = vcmp.le.f32.partialorder %v1373_v63, 0.7853982  ;;  %v1567_v1 = vsel %vm1561_vm0, %v1564_v62, %v1566_v7  ;;  %v1616_v41 = vsel %vm1615_vm11, 1, %v12903_v18  ;;  %v1608_v47 = vshrl.u32 %v1604_v3, 16 }
 0x275   :  { %v1490_v59 = vor.u32 4788187, %v1489_v54  ;;  %v8766_v43 = vadd.s32 %v1613_v46, %v1609_v39  ;;  %v1618_v35 = vadd.s32 %v1616_v41, %v1614_v24  ;;  %v1493_v33 = vcvt.s32.f32 %v1486_v27 }
 0x276   :  { %v1500_v11 = vsel %vm8759_vm12, 0, %v1498_v45  ;;  %v1610_v26 = vshrl.u32 %v1605_v44, 16  ;;  %v450_v63 = vand.u32 8388607, %v443_v12  ;;  %v461_v30 = vshrl.u32 %v12907_v25, %v8746_v34 }
 0x277   :  { %v1491_v23 = vand.u32 2147483647, %v1490_v59  ;;  %v1619_v61 = vadd.s32 %v1618_v35, %v1608_v47  ;;  %vm1623_vm13 = vc.u32 %v8752_v50, %v8766_v43  ;;  %v463_v3 = vshll.u32 %v12907_v25, %v8703_v53 }
 0x278   :  { %v464_v8 = vshrl.u32 %v12897_v28, %v8746_v34  ;;  %v466_v62 = vshll.u32 %v12897_v28, %v8703_v53  ;;  %v467_v7 = vshrl.u32 %v12898_v4, %v8746_v34  ;;  %v469_v58 = vshll.u32 %v12898_v4, %v8703_v53 }
 0x279   :  { %v1494_v57 = vmul.f32 %v1493_v33, %v1491_v23  ;;  %v1620_v52 = vadd.s32 %v1619_v61, %v1610_v26  ;;  %v470_v49 = vshrl.u32 %v12899_v9, %v8746_v34  ;;  %vm764_vm14 = vcmp.gt.s32.totalorder %v8381_v16, 0  ;;  %v12945_v61 = vld [vmem:[#allocation8_spill] sm:$0xff] }
 0x27a   :  { %v460_v44 = vshll.u32 %v12908_v5, %v8703_v53  ;;  %v8791_v10 = vor.u32 %v464_v8, %v463_v3  ;;  %v472_v13 = vshll.u32 %v12899_v9, %v8703_v53  ;;  %v473_v21 = vshrl.u32 %v12900_v38, %v8746_v34 }
 0x27b   :  { %v1495_v17 = vxor.u32 2147483648, %v1494_v57  ;;  %v1624_v42 = vadd.s32 1, %v1620_v52  ;;  %v8797_v40 = vor.u32 %v467_v7, %v466_v62  ;;  %v471_v15 = vor.u32 %v470_v49, %v469_v58 }
 0x27c   :  { %v8800_v6 = vand.u32 31, %v8653_v20  ;;  %v1621_v2 = vmul.u32 %v8681_v55, %v1567_v1  ;;  %v451_v14 = vor.u32 8388608, %v450_v63  ;;  %v474_v32 = vor.u32 %v473_v21, %v472_v13 }
 0x27d   :  { %v1496_v19 = vsel %vm1375_vm7, %v1495_v17, %v1494_v57  ;;  %v1517_v0 = vadd.s32 3, %v1500_v11  ;;  %v1625_v53 = vsel %vm1623_vm13, %v1624_v42, %v1620_v52  ;;  %v8808_v39 = vor.u32 %v461_v30, %v460_v44 }
 0x27e   :  { %v8813_v56 = vsel %vm8759_vm12, %v12919_v60, %v1496_v19  ;;  %v1626_v29 = vadd.s32 %v1625_v53, %v1621_v2  ;;  %vm475_vm15 = vcmp.lt.s32.totalorder %v8755_v37, 1  ;;  %vm478_vm0 = vcmp.lt.s32.totalorder %v8755_v37, 4 }
 0x27f   :  { %v1501_v55 = vmul.f32 %v8813_v56, %v8813_v56  ;;  %vm476_vm1 = vcmp.lt.s32.totalorder %v8755_v37, 2  ;;  %v484_v22 = vsel %vm478_vm0, %v471_v15, 920167782  ;;  %v487_v46 = vsel %vm475_vm15, %v8791_v10, %v8797_v40 }
 0x280   :  { %v1627_v45 = vadd.s32 536870912, %v1626_v29  ;;  %vm477_vm2 = vcmp.lt.s32.totalorder %v8755_v37, 3  ;;  %v488_v24 = vsel %vm478_vm0, %v474_v32, 1326507024  ;;  %v8829_v27 = vshll.u32 %v451_v14, 8 }
 0x281   :  { %v1502_v54 = vmul.f32 -0.001358992, %v1501_v55  ;;  %v1509_v51 = vmul.f32 -0.00019511016, %v1501_v55  ;;  %v483_v1 = vsel %vm475_vm15, %v8808_v39, %v8791_v10  ;;  %v489_v41 = vsel %vm477_vm2, %v471_v15, %v488_v24 }
 0x282   :  { %v1628_v59 = vshrl.u32 %v1627_v45, 30  ;;  %v485_v47 = vsel %vm477_vm2, %v8797_v40, %v484_v22  ;;  %v490_v35 = vsel %vm476_vm1, %v487_v46, %v489_v41  ;;  %v492_v33 = vand.u32 65535, %v8829_v27 }
 0x283   :  { %v1503_v11 = vadd.f32 0.041655596, %v1502_v54  ;;  %v1510_v26 = vadd.f32 0.008332121, %v1509_v51  ;;  %v494_v63 = vand.u32 65535, %v490_v35  ;;  %v495_v23 = vshrl.u32 %v490_v35, 16 }
 0x284   :  { %v8844_v30 = vadd.s32 4294967169, %v12945_v61  ;;  %v1518_v3 = vand.u32 3, %v1517_v0  ;;  %v1629_v8 = vshll.u32 %v1628_v59, 30  ;;  %v493_v62 = vshrl.u32 %v8829_v27, 16 }
 0x285   :  { %v8850_v7 = vsel %vm764_vm14, %v8381_v16, 0  ;;  %v1504_v57 = vmul.f32 %v1503_v11, %v1501_v55  ;;  %v1511_v52 = vmul.f32 %v1510_v26, %v1501_v55  ;;  %v497_v58 = vmul.u32 %v495_v23, %v492_v33 }
 0x286   :  { %v8853_v49 = vsub.s32 32, %v8800_v6  ;;  %v8855_v44 = vsub.s32 %v1626_v29, %v1629_v8  ;;  %v486_v13 = vsel %vm476_vm1, %v483_v1, %v485_v47  ;;  %v8859_v21 = vmul.u32 %v494_v63, %v493_v62 }
 0x287   :  { %v1505_v17 = vadd.f32 -0.4999988, %v1504_v57  ;;  %v1512_v42 = vadd.f32 -0.16666654, %v1511_v52  ;;  %vm1530_vm3 = vcmp.lt.s32.totalorder %v12924_v31, 0  ;;  %v500_v15 = vshll.u32 %v497_v58, 16 }
 0x288   :  { %vm1520_vm4 = vcmp.eq.s32.totalorder %v1518_v3, 0  ;;  %vm1523_vm5 = vcmp.eq.s32.totalorder %v1518_v3, 2  ;;  %vm1631_vm6 = vcmp.lt.s32.totalorder %v8855_v44, 0  ;;  %v1632_v16 = vsub.s32 0, %v8855_v44 }
 0x289   :  { %v1652_v2 = vsub.s32 4, %v1628_v59  ;;  %v496_v14 = vmul.u32 %v494_v63, %v492_v33  ;;  %v1506_v32 = vmul.f32 %v1505_v17, %v1501_v55  ;;  %v1513_v19 = vmul.f32 %v1512_v42, %v1501_v55 }
 0x28a   :  { %vm1519_vm7 = vcmp.lt.s32.totalorder %v1518_v3, 2  ;;  %v499_v0 = vmul.u32 %v495_v23, %v493_v62  ;;  %v517_v53 = vshrl.u32 %v486_v13, 16  ;;  %vm1516_vm8 = vweird.f32 %v12919_v60 }
 0x28b   :  { %v1633_v29 = vsel %vm1631_vm6, %v1632_v16, %v8855_v44  ;;  %v502_v22 = vshll.u32 %v8859_v21, 16  ;;  %vm504_vm9 = vc.u32 %v496_v14, %v500_v15  ;;  %v506_v46 = vadd.s32 %v500_v15, %v496_v14 }
 0x28c   :  { %v1507_v45 = vadd.f32 1.0, %v1506_v32  ;;  %v1514_v24 = vadd.f32 1.0, %v1513_v19  ;;  %v1634_v54 = vclz %v1633_v29  ;;  %v505_v51 = vsel %vm504_vm9, 1, %v12903_v18 }
 0x28d   :  { %v1622_v1 = vadd.s32 %v8766_v43, %v8752_v50  ;;  %v459_v55 = vshrl.u32 %v12908_v5, %v8746_v34  ;;  %v507_v41 = vadd.s32 %v505_v51, %v499_v0  ;;  %v516_v47 = vand.u32 65535, %v486_v13  ;;  %v12948_v51 = vld [vmem:[#allocation3_spill] sm:$0xff] }
 0x28e   :  { %v1515_v35 = vmul.f32 %v1514_v24, %v8813_v56  ;;  %v1524_v11 = vxor.u32 2147483648, %v1507_v45  ;;  %vm8875_vm10 = vcmp.le.f32.partialorder %v1528_v36, 0.7853982  ;;  %v6473_v63 = vadd.s32 4294967294, %v1634_v54 }
 0x28f   :  { %vm508_vm11 = vc.u32 %v506_v46, %v502_v22  ;;  %v1653_v23 = vsel %vm1530_vm3, %v1652_v2, %v1628_v59  ;;  %v480_v34 = vsel %vm478_vm0, %v8797_v40, 2102212464  ;;  %v519_v43 = vmul.u32 %v517_v53, %v492_v33 }
 0x290   :  { %v509_v50 = vsel %vm508_vm11, 1, %v12903_v18  ;;  %v1521_v56 = vxor.u32 2147483648, %v1515_v35  ;;  %vm6474_vm12 = vcmp.lt.s32.totalorder %v6473_v63, 0  ;;  %v501_v61 = vshrl.u32 %v497_v58, 16 }
 0x291   :  { %v511_v8 = vadd.s32 %v509_v50, %v507_v41  ;;  %v1637_v36 = vsel %vm6474_vm12, 0, %v6473_v63  ;;  %v518_v57 = vmul.u32 %v516_v47, %v492_v33  ;;  %v520_v52 = vmul.u32 %v516_v47, %v493_v62 }
 0x292   :  { %v522_v13 = vshll.u32 %v519_v43, 16  ;;  %v1522_v17 = vsel %vm1520_vm4, %v1507_v45, %v1521_v56  ;;  %v1525_v42 = vsel %vm1523_vm5, %v1524_v11, %v1515_v35  ;;  %v1638_v59 = vsub.s32 32, %v1637_v36 }
 0x293   :  { %v1642_v15 = vsub.s32 4294967266, %v1637_v36  ;;  %v1526_v16 = vsel %vm1519_vm7, %v1522_v17, %v1525_v42  ;;  %v1639_v40 = vshll.u32 %v8855_v44, %v1637_v36  ;;  %v512_v2 = vadd.s32 %v511_v8, %v501_v61 }
 0x294   :  { %v521_v14 = vmul.u32 %v517_v53, %v493_v62  ;;  %v1527_v58 = vsel %vm1516_vm8, nan, %v1526_v16  ;;  %v1640_v32 = vshrl.u32 %v1622_v1, %v1638_v59  ;;  %vm526_vm13 = vc.u32 %v518_v57, %v522_v13 }
 0x295   :  { %v1643_v19 = vadd.s32 127, %v1642_v15  ;;  %3036 = vmatpush.msra.mxu2 %v1527_v58  ;;  %v503_v33 = vshrl.u32 %v8859_v21, 16  ;;  %v524_v0 = vshll.u32 %v520_v52, 16  ;;  %v527_v29 = vsel %vm526_vm13, 1, %v12903_v18 }
 0x296   :  { %v528_v22 = vadd.s32 %v522_v13, %v518_v57  ;;  %v1641_v46 = vor.u32 %v1640_v32, %v1639_v40  ;;  %v479_v44 = vsel %vm475_vm15, %v459_v55, %v8808_v39  ;;  %v529_v62 = vadd.s32 %v527_v29, %v521_v14 }
 0x297   :  { %v1644_v3 = vshll.u32 %v1643_v19, 23  ;;  %v1655_v60 = vsel %vm8875_vm10, 0, %v1653_v23  ;;  %v481_v53 = vsel %vm477_vm2, %v8791_v10, %v480_v34  ;;  %v8901_v45 = vadd.s32 %v512_v2, %v503_v33 }
 0x298   :  { %vm530_vm14 = vc.u32 %v528_v22, %v524_v0  ;;  %v8904_v21 = vshrl.u32 %v8653_v20, 5  ;;  %v598_v1 = vand.u32 2147483647, %v12948_v51  ;;  %v8909_v39 = vand.u32 31, %v8850_v7 }
 0x299   :  { %v1645_v24 = vor.u32 4788187, %v1644_v3  ;;  %v531_v54 = vsel %vm530_vm14, 1, %v12903_v18  ;;  %v523_v55 = vshrl.u32 %v519_v43, 16  ;;  %v8911_v41 = vadd.s32 %v528_v22, %v524_v0 }
 0x29a   :  { %v533_v47 = vadd.s32 %v531_v54, %v529_v62  ;;  %v1648_v10 = vcvt.s32.f32 %v1641_v46  ;;  %v1672_v11 = vadd.s32 3, %v1655_v60  ;;  %v482_v63 = vsel %vm476_vm1, %v479_v44, %v481_v53 }
 0x29b   :  { %v1646_v35 = vand.u32 2147483647, %v1645_v24  ;;  %v525_v20 = vshrl.u32 %v520_v52, 16  ;;  %vm538_vm15 = vc.u32 %v8901_v45, %v8911_v41  ;;  %v619_v34 = vshrl.u32 %v12897_v28, %v8853_v49 }
 0x29c   :  { %v534_v23 = vadd.s32 %v533_v47, %v523_v55  ;;  %v605_v43 = vand.u32 8388607, %v598_v1  ;;  %v616_v56 = vshrl.u32 %v12907_v25, %v8853_v49  ;;  %v622_v61 = vshrl.u32 %v12898_v4, %v8853_v49 }
 0x29d   :  { %v1649_v50 = vmul.f32 %v1648_v10, %v1646_v35  ;;  %v618_v8 = vshll.u32 %v12907_v25, %v8800_v6  ;;  %v621_v36 = vshll.u32 %v12897_v28, %v8800_v6  ;;  %v625_v57 = vshrl.u32 %v12899_v9, %v8853_v49 }
 0x29e   :  { %v535_v37 = vadd.s32 %v534_v23, %v525_v20  ;;  %v615_v13 = vshll.u32 %v12908_v5, %v8800_v6  ;;  %v627_v17 = vshll.u32 %v12899_v9, %v8800_v6  ;;  %v628_v42 = vshrl.u32 %v12900_v38, %v8853_v49 }
 0x29f   :  { %v1650_v52 = vxor.u32 2147483648, %v1649_v50  ;;  %v8937_v15 = vor.u32 %v619_v34, %v618_v8  ;;  %v8939_v16 = vor.u32 %v622_v61, %v621_v36  ;;  %v624_v40 = vshll.u32 %v12898_v4, %v8800_v6 }
 0x2a0   :  { %v539_v59 = vadd.s32 1, %v535_v37  ;;  %v536_v14 = vmul.u32 %v8829_v27, %v482_v63  ;;  %v606_v58 = vor.u32 8388608, %v605_v43  ;;  %v629_v32 = vor.u32 %v628_v42, %v627_v17 }
 0x2a1   :  { %v1651_v2 = vsel %vm1530_vm3, %v1650_v52, %v1649_v50  ;;  %v8954_v0 = vor.u32 %v616_v56, %v615_v13  ;;  %v626_v29 = vor.u32 %v625_v57, %v624_v40  ;;  %vm630_vm0 = vcmp.lt.s32.totalorder %v8904_v21, 1 }
 0x2a2   :  { %v8949_v19 = vsel %vm8875_vm10, %v12924_v31, %v1651_v2  ;;  %v540_v33 = vsel %vm538_vm15, %v539_v59, %v535_v37  ;;  %vm633_vm1 = vcmp.lt.s32.totalorder %v8904_v21, 4  ;;  %v8960_v27 = vand.u32 3, %v1672_v11 }
 0x2a3   :  { %v1656_v6 = vmul.f32 %v8949_v19, %v8949_v19  ;;  %v541_v22 = vadd.s32 %v540_v33, %v536_v14  ;;  %vm631_vm2 = vcmp.lt.s32.totalorder %v8904_v21, 2  ;;  %v642_v26 = vsel %vm630_vm0, %v8937_v15, %v8939_v16 }
 0x2a4   :  { %v643_v46 = vsel %vm633_vm1, %v629_v32, 1326507024  ;;  %vm632_vm3 = vcmp.lt.s32.totalorder %v8904_v21, 3  ;;  %v638_v60 = vsel %vm630_vm0, %v8954_v0, %v8937_v15  ;;  %v639_v53 = vsel %vm633_vm1, %v626_v29, 920167782 }
 0x2a5   :  { %v1657_v3 = vmul.f32 -0.001358992, %v1656_v6  ;;  %v1664_v44 = vmul.f32 -0.00019511016, %v1656_v6  ;;  %v542_v62 = vadd.s32 536870912, %v541_v22  ;;  %v644_v24 = vsel %vm632_vm3, %v626_v29, %v643_v46 }
 0x2a6   :  { %v8978_v54 = vshll.u32 %v606_v58, 8  ;;  %v645_v10 = vsel %vm631_vm2, %v642_v26, %v644_v24  ;;  %v640_v56 = vsel %vm632_vm3, %v8939_v16, %v639_v53  ;;  %v8995_v61 = vadd.s32 1, %v8844_v30 }
 0x2a7   :  { %v1658_v55 = vadd.f32 0.041655596, %v1657_v3  ;;  %v1665_v47 = vadd.f32 0.008332121, %v1664_v44  ;;  %v8980_v35 = vshrl.u32 %v542_v62, 30  ;;  %v649_v20 = vand.u32 65535, %v645_v10 }
 0x2a8   :  { %v8985_v11 = vand.u32 65535, %v8978_v54  ;;  %v8988_v63 = vshrl.u32 %v8978_v54, 16  ;;  %v650_v23 = vshrl.u32 %v645_v10, 16  ;;  %v9002_v36 = vsub.s32 32, %v8909_v39 }
 0x2a9   :  { %v1659_v34 = vmul.f32 %v1658_v55, %v1656_v6  ;;  %v1666_v50 = vmul.f32 %v1665_v47, %v1656_v6  ;;  %v544_v43 = vshll.u32 %v8980_v35, 30  ;;  %vm1675_vm4 = vcmp.eq.s32.totalorder %v8960_v27, 0 }
 0x2aa   :  { %v652_v37 = vmul.u32 %v650_v23, %v8985_v11  ;;  %v8999_v8 = vmul.u32 %v649_v20, %v8988_v63  ;;  %v614_v17 = vshrl.u32 %v12908_v5, %v8853_v49  ;;  %v641_v30 = vsel %vm631_vm2, %v638_v60, %v640_v56 }
 0x2ab   :  { %v1660_v57 = vadd.f32 -0.4999988, %v1659_v34  ;;  %v1667_v52 = vadd.f32 -0.16666654, %v1666_v50  ;;  %v9004_v13 = vsub.s32 %v541_v22, %v544_v43  ;;  %v651_v42 = vmul.u32 %v649_v20, %v8985_v11 }
 0x2ac   :  { %v655_v59 = vshll.u32 %v652_v37, 16  ;;  %vm1674_vm5 = vcmp.lt.s32.totalorder %v8960_v27, 2  ;;  %vm445_vm6 = vcmp.lt.s32.totalorder %v12942_v48, 0  ;;  %vm1671_vm8 = vweird.f32 %v12924_v31 }
 0x2ad   :  { %v1661_v40 = vmul.f32 %v1660_v57, %v1656_v6  ;;  %v1668_v2 = vmul.f32 %v1667_v52, %v1656_v6  ;;  %vm546_vm7 = vcmp.lt.s32.totalorder %v9004_v13, 0  ;;  %v547_v14 = vsub.s32 0, %v9004_v13 }
 0x2ae   :  { %v654_v49 = vmul.u32 %v650_v23, %v8988_v63  ;;  %v657_v58 = vshll.u32 %v8999_v8, 16  ;;  %vm659_vm9 = vc.u32 %v651_v42, %v655_v59  ;;  %v661_v32 = vadd.s32 %v655_v59, %v651_v42 }
 0x2af   :  { %v1662_v33 = vadd.f32 1.0, %v1661_v40  ;;  %v1669_v29 = vadd.f32 1.0, %v1668_v2  ;;  %v548_v6 = vsel %vm546_vm7, %v547_v14, %v9004_v13  ;;  %v660_v22 = vsel %vm659_vm9, 1, %v12903_v18 }
 0x2b0   :  { %v549_v26 = vclz %v548_v6  ;;  %v635_v46 = vsel %vm633_vm1, %v8939_v16, 2102212464  ;;  %v662_v3 = vadd.s32 %v660_v22, %v654_v49  ;;  %vm663_vm10 = vc.u32 %v661_v32, %v657_v58 }
 0x2b1   :  { %vm919_vm11 = vcmp.gt.s32.totalorder %v8995_v61, 0  ;;  %v1670_v44 = vmul.f32 %v1669_v29, %v8949_v19  ;;  %v1679_v62 = vxor.u32 2147483648, %v1662_v33  ;;  %vm9028_vm12 = vcmp.le.f32.partialorder %v443_v12, 0.7853982 }
 0x2b2   :  { %v664_v53 = vsel %vm663_vm10, 1, %v12903_v18  ;;  %v671_v24 = vand.u32 65535, %v641_v30  ;;  %vm1678_vm13 = vcmp.eq.s32.totalorder %v8960_v27, 2  ;;  %v537_v16 = vadd.s32 %v8911_v41, %v8901_v45 }
 0x2b3   :  { %v6452_v55 = vadd.s32 4294967294, %v549_v26  ;;  %v567_v47 = vsub.s32 4, %v8980_v35  ;;  %v1676_v10 = vxor.u32 2147483648, %v1670_v44  ;;  %v634_v19 = vsel %vm630_vm0, %v614_v17, %v8954_v0 }
 0x2b4   :  { %v666_v12 = vadd.s32 %v664_v53, %v662_v3  ;;  %v672_v20 = vshrl.u32 %v641_v30, 16  ;;  %v1680_v23 = vsel %vm1678_vm13, %v1679_v62, %v1670_v44  ;;  %v636_v34 = vsel %vm632_vm3, %v8937_v15, %v635_v46 }
 0x2b5   :  { %vm6453_vm14 = vcmp.lt.s32.totalorder %v6452_v55, 0  ;;  %v656_v50 = vshrl.u32 %v652_v37, 16  ;;  %v1677_v45 = vsel %vm1675_vm4, %v1662_v33, %v1676_v10  ;;  %v675_v56 = vmul.u32 %v671_v24, %v8988_v63 }
 0x2b6   :  { %v552_v41 = vsel %vm6453_vm14, 0, %v6452_v55  ;;  %v674_v43 = vmul.u32 %v672_v20, %v8985_v11  ;;  %v1681_v0 = vsel %vm1674_vm5, %v1677_v45, %v1680_v23  ;;  %v568_v17 = vsel %vm445_vm6, %v567_v47, %v8980_v35 }
 0x2b7   :  { %v553_v57 = vsub.s32 32, %v552_v41  ;;  %v557_v52 = vsub.s32 4294967266, %v552_v41  ;;  %v1682_v15 = vsel %vm1671_vm8, nan, %v1681_v0  ;;  %v667_v37 = vadd.s32 %v666_v12, %v656_v50 }
 0x2b8   :  { %v673_v30 = vmul.u32 %v671_v24, %v8985_v11  ;;  %v677_v42 = vshll.u32 %v674_v43, 16  ;;  %3065 = vmatpush.msra.mxu3 %v1682_v15  ;;  %v554_v59 = vshll.u32 %v9004_v13, %v552_v41  ;;  %v658_v27 = vshrl.u32 %v8999_v8, 16  ;;  %v12951_v13 = vld [vmem:[#allocation4_spill] sm:$0xff] }
 0x2b9   :  { %v555_v40 = vshrl.u32 %v537_v16, %v553_v57  ;;  %v558_v2 = vadd.s32 127, %v557_v52  ;;  %v676_v14 = vmul.u32 %v672_v20, %v8988_v63  ;;  %v679_v49 = vshll.u32 %v675_v56, 16 }
 0x2ba   :  { %vm681_vm15 = vc.u32 %v673_v30, %v677_v42  ;;  %v683_v58 = vadd.s32 %v677_v42, %v673_v30  ;;  %v570_v31 = vsel %vm9028_vm12, 0, %v568_v17  ;;  %v9061_v33 = vadd.s32 %v667_v37, %v658_v27 }
 0x2bb   :  { %v556_v35 = vor.u32 %v555_v40, %v554_v59  ;;  %v559_v32 = vshll.u32 %v558_v2, 23  ;;  %v682_v11 = vsel %vm681_vm15, 1, %v12903_v18  ;;  %v753_v6 = vand.u32 2147483647, %v12951_v13 }
 0x2bc   :  { %v684_v29 = vadd.s32 %v682_v11, %v676_v14  ;;  %vm685_vm0 = vc.u32 %v683_v58, %v679_v49  ;;  %v9065_v8 = vshrl.u32 %v8850_v7, 5  ;;  %v9070_v63 = vsel %vm919_vm11, %v8995_v61, 0 }
 0x2bd   :  { %v560_v22 = vor.u32 4788187, %v559_v32  ;;  %v686_v26 = vsel %vm685_vm0, 1, %v12903_v18  ;;  %v637_v46 = vsel %vm631_vm2, %v634_v19, %v636_v34  ;;  %v678_v3 = vshrl.u32 %v674_v43, 16 }
 0x2be   :  { %v9075_v44 = vadd.s32 %v683_v58, %v679_v49  ;;  %v688_v62 = vadd.s32 %v686_v26, %v684_v29  ;;  %v563_v24 = vcvt.s32.f32 %v556_v35  ;;  %v587_v16 = vadd.s32 3, %v570_v31 }
 0x2bf   :  { %v561_v53 = vand.u32 2147483647, %v560_v22  ;;  %v680_v7 = vshrl.u32 %v675_v56, 16  ;;  %v760_v61 = vand.u32 8388607, %v753_v6  ;;  %v774_v47 = vshrl.u32 %v12897_v28, %v9002_v36 }
 0x2c0   :  { %v689_v55 = vadd.s32 %v688_v62, %v678_v3  ;;  %vm693_vm1 = vc.u32 %v9061_v33, %v9075_v44  ;;  %v771_v10 = vshrl.u32 %v12907_v25, %v9002_v36  ;;  %v773_v19 = vshll.u32 %v12907_v25, %v8909_v39 }
 0x2c1   :  { %v564_v21 = vmul.f32 %v563_v24, %v561_v53  ;;  %v777_v12 = vshrl.u32 %v12898_v4, %v9002_v36  ;;  %v776_v23 = vshll.u32 %v12897_v28, %v8909_v39  ;;  %v779_v34 = vshll.u32 %v12898_v4, %v8909_v39 }
 0x2c2   :  { %v690_v20 = vadd.s32 %v689_v55, %v680_v7  ;;  %v780_v50 = vshrl.u32 %v12899_v9, %v9002_v36  ;;  %v770_v41 = vshll.u32 %v12908_v5, %v8909_v39  ;;  %v782_v43 = vshll.u32 %v12899_v9, %v8909_v39 }
 0x2c3   :  { %v565_v45 = vxor.u32 2147483648, %v564_v21  ;;  %v783_v56 = vshrl.u32 %v12900_v38, %v9002_v36  ;;  %v9101_v57 = vor.u32 %v774_v47, %v773_v19  ;;  %v9103_v52 = vor.u32 %v777_v12, %v776_v23 }
 0x2c4   :  { %v694_v0 = vadd.s32 1, %v690_v20  ;;  %v781_v17 = vor.u32 %v780_v50, %v779_v34  ;;  %v691_v37 = vmul.u32 %v8978_v54, %v637_v46  ;;  %v761_v30 = vor.u32 8388608, %v760_v61 }
 0x2c5   :  { %v566_v15 = vsel %vm445_vm6, %v565_v45, %v564_v21  ;;  %v784_v42 = vor.u32 %v783_v56, %v782_v43  ;;  %v9114_v40 = vor.u32 %v771_v10, %v770_v41  ;;  %vm788_vm2 = vcmp.lt.s32.totalorder %v9065_v8, 4 }
 0x2c6   :  { %v569_v39 = vsel %vm9028_vm12, %v12942_v48, %v566_v15  ;;  %v695_v59 = vsel %vm693_vm1, %v694_v0, %v690_v20  ;;  %vm785_vm3 = vcmp.lt.s32.totalorder %v9065_v8, 1  ;;  %v794_v54 = vsel %vm788_vm2, %v781_v17, 920167782 }
 0x2c7   :  { %v571_v2 = vmul.f32 %v569_v39, %v569_v39  ;;  %v696_v27 = vadd.s32 %v695_v59, %v691_v37  ;;  %v9120_v14 = vand.u32 3, %v587_v16  ;;  %vm786_vm4 = vcmp.lt.s32.totalorder %v9065_v8, 2 }
 0x2c8   :  { %v797_v60 = vsel %vm785_vm3, %v9101_v57, %v9103_v52  ;;  %v798_v49 = vsel %vm788_vm2, %v784_v42, 1326507024  ;;  %vm787_vm5 = vcmp.lt.s32.totalorder %v9065_v8, 3  ;;  %v793_v31 = vsel %vm785_vm3, %v9114_v40, %v9101_v57 }
 0x2c9   :  { %v572_v58 = vmul.f32 -0.001358992, %v571_v2  ;;  %v579_v35 = vmul.f32 -0.00019511016, %v571_v2  ;;  %v697_v32 = vadd.s32 536870912, %v696_v27  ;;  %v795_v11 = vsel %vm787_vm5, %v9103_v52, %v794_v54 }
 0x2ca   :  { %v799_v29 = vsel %vm787_vm5, %v781_v17, %v798_v49  ;;  %v9139_v22 = vshll.u32 %v761_v30, 8  ;;  %v796_v21 = vsel %vm786_vm4, %v793_v31, %v795_v11  ;;  %v9153_v10 = vshrl.u32 %v9070_v63, 5 }
 0x2cb   :  { %v573_v26 = vadd.f32 0.041655596, %v572_v58  ;;  %v580_v46 = vadd.f32 0.008332121, %v579_v35  ;;  %v9141_v3 = vshrl.u32 %v697_v32, 30  ;;  %v800_v62 = vsel %vm786_vm4, %v797_v60, %v799_v29 }
 0x2cc   :  { %v802_v53 = vand.u32 65535, %v9139_v22  ;;  %v9147_v24 = vshrl.u32 %v9139_v22, 16  ;;  %v804_v16 = vand.u32 65535, %v800_v62  ;;  %v805_v7 = vshrl.u32 %v800_v62, 16 }
 0x2cd   :  { %v574_v55 = vmul.f32 %v573_v26, %v571_v2  ;;  %v581_v61 = vmul.f32 %v580_v46, %v571_v2  ;;  %v699_v47 = vshll.u32 %v9141_v3, 30  ;;  %v9159_v20 = vand.u32 31, %v9070_v63 }
 0x2ce   :  { %v807_v19 = vmul.u32 %v805_v7, %v802_v53  ;;  %v9156_v12 = vmul.u32 %v804_v16, %v9147_v24  ;;  %v769_v45 = vshrl.u32 %v12908_v5, %v9002_v36  ;;  %v806_v41 = vmul.u32 %v804_v16, %v802_v53 }
 0x2cf   :  { %v575_v23 = vadd.f32 -0.4999988, %v574_v55  ;;  %v582_v34 = vadd.f32 -0.16666654, %v581_v61  ;;  %v700_v50 = vsub.s32 %v696_v27, %v699_v47  ;;  %v827_v56 = vshrl.u32 %v796_v21, 16 }
 0x2d0   :  { %v810_v43 = vshll.u32 %v807_v19, 16  ;;  %vm589_vm6 = vcmp.lt.s32.totalorder %v9120_v14, 2  ;;  %vm586_vm8 = vweird.f32 %v12942_v48  ;;  %v809_v63 = vmul.u32 %v805_v7, %v9147_v24 }
 0x2d1   :  { %v576_v0 = vmul.f32 %v575_v23, %v571_v2  ;;  %v583_v17 = vmul.f32 %v582_v34, %v571_v2  ;;  %vm701_vm7 = vcmp.lt.s32.totalorder %v700_v50, 0  ;;  %v702_v15 = vsub.s32 0, %v700_v50 }
 0x2d2   :  { %v812_v37 = vshll.u32 %v9156_v12, 16  ;;  %vm814_vm9 = vc.u32 %v806_v41, %v810_v43  ;;  %v816_v30 = vadd.s32 %v810_v43, %v806_v41  ;;  %v790_v2 = vsel %vm788_vm2, %v9103_v52, 2102212464 }
 0x2d3   :  { %v577_v42 = vadd.f32 1.0, %v576_v0  ;;  %v584_v59 = vadd.f32 1.0, %v583_v17  ;;  %v703_v36 = vsel %vm701_vm7, %v702_v15, %v700_v50  ;;  %v815_v27 = vsel %vm814_vm9, 1, %v12903_v18  ;;  %v12952_v15 = vld [vmem:[#allocation5_spill] sm:$0xff] }
 0x2d4   :  { %v704_v54 = vclz %v703_v36  ;;  %v817_v60 = vadd.s32 %v815_v27, %v809_v63  ;;  %vm818_vm10 = vc.u32 %v816_v30, %v812_v37  ;;  %v826_v32 = vand.u32 65535, %v796_v21 }
 0x2d5   :  { %v585_v49 = vmul.f32 %v584_v59, %v569_v39  ;;  %v594_v58 = vxor.u32 2147483648, %v577_v42  ;;  %v819_v35 = vsel %vm818_vm10, 1, %v12903_v18  ;;  %vm590_vm11 = vcmp.eq.s32.totalorder %v9120_v14, 0 }
 0x2d6   :  { %vm593_vm12 = vcmp.eq.s32.totalorder %v9120_v14, 2  ;;  %v692_v31 = vadd.s32 %v9075_v44, %v9061_v33  ;;  %v6455_v11 = vadd.s32 4294967294, %v704_v54  ;;  %v789_v52 = vsel %vm785_vm3, %v769_v45, %v9114_v40 }
 0x2d7   :  { %v591_v29 = vxor.u32 2147483648, %v585_v49  ;;  %v821_v26 = vadd.s32 %v819_v35, %v817_v60  ;;  %v829_v46 = vmul.u32 %v827_v56, %v802_v53  ;;  %v595_v39 = vsel %vm593_vm12, %v594_v58, %v585_v49 }
 0x2d8   :  { %vm6456_vm13 = vcmp.lt.s32.totalorder %v6455_v11, 0  ;;  %v791_v62 = vsel %vm787_vm5, %v9101_v57, %v790_v2  ;;  %v811_v16 = vshrl.u32 %v807_v19, 16  ;;  %v830_v61 = vmul.u32 %v826_v32, %v9147_v24 }
 0x2d9   :  { %v592_v7 = vsel %vm590_vm11, %v577_v42, %v591_v29  ;;  %v707_v55 = vsel %vm6456_vm13, 0, %v6455_v11  ;;  %v832_v33 = vshll.u32 %v829_v46, 16  ;;  %v828_v40 = vmul.u32 %v826_v32, %v802_v53 }
 0x2da   :  { %v596_v44 = vsel %vm589_vm6, %v592_v7, %v595_v39  ;;  %v708_v47 = vsub.s32 32, %v707_v55  ;;  %v712_v21 = vsub.s32 4294967266, %v707_v55  ;;  %v813_v34 = vshrl.u32 %v9156_v12, 16 }
 0x2db   :  { %v597_v23 = vsel %vm586_vm8, nan, %v596_v44  ;;  %v822_v45 = vadd.s32 %v821_v26, %v811_v16  ;;  %v831_v57 = vmul.u32 %v827_v56, %v9147_v24  ;;  %v709_v19 = vshll.u32 %v700_v50, %v707_v55 }
 0x2dc   :  { %2979 = vmatpush.msra.mxu0 %v597_v23  ;;  %v710_v41 = vshrl.u32 %v692_v31, %v708_v47  ;;  %v713_v43 = vadd.s32 127, %v712_v21  ;;  %vm836_vm14 = vc.u32 %v828_v40, %v832_v33  ;;  %v834_v0 = vshll.u32 %v830_v61, 16 }
 0x2dd   :  { %v837_v14 = vsel %vm836_vm14, 1, %v12903_v18  ;;  %v838_v17 = vadd.s32 %v832_v33, %v828_v40  ;;  %v908_v63 = vand.u32 2147483647, %v12952_v15  ;;  %v722_v48 = vsub.s32 4, %v9141_v3 }
 0x2de   :  { %v711_v53 = vor.u32 %v710_v41, %v709_v19  ;;  %v714_v37 = vshll.u32 %v713_v43, 23  ;;  %v839_v30 = vadd.s32 %v837_v14, %v831_v57  ;;  %v9193_v12 = vsub.s32 32, %v9159_v20 }
 0x2df   :  { %vm9197_vm15 = vcmp.le.f32.partialorder %v598_v1, 0.7853982  ;;  %v9201_v50 = vadd.s32 %v822_v45, %v813_v34  ;;  %vm840_vm0 = vc.u32 %v838_v17, %v834_v0  ;;  %vm600_vm1 = vcmp.lt.s32.totalorder %v12948_v51, 0 }
 0x2e0   :  { %v715_v56 = vor.u32 4788187, %v714_v37  ;;  %v841_v42 = vsel %vm840_vm0, 1, %v12903_v18  ;;  %v915_v59 = vand.u32 8388607, %v908_v63  ;;  %v792_v36 = vsel %vm786_vm4, %v789_v52, %v791_v62 }
 0x2e1   :  { %v833_v27 = vshrl.u32 %v829_v46, 16  ;;  %v9209_v54 = vadd.s32 %v838_v17, %v834_v0  ;;  %v843_v1 = vadd.s32 %v841_v42, %v839_v30  ;;  %v718_v60 = vcvt.s32.f32 %v711_v53 }
 0x2e2   :  { %v716_v2 = vand.u32 2147483647, %v715_v56  ;;  %v723_v49 = vsel %vm600_vm1, %v722_v48, %v9141_v3  ;;  %v835_v58 = vshrl.u32 %v830_v61, 16  ;;  %v929_v32 = vshrl.u32 %v12897_v28, %v9193_v12 }
 0x2e3   :  { %v844_v35 = vadd.s32 %v843_v1, %v833_v27  ;;  %vm848_vm2 = vc.u32 %v9201_v50, %v9209_v54  ;;  %v932_v8 = vshrl.u32 %v12898_v4, %v9193_v12  ;;  %v916_v11 = vor.u32 8388608, %v915_v59 }
 0x2e4   :  { %v719_v31 = vmul.f32 %v718_v60, %v716_v2  ;;  %v934_v29 = vshll.u32 %v12898_v4, %v9159_v20  ;;  %v935_v52 = vshrl.u32 %v12899_v9, %v9193_v12  ;;  %v926_v26 = vshrl.u32 %v12907_v25, %v9193_v12 }
 0x2e5   :  { %v845_v3 = vadd.s32 %v844_v35, %v835_v58  ;;  %v928_v46 = vshll.u32 %v12907_v25, %v9159_v20  ;;  %v931_v39 = vshll.u32 %v12897_v28, %v9159_v20  ;;  %v937_v7 = vshll.u32 %v12899_v9, %v9159_v20 }
 0x2e6   :  { %v720_v62 = vxor.u32 2147483648, %v719_v31  ;;  %v936_v16 = vor.u32 %v935_v52, %v934_v29  ;;  %v938_v55 = vshrl.u32 %v12900_v38, %v9193_v12  ;;  %v925_v33 = vshll.u32 %v12908_v5, %v9159_v20 }
 0x2e7   :  { %v849_v61 = vadd.s32 1, %v845_v3  ;;  %v9236_v44 = vor.u32 %v929_v32, %v928_v46  ;;  %v9238_v47 = vor.u32 %v932_v8, %v931_v39  ;;  %v725_v40 = vsel %vm9197_vm15, 0, %v723_v49 }
 0x2e8   :  { %v721_v21 = vsel %vm600_vm1, %v720_v62, %v719_v31  ;;  %v846_v23 = vmul.u32 %v9139_v22, %v792_v36  ;;  %v939_v34 = vor.u32 %v938_v55, %v937_v7  ;;  %v9251_v57 = vor.u32 %v926_v26, %v925_v33 }
 0x2e9   :  { %v724_v45 = vsel %vm9197_vm15, %v12948_v51, %v721_v21  ;;  %v850_v20 = vsel %vm848_vm2, %v849_v61, %v845_v3  ;;  %vm943_vm3 = vcmp.lt.s32.totalorder %v9153_v10, 4  ;;  %vm940_vm4 = vcmp.lt.s32.totalorder %v9153_v10, 1 }
 0x2ea   :  { %v726_v19 = vmul.f32 %v724_v45, %v724_v45  ;;  %v851_v41 = vadd.s32 %v850_v20, %v846_v23  ;;  %v949_v22 = vsel %vm943_vm3, %v936_v16, 920167782  ;;  %v742_v43 = vadd.s32 3, %v725_v40 }
 0x2eb   :  { %v952_v0 = vsel %vm940_vm4, %v9236_v44, %v9238_v47  ;;  %v953_v14 = vsel %vm943_vm3, %v939_v34, 1326507024  ;;  %v9263_v17 = vshll.u32 %v916_v11, 8  ;;  %vm942_vm5 = vcmp.lt.s32.totalorder %v9153_v10, 3 }
 0x2ec   :  { %v727_v53 = vmul.f32 -0.001358992, %v726_v19  ;;  %v734_v37 = vmul.f32 -0.00019511016, %v726_v19  ;;  %v852_v48 = vadd.s32 536870912, %v851_v41  ;;  %vm941_vm6 = vcmp.lt.s32.totalorder %v9153_v10, 2 }
 0x2ed   :  { %v948_v30 = vsel %vm940_vm4, %v9251_v57, %v9236_v44  ;;  %v950_v24 = vsel %vm942_vm5, %v9238_v47, %v949_v22  ;;  %v954_v56 = vsel %vm942_vm5, %v936_v16, %v953_v14  ;;  %v957_v1 = vand.u32 65535, %v9263_v17 }
 0x2ee   :  { %v728_v42 = vadd.f32 0.041655596, %v727_v53  ;;  %v735_v59 = vadd.f32 0.008332121, %v734_v37  ;;  %v9276_v36 = vshrl.u32 %v852_v48, 30  ;;  %v955_v27 = vsel %vm941_vm6, %v952_v0, %v954_v56 }
 0x2ef   :  { %v958_v2 = vshrl.u32 %v9263_v17, 16  ;;  %v959_v60 = vand.u32 65535, %v955_v27  ;;  %v960_v49 = vshrl.u32 %v955_v27, 16  ;;  %v951_v8 = vsel %vm941_vm6, %v948_v30, %v950_v24 }
 0x2f0   :  { %v729_v58 = vmul.f32 %v728_v42, %v726_v19  ;;  %v736_v35 = vmul.f32 %v735_v59, %v726_v19  ;;  %v854_v32 = vshll.u32 %v9276_v36, 30  ;;  %v743_v3 = vand.u32 3, %v742_v43 }
 0x2f1   :  { %v962_v31 = vmul.u32 %v960_v49, %v957_v1  ;;  %v9285_v11 = vmul.u32 %v959_v60, %v958_v2  ;;  %v961_v46 = vmul.u32 %v959_v60, %v957_v1  ;;  %v981_v62 = vand.u32 65535, %v951_v8 }
 0x2f2   :  { %v730_v29 = vadd.f32 -0.4999988, %v729_v58  ;;  %v737_v52 = vadd.f32 -0.16666654, %v736_v35  ;;  %v855_v26 = vsub.s32 %v851_v41, %v854_v32  ;;  %v982_v16 = vshrl.u32 %v951_v8, 16 }
 0x2f3   :  { %v965_v39 = vshll.u32 %v962_v31, 16  ;;  %v964_v33 = vmul.u32 %v960_v49, %v958_v2  ;;  %v967_v21 = vshll.u32 %v9285_v11, 16  ;;  %vm741_vm9 = vweird.f32 %v12948_v51 }
 0x2f4   :  { %v731_v7 = vmul.f32 %v730_v29, %v726_v19  ;;  %v738_v55 = vmul.f32 %v737_v52, %v726_v19  ;;  %vm856_vm7 = vcmp.lt.s32.totalorder %v855_v26, 0  ;;  %v857_v61 = vsub.s32 0, %v855_v26 }
 0x2f5   :  { %vm969_vm8 = vc.u32 %v961_v46, %v965_v39  ;;  %v971_v40 = vadd.s32 %v965_v39, %v961_v46  ;;  %v984_v19 = vmul.u32 %v982_v16, %v957_v1  ;;  %vm744_vm11 = vcmp.lt.s32.totalorder %v743_v3, 2 }
 0x2f6   :  { %v732_v23 = vadd.f32 1.0, %v731_v7  ;;  %v739_v34 = vadd.f32 1.0, %v738_v55  ;;  %v858_v20 = vsel %vm856_vm7, %v857_v61, %v855_v26  ;;  %v970_v22 = vsel %vm969_vm8, 1, %v12903_v18 }
 0x2f7   :  { %v859_v41 = vclz %v858_v20  ;;  %vm973_vm10 = vc.u32 %v971_v40, %v967_v21  ;;  %v972_v14 = vadd.s32 %v970_v22, %v964_v33  ;;  %vm745_vm12 = vcmp.eq.s32.totalorder %v743_v3, 0 }
 0x2f8   :  { %v740_v43 = vmul.f32 %v739_v34, %v724_v45  ;;  %v749_v0 = vxor.u32 2147483648, %v732_v23  ;;  %v974_v37 = vsel %vm973_vm10, 1, %v12903_v18  ;;  %vm748_vm13 = vcmp.eq.s32.totalorder %v743_v3, 2 }
 0x2f9   :  { %v6458_v53 = vadd.s32 4294967294, %v859_v41  ;;  %v847_v30 = vadd.s32 %v9209_v54, %v9201_v50  ;;  %v985_v24 = vmul.u32 %v981_v62, %v958_v2  ;;  %v966_v56 = vshrl.u32 %v962_v31, 16 }
 0x2fa   :  { %v746_v48 = vxor.u32 2147483648, %v740_v43  ;;  %v983_v42 = vmul.u32 %v981_v62, %v957_v1  ;;  %v987_v59 = vshll.u32 %v984_v19, 16  ;;  %v750_v45 = vsel %vm748_vm13, %v749_v0, %v740_v43 }
 0x2fb   :  { %vm6459_vm14 = vcmp.lt.s32.totalorder %v6458_v53, 0  ;;  %v976_v49 = vadd.s32 %v974_v37, %v972_v14  ;;  %v986_v8 = vmul.u32 %v982_v16, %v958_v2  ;;  %v989_v46 = vshll.u32 %v985_v24, 16 }
 0x2fc   :  { %v747_v27 = vsel %vm745_vm12, %v732_v23, %v746_v48  ;;  %v862_v60 = vsel %vm6459_vm14, 0, %v6458_v53  ;;  %vm991_vm15 = vc.u32 %v983_v42, %v987_v59  ;;  %v993_v31 = vadd.s32 %v987_v59, %v983_v42 }
 0x2fd   :  { %v751_v58 = vsel %vm744_vm11, %v747_v27, %v750_v45  ;;  %v863_v35 = vsub.s32 32, %v862_v60  ;;  %v867_v32 = vsub.s32 4294967266, %v862_v60  ;;  %v864_v52 = vshll.u32 %v855_v26, %v862_v60 }
 0x2fe   :  { %v752_v29 = vsel %vm741_vm9, nan, %v751_v58  ;;  %v992_v1 = vsel %vm991_vm15, 1, %v12903_v18  ;;  %v977_v39 = vadd.s32 %v976_v49, %v966_v56  ;;  %v945_v2 = vsel %vm943_vm3, %v9238_v47, 2102212464 }
 0x2ff   :  { %3008 = vmatpush.msra.mxu1 %v752_v29  ;;  %v865_v50 = vshrl.u32 %v847_v30, %v863_v35  ;;  %v868_v54 = vadd.s32 127, %v867_v32  ;;  %v994_v62 = vadd.s32 %v992_v1, %v986_v8  ;;  %vm995_vm0 = vc.u32 %v993_v31, %v989_v46 }
 0x300   :  { %v924_v51 = vshrl.u32 %v12908_v5, %v9193_v12  ;;  %v968_v26 = vshrl.u32 %v9285_v11, 16  ;;  %v996_v16 = vsel %vm995_vm0, 1, %v12903_v18  ;;  %v988_v61 = vshrl.u32 %v984_v19, 16 }
 0x301   :  { %v866_v7 = vor.u32 %v865_v50, %v864_v52  ;;  %v869_v3 = vshll.u32 %v868_v54, 23  ;;  %v998_v33 = vadd.s32 %v996_v16, %v994_v62  ;;  %v946_v40 = vsel %vm942_vm5, %v9236_v44, %v945_v2 }
 0x302   :  { %v944_v21 = vsel %vm940_vm4, %v924_v51, %v9251_v57  ;;  %v978_v47 = vadd.s32 %v977_v39, %v968_v26  ;;  %v990_v20 = vshrl.u32 %v985_v24, 16  ;;  %v997_v22 = vadd.s32 %v993_v31, %v989_v46 }
 0x303   :  { %v870_v55 = vor.u32 4788187, %v869_v3  ;;  %v873_v34 = vcvt.s32.f32 %v866_v7  ;;  %v999_v12 = vadd.s32 %v998_v33, %v988_v61  ;;  %v947_v41 = vsel %vm941_vm6, %v944_v21, %v946_v40 }
 0x304   :  { %vm1003_vm1 = vc.u32 %v978_v47, %v997_v22  ;;  %vm755_vm2 = vcmp.lt.s32.totalorder %v12951_v13, 0  ;;  %v1001_v57 = vmul.u32 %v9263_v17, %v947_v41  ;;  %vm9316_vm3 = vcmp.le.f32.partialorder %v753_v6, 0.7853982  ;;  %v9334_v41 = vld [vmem:[%s12714_s2] sm:$0xff] }
 0x305   :  { %v871_v23 = vand.u32 2147483647, %v870_v55  ;;  %v1000_v43 = vadd.s32 %v999_v12, %v990_v20  ;;  %v877_v53 = vsub.s32 4, %v9276_v36  ;;  %v1002_v51 = vadd.s32 %v997_v22, %v978_v47 }
 0x306   :  { %vm896_vm9 = vweird.f32 %v12951_v13  ;;  %vm2951_vm10 = vcmask 261120   ;;  %vm910_vm11 = vcmp.lt.s32.totalorder %v12952_v15, 0  ;;  %vm9350_vm12 = vcmp.le.f32.partialorder %v908_v63, 0.7853982 }
 0x307   :  { %v874_v11 = vmul.f32 %v873_v34, %v871_v23  ;;  %v1004_v14 = vadd.s32 1, %v1000_v43  ;;  %v878_v56 = vsel %vm755_vm2, %v877_v53, %v9276_v36  ;;  %6499 = vmatmul.msk.f32.vlgmr.msra.gmra.mxu0 %vm2951_vm10, %v9334_v41  ;;  %6503 = vmatmul.msk.f32.vlgmr.msra.gmra.mxu1 %vm2951_vm10, %v9334_v41  ;;  %vm1051_vm0 = vweird.f32 %v12952_v15 }
 0x308   :  { %v880_v45 = vsel %vm9316_vm3, 0, %v878_v56 }
 0x309   :  { %v875_v0 = vxor.u32 2147483648, %v874_v11  ;;  %v1005_v37 = vsel %vm1003_vm1, %v1004_v14, %v1000_v43  ;;  %v897_v29 = vadd.s32 3, %v880_v45  ;;  %v2928_v45 = vld [vmem:[%s12715_s3 + $0x8] sm:$0xff] }
 0x30a   :  { %v1006_v48 = vadd.s32 %v1005_v37, %v1001_v57  ;;  %2938 = vperm.xlu1 %6622, %v2928_v45  }
 0x30b   :  { %v876_v19 = vsel %vm755_vm2, %v875_v0, %v874_v11  ;;  %v898_v31 = vand.u32 3, %v897_v29  ;;  %v9345_v0 = vld [vmem:[%s12714_s2 + $0x8] sm:$0xff] }
 0x30c   :  { %v879_v10 = vsel %vm9316_vm3, %v12951_v13, %v876_v19  ;;  %v1007_v24 = vadd.s32 536870912, %v1006_v48  ;;  %v2927_v19 = vld [vmem:[%s12715_s3] sm:$0xff] }
 0x30d   :  { %v881_v30 = vmul.f32 %v879_v10, %v879_v10  ;;  %vm899_vm5 = vcmp.lt.s32.totalorder %v898_v31, 2  ;;  %vm900_vm7 = vcmp.eq.s32.totalorder %v898_v31, 0  ;;  %vm903_vm8 = vcmp.eq.s32.totalorder %v898_v31, 2  ;;  %2933 = vperm.xlu0 %6621, %v2927_v19  }
 0x30e   :  { %v9325_v59 = vshrl.u32 %v1007_v24, 30  ;;  %v2925_v24 = vld [vmem:[%s12714_s2 + $0x10] sm:$0xff] }
 0x30f   :  { %v882_v17 = vmul.f32 -0.001358992, %v881_v30  ;;  %v889_v42 = vmul.f32 -0.00019511016, %v881_v30  ;;  %6500 = vmatmul.msk.f32.gmra.mxu0 %vm2951_vm10, %v9345_v0  ;;  %6504 = vmatmul.msk.f32.gmra.mxu1 %vm2951_vm10, %v9345_v0 }
 0x310   :  { %v1009_v60 = vshll.u32 %v9325_v59, 30  ;;  %v1032_v53 = vsub.s32 4, %v9325_v59 }
 0x311   :  { %v883_v6 = vadd.f32 0.041655596, %v882_v17  ;;  %v890_v27 = vadd.f32 0.008332121, %v889_v42 }
 0x312   :  { %v1010_v35 = vsub.s32 %v1006_v48, %v1009_v60 }
 0x313   :  { %v884_v49 = vmul.f32 %v883_v6, %v881_v30  ;;  %v891_v58 = vmul.f32 %v890_v27, %v881_v30 }
 0x314   :  { %vm1011_vm4 = vcmp.lt.s32.totalorder %v1010_v35, 0  ;;  %v1012_v52 = vsub.s32 0, %v1010_v35 }
 0x315   :  { %v885_v32 = vadd.f32 -0.4999988, %v884_v49  ;;  %v892_v8 = vadd.f32 -0.16666654, %v891_v58 }
 0x316   :  { %v1013_v50 = vsel %vm1011_vm4, %v1012_v52, %v1010_v35 }
 0x317   :  { %v886_v36 = vmul.f32 %v885_v32, %v881_v30  ;;  %v893_v46 = vmul.f32 %v892_v8, %v881_v30  ;;  %v1014_v39 = vclz %v1013_v50  ;;  %v1033_v30 = vsel %vm910_vm11, %v1032_v53, %v9325_v59  ;;  %6501 = vmatmul.msk.f32.gmra.mxu0 %vm2951_vm10, %v2925_v24  ;;  %6505 = vmatmul.msk.f32.gmra.mxu1 %vm2951_vm10, %v2925_v24  ;;  %v2926_v32 = vld [vmem:[%s12714_s2 + $0x18] sm:$0xff]  ;;  %v5577_v50 = vld [vmem:[%s12716_s4 + $0x8] sm:$0xff] }
 0x318   :  { %v1035_v42 = vsel %vm9350_vm12, 0, %v1033_v30  ;;  %5587 = vperm.xlu0 %6621, %v5577_v50  }
 0x319   :  { %v887_v54 = vadd.f32 1.0, %v886_v36  ;;  %v894_v1 = vadd.f32 1.0, %v893_v46  ;;  %v6461_v3 = vadd.s32 4294967294, %v1014_v39  ;;  %v1052_v49 = vadd.s32 3, %v1035_v42 }
 0x31b   :  { %v895_v62 = vmul.f32 %v894_v1, %v879_v10  ;;  %v904_v7 = vxor.u32 2147483648, %v887_v54  ;;  %vm6462_vm6 = vcmp.lt.s32.totalorder %v6461_v3, 0  ;;  %v1053_v52 = vand.u32 3, %v1052_v49  ;;  %v2929_v1 = vld [vmem:[%s12715_s3 + $0x10] sm:$0xff] }
 0x31c   :  { %v1017_v26 = vsel %vm6462_vm6, 0, %v6461_v3  ;;  %2943 = vperm.xlu2 %6623, %v2929_v1  }
 0x31d   :  { %v901_v2 = vxor.u32 2147483648, %v895_v62  ;;  %v905_v55 = vsel %vm903_vm8, %v904_v7, %v895_v62  ;;  %v1018_v61 = vsub.s32 32, %v1017_v26  ;;  %v1022_v33 = vsub.s32 4294967266, %v1017_v26 }
 0x31e   :  { %v1019_v23 = vshll.u32 %v1010_v35, %v1017_v26  ;;  %vm1055_vm13 = vcmp.eq.s32.totalorder %v1053_v52, 0  ;;  %vm1058_vm14 = vcmp.eq.s32.totalorder %v1053_v52, 2  ;;  %vm1054_vm15 = vcmp.lt.s32.totalorder %v1053_v52, 2 }
 0x31f   :  { %v902_v16 = vsel %vm900_vm7, %v887_v54, %v901_v2  ;;  %v1020_v34 = vshrl.u32 %v1002_v51, %v1018_v61  ;;  %v1023_v20 = vadd.s32 127, %v1022_v33  ;;  %6502 = vmatmul.msk.f32.gmra.mxu0 %vm2951_vm10, %v2926_v32  ;;  %6506 = vmatmul.msk.f32.gmra.mxu1 %vm2951_vm10, %v2926_v32  ;;  %v2930_v54 = vld [vmem:[%s12715_s3 + $0x18] sm:$0xff]  ;;  %v5578_v2 = vld [vmem:[%s12716_s4 + $0x10] sm:$0xff]  ;;  %v5576_v51 = vld [vmem:[%s12716_s4] sm:$0xff]  ;;  %v12959_v26 = vmov 1  }
 0x320   :  { %v906_v21 = vsel %vm899_vm5, %v902_v16, %v905_v55  ;;  %2948 = vperm.xlu1 %6622, %v2930_v54   ;;  %5592 = vperm.xlu0 %6621, %v5578_v2  }
 0x321   :  { %v907_v40 = vsel %vm896_vm9, nan, %v906_v21  ;;  %v1021_v12 = vor.u32 %v1020_v34, %v1019_v23  ;;  %v1024_v11 = vshll.u32 %v1023_v20, 23 }
 0x322   :  { %3037 = vmatpush.msra.mxu2 %v907_v40 }
 0x323   :  { %v1025_v47 = vor.u32 4788187, %v1024_v11  ;;  %6507 = vmatmul.msk.f32.vlgmr.msra.gmra.mxu2 %vm2951_vm10, %v9334_v41  ;;  %v1028_v22 = vcvt.s32.f32 %v1021_v12 }
 0x324   :  { %5582 = vperm.xlu2 %6623, %v5576_v51  }
 0x325   :  { %v1026_v13 = vand.u32 2147483647, %v1025_v47 }
 0x327   :  { %v1029_v43 = vmul.f32 %v1028_v22, %v1026_v13 }
 0x328   :  { %6624 = vset.pattern.permute.xlu1 %v12959_v26  ;;  %6627 = vset.pattern.permute.xlu0 %v12959_v26 }
 0x329   :  { %v1030_v14 = vxor.u32 2147483648, %v1029_v43  ;;  %5663 = vperm.xlu1 %6624, %v5576_v51  }
 0x32b   :  { %v1031_v44 = vsel %vm910_vm11, %v1030_v14, %v1029_v43  ;;  %6508 = vmatmul.msk.f32.gmra.mxu2 %vm2951_vm10, %v9345_v0 }
 0x32c   :  { %v1034_v63 = vsel %vm9350_vm12, %v12952_v15, %v1031_v44  ;;  %6625 = vset.pattern.permute.xlu2 %v12959_v26 }
 0x32d   :  { %v1036_v37 = vmul.f32 %v1034_v63, %v1034_v63  ;;  %5667 = vperm.xlu2 %6625, %v5577_v50  }
 0x32f   :  { %v1037_v10 = vmul.f32 -0.001358992, %v1036_v37  ;;  %v1044_v48 = vmul.f32 -0.00019511016, %v1036_v37 }
 0x331   :  { %v1038_v56 = vadd.f32 0.041655596, %v1037_v10  ;;  %v1045_v17 = vadd.f32 0.008332121, %v1044_v48  ;;  %5671 = vperm.xlu1 %6624, %v5578_v2  }
 0x333   :  { %v1039_v6 = vmul.f32 %v1038_v56, %v1036_v37  ;;  %v1046_v27 = vmul.f32 %v1045_v17, %v1036_v37  ;;  %6509 = vmatmul.msk.f32.gmra.mxu2 %vm2951_vm10, %v2925_v24 }
 0x335   :  { %v1040_v59 = vadd.f32 -0.4999988, %v1039_v6  ;;  %v1047_v60 = vadd.f32 -0.16666654, %v1046_v27  ;;  %6626 = vset.pattern.permute.xlu2 %v12903_v18 }
 0x337   :  { %v1041_v58 = vmul.f32 %v1040_v59, %v1036_v37  ;;  %v1048_v35 = vmul.f32 %v1047_v60, %v1036_v37 }
 0x339   :  { %v1042_v8 = vadd.f32 1.0, %v1041_v58  ;;  %v1049_v29 = vadd.f32 1.0, %v1048_v35  ;;  %6628 = vset.pattern.permute.xlu1 %v12903_v18 }
 0x33b   :  { %v1050_v36 = vmul.f32 %v1049_v29, %v1034_v63  ;;  %v1059_v46 = vxor.u32 2147483648, %v1042_v8  ;;  %6510 = vmatmul.msk.f32.gmra.mxu2 %vm2951_vm10, %v2926_v32 }
 0x33d   :  { %v1056_v31 = vxor.u32 2147483648, %v1050_v36  ;;  %v1060_v62 = vsel %vm1058_vm14, %v1059_v46, %v1050_v36 }
 0x33f   :  { %v1057_v39 = vsel %vm1055_vm13, %v1042_v8, %v1056_v31 }
 0x340   :  { %v1061_v7 = vsel %vm1054_vm15, %v1057_v39, %v1060_v62 }
 0x341   :  { %v1062_v3 = vsel %vm1051_vm0, nan, %v1061_v7 }
 0x342   :  { %3066 = vmatpush.msra.mxu3 %v1062_v3 }
 0x343   :  { %6511 = vmatmul.msk.f32.vlgmr.msra.gmra.mxu3 %vm2951_vm10, %v9334_v41 }
 0x34b   :  { %6512 = vmatmul.msk.f32.gmra.mxu3 %vm2951_vm10, %v9345_v0 }
 0x353   :  { %6513 = vmatmul.msk.f32.gmra.mxu3 %vm2951_vm10, %v2925_v24 }
 0x35b   :  { %6514 = vmatmul.msk.f32.gmra.mxu3 %vm2951_vm10, %v2926_v32 }
 0x37f   :  { %v9412_v15 = vpop.permute.xlu0 %2933 }
 0x384   :  { %v2981_v16 = vpop.f32.mrf.mxu0  ;;  %v3010_v62 = vpop.f32.mrf.mxu1 }
 0x385   :  { %v2982_v55 = vadd.f32 %v2981_v16, %v9412_v15  ;;  %v3011_v7 = vadd.f32 %v3010_v62, %v9412_v15 }
 0x387   :  { %v9415_v61 = vmul.f32 30.0, %v2982_v55  ;;  %v9480_v16 = vmul.f32 30.0, %v3011_v7 }
 0x389   :  { %12960 = vst [vmem:[#allocation16_spill] sm:$0xff] %v9415_v61  ;;  %v3099_v33 = vand.u32 2139095040, %v9415_v61  ;;  %v3096_v47 = vand.u32 2147483647, %v9415_v61 }
 0x38a   :  { %12961 = vst [vmem:[#allocation14_spill] sm:$0xff] %v9480_v16 }
 0x38b   :  { %v3100_v21 = vshrl.u32 %v3099_v33, 23  ;;  %v3103_v10 = vand.u32 8388607, %v3096_v47 }
 0x38d   :  { %v6515_v40 = vadd.s32 4294967169, %v3100_v21  ;;  %v3104_v42 = vor.u32 8388608, %v3103_v10 }
 0x38f   :  { %v3106_v23 = vadd.s32 1, %v6515_v40  ;;  %v9469_v49 = vshll.u32 %v3104_v42, 8 }
 0x391   :  { %vm3107_vm1 = vcmp.gt.s32.totalorder %v3106_v23, 0  ;;  %v3145_v32 = vand.u32 65535, %v9469_v49  ;;  %v3146_v46 = vshrl.u32 %v9469_v49, 16 }
 0x392   :  { %v3108_v34 = vsel %vm3107_vm1, %v3106_v23, 0 }
 0x393   :  { %v3110_v20 = vand.u32 31, %v3108_v34  ;;  %v9424_v13 = vshrl.u32 %v3108_v34, 5  ;;  %v3254_v34 = vand.u32 2139095040, %v9480_v16 }
 0x395   :  { %v9418_v12 = vsub.s32 32, %v3110_v20  ;;  %v3122_v11 = vshll.u32 %v12898_v4, %v3110_v20  ;;  %v3113_v22 = vshll.u32 %v12908_v5, %v3110_v20  ;;  %v3116_v43 = vshll.u32 %v12907_v25, %v3110_v20 }
 0x396   :  { %v3125_v0 = vshll.u32 %v12899_v9, %v3110_v20  ;;  %v3119_v19 = vshll.u32 %v12897_v28, %v3110_v20  ;;  %vm3131_vm2 = vcmp.lt.s32.totalorder %v9424_v13, 4  ;;  %vm3128_vm3 = vcmp.lt.s32.totalorder %v9424_v13, 1 }
 0x397   :  { %v3123_v41 = vshrl.u32 %v12899_v9, %v9418_v12  ;;  %v3126_v14 = vshrl.u32 %v12900_v38, %v9418_v12  ;;  %v3114_v57 = vshrl.u32 %v12907_v25, %v9418_v12  ;;  %v3117_v44 = vshrl.u32 %v12897_v28, %v9418_v12 }
 0x398   :  { %v3120_v53 = vshrl.u32 %v12898_v4, %v9418_v12  ;;  %vm3130_vm4 = vcmp.lt.s32.totalorder %v9424_v13, 3  ;;  %vm3129_vm5 = vcmp.lt.s32.totalorder %v9424_v13, 2  ;;  %v3112_v10 = vshrl.u32 %v12908_v5, %v9418_v12 }
 0x399   :  { %v3124_v63 = vor.u32 %v3123_v41, %v3122_v11  ;;  %v3127_v37 = vor.u32 %v3126_v14, %v3125_v0  ;;  %v9441_v48 = vor.u32 %v3114_v57, %v3113_v22  ;;  %v9443_v30 = vor.u32 %v3117_v44, %v3116_v43 }
 0x39a   :  { %v9445_v24 = vor.u32 %v3120_v53, %v3119_v19  ;;  %v3255_v43 = vshrl.u32 %v3254_v34, 23 }
 0x39b   :  { %v3137_v56 = vsel %vm3131_vm2, %v3124_v63, 920167782  ;;  %v3141_v17 = vsel %vm3131_vm2, %v3127_v37, 1326507024  ;;  %v3136_v6 = vsel %vm3128_vm3, %v9441_v48, %v9443_v30 }
 0x39c   :  { %v3138_v27 = vsel %vm3130_vm4, %v9445_v24, %v3137_v56  ;;  %v3140_v45 = vsel %vm3128_vm3, %v9443_v30, %v9445_v24  ;;  %v3142_v59 = vsel %vm3130_vm4, %v3124_v63, %v3141_v17  ;;  %v6518_v44 = vadd.s32 4294967169, %v3255_v43 }
 0x39d   :  { %v3139_v60 = vsel %vm3129_vm5, %v3136_v6, %v3138_v27  ;;  %v3143_v58 = vsel %vm3129_vm5, %v3140_v45, %v3142_v59  ;;  %v3132_v59 = vsel %vm3128_vm3, %v3112_v10, %v9441_v48 }
 0x39e   :  { %v3170_v35 = vshrl.u32 %v3139_v60, 16  ;;  %v3148_v8 = vshrl.u32 %v3143_v58, 16  ;;  %v3169_v36 = vand.u32 65535, %v3139_v60  ;;  %v3147_v50 = vand.u32 65535, %v3143_v58 }
 0x39f   :  { %v3261_v37 = vadd.s32 1, %v6518_v44  ;;  %v3133_v60 = vsel %vm3131_vm2, %v9445_v24, 2102212464  ;;  %v12763_v58 = vand.u32 2147483647, %v9480_v16 }
 0x3a0   :  { %v3172_v29 = vmul.u32 %v3170_v35, %v3145_v32  ;;  %v3150_v52 = vmul.u32 %v3148_v8, %v3145_v32  ;;  %v3171_v31 = vmul.u32 %v3169_v36, %v3145_v32  ;;  %v9475_v39 = vmul.u32 %v3169_v36, %v3146_v46 }
 0x3a1   :  { %v3149_v3 = vmul.u32 %v3147_v50, %v3145_v32  ;;  %v3151_v2 = vmul.u32 %v3147_v50, %v3146_v46  ;;  %v3174_v23 = vmul.u32 %v3170_v35, %v3146_v46  ;;  %v3152_v20 = vmul.u32 %v3148_v8, %v3146_v46 }
 0x3a2   :  { %v3175_v54 = vshll.u32 %v3172_v29, 16  ;;  %v3153_v1 = vshll.u32 %v3150_v52, 16  ;;  %v3177_v33 = vshll.u32 %v9475_v39, 16  ;;  %v3176_v17 = vshrl.u32 %v3172_v29, 16 }
 0x3a3   :  { %v3155_v40 = vshll.u32 %v3151_v2, 16  ;;  %vm3262_vm10 = vcmp.gt.s32.totalorder %v3261_v37, 0  ;;  %v3154_v27 = vshrl.u32 %v3150_v52, 16  ;;  %v3178_v32 = vshrl.u32 %v9475_v39, 16 }
 0x3a4   :  { %vm3179_vm6 = vc.u32 %v3171_v31, %v3175_v54  ;;  %v9478_v51 = vadd.s32 %v3175_v54, %v3171_v31  ;;  %vm3157_vm7 = vc.u32 %v3149_v3, %v3153_v1  ;;  %v3159_v55 = vadd.s32 %v3153_v1, %v3149_v3 }
 0x3a5   :  { %v3180_v21 = vsel %vm3179_vm6, 1, %v12903_v18  ;;  %v3158_v11 = vsel %vm3157_vm7, 1, %v12903_v18  ;;  %v3263_v6 = vsel %vm3262_vm10, %v3261_v37, 0  ;;  %v3156_v50 = vshrl.u32 %v3151_v2, 16 }
 0x3a6   :  { %vm3183_vm8 = vc.u32 %v9478_v51, %v3177_v33  ;;  %v3039_v41 = vpop.f32.mrf.mxu2  ;;  %vm3161_vm9 = vc.u32 %v3159_v55, %v3155_v40  ;;  %v3182_v22 = vadd.s32 %v3180_v21, %v3174_v23  ;;  %v3160_v57 = vadd.s32 %v3158_v11, %v3152_v20 }
 0x3a7   :  { %v3040_v0 = vadd.f32 %v3039_v41, %v9412_v15  ;;  %v3184_v14 = vsel %vm3183_vm8, 1, %v12903_v18  ;;  %v3162_v53 = vsel %vm3161_vm9, 1, %v12903_v18  ;;  %v3265_v35 = vand.u32 31, %v3263_v6 }
 0x3a8   :  { %v3186_v63 = vadd.s32 %v3184_v14, %v3182_v22  ;;  %v3164_v56 = vadd.s32 %v3162_v53, %v3160_v57  ;;  %v9505_v8 = vshrl.u32 %v3263_v6, 5  ;;  %v3258_v31 = vand.u32 8388607, %v12763_v58 }
 0x3a9   :  { %v9491_v19 = vmul.f32 30.0, %v3040_v0  ;;  %v9507_v36 = vsub.s32 32, %v3265_v35  ;;  %v3268_v52 = vshll.u32 %v12908_v5, %v3265_v35  ;;  %v3271_v46 = vshll.u32 %v12907_v25, %v3265_v35 }
 0x3aa   :  { %v3187_v45 = vadd.s32 %v3186_v63, %v3176_v17  ;;  %v3165_v12 = vadd.s32 %v3164_v56, %v3154_v27  ;;  %v3274_v48 = vshll.u32 %v12897_v28, %v3265_v35  ;;  %v3277_v24 = vshll.u32 %v12898_v4, %v3265_v35 }
 0x3ab   :  { %12962 = vst [vmem:[#allocation6_spill] sm:$0xff] %v9491_v19  ;;  %v3409_v42 = vand.u32 2139095040, %v9491_v19  ;;  %v3280_v1 = vshll.u32 %v12899_v9, %v3265_v35  ;;  %v3269_v62 = vshrl.u32 %v12907_v25, %v9507_v36  ;;  %v3272_v7 = vshrl.u32 %v12897_v28, %v9507_v36 }
 0x3ac   :  { %v3188_v54 = vadd.s32 %v3187_v45, %v3178_v32  ;;  %v3275_v3 = vshrl.u32 %v12898_v4, %v9507_v36  ;;  %v9522_v55 = vadd.s32 %v3165_v12, %v3156_v50  ;;  %v3278_v2 = vshrl.u32 %v12899_v9, %v9507_v36 }
 0x3ad   :  { %v3410_v29 = vshrl.u32 %v3409_v42, 23  ;;  %v3281_v21 = vshrl.u32 %v12900_v38, %v9507_v36  ;;  %vm3283_vm11 = vcmp.lt.s32.totalorder %v9505_v8, 1  ;;  %v9529_v40 = vor.u32 %v3269_v62, %v3268_v52 }
 0x3ae   :  { %v9531_v23 = vor.u32 %v3272_v7, %v3271_v46  ;;  %v9533_v34 = vor.u32 %v3275_v3, %v3274_v48  ;;  %v3279_v11 = vor.u32 %v3278_v2, %v3277_v24  ;;  %vm3285_vm12 = vcmp.lt.s32.totalorder %v9505_v8, 3 }
 0x3af   :  { %v6521_v20 = vadd.s32 4294967169, %v3410_v29  ;;  %v3282_v41 = vor.u32 %v3281_v21, %v3280_v1  ;;  %vm3286_vm13 = vcmp.lt.s32.totalorder %v9505_v8, 4  ;;  %v3134_v22 = vsel %vm3130_vm4, %v9443_v30, %v3133_v60 }
 0x3b0   :  { %v3192_v43 = vadd.s32 1, %v3188_v54  ;;  %v3259_v0 = vor.u32 8388608, %v3258_v31  ;;  %v3295_v14 = vsel %vm3283_vm11, %v9531_v23, %v9533_v34  ;;  %v9547_v57 = vadd.s32 %v9478_v51, %v3177_v33 }
 0x3b1   :  { %v3292_v44 = vsel %vm3286_vm13, %v3279_v11, 920167782  ;;  %v3296_v53 = vsel %vm3286_vm13, %v3282_v41, 1326507024  ;;  %v12760_v30 = vand.u32 2147483647, %v9491_v19  ;;  %v3291_v63 = vsel %vm3283_vm11, %v9529_v40, %v9531_v23 }
 0x3b2   :  { %vm3284_vm14 = vcmp.lt.s32.totalorder %v9505_v8, 2  ;;  %v3293_v39 = vsel %vm3285_vm12, %v9533_v34, %v3292_v44  ;;  %v3297_v51 = vsel %vm3285_vm12, %v3279_v11, %v3296_v53  ;;  %vm3191_vm15 = vc.u32 %v9522_v55, %v9547_v57 }
 0x3b3   :  { %v3298_v33 = vsel %vm3284_vm14, %v3295_v14, %v3297_v51  ;;  %v3416_v37 = vadd.s32 1, %v6521_v20  ;;  %v3135_v10 = vsel %vm3129_vm5, %v3132_v59, %v3134_v22  ;;  %v9570_v56 = vshll.u32 %v3259_v0, 8 }
 0x3b4   :  { %v3294_v17 = vsel %vm3284_vm14, %v3291_v63, %v3293_v39  ;;  %v3193_v42 = vsel %vm3191_vm15, %v3192_v43, %v3188_v54  ;;  %v3303_v6 = vshrl.u32 %v3298_v33, 16  ;;  %v3413_v27 = vand.u32 8388607, %v12760_v30 }
 0x3b5   :  { %v3189_v45 = vmul.u32 %v9469_v49, %v3135_v10  ;;  %v3302_v60 = vand.u32 65535, %v3298_v33  ;;  %vm3417_vm0 = vcmp.gt.s32.totalorder %v3416_v37, 0  ;;  %v3300_v12 = vand.u32 65535, %v9570_v56 }
 0x3b6   :  { %v3325_v32 = vshrl.u32 %v3294_v17, 16  ;;  %v3301_v59 = vshrl.u32 %v9570_v56, 16  ;;  %v3414_v52 = vor.u32 8388608, %v3413_v27  ;;  %v3418_v46 = vsel %vm3417_vm0, %v3416_v37, 0 }
 0x3b7   :  { %v9578_v13 = vadd.s32 %v3193_v42, %v3189_v45  ;;  %v9581_v29 = vmul.u32 %v3303_v6, %v3300_v12  ;;  %v3324_v54 = vand.u32 65535, %v3294_v17  ;;  %v3420_v1 = vand.u32 31, %v3418_v46 }
 0x3b8   :  { %v9584_v50 = vmul.u32 %v3302_v60, %v3301_v59  ;;  %v9586_v49 = vmul.u32 %v3325_v32, %v3300_v12  ;;  %v3304_v31 = vmul.u32 %v3302_v60, %v3300_v12  ;;  %v9590_v7 = vshll.u32 %v3414_v52, 8 }
 0x3b9   :  { %v3195_v24 = vadd.s32 536870912, %v9578_v13  ;;  %v3308_v62 = vshll.u32 %v9581_v29, 16  ;;  %v3307_v2 = vmul.u32 %v3303_v6, %v3301_v59  ;;  %v3326_v20 = vmul.u32 %v3324_v54, %v3300_v12 }
 0x3ba   :  { %v3310_v21 = vshll.u32 %v9584_v50, 16  ;;  %v3330_v11 = vshll.u32 %v9586_v49, 16  ;;  %v9598_v41 = vshrl.u32 %v3418_v46, 5  ;;  %v3423_v22 = vshll.u32 %v12908_v5, %v3420_v1 }
 0x3bb   :  { %v3426_v43 = vshll.u32 %v12907_v25, %v3420_v1  ;;  %v3429_v44 = vshll.u32 %v12897_v28, %v3420_v1  ;;  %vm3312_vm1 = vc.u32 %v3304_v31, %v3308_v62  ;;  %v3432_v63 = vshll.u32 %v12898_v4, %v3420_v1 }
 0x3bc   :  { %v3435_v51 = vshll.u32 %v12899_v9, %v3420_v1  ;;  %v3314_v42 = vadd.s32 %v3308_v62, %v3304_v31  ;;  %v9621_v6 = vmul.u32 %v3324_v54, %v3301_v59  ;;  %v3329_v27 = vmul.u32 %v3325_v32, %v3301_v59 }
 0x3bd   :  { %v3313_v60 = vsel %vm3312_vm1, 1, %v12903_v18  ;;  %vm3438_vm2 = vcmp.lt.s32.totalorder %v9598_v41, 1  ;;  %v3455_v12 = vand.u32 65535, %v9590_v7  ;;  %vm3334_vm3 = vc.u32 %v3326_v20, %v3330_v11 }
 0x3be   :  { %v9626_v52 = vadd.s32 %v3330_v11, %v3326_v20  ;;  %vm3441_vm4 = vcmp.lt.s32.totalorder %v9598_v41, 4  ;;  %vm3440_vm5 = vcmp.lt.s32.totalorder %v9598_v41, 3  ;;  %v3332_v54 = vshll.u32 %v9621_v6, 16 }
 0x3bf   :  { %vm3439_vm6 = vcmp.lt.s32.totalorder %v9598_v41, 2  ;;  %vm3316_vm7 = vc.u32 %v3314_v42, %v3310_v21  ;;  %v3335_v62 = vsel %vm3334_vm3, 1, %v12903_v18 }
 0x3c0   :  { %vm3338_vm8 = vc.u32 %v9626_v52, %v3332_v54  ;;  %v3337_v21 = vadd.s32 %v3335_v62, %v3329_v27 }
 0x3c6   :  { %v3068_v35 = vpop.f32.mrf.mxu3 }
 0x3c7   :  { %v3069_v48 = vadd.f32 %v3068_v35, %v9412_v15  ;;  %v9595_v15 = vsub.s32 32, %v3420_v1 }
 0x3c9   :  { %v9592_v3 = vmul.f32 30.0, %v3069_v48  ;;  %v3424_v0 = vshrl.u32 %v12907_v25, %v9595_v15  ;;  %v3427_v14 = vshrl.u32 %v12897_v28, %v9595_v15  ;;  %v3430_v53 = vshrl.u32 %v12898_v4, %v9595_v15 }
 0x3ca   :  { %v3433_v39 = vshrl.u32 %v12899_v9, %v9595_v15  ;;  %v3436_v17 = vshrl.u32 %v12900_v38, %v9595_v15 }
 0x3cb   :  { %12963 = vst [vmem:[#allocation15_spill] sm:$0xff] %v9592_v3  ;;  %v9613_v33 = vor.u32 %v3424_v0, %v3423_v22  ;;  %v9615_v37 = vor.u32 %v3427_v14, %v3426_v43  ;;  %v9617_v10 = vor.u32 %v3430_v53, %v3429_v44  ;;  %v9657_v14 = vshrl.u32 %v3195_v24, 30 }
 0x3cc   :  { %v3434_v45 = vor.u32 %v3433_v39, %v3432_v63  ;;  %v3437_v35 = vor.u32 %v3436_v17, %v3435_v51  ;;  %v3315_v53 = vadd.s32 %v3313_v60, %v3307_v2  ;;  %v3456_v63 = vshrl.u32 %v9590_v7, 16 }
 0x3cd   :  { %v3446_v46 = vsel %vm3438_vm2, %v9613_v33, %v9615_v37  ;;  %v3450_v59 = vsel %vm3438_vm2, %v9615_v37, %v9617_v10  ;;  %v3317_v51 = vsel %vm3316_vm7, 1, %v12903_v18  ;;  %v3339_v17 = vsel %vm3338_vm8, 1, %v12903_v18 }
 0x3ce   :  { %v3447_v32 = vsel %vm3441_vm4, %v3434_v45, 920167782  ;;  %v3451_v48 = vsel %vm3441_vm4, %v3437_v35, 1326507024  ;;  %v3197_v27 = vshll.u32 %v9657_v14, 30  ;;  %v3319_v60 = vadd.s32 %v3317_v51, %v3315_v53 }
 0x3cf   :  { %v3448_v1 = vsel %vm3440_vm5, %v9617_v10, %v3447_v32  ;;  %v3452_v31 = vsel %vm3440_vm5, %v3434_v45, %v3451_v48  ;;  %v3564_v45 = vand.u32 2139095040, %v9592_v3 }
 0x3d0   :  { %v3449_v20 = vsel %vm3439_vm6, %v3446_v46, %v3448_v1  ;;  %v3453_v11 = vsel %vm3439_vm6, %v3450_v59, %v3452_v31  ;;  %v3341_v59 = vadd.s32 %v3339_v17, %v3337_v21  ;;  %v3309_v1 = vshrl.u32 %v9581_v29, 16 }
 0x3d1   :  { %v3458_v22 = vshrl.u32 %v3453_v11, 16  ;;  %v3479_v43 = vand.u32 65535, %v3449_v20  ;;  %v3480_v0 = vshrl.u32 %v3449_v20, 16  ;;  %v3457_v44 = vand.u32 65535, %v3453_v11  ;;  %v5579_v20 = vld [vmem:[%s12716_s4 + $0x18] sm:$0xff] }
 0x3d2   :  { %v3565_v62 = vshrl.u32 %v3564_v45, 23  ;;  %v3331_v11 = vshrl.u32 %v9586_v49, 16  ;;  %5675 = vperm.xlu0 %6627, %v5579_v20   ;;  %5597 = vperm.xlu2 %6626, %v5579_v20  }
 0x3d3   :  { %v9660_v39 = vmul.u32 %v3458_v22, %v3455_v12  ;;  %v3482_v42 = vmul.u32 %v3480_v0, %v3455_v12  ;;  %v9666_v46 = vmul.u32 %v3479_v43, %v3456_v63  ;;  %v3459_v24 = vmul.u32 %v3457_v44, %v3455_v12 }
 0x3d4   :  { %v9668_v32 = vmul.u32 %v3457_v44, %v3456_v63  ;;  %v3481_v48 = vmul.u32 %v3479_v43, %v3455_v12  ;;  %v3484_v12 = vmul.u32 %v3480_v0, %v3456_v63  ;;  %v3320_v43 = vadd.s32 %v3319_v60, %v3309_v1 }
 0x3d5   :  { %v3463_v35 = vshll.u32 %v9660_v39, 16  ;;  %v3485_v2 = vshll.u32 %v3482_v42, 16  ;;  %v3487_v44 = vshll.u32 %v9666_v46, 16  ;;  %v3342_v21 = vadd.s32 %v3341_v59, %v3331_v11 }
 0x3d6   :  { %v3465_v53 = vshll.u32 %v9668_v32, 16  ;;  %v3462_v49 = vmul.u32 %v3458_v22, %v3456_v63  ;;  %v6524_v45 = vadd.s32 4294967169, %v3565_v62  ;;  %v3267_v0 = vshrl.u32 %v12908_v5, %v9507_v36 }
 0x3d7   :  { %vm3467_vm9 = vc.u32 %v3459_v24, %v3463_v35  ;;  %v3469_v31 = vadd.s32 %v3463_v35, %v3459_v24  ;;  %vm3489_vm10 = vc.u32 %v3481_v48, %v3485_v2  ;;  %v9677_v30 = vadd.s32 %v3485_v2, %v3481_v48 }
 0x3d8   :  { %v3490_v29 = vsel %vm3489_vm10, 1, %v12903_v18  ;;  %v3468_v51 = vsel %vm3467_vm9, 1, %v12903_v18  ;;  %v9686_v35 = vsub.s32 %v9578_v13, %v3197_v27  ;;  %v3333_v24 = vshrl.u32 %v9621_v6, 16 }
 0x3d9   :  { %vm3493_vm15 = vc.u32 %v9677_v30, %v3487_v44  ;;  %vm3471_vm0 = vc.u32 %v3469_v31, %v3465_v53  ;;  %v3492_v17 = vadd.s32 %v3490_v29, %v3484_v12  ;;  %v3288_v60 = vsel %vm3286_vm13, %v9533_v34, 2102212464 }
 0x3da   :  { %v3494_v2 = vsel %vm3493_vm15, 1, %v12903_v18  ;;  %v3311_v59 = vshrl.u32 %v9584_v50, 16  ;;  %v3470_v22 = vadd.s32 %v3468_v51, %v3462_v49  ;;  %v3571_v63 = vadd.s32 1, %v6524_v45  ;;  %6629 = vset.pattern.permute.xlu2 %v12959_v26 }
 0x3db   :  { %v3343_v48 = vadd.s32 %v3342_v21, %v3333_v24  ;;  %v3472_v1 = vsel %vm3471_vm0, 1, %v12903_v18  ;;  %v3496_v27 = vadd.s32 %v3494_v2, %v3492_v17  ;;  %v3200_v36 = vsub.s32 0, %v9686_v35 }
 0x3dc   :  { %v9697_v13 = vadd.s32 %v3320_v43, %v3311_v59  ;;  %vm3572_vm1 = vcmp.gt.s32.totalorder %v3571_v63, 0  ;;  %v3287_v31 = vsel %vm3283_vm11, %v3267_v0, %v9529_v40  ;;  %v3289_v34 = vsel %vm3285_vm12, %v9531_v23, %v3288_v60 }
 0x3dd   :  { %v9709_v50 = vadd.s32 %v9626_v52, %v3332_v54  ;;  %v3474_v62 = vadd.s32 %v3472_v1, %v3470_v22  ;;  %v3486_v20 = vshrl.u32 %v3482_v42, 16  ;;  %v3573_v11 = vsel %vm3572_vm1, %v3571_v63, 0 }
 0x3de   :  { %vm3199_vm13 = vcmp.lt.s32.totalorder %v9686_v35, 0  ;;  %v3347_v53 = vadd.s32 1, %v3343_v48  ;;  %v3464_v40 = vshrl.u32 %v9660_v39, 16  ;;  %v3575_v23 = vand.u32 31, %v3573_v11 }
 0x3df   :  { %vm3346_vm11 = vc.u32 %v9697_v13, %v9709_v50  ;;  %v3497_v12 = vadd.s32 %v3496_v27, %v3486_v20  ;;  %v3290_v6 = vsel %vm3284_vm14, %v3287_v31, %v3289_v34  ;;  %v3201_v52 = vsel %vm3199_vm13, %v3200_v36, %v9686_v35 }
 0x3e0   :  { %v3475_v54 = vadd.s32 %v3474_v62, %v3464_v40  ;;  %v3488_v42 = vshrl.u32 %v9666_v46, 16  ;;  %v9720_v29 = vsub.s32 32, %v3575_v23  ;;  %v3348_v26 = vsel %vm3346_vm11, %v3347_v53, %v3343_v48 }
 0x3e1   :  { %v3422_v43 = vshrl.u32 %v12908_v5, %v9595_v15  ;;  %v3443_v39 = vsel %vm3441_vm4, %v9617_v10, 2102212464  ;;  %v3344_v21 = vmul.u32 %v9570_v56, %v3290_v6  ;;  %v3466_v8 = vshrl.u32 %v9668_v32, 16 }
 0x3e2   :  { %v3498_v51 = vadd.s32 %v3497_v12, %v3488_v42  ;;  %v3202_v49 = vclz %v3201_v52  ;;  %v12762_v45 = vand.u32 2147483647, %v9592_v3  ;;  %v3588_v0 = vshrl.u32 %v12899_v9, %v9720_v29 }
 0x3e3   :  { %v3442_v17 = vsel %vm3438_vm2, %v3422_v43, %v9613_v33  ;;  %v3349_v15 = vadd.s32 %v3348_v26, %v3344_v21  ;;  %v3444_v10 = vsel %vm3440_vm5, %v9615_v37, %v3443_v39  ;;  %v9738_v24 = vadd.s32 %v3475_v54, %v3466_v8 }
 0x3e4   :  { %v3587_v56 = vshll.u32 %v12898_v4, %v3575_v23  ;;  %v3582_v32 = vshrl.u32 %v12897_v28, %v9720_v29  ;;  %v3585_v33 = vshrl.u32 %v12898_v4, %v9720_v29  ;;  %v3590_v2 = vshll.u32 %v12899_v9, %v3575_v23 }
 0x3e5   :  { %v3591_v60 = vshrl.u32 %v12900_v38, %v9720_v29  ;;  %v9751_v59 = vadd.s32 %v9677_v30, %v3487_v44  ;;  %v3502_v37 = vadd.s32 1, %v3498_v51  ;;  %v9753_v22 = vshrl.u32 %v3573_v11, 5 }
 0x3e6   :  { %v3579_v63 = vshrl.u32 %v12907_v25, %v9720_v29  ;;  %v3581_v48 = vshll.u32 %v12907_v25, %v3575_v23  ;;  %v3584_v1 = vshll.u32 %v12897_v28, %v3575_v23  ;;  %v3589_v27 = vor.u32 %v3588_v0, %v3587_v56 }
 0x3e7   :  { %v3592_v36 = vor.u32 %v3591_v60, %v3590_v2  ;;  %v3445_v31 = vsel %vm3439_vm6, %v3442_v17, %v3444_v10  ;;  %vm3501_vm12 = vc.u32 %v9738_v24, %v9751_v59  ;;  %v3578_v30 = vshll.u32 %v12908_v5, %v3575_v23 }
 0x3e8   :  { %v3350_v46 = vadd.s32 536870912, %v3349_v15  ;;  %v3568_v44 = vand.u32 8388607, %v12762_v45  ;;  %v9766_v34 = vor.u32 %v3582_v32, %v3581_v48  ;;  %v9768_v62 = vor.u32 %v3585_v33, %v3584_v1  ;;  %v3042_v33 = vpop.f32.mrf.mxu2 }
 0x3e9   :  { %v9770_v20 = vor.u32 %v3579_v63, %v3578_v30  ;;  %vm3596_vm14 = vcmp.lt.s32.totalorder %v9753_v22, 4  ;;  %v6516_v11 = vadd.s32 4294967294, %v3202_v49  ;;  %v3503_v41 = vsel %vm3501_vm12, %v3502_v37, %v3498_v51  ;;  %v9810_v37 = vpop.permute.xlu1 %2938 }
 0x3ea   :  { %v3602_v53 = vsel %vm3596_vm14, %v3589_v27, 920167782  ;;  %v3606_v40 = vsel %vm3596_vm14, %v3592_v36, 1326507024  ;;  %v3499_v12 = vmul.u32 %v9590_v7, %v3445_v31  ;;  %vm3593_vm2 = vcmp.lt.s32.totalorder %v9753_v22, 1 }
 0x3eb   :  { %vm3595_vm3 = vcmp.lt.s32.totalorder %v9753_v22, 3  ;;  %v9780_v23 = vshrl.u32 %v3350_v46, 30  ;;  %v3569_v6 = vor.u32 8388608, %v3568_v44  ;;  %v3605_v52 = vsel %vm3593_vm2, %v9766_v34, %v9768_v62 }
 0x3ec   :  { %v3607_v54 = vsel %vm3595_vm3, %v3589_v27, %v3606_v40  ;;  %v3504_v42 = vadd.s32 %v3503_v41, %v3499_v12  ;;  %v3601_v7 = vsel %vm3593_vm2, %v9770_v20, %v9766_v34  ;;  %v3603_v26 = vsel %vm3595_vm3, %v9768_v62, %v3602_v53 }
 0x3ed   :  { %12964 = vst [vmem:[#allocation7_spill] sm:$0xff] %v9780_v23  ;;  %vm6517_vm4 = vcmp.lt.s32.totalorder %v6516_v11, 0  ;;  %vm3594_vm5 = vcmp.lt.s32.totalorder %v9753_v22, 2  ;;  %v3352_v39 = vshll.u32 %v9780_v23, 30  ;;  %v9801_v8 = vshll.u32 %v3569_v6, 8 }
 0x3ee   :  { %v3608_v43 = vsel %vm3594_vm5, %v3605_v52, %v3607_v54  ;;  %v3604_v21 = vsel %vm3594_vm5, %v3601_v7, %v3603_v26  ;;  %v3205_v51 = vsel %vm6517_vm4, 0, %v6516_v11  ;;  %v3505_v49 = vadd.s32 536870912, %v3504_v42 }
 0x3ef   :  { %v3613_v17 = vshrl.u32 %v3608_v43, 16  ;;  %v3635_v0 = vshrl.u32 %v3604_v21, 16  ;;  %v3210_v10 = vsub.s32 4294967266, %v3205_v51  ;;  %v9803_v56 = vsub.s32 %v3349_v15, %v3352_v39 }
 0x3f0   :  { %v3610_v32 = vand.u32 65535, %v9801_v8  ;;  %v9806_v2 = vshrl.u32 %v3505_v49, 30  ;;  %v3043_v48 = vadd.f32 %v3042_v33, %v9810_v37  ;;  %v3206_v1 = vsub.s32 32, %v3205_v51 }
 0x3f1   :  { %v3211_v27 = vadd.s32 127, %v3210_v10  ;;  %v3355_v36 = vsub.s32 0, %v9803_v56  ;;  %v3612_v31 = vand.u32 65535, %v3608_v43  ;;  %vm3354_vm6 = vcmp.lt.s32.totalorder %v9803_v56, 0 }
 0x3f2   :  { %12965 = vst [vmem:[#allocation12_spill] sm:$0xff] %v9806_v2  ;;  %v9808_v60 = vmul.u32 %v3613_v17, %v3610_v32  ;;  %v9812_v63 = vmul.u32 %v3635_v0, %v3610_v32  ;;  %v3507_v15 = vshll.u32 %v9806_v2, 30  ;;  %v3634_v30 = vand.u32 65535, %v3604_v21 }
 0x3f3   :  { %v3190_v46 = vadd.s32 %v9547_v57, %v9522_v55  ;;  %v3611_v11 = vshrl.u32 %v9801_v8, 16  ;;  %v9823_v53 = vmul.f32 30.0, %v3043_v48  ;;  %v3212_v12 = vshll.u32 %v3211_v27, 23 }
 0x3f4   :  { %v3618_v44 = vshll.u32 %v9808_v60, 16  ;;  %v3640_v41 = vshll.u32 %v9812_v63, 16  ;;  %v3356_v6 = vsel %vm3354_vm6, %v3355_v36, %v9803_v56  ;;  %v3614_v52 = vmul.u32 %v3612_v31, %v3610_v32  ;;  %v2984_v36 = vpop.f32.mrf.mxu0 }
 0x3f5   :  { %12966 = vst [vmem:[#allocation13_spill] sm:$0xff] %v9823_v53  ;;  %v3208_v40 = vshrl.u32 %v3190_v46, %v3206_v1  ;;  %v9826_v54 = vsub.s32 %v3504_v42, %v3507_v15  ;;  %v9828_v7 = vmul.u32 %v3612_v31, %v3611_v11  ;;  %v3636_v26 = vmul.u32 %v3634_v30, %v3610_v32 }
 0x3f6   :  { %v9830_v43 = vmul.u32 %v3634_v30, %v3611_v11  ;;  %v3207_v55 = vshll.u32 %v9686_v35, %v3205_v51  ;;  %vm3622_vm7 = vc.u32 %v3614_v52, %v3618_v44  ;;  %v3624_v57 = vadd.s32 %v3618_v44, %v3614_v52 }
 0x3f7   :  { %vm3644_vm8 = vc.u32 %v3636_v26, %v3640_v41  ;;  %v9833_v39 = vadd.s32 %v3640_v41, %v3636_v26  ;;  %v4029_v21 = vand.u32 2139095040, %v9823_v53  ;;  %v3213_v49 = vor.u32 4788187, %v3212_v12 }
 0x3f8   :  { %v3357_v10 = vclz %v3356_v6  ;;  %v3209_v33 = vor.u32 %v3208_v40, %v3207_v55  ;;  %vm3509_vm9 = vcmp.lt.s32.totalorder %v9826_v54, 0  ;;  %v3620_v42 = vshll.u32 %v9828_v7, 16 }
 0x3f9   :  { %v3642_v32 = vshll.u32 %v9830_v43, 16  ;;  %v3510_v48 = vsub.s32 0, %v9826_v54  ;;  %v3623_v35 = vsel %vm3622_vm7, 1, %v12903_v18  ;;  %v3639_v51 = vmul.u32 %v3635_v0, %v3611_v11 }
 0x3fa   :  { %v3645_v1 = vsel %vm3644_vm8, 1, %v12903_v18  ;;  %v3617_v27 = vmul.u32 %v3613_v17, %v3611_v11  ;;  %vm3626_vm10 = vc.u32 %v3624_v57, %v3620_v42  ;;  %v4030_v31 = vshrl.u32 %v4029_v21, 23  ;;  %v3013_v11 = vpop.f32.mrf.mxu1 }
 0x3fb   :  { %vm3648_vm15 = vc.u32 %v9833_v39, %v3642_v32  ;;  %v3214_v15 = vand.u32 2147483647, %v3213_v49  ;;  %v6519_v30 = vadd.s32 4294967294, %v3357_v10  ;;  %v3216_v46 = vcvt.s32.f32 %v3209_v33  ;;  %v3071_v49 = vpop.f32.mrf.mxu3 }
 0x3fc   :  { %v3625_v44 = vadd.s32 %v3623_v35, %v3617_v27  ;;  %v3647_v41 = vadd.s32 %v3645_v1, %v3639_v51  ;;  %v6533_v40 = vadd.s32 4294967169, %v4030_v31  ;;  %v3511_v12 = vsel %vm3509_vm9, %v3510_v48, %v9826_v54 }
 0x3fd   :  { %v3627_v0 = vsel %vm3626_vm10, 1, %v12903_v18  ;;  %v3649_v6 = vsel %vm3648_vm15, 1, %v12903_v18  ;;  %v2985_v17 = vadd.f32 %v2984_v36, %v9810_v37  ;;  %v9849_v26 = vmul.f32 %v3216_v46, %v3214_v15 }
 0x3fe   :  { %v4036_v52 = vadd.s32 1, %v6533_v40  ;;  %vm6520_vm0 = vcmp.lt.s32.totalorder %v6519_v30, 0  ;;  %v3512_v55 = vclz %v3511_v12  ;;  %v3629_v57 = vadd.s32 %v3627_v0, %v3625_v44 }
 0x3ff   :  { %v3651_v21 = vadd.s32 %v3649_v6, %v3647_v41  ;;  %v3014_v10 = vadd.f32 %v3013_v11, %v9810_v37  ;;  %v9852_v33 = vmul.f32 30.0, %v2985_v17  ;;  %v3619_v48 = vshrl.u32 %v9808_v60, 16 }
 0x400   :  { %vm4037_vm1 = vcmp.gt.s32.totalorder %v4036_v52, 0  ;;  %v3641_v35 = vshrl.u32 %v9812_v63, 16  ;;  %v9856_v1 = vsel %vm6520_vm0, 0, %v6519_v30  ;;  %v3072_v27 = vadd.f32 %v3071_v49, %v9810_v37 }
 0x401   :  { %v4038_v42 = vsel %vm4037_vm1, %v4036_v52, 0  ;;  %v3218_v36 = vxor.u32 2147483648, %v9849_v26  ;;  %v6522_v31 = vadd.s32 4294967294, %v3512_v55  ;;  %v3630_v15 = vadd.s32 %v3629_v57, %v3619_v48 }
 0x402   :  { %v4040_v51 = vand.u32 31, %v4038_v42  ;;  %v3652_v46 = vadd.s32 %v3651_v21, %v3641_v35  ;;  %v3577_v44 = vshrl.u32 %v12908_v5, %v9720_v29  ;;  %v3598_v41 = vsel %vm3596_vm14, %v9768_v62, 2102212464 }
 0x403   :  { %v9865_v60 = vmul.f32 30.0, %v3014_v10  ;;  %v3719_v63 = vand.u32 2139095040, %v9852_v33  ;;  %v3365_v30 = vsub.s32 4294967266, %v9856_v1  ;;  %v3621_v37 = vshrl.u32 %v9828_v7, 16 }
 0x404   :  { %v3643_v40 = vshrl.u32 %v9830_v43, 16  ;;  %v9871_v12 = vsub.s32 32, %v4040_v51  ;;  %v3345_v0 = vadd.s32 %v9709_v50, %v9697_v13  ;;  %v9877_v29 = vadd.s32 %v9751_v59, %v9738_v24 }
 0x405   :  { %12967 = vst [vmem:[#allocation9_spill] sm:$0xff] %v9865_v60  ;;  %v3597_v62 = vsel %vm3593_vm2, %v3577_v44, %v9770_v20  ;;  %v9882_v6 = vmul.f32 30.0, %v3072_v27  ;;  %vm6523_vm13 = vcmp.lt.s32.totalorder %v6522_v31, 0  ;;  %v3599_v7 = vsel %vm3595_vm3, %v9766_v34, %v3598_v41 }
 0x406   :  { %v9887_v43 = vadd.s32 %v3630_v15, %v3621_v37  ;;  %v3653_v17 = vadd.s32 %v3652_v46, %v3643_v40  ;;  %v3361_v13 = vsub.s32 32, %v9856_v1  ;;  %v3362_v50 = vshll.u32 %v9803_v56, %v9856_v1 }
 0x407   :  { %12968 = vst [vmem:[#allocation10_spill] sm:$0xff] %v9882_v6  ;;  %v3720_v24 = vshrl.u32 %v3719_v63, 23  ;;  %v3874_v59 = vand.u32 2139095040, %v9865_v60  ;;  %v3366_v11 = vadd.s32 127, %v3365_v30  ;;  %v9894_v20 = vadd.s32 %v9833_v39, %v3642_v32 }
 0x408   :  { %v4053_v52 = vshrl.u32 %v12899_v9, %v9871_v12  ;;  %v4056_v34 = vshrl.u32 %v12900_v38, %v9871_v12  ;;  %v9900_v55 = vsel %vm6523_vm13, 0, %v6522_v31  ;;  %v3600_v57 = vsel %vm3594_vm5, %v3597_v62, %v3599_v7 }
 0x409   :  { %v12761_v56 = vand.u32 2147483647, %v9823_v53  ;;  %v4184_v21 = vand.u32 2139095040, %v9882_v6  ;;  %vm3656_vm11 = vc.u32 %v9887_v43, %v9894_v20  ;;  %v3657_v39 = vadd.s32 1, %v3653_v17 }
 0x40a   :  { %v4052_v32 = vshll.u32 %v12898_v4, %v4040_v51  ;;  %v4055_v49 = vshll.u32 %v12899_v9, %v4040_v51  ;;  %vm3098_vm12 = vcmp.lt.s32.totalorder %v9415_v61, 0  ;;  %v9911_v10 = vshrl.u32 %v4038_v42, 5 }
 0x40b   :  { %v4044_v22 = vshrl.u32 %v12907_v25, %v9871_v12  ;;  %v4047_v48 = vshrl.u32 %v12897_v28, %v9871_v12  ;;  %v4050_v35 = vshrl.u32 %v12898_v4, %v9871_v12  ;;  %v3367_v1 = vshll.u32 %v3366_v11, 23 }
 0x40c   :  { %v3520_v27 = vsub.s32 4294967266, %v9900_v55  ;;  %v4054_v31 = vor.u32 %v4053_v52, %v4052_v32  ;;  %v4057_v15 = vor.u32 %v4056_v34, %v4055_v49  ;;  %v4043_v46 = vshll.u32 %v12908_v5, %v4040_v51 }
 0x40d   :  { %v4046_v44 = vshll.u32 %v12907_v25, %v4040_v51  ;;  %v4049_v42 = vshll.u32 %v12897_v28, %v4040_v51  ;;  %v4185_v41 = vshrl.u32 %v4184_v21, 23  ;;  %v3654_v63 = vmul.u32 %v9801_v8, %v3600_v57 }
 0x40e   :  { %v3658_v30 = vsel %vm3656_vm11, %v3657_v39, %v3653_v17  ;;  %v3875_v37 = vshrl.u32 %v3874_v59, 23  ;;  %v4033_v40 = vand.u32 8388607, %v12761_v56  ;;  %v9929_v62 = vor.u32 %v4044_v22, %v4043_v46 }
 0x40f   :  { %v9931_v7 = vor.u32 %v4047_v48, %v4046_v44  ;;  %v9933_v11 = vor.u32 %v4050_v35, %v4049_v42  ;;  %vm4061_vm14 = vcmp.lt.s32.totalorder %v9911_v10, 4  ;;  %v3521_v51 = vadd.s32 127, %v3520_v27 }
 0x410   :  { %v6527_v52 = vadd.s32 4294967169, %v3720_v24  ;;  %v4067_v8 = vsel %vm4061_vm14, %v4054_v31, 920167782  ;;  %v4071_v17 = vsel %vm4061_vm14, %v4057_v15, 1326507024  ;;  %v3363_v59 = vshrl.u32 %v3345_v0, %v3361_v13 }
 0x411   :  { %v3368_v34 = vor.u32 4788187, %v3367_v1  ;;  %v3516_v57 = vsub.s32 32, %v9900_v55  ;;  %v6536_v21 = vadd.s32 4294967169, %v4185_v41  ;;  %v9941_v39 = vadd.s32 %v3658_v30, %v3654_v63 }
 0x412   :  { %v4034_v32 = vor.u32 8388608, %v4033_v40  ;;  %vm4058_vm2 = vcmp.lt.s32.totalorder %v9911_v10, 1  ;;  %vm4060_vm3 = vcmp.lt.s32.totalorder %v9911_v10, 3  ;;  %vm9960_vm4 = vcmp.le.f32.partialorder %v3096_v47, 0.7853982 }
 0x413   :  { %v4066_v24 = vsel %vm4058_vm2, %v9929_v62, %v9931_v7  ;;  %v4068_v0 = vsel %vm4060_vm3, %v9933_v11, %v4067_v8  ;;  %v4070_v13 = vsel %vm4058_vm2, %v9931_v7, %v9933_v11  ;;  %v4072_v49 = vsel %vm4060_vm3, %v4054_v31, %v4071_v17 }
 0x414   :  { %v12969_v22 = vmov 0  ;;  %v3219_v48 = vsel %vm3098_vm12, %v3218_v36, %v9849_v26  ;;  %v3522_v35 = vshll.u32 %v3521_v51, 23  ;;  %v3726_v1 = vadd.s32 1, %v6527_v52 }
 0x415   :  { %v12970_v22 = vsel %vm9960_vm4, 4294967295, %v12969_v22  ;;  %v3364_v27 = vor.u32 %v3363_v59, %v3362_v50  ;;  %v3518_v15 = vshrl.u32 %v9877_v29, %v3516_v57  ;;  %vm4059_vm5 = vcmp.lt.s32.totalorder %v9911_v10, 2 }
 0x416   :  { %12971 = vst [vmem:[#allocation11_spill] sm:$0xff] %v12970_v22  ;;  %v4191_v31 = vadd.s32 1, %v6536_v21  ;;  %v3660_v46 = vadd.s32 536870912, %v9941_v39  ;;  %v6530_v47 = vadd.s32 4294967169, %v3875_v37  ;;  %v9974_v44 = vsel %vm4059_vm5, %v4066_v24, %v4068_v0  ;;  %v10006_v24 = vpop.permute.xlu2 %2943  ;;  %v2987_v0 = vpop.f32.mrf.mxu0 }
 0x417   :  { %v9978_v42 = vsel %vm4059_vm5, %v4070_v13, %v4072_v49  ;;  %v3220_v26 = vsub.s32 4, %v9657_v14  ;;  %v3369_v36 = vand.u32 2147483647, %v3368_v34  ;;  %v9981_v50 = vshll.u32 %v4034_v32, 8  ;;  %12977 = vst [vmem:[#allocation17_spill] sm:$0xff] %v10006_v24 }
 0x418   :  { %vm4192_vm6 = vcmp.gt.s32.totalorder %v4191_v31, 0  ;;  %v3517_v29 = vshll.u32 %v9826_v54, %v9900_v55  ;;  %v3523_v41 = vor.u32 4788187, %v3522_v35  ;;  %vm3727_vm7 = vcmp.gt.s32.totalorder %v3726_v1, 0 }
 0x419   :  { %v4193_v63 = vsel %vm4192_vm6, %v4191_v31, 0  ;;  %v9988_v30 = vsel %vm9960_vm4, %v9415_v61, %v3219_v48  ;;  %v12765_v37 = vshrl.u32 %v9978_v42, 16  ;;  %v4100_v40 = vshrl.u32 %v9974_v44, 16 }
 0x41a   :  { %12972 = vst [vmem:[#allocation2_spill] sm:$0xff] %v9988_v30  ;;  %v3371_v51 = vcvt.s32.f32 %v3364_v27  ;;  %v3519_v52 = vor.u32 %v3518_v15, %v3517_v29  ;;  %v9992_v8 = vshrl.u32 %v3660_v46, 30  ;;  %v3881_v17 = vadd.s32 1, %v6530_v47 }
 0x41b   :  { %v3728_v59 = vsel %vm3727_vm7, %v3726_v1, 0  ;;  %v4075_v54 = vand.u32 65535, %v9981_v50  ;;  %v4195_v55 = vand.u32 31, %v4193_v63  ;;  %v9998_v34 = vsel %vm3098_vm12, %v3220_v26, %v9657_v14 }
 0x41c   :  { %12973 = vst [vmem:[#allocation8_spill] sm:$0xff] %v9992_v8  ;;  %v10002_v57 = vmul.f32 %v9988_v30, %v9988_v30  ;;  %v10004_v21 = vmul.f32 %v3371_v51, %v3369_v36  ;;  %v3524_v32 = vand.u32 2147483647, %v3523_v41  ;;  %v3526_v35 = vcvt.s32.f32 %v3519_v52 }
 0x41d   :  { %12974 = vst [vmem:[#allocation3_spill] sm:$0xff] %v9998_v34  ;;  %v10012_v48 = vmul.u32 %v12765_v37, %v4075_v54  ;;  %v10014_v14 = vmul.u32 %v4100_v40, %v4075_v54  ;;  %v3662_v1 = vshll.u32 %v9992_v8, 30  ;;  %v10017_v27 = vand.u32 31, %v3728_v59 }
 0x41e   :  { %12975 = vst [vmem:[#allocation4_spill] sm:$0xff] %v10002_v57  ;;  %vm3882_vm8 = vcmp.gt.s32.totalorder %v3881_v17, 0  ;;  %v4077_v15 = vand.u32 65535, %v9978_v42  ;;  %v4099_v31 = vand.u32 65535, %v9974_v44  ;;  %v10021_v46 = vsub.s32 32, %v4195_v55 }
 0x41f   :  { %12976 = vst [vmem:[#allocation5_spill] sm:$0xff] %v10004_v21  ;;  %v2988_v47 = vadd.f32 %v2987_v0, %v10006_v24  ;;  %v10025_v36 = vmul.f32 %v3526_v35, %v3524_v32  ;;  %v10027_v29 = vshrl.u32 %v3728_v59, 5  ;;  %v12764_v41 = vand.u32 2147483647, %v9882_v6 }
 0x420   :  { %v10032_v51 = vadd.s32 %v9894_v20, %v9887_v43  ;;  %v3883_v52 = vsel %vm3882_vm8, %v3881_v17, 0  ;;  %v4083_v56 = vshll.u32 %v10012_v48, 16  ;;  %v4105_v44 = vshll.u32 %v10014_v14, 16 }
 0x421   :  { %12978 = vst [vmem:[#allocation18_spill] sm:$0xff] %v10025_v36  ;;  %v10037_v45 = vsub.s32 %v9941_v39, %v3662_v1  ;;  %v10040_v0 = vsub.s32 32, %v10017_v27  ;;  %v10042_v32 = vshrl.u32 %v3883_v52, 5  ;;  %v4076_v59 = vshrl.u32 %v9981_v50, 16 }
 0x422   :  { %12979 = vst [vmem:[#allocation19_spill] sm:$0xff] %v10032_v51  ;;  %v4079_v35 = vmul.u32 %v4077_v15, %v4075_v54  ;;  %v4101_v58 = vmul.u32 %v4099_v31, %v4075_v54  ;;  %v4208_v43 = vshrl.u32 %v12899_v9, %v10021_v46  ;;  %v10047_v20 = vmul.f32 30.0, %v2988_v47 }
 0x423   :  { %12980 = vst [vmem:[#allocation20_spill] sm:$0xff] %v10037_v45  ;;  %v10049_v17 = vmul.u32 %v4077_v15, %v4076_v59  ;;  %v10051_v26 = vmul.u32 %v4099_v31, %v4076_v59  ;;  %v4188_v39 = vand.u32 8388607, %v12764_v41  ;;  %v4211_v1 = vshrl.u32 %v12900_v38, %v10021_v46 }
 0x424   :  { %12981 = vst [vmem:[#allocation21_spill] sm:$0xff] %v10040_v0  ;;  %vm10057_vm9 = vc.u32 %v4079_v35, %v4083_v56  ;;  %vm10061_vm10 = vc.u32 %v4101_v58, %v4105_v44  ;;  %v10065_v47 = vshrl.u32 %v4193_v63, 5  ;;  %v4207_v15 = vshll.u32 %v12898_v4, %v4195_v55 }
 0x425   :  { %12982 = vst [vmem:[#allocation22_spill] sm:$0xff] %v10047_v20  ;;  %vm3664_vm15 = vcmp.lt.s32.totalorder %v10037_v45, 0  ;;  %v4199_v31 = vshrl.u32 %v12907_v25, %v10021_v46  ;;  %v4202_v41 = vshrl.u32 %v12897_v28, %v10021_v46  ;;  %v4205_v13 = vshrl.u32 %v12898_v4, %v10021_v46 }
 0x426   :  { %v4210_v37 = vshll.u32 %v12899_v9, %v4195_v55  ;;  %v4089_v61 = vadd.s32 %v4083_v56, %v4079_v35  ;;  %v4104_v30 = vmul.u32 %v4100_v40, %v4076_v59  ;;  %v10076_v22 = vadd.s32 %v4105_v44, %v4101_v58 }
 0x427   :  { %v4209_v63 = vor.u32 %v4208_v43, %v4207_v15  ;;  %v4198_v34 = vshll.u32 %v12908_v5, %v4195_v55  ;;  %v4201_v57 = vshll.u32 %v12907_v25, %v4195_v55  ;;  %v4204_v6 = vshll.u32 %v12897_v28, %v4195_v55 }
 0x428   :  { %v4212_v53 = vor.u32 %v4211_v1, %v4210_v37  ;;  %v4085_v8 = vshll.u32 %v10049_v17, 16  ;;  %v4088_v3 = vsel %vm10057_vm9, 1, %v12903_v18  ;;  %v4107_v36 = vshll.u32 %v10051_v26, 16 }
 0x429   :  { %v4110_v58 = vsel %vm10061_vm10, 1, %v12903_v18  ;;  %v10089_v56 = vor.u32 %v4199_v31, %v4198_v34  ;;  %v10091_v40 = vor.u32 %v4202_v41, %v4201_v57  ;;  %v10093_v44 = vor.u32 %v4205_v13, %v4204_v6 }
 0x42a   :  { %vm4216_vm0 = vcmp.lt.s32.totalorder %v10065_v47, 4  ;;  %v12987_v37 = vshrl.u32 %v9978_v42, 16  ;;  %vm4091_vm1 = vc.u32 %v4089_v61, %v4085_v8  ;;  %vm4113_vm13 = vc.u32 %v10076_v22, %v4107_v36 }
 0x42b   :  { %v4222_v49 = vsel %vm4216_vm0, %v4209_v63, 920167782  ;;  %v3665_v35 = vsub.s32 0, %v10037_v45  ;;  %v4189_v43 = vor.u32 8388608, %v4188_v39  ;;  %v4226_v34 = vsel %vm4216_vm0, %v4212_v53, 1326507024 }
 0x42c   :  { %v4082_v55 = vmul.u32 %v12987_v37, %v4076_v59  ;;  %v4339_v6 = vand.u32 2139095040, %v10047_v20  ;;  %v4112_v13 = vadd.s32 %v4110_v58, %v4104_v30  ;;  %vm4213_vm11 = vcmp.lt.s32.totalorder %v10065_v47, 1 }
 0x42d   :  { %vm4215_vm12 = vcmp.lt.s32.totalorder %v10065_v47, 3  ;;  %v4092_v61 = vsel %vm4091_vm1, 1, %v12903_v18  ;;  %v4114_v42 = vsel %vm4113_vm13, 1, %v12903_v18  ;;  %v4221_v8 = vsel %vm4213_vm11, %v10089_v56, %v10091_v40 }
 0x42e   :  { %v4090_v57 = vadd.s32 %v4088_v3, %v4082_v55  ;;  %v4223_v53 = vsel %vm4215_vm12, %v10093_v44, %v4222_v49  ;;  %v10118_v3 = vshll.u32 %v12898_v4, %v10017_v27  ;;  %v10122_v30 = vshll.u32 %v12899_v9, %v10017_v27 }
 0x42f   :  { %v4225_v41 = vsel %vm4213_vm11, %v10091_v40, %v10093_v44  ;;  %v4227_v59 = vsel %vm4215_vm12, %v4209_v63, %v4226_v34  ;;  %v10132_v39 = vshrl.u32 %v12899_v9, %v10040_v0  ;;  %v10134_v1 = vand.u32 31, %v3883_v52 }
 0x430   :  { %vm4214_vm6 = vcmp.lt.s32.totalorder %v10065_v47, 2  ;;  %v4340_v54 = vshrl.u32 %v4339_v6, 23  ;;  %v10140_v15 = vsel %vm3664_vm15, %v3665_v35, %v10037_v45  ;;  %v4094_v31 = vadd.s32 %v4092_v61, %v4090_v57 }
 0x431   :  { %v4116_v58 = vadd.s32 %v4114_v42, %v4112_v13  ;;  %v10144_v37 = vsel %vm4214_vm6, %v4221_v8, %v4223_v53  ;;  %v10148_v63 = vshrl.u32 %v12900_v38, %v10040_v0  ;;  %v10152_v52 = vsel %vm4214_vm6, %v4225_v41, %v4227_v59 }
 0x432   :  { %v10154_v55 = vshll.u32 %v4189_v43, 8  ;;  %v6539_v49 = vadd.s32 4294967169, %v4340_v54  ;;  %v4042_v35 = vshrl.u32 %v12908_v5, %v9871_v12  ;;  %v4063_v34 = vsel %vm4061_vm14, %v9933_v11, 2102212464 }
 0x433   :  { %v4084_v6 = vshrl.u32 %v10012_v48, 16  ;;  %v4106_v57 = vshrl.u32 %v10014_v14, 16  ;;  %v10165_v61 = vsub.s32 32, %v10134_v1  ;;  %v12780_v43 = vshrl.u32 %v10144_v37, 16 }
 0x434   :  { %v4346_v42 = vadd.s32 1, %v6539_v49  ;;  %v10171_v12 = vsel %vm4058_vm2, %v4042_v35, %v9929_v62  ;;  %v12781_v11 = vshrl.u32 %v10152_v52, 16  ;;  %v10177_v48 = vsel %vm4060_vm3, %v9931_v7, %v4063_v34 }
 0x435   :  { %v4095_v8 = vadd.s32 %v4094_v31, %v4084_v6  ;;  %v4117_v53 = vadd.s32 %v4116_v58, %v4106_v57  ;;  %v4230_v14 = vand.u32 65535, %v10154_v55  ;;  %v4232_v41 = vand.u32 65535, %v10152_v52 }
 0x436   :  { %vm4347_vm14 = vcmp.gt.s32.totalorder %v4346_v42, 0  ;;  %v4086_v59 = vshrl.u32 %v10049_v17, 16  ;;  %v4108_v54 = vshrl.u32 %v10051_v26, 16  ;;  %v4254_v62 = vand.u32 65535, %v10144_v37 }
 0x437   :  { %v4348_v31 = vsel %vm4347_vm14, %v4346_v42, 0  ;;  %v10185_v58 = vadd.s32 %v10076_v22, %v4107_v36  ;;  %v10189_v49 = vmul.u32 %v12780_v43, %v4230_v14  ;;  %v12791_v7 = vand.u32 2147483647, %v10047_v20 }
 0x438   :  { %v4350_v35 = vand.u32 31, %v4348_v31  ;;  %v10192_v34 = vadd.s32 %v4095_v8, %v4086_v59  ;;  %v10194_v6 = vadd.s32 %v4117_v53, %v4108_v54  ;;  %v4231_v17 = vshrl.u32 %v10154_v55, 16 }
 0x439   :  { %v10199_v26 = vmul.u32 %v12781_v11, %v4230_v14  ;;  %v4234_v57 = vmul.u32 %v4232_v41, %v4230_v14  ;;  %v4256_v13 = vmul.u32 %v4254_v62, %v4230_v14  ;;  %v10205_v43 = vshrl.u32 %v4348_v31, 5 }
 0x43a   :  { %v10201_v22 = vsub.s32 32, %v4350_v35  ;;  %v4353_v36 = vshll.u32 %v12908_v5, %v4350_v35  ;;  %v4356_v42 = vshll.u32 %v12907_v25, %v4350_v35  ;;  %v4359_v8 = vshll.u32 %v12897_v28, %v4350_v35 }
 0x43b   :  { %v4362_v53 = vshll.u32 %v12898_v4, %v4350_v35  ;;  %v4260_v59 = vshll.u32 %v10189_v49, 16  ;;  %v4343_v54 = vand.u32 8388607, %v12791_v7  ;;  %v4238_v2 = vshll.u32 %v10199_v26, 16 }
 0x43c   :  { %v4354_v11 = vshrl.u32 %v12907_v25, %v10201_v22  ;;  %v4357_v21 = vshrl.u32 %v12897_v28, %v10201_v22  ;;  %v4360_v14 = vshrl.u32 %v12898_v4, %v10201_v22  ;;  %v4363_v31 = vshrl.u32 %v12899_v9, %v10201_v22 }
 0x43d   :  { %v4365_v23 = vshll.u32 %v12899_v9, %v4350_v35  ;;  %v10222_v45 = vmul.u32 %v4254_v62, %v4231_v17  ;;  %v4366_v51 = vshrl.u32 %v12900_v38, %v10201_v22  ;;  %v10230_v19 = vmul.u32 %v4232_v41, %v4231_v17 }
 0x43e   :  { %v10224_v20 = vor.u32 %v4354_v11, %v4353_v36  ;;  %v10226_v7 = vor.u32 %v4357_v21, %v4356_v42  ;;  %v10232_v16 = vor.u32 %v4360_v14, %v4359_v8  ;;  %v4364_v60 = vor.u32 %v4363_v31, %v4362_v53 }
 0x43f   :  { %vm4368_vm2 = vcmp.lt.s32.totalorder %v10205_v43, 1  ;;  %vm4264_vm3 = vc.u32 %v4256_v13, %v4260_v59  ;;  %v10235_v0 = vadd.s32 %v4260_v59, %v4256_v13  ;;  %v4344_v35 = vor.u32 8388608, %v4343_v54 }
 0x440   :  { %vm4370_vm7 = vcmp.lt.s32.totalorder %v10205_v43, 3  ;;  %vm10238_vm8 = vc.u32 %v4234_v57, %v4238_v2  ;;  %v4244_v21 = vadd.s32 %v4238_v2, %v4234_v57  ;;  %v4367_v62 = vor.u32 %v4366_v51, %v4365_v23 }
 0x441   :  { %vm4371_vm9 = vcmp.lt.s32.totalorder %v10205_v43, 4  ;;  %vm3751_vm10 = vcmp.lt.s32.totalorder %v10027_v29, 4  ;;  %v12800_v41 = vshll.u32 %v10222_v45, 16  ;;  %vm4369_vm15 = vcmp.lt.s32.totalorder %v10205_v43, 2 }
 0x442   :  { %v4376_v13 = vsel %vm4368_vm2, %v10224_v20, %v10226_v7  ;;  %v4377_v36 = vsel %vm4371_vm9, %v4364_v60, 920167782  ;;  %vm4121_vm1 = vc.u32 %v10192_v34, %v10185_v58  ;;  %v4240_v23 = vshll.u32 %v10230_v19, 16 }
 0x443   :  { %v4265_v2 = vsel %vm4264_vm3, 1, %v12903_v18  ;;  %v4378_v51 = vsel %vm4370_vm7, %v10232_v16, %v4377_v36  ;;  %v12990_v57 = vshrl.u32 %v10144_v37, 16  ;;  %vm4268_vm13 = vc.u32 %v10235_v0, %v12800_v41 }
 0x444   :  { %v4380_v8 = vsel %vm4368_vm2, %v10226_v7, %v10232_v16  ;;  %v10268_v53 = vshll.u32 %v4344_v35, 8  ;;  %v4122_v59 = vadd.s32 1, %v10194_v6  ;;  %v4243_v54 = vsel %vm10238_vm8, 1, %v12903_v18 }
 0x445   :  { %v4259_v42 = vmul.u32 %v12990_v57, %v4231_v17  ;;  %v10276_v37 = vsel %vm4369_vm15, %v4376_v13, %v4378_v51  ;;  %v4381_v14 = vsel %vm4371_vm9, %v4367_v62, 1326507024  ;;  %v12991_v31 = vshrl.u32 %v10152_v52, 16 }
 0x446   :  { %vm4246_vm14 = vc.u32 %v4244_v21, %v4240_v23  ;;  %v4382_v35 = vsel %vm4370_vm7, %v4364_v60, %v4381_v14  ;;  %v4065_v11 = vsel %vm4059_vm5, %v10171_v12, %v10177_v48  ;;  %v4269_v41 = vsel %vm4268_vm13, 1, %v12903_v18  ;;  %v3016_v23 = vpop.f32.mrf.mxu1 }
 0x447   :  { %v4237_v36 = vmul.u32 %v12991_v31, %v4231_v17  ;;  %v4267_v57 = vadd.s32 %v4265_v2, %v4259_v42  ;;  %v10291_v13 = vsel %vm4369_vm15, %v4380_v8, %v4382_v35  ;;  %v4410_v62 = vshrl.u32 %v10276_v37, 16 }
 0x448   :  { %v10296_v52 = vor.u32 %v10132_v39, %v10118_v3  ;;  %v4385_v60 = vand.u32 65535, %v10268_v53  ;;  %v4388_v21 = vshrl.u32 %v10291_v13, 16  ;;  %v3747_v10 = vor.u32 %v10148_v63, %v10122_v30 }
 0x449   :  { %v4245_v17 = vadd.s32 %v4243_v54, %v4237_v36  ;;  %v10304_v12 = vshll.u32 %v12899_v9, %v10134_v1  ;;  %v4123_v48 = vsel %vm4121_vm1, %v4122_v59, %v10194_v6  ;;  %v4247_v3 = vsel %vm4246_vm14, 1, %v12903_v18 }
 0x44a   :  { %v10313_v39 = vshrl.u32 %v12900_v38, %v10165_v61  ;;  %v4119_v2 = vmul.u32 %v9981_v50, %v4065_v11  ;;  %v4271_v51 = vadd.s32 %v4269_v41, %v4267_v57  ;;  %v10316_v42 = vmul.u32 %v4410_v62, %v4385_v60 }
 0x44b   :  { %v12992_v30 = vclz %v10140_v15  ;;  %v3897_v8 = vshll.u32 %v12898_v4, %v10134_v1  ;;  %v10322_v54 = vmul.u32 %v4388_v21, %v4385_v60  ;;  %v3017_v6 = vadd.f32 %v3016_v23, %v10006_v24 }
 0x44c   :  { %v10325_v59 = vadd.s32 %v4123_v48, %v4119_v2  ;;  %v4249_v14 = vadd.s32 %v4247_v3, %v4245_v17  ;;  %v4261_v31 = vshrl.u32 %v10189_v49, 16  ;;  %v4409_v50 = vand.u32 65535, %v10276_v37 }
 0x44d   :  { %v6525_v63 = vadd.s32 4294967294, %v12992_v30  ;;  %v10332_v41 = vsel %vm3751_vm10, %v10296_v52, 920167782  ;;  %v10336_v15 = vsel %vm3751_vm10, %v3747_v10, 1326507024  ;;  %v3898_v36 = vshrl.u32 %v12899_v9, %v10165_v61 }
 0x44e   :  { %v4387_v57 = vand.u32 65535, %v10291_v13  ;;  %v3902_v35 = vor.u32 %v10313_v39, %v10304_v12  ;;  %v4239_v49 = vshrl.u32 %v10199_v26, 16  ;;  %v4272_v37 = vadd.s32 %v4271_v51, %v4261_v31 }
 0x44f   :  { %v4415_v11 = vshll.u32 %v10316_v42, 16  ;;  %vm6526_vm5 = vcmp.lt.s32.totalorder %v6525_v63, 0  ;;  %v4386_v17 = vshrl.u32 %v10268_v53, 16  ;;  %v4393_v23 = vshll.u32 %v10322_v54, 16 }
 0x450   :  { %v10347_v10 = vmul.f32 30.0, %v3017_v6  ;;  %vm3906_vm3 = vcmp.lt.s32.totalorder %v10042_v32, 4  ;;  %v4125_v48 = vadd.s32 536870912, %v10325_v59  ;;  %v4250_v13 = vadd.s32 %v4249_v14, %v4239_v49 }
 0x451   :  { %v4263_v3 = vshrl.u32 %v10222_v45, 16  ;;  %v4411_v12 = vmul.u32 %v4409_v50, %v4385_v60  ;;  %v4218_v26 = vsel %vm4216_vm0, %v10093_v44, 2102212464  ;;  %v4389_v39 = vmul.u32 %v4387_v57, %v4385_v60 }
 0x452   :  { %12993 = vst [vmem:[#allocation23_spill] sm:$0xff] %v10347_v10  ;;  %v10355_v2 = vmul.u32 %v4387_v57, %v4386_v17  ;;  %v10357_v51 = vmul.u32 %v4409_v50, %v4386_v17  ;;  %v4197_v30 = vshrl.u32 %v12908_v5, %v10021_v46  ;;  %v4241_v6 = vshrl.u32 %v10230_v19, 16 }
 0x453   :  { %v4273_v31 = vadd.s32 %v4272_v37, %v4263_v3  ;;  %vm10362_vm8 = vc.u32 %v4411_v12, %v4415_v11  ;;  %vm4397_vm1 = vc.u32 %v4389_v39, %v4393_v23  ;;  %v4399_v49 = vadd.s32 %v4393_v23, %v4389_v39 }
 0x454   :  { %v10366_v24 = vadd.s32 %v4415_v11, %v4411_v12  ;;  %v4494_v44 = vand.u32 2139095040, %v10347_v10  ;;  %v10369_v60 = vshrl.u32 %v4125_v48, 30  ;;  %v4217_v50 = vsel %vm4213_vm11, %v4197_v30, %v10089_v56 }
 0x455   :  { %v4219_v19 = vsel %vm4215_vm12, %v10091_v40, %v4218_v26  ;;  %v10377_v46 = vadd.s32 %v4250_v13, %v4241_v6  ;;  %v12997_v57 = vshll.u32 %v10222_v45, 16  ;;  %v4395_v11 = vshll.u32 %v10355_v2, 16 }
 0x456   :  { %12996 = vst [vmem:[#allocation24_spill] sm:$0xff] %v10369_v60  ;;  %v4417_v23 = vshll.u32 %v10357_v51, 16  ;;  %v4495_v48 = vshrl.u32 %v4494_v44, 23  ;;  %v4277_v3 = vadd.s32 1, %v4273_v31  ;;  %v4398_v12 = vsel %vm4397_vm1, 1, %v12903_v18 }
 0x457   :  { %v10382_v37 = vadd.s32 %v10235_v0, %v12997_v57  ;;  %v4414_v56 = vmul.u32 %v4410_v62, %v4386_v17  ;;  %v4420_v40 = vsel %vm10362_vm8, 1, %v12903_v18  ;;  %v4392_v13 = vmul.u32 %v4388_v21, %v4386_v17 }
 0x458   :  { %vm4401_vm0 = vc.u32 %v4399_v49, %v4395_v11  ;;  %vm4423_vm11 = vc.u32 %v10366_v24, %v4417_v23  ;;  %v6542_v45 = vadd.s32 4294967169, %v4495_v48  ;;  %v10394_v0 = vsel %vm6526_vm5, 0, %v6525_v63 }
 0x459   :  { %v4127_v26 = vshll.u32 %v10369_v60, 30  ;;  %v4220_v39 = vsel %vm4214_vm6, %v4217_v50, %v4219_v19  ;;  %vm4276_vm12 = vc.u32 %v10377_v46, %v10382_v37  ;;  %v4400_v62 = vadd.s32 %v4398_v12, %v4392_v13 }
 0x45a   :  { %v4422_v30 = vadd.s32 %v4420_v40, %v4414_v56  ;;  %v12803_v21 = vand.u32 2147483647, %v10347_v10  ;;  %v4501_v17 = vadd.s32 1, %v6542_v45  ;;  %v10402_v6 = vor.u32 %v3898_v36, %v3897_v8 }
 0x45b   :  { %v4352_v14 = vshrl.u32 %v12908_v5, %v10201_v22  ;;  %v4402_v63 = vsel %vm4401_vm0, 1, %v12903_v18  ;;  %v4424_v49 = vsel %vm4423_vm11, 1, %v12903_v18  ;;  %v10411_v44 = vsel %vm3906_vm3, %v3902_v35, 1326507024 }
 0x45c   :  { %v4278_v50 = vsel %vm4276_vm12, %v4277_v3, %v4273_v31  ;;  %vm4502_vm6 = vcmp.gt.s32.totalorder %v4501_v17, 0  ;;  %v3675_v19 = vsub.s32 4294967266, %v10394_v0  ;;  %v10415_v8 = vsub.s32 %v10325_v59, %v4127_v26 }
 0x45d   :  { %v4274_v36 = vmul.u32 %v10154_v55, %v4220_v39  ;;  %v4503_v22 = vsel %vm4502_vm6, %v4501_v17, 0  ;;  %v4404_v57 = vadd.s32 %v4402_v63, %v4400_v62  ;;  %v4426_v11 = vadd.s32 %v4424_v49, %v4422_v30 }
 0x45e   :  { %v4498_v48 = vand.u32 8388607, %v12803_v21  ;;  %v4505_v12 = vand.u32 31, %v4503_v22  ;;  %v4372_v35 = vsel %vm4368_vm2, %v4352_v14, %v10224_v20  ;;  %v4373_v59 = vsel %vm4371_vm9, %v10232_v16, 2102212464 }
 0x45f   :  { %v10420_v56 = vadd.s32 %v4278_v50, %v4274_v36  ;;  %v4416_v31 = vshrl.u32 %v10316_v42, 16  ;;  %v4394_v55 = vshrl.u32 %v10322_v54, 16  ;;  %v10430_v3 = vshrl.u32 %v4503_v22, 5 }
 0x460   :  { %v10432_v40 = vsub.s32 32, %v4505_v12  ;;  %v4508_v13 = vshll.u32 %v12908_v5, %v4505_v12  ;;  %v4511_v45 = vshll.u32 %v12907_v25, %v4505_v12  ;;  %v4514_v26 = vshll.u32 %v12897_v28, %v4505_v12 }
 0x461   :  { %v4517_v20 = vshll.u32 %v12898_v4, %v4505_v12  ;;  %v4520_v39 = vshll.u32 %v12899_v9, %v4505_v12  ;;  %v4405_v62 = vadd.s32 %v4404_v57, %v4394_v55  ;;  %v4427_v16 = vadd.s32 %v4426_v11, %v4416_v31 }
 0x462   :  { %v4499_v30 = vor.u32 8388608, %v4498_v48  ;;  %v4509_v42 = vshrl.u32 %v12907_v25, %v10432_v40  ;;  %v4512_v54 = vshrl.u32 %v12897_v28, %v10432_v40  ;;  %v4515_v17 = vshrl.u32 %v12898_v4, %v10432_v40 }
 0x463   :  { %v4518_v14 = vshrl.u32 %v12899_v9, %v10432_v40  ;;  %v4521_v63 = vshrl.u32 %v12900_v38, %v10432_v40  ;;  %v4396_v49 = vshrl.u32 %v10355_v2, 16  ;;  %v4418_v50 = vshrl.u32 %v10357_v51, 16 }
 0x464   :  { %v10451_v36 = vor.u32 %v4509_v42, %v4508_v13  ;;  %vm4523_vm2 = vcmp.lt.s32.totalorder %v10430_v3, 1  ;;  %v10454_v22 = vor.u32 %v4512_v54, %v4511_v45  ;;  %v10456_v57 = vor.u32 %v4515_v17, %v4514_v26 }
 0x465   :  { %v4519_v11 = vor.u32 %v4518_v14, %v4517_v20  ;;  %v4522_v48 = vor.u32 %v4521_v63, %v4520_v39  ;;  %v4374_v12 = vsel %vm4370_vm7, %v10226_v7, %v4373_v59  ;;  %v10461_v31 = vadd.s32 %v4405_v62, %v4396_v49  ;;  %v12999_v63 = vld [vmem:[#allocation21_spill] sm:$0xff] }
 0x466   :  { %v4428_v55 = vadd.s32 %v4427_v16, %v4418_v50  ;;  %vm4525_vm9 = vcmp.lt.s32.totalorder %v10430_v3, 3  ;;  %vm4526_vm13 = vcmp.lt.s32.totalorder %v10430_v3, 4  ;;  %v4531_v2 = vsel %vm4523_vm2, %v10451_v36, %v10454_v22 }
 0x467   :  { %v4535_v13 = vsel %vm4523_vm2, %v10454_v22, %v10456_v57  ;;  %v10473_v45 = vshll.u32 %v4499_v30, 8  ;;  %v4280_v7 = vadd.s32 536870912, %v10420_v56  ;;  %v10479_v59 = vadd.s32 %v10366_v24, %v4417_v23 }
 0x468   :  { %v4532_v26 = vsel %vm4526_vm13, %v4519_v11, 920167782  ;;  %v4536_v20 = vsel %vm4526_vm13, %v4522_v48, 1326507024  ;;  %v4375_v39 = vsel %vm4369_vm15, %v4372_v35, %v4374_v12  ;;  %vm4524_vm7 = vcmp.lt.s32.totalorder %v10430_v3, 2 }
 0x469   :  { %12998 = vst [vmem:[#allocation25_spill] sm:$0xff] %v10479_v59  ;;  %v4533_v62 = vsel %vm4525_vm9, %v10456_v57, %v4532_v26  ;;  %v4537_v51 = vsel %vm4525_vm9, %v4519_v11, %v4536_v20  ;;  %vm4431_vm14 = vc.u32 %v10461_v31, %v10479_v59  ;;  %v12812_v43 = vand.u32 2147483647, %v9852_v33 }
 0x46a   :  { %v4534_v24 = vsel %vm4524_vm7, %v4531_v2, %v4533_v62  ;;  %v4538_v23 = vsel %vm4524_vm7, %v4535_v13, %v4537_v51  ;;  %v4432_v35 = vadd.s32 1, %v4428_v55  ;;  %v4540_v16 = vand.u32 65535, %v10473_v45 }
 0x46b   :  { %v4542_v30 = vand.u32 65535, %v4538_v23  ;;  %v4543_v42 = vshrl.u32 %v4538_v23, 16  ;;  %v4541_v54 = vshrl.u32 %v10473_v45, 16  ;;  %v4565_v17 = vshrl.u32 %v4534_v24, 16 }
 0x46c   :  { %v3733_v14 = vshll.u32 %v12908_v5, %v10017_v27  ;;  %v3734_v49 = vshrl.u32 %v12907_v25, %v12999_v63  ;;  %v4564_v11 = vand.u32 65535, %v4534_v24  ;;  %v3736_v48 = vshll.u32 %v12907_v25, %v10017_v27 }
 0x46d   :  { %v10506_v50 = vmul.u32 %v4543_v42, %v4540_v16  ;;  %v3737_v12 = vshrl.u32 %v12897_v28, %v12999_v63  ;;  %v10514_v2 = vadd.s32 127, %v3675_v19  ;;  %v10516_v13 = vshrl.u32 %v4280_v7, 30 }
 0x46e   :  { %v10518_v26 = vmul.u32 %v4542_v30, %v4541_v54  ;;  %v4567_v20 = vmul.u32 %v4565_v17, %v4540_v16  ;;  %v4544_v62 = vmul.u32 %v4542_v30, %v4540_v16  ;;  %v3739_v24 = vshll.u32 %v12897_v28, %v10017_v27 }
 0x46f   :  { %v4548_v51 = vshll.u32 %v10506_v50, 16  ;;  %v3740_v23 = vshrl.u32 %v12898_v4, %v12999_v63  ;;  %vm4129_vm15 = vcmp.lt.s32.totalorder %v10415_v8, 0  ;;  %v4429_v21 = vmul.u32 %v10268_v53, %v4375_v39 }
 0x470   :  { %v4433_v19 = vsel %vm4431_vm14, %v4432_v35, %v4428_v55  ;;  %v3723_v7 = vand.u32 8388607, %v12812_v43  ;;  %v10532_v30 = vor.u32 %v3734_v49, %v3733_v14  ;;  %v4566_v38 = vmul.u32 %v4564_v11, %v4540_v16 }
 0x471   :  { %vm4552_vm5 = vc.u32 %v4544_v62, %v4548_v51  ;;  %v4554_v47 = vadd.s32 %v4548_v51, %v4544_v62  ;;  %v10534_v27 = vor.u32 %v3737_v12, %v3736_v48  ;;  %v4550_v9 = vshll.u32 %v10518_v26, 16 }
 0x472   :  { %v4553_v10 = vsel %vm4552_vm5, 1, %v12903_v18  ;;  %v4568_v60 = vmul.u32 %v4564_v11, %v4541_v54  ;;  %v4570_v53 = vshll.u32 %v4567_v20, 16  ;;  %v10538_v39 = vadd.s32 %v4433_v19, %v4429_v21 }
 0x473   :  { %v4547_v59 = vmul.u32 %v4543_v42, %v4541_v54  ;;  %v3741_v55 = vor.u32 %v3740_v23, %v3739_v24  ;;  %vm3748_vm8 = vcmp.lt.s32.totalorder %v10027_v29, 1  ;;  %vm4556_vm1 = vc.u32 %v4554_v47, %v4550_v9 }
 0x474   :  { %v4569_v35 = vmul.u32 %v4565_v17, %v4541_v54  ;;  %vm4574_vm0 = vc.u32 %v4566_v38, %v4570_v53  ;;  %vm3750_vm11 = vcmp.lt.s32.totalorder %v10027_v29, 3  ;;  %v3724_v49 = vor.u32 8388608, %v3723_v7 }
 0x475   :  { %v4555_v16 = vadd.s32 %v4553_v10, %v4547_v59  ;;  %v4575_v14 = vsel %vm4574_vm0, 1, %v12903_v18  ;;  %vm3749_vm12 = vcmp.lt.s32.totalorder %v10027_v29, 2  ;;  %v4572_v48 = vshll.u32 %v4568_v60, 16 }
 0x476   :  { %v4576_v11 = vadd.s32 %v4570_v53, %v4566_v38  ;;  %v4577_v12 = vadd.s32 %v4575_v14, %v4569_v35  ;;  %v3756_v21 = vsel %vm3748_vm8, %v10532_v30, %v10534_v27  ;;  %v4130_v9 = vsub.s32 0, %v10415_v8 }
 0x477   :  { %v4507_v47 = vshrl.u32 %v12908_v5, %v10432_v40  ;;  %v4557_v10 = vsel %vm4556_vm1, 1, %v12903_v18  ;;  %v3758_v59 = vsel %vm3750_vm11, %v3741_v55, %v10332_v41  ;;  %v4282_v42 = vshll.u32 %v10516_v13, 30 }
 0x478   :  { %v4435_v38 = vadd.s32 536870912, %v10538_v39  ;;  %v4528_v54 = vsel %vm4526_vm13, %v10456_v57, 2102212464  ;;  %vm4578_vm6 = vc.u32 %v4576_v11, %v4572_v48  ;;  %v4571_v17 = vshrl.u32 %v4567_v20, 16 }
 0x479   :  { %v4579_v62 = vsel %vm4578_vm6, 1, %v12903_v18  ;;  %v3759_v40 = vsel %vm3749_vm12, %v3756_v21, %v3758_v59  ;;  %v3760_v51 = vsel %vm3748_vm8, %v10534_v27, %v3741_v55  ;;  %v4559_v41 = vadd.s32 %v4557_v10, %v4555_v16 }
 0x47a   :  { %v4581_v24 = vadd.s32 %v4579_v62, %v4577_v12  ;;  %v3762_v23 = vsel %vm3750_vm11, %v10296_v52, %v10336_v15  ;;  %v10570_v19 = vshll.u32 %v3724_v49, 8  ;;  %v10575_v57 = vsel %vm4129_vm15, %v4130_v9, %v10415_v8 }
 0x47b   :  { %v4527_v20 = vsel %vm4523_vm2, %v4507_v47, %v10451_v36  ;;  %v4529_v7 = vsel %vm4525_vm9, %v10454_v22, %v4528_v54  ;;  %v3763_v53 = vsel %vm3749_vm12, %v3760_v51, %v3762_v23  ;;  %v4549_v52 = vshrl.u32 %v10506_v50, 16 }
 0x47c   :  { %v4582_v15 = vadd.s32 %v4581_v24, %v4571_v17  ;;  %v3767_v35 = vand.u32 65535, %v3763_v53  ;;  %v3789_v16 = vand.u32 65535, %v3759_v40  ;;  %v3765_v14 = vand.u32 65535, %v10570_v19 }
 0x47d   :  { %v3766_v49 = vshrl.u32 %v10570_v19, 16  ;;  %v3768_v12 = vshrl.u32 %v3763_v53, 16  ;;  %v3790_v21 = vshrl.u32 %v3759_v40, 16  ;;  %v10589_v36 = vsub.s32 %v10420_v56, %v4282_v42 }
 0x47e   :  { %v10591_v9 = vshrl.u32 %v4435_v38, 30  ;;  %v4560_v22 = vadd.s32 %v4559_v41, %v4549_v52  ;;  %v3732_v47 = vshrl.u32 %v12908_v5, %v12999_v63  ;;  %v4530_v50 = vsel %vm4524_vm7, %v4527_v20, %v4529_v7 }
 0x47f   :  { %v4573_v10 = vshrl.u32 %v4568_v60, 16  ;;  %v3770_v59 = vmul.u32 %v3768_v12, %v3765_v14  ;;  %v3771_v54 = vmul.u32 %v3767_v35, %v3766_v49  ;;  %v4551_v17 = vshrl.u32 %v10518_v26, 16 }
 0x480   :  { %v10598_v62 = vadd.s32 %v4576_v11, %v4572_v48  ;;  %v3753_v56 = vsel %vm3751_vm10, %v3741_v55, 2102212464  ;;  %v3792_v42 = vmul.u32 %v3790_v21, %v3765_v14  ;;  %v3769_v40 = vmul.u32 %v3767_v35, %v3765_v14 }
 0x481   :  { %v4583_v38 = vadd.s32 %v4582_v15, %v4573_v10  ;;  %v3773_v51 = vshll.u32 %v3770_v59, 16  ;;  %v3793_v41 = vmul.u32 %v3789_v16, %v3766_v49  ;;  %v10602_v24 = vadd.s32 %v4560_v22, %v4551_v17 }
 0x482   :  { %v3772_v63 = vmul.u32 %v3768_v12, %v3766_v49  ;;  %v3791_v3 = vmul.u32 %v3789_v16, %v3765_v14  ;;  %v3795_v23 = vshll.u32 %v3792_v42, 16  ;;  %v3775_v60 = vshll.u32 %v3771_v54, 16  ;;  %v13000_v12 = vld [vmem:[#allocation9_spill] sm:$0xff] }
 0x483   :  { %vm3777_vm2 = vc.u32 %v3769_v40, %v3773_v51  ;;  %v3779_v20 = vadd.s32 %v3773_v51, %v3769_v40  ;;  %v3794_v7 = vmul.u32 %v3790_v21, %v3766_v49  ;;  %v3797_v48 = vshll.u32 %v3793_v41, 16 }
 0x484   :  { %v3778_v26 = vsel %vm3777_vm2, 1, %v12903_v18  ;;  %vm3799_vm9 = vc.u32 %v3791_v3, %v3795_v23  ;;  %v3801_v11 = vadd.s32 %v3795_v23, %v3791_v3  ;;  %v4587_v55 = vadd.s32 1, %v4583_v38 }
 0x485   :  { %v3780_v53 = vadd.s32 %v3778_v26, %v3772_v63  ;;  %vm3781_vm10 = vc.u32 %v3779_v20, %v3775_v60  ;;  %v3800_v52 = vsel %vm3799_vm9, 1, %v12903_v18  ;;  %vm4586_vm13 = vc.u32 %v10602_v24, %v10598_v62 }
 0x486   :  { %v3782_v15 = vsel %vm3781_vm10, 1, %v12903_v18  ;;  %v3802_v35 = vadd.s32 %v3800_v52, %v3794_v7  ;;  %vm3803_vm7 = vc.u32 %v3801_v11, %v3797_v48  ;;  %v3774_v16 = vshrl.u32 %v3770_v59, 16 }
 0x487   :  { %v3784_v14 = vadd.s32 %v3782_v15, %v3780_v53  ;;  %v3804_v49 = vsel %vm3803_vm7, 1, %v12903_v18  ;;  %v12811_v21 = vand.u32 2147483647, %v13000_v12  ;;  %v3752_v22 = vsel %vm3748_vm8, %v3732_v47, %v10532_v30  ;;  %v13002_v15 = vld [vmem:[#allocation6_spill] sm:$0xff] }
 0x488   :  { %v3754_v10 = vsel %vm3750_vm11, %v10534_v27, %v3753_v56  ;;  %v3796_v17 = vshrl.u32 %v3792_v42, 16  ;;  %v3806_v40 = vadd.s32 %v3804_v49, %v3802_v35  ;;  %v4584_v51 = vmul.u32 %v10473_v45, %v4530_v50 }
 0x489   :  { %v4588_v63 = vsel %vm4586_vm13, %v4587_v55, %v4583_v38  ;;  %v3776_v3 = vshrl.u32 %v3771_v54, 16  ;;  %v3785_v59 = vadd.s32 %v3784_v14, %v3774_v16  ;;  %v3798_v23 = vshrl.u32 %v3793_v41, 16  ;;  %v13001_v55 = vld [vmem:[#allocation14_spill] sm:$0xff] }
 0x48a   :  { %v3807_v60 = vadd.s32 %v3806_v40, %v3796_v17  ;;  %v3878_v20 = vand.u32 8388607, %v12811_v21  ;;  %v3891_v7 = vshll.u32 %v12907_v25, %v10134_v1  ;;  %v3755_v30 = vsel %vm3749_vm12, %v3752_v22, %v3754_v10  ;;  %v13004_v17 = vld [vmem:[#allocation19_spill] sm:$0xff] }
 0x48b   :  { %v10624_v47 = vadd.s32 %v3785_v59, %v3776_v3  ;;  %v10626_v27 = vadd.s32 %v3801_v11, %v3797_v48  ;;  %v3892_v45 = vshrl.u32 %v12897_v28, %v10165_v61  ;;  %v4437_v50 = vshll.u32 %v10591_v9, 30 }
 0x48c   :  { %v10631_v54 = vadd.s32 %v4588_v63, %v4584_v51  ;;  %v3808_v56 = vadd.s32 %v3807_v60, %v3798_v23  ;;  %v3894_v42 = vshll.u32 %v12897_v28, %v10134_v1  ;;  %vm4284_vm14 = vcmp.lt.s32.totalorder %v10589_v36, 0 }
 0x48d   :  { %v4285_v29 = vsub.s32 0, %v10589_v36  ;;  %vm3811_vm15 = vc.u32 %v10624_v47, %v10626_v27  ;;  %v3879_v38 = vor.u32 8388608, %v3878_v20  ;;  %v3809_v41 = vmul.u32 %v10570_v19, %v3755_v30 }
 0x48e   :  { %v3812_v26 = vadd.s32 1, %v3808_v56  ;;  %v10640_v48 = vor.u32 %v3892_v45, %v3891_v7  ;;  %v3895_v11 = vshrl.u32 %v12898_v4, %v10165_v61  ;;  %vm3253_vm5 = vcmp.lt.s32.totalorder %v13001_v55, 0 }
 0x48f   :  { %v3888_v53 = vshll.u32 %v12908_v5, %v10134_v1  ;;  %v3889_v52 = vshrl.u32 %v12907_v25, %v10165_v61  ;;  %vm3903_vm8 = vcmp.lt.s32.totalorder %v10042_v32, 1  ;;  %vm3905_vm1 = vcmp.lt.s32.totalorder %v10042_v32, 3 }
 0x490   :  { %vm3408_vm0 = vcmp.lt.s32.totalorder %v13002_v15, 0  ;;  %v10653_v19 = vsub.s32 %v10538_v39, %v4437_v50  ;;  %v4590_v35 = vadd.s32 536870912, %v10631_v54  ;;  %v3813_v16 = vsel %vm3811_vm15, %v3812_v26, %v3808_v56  ;;  %v13006_v50 = vld [vmem:[#allocation20_spill] sm:$0xff] }
 0x491   :  { %v10656_v14 = vor.u32 %v3895_v11, %v3894_v42  ;;  %v3912_v1 = vsel %vm3906_vm3, %v10402_v6, 920167782  ;;  %v3814_v49 = vadd.s32 %v3813_v16, %v3809_v41  ;;  %v3917_v22 = vsel %vm3905_vm1, %v10402_v6, %v10411_v44 }
 0x492   :  { %v10665_v10 = vshll.u32 %v3879_v38, 8  ;;  %v13003_v39 = vsub.s32 32, %v10394_v0  ;;  %v4132_v51 = vclz %v10575_v57  ;;  %vm3904_vm11 = vcmp.lt.s32.totalorder %v10042_v32, 2  ;;  %v13027_v32 = vld [vmem:[#allocation25_spill] sm:$0xff] }
 0x493   :  { %v3915_v63 = vsel %vm3903_vm8, %v10640_v48, %v10656_v14  ;;  %v4286_v3 = vsel %vm4284_vm14, %v4285_v29, %v10589_v36  ;;  %v3815_v6 = vadd.s32 536870912, %v3814_v49  ;;  %v10679_v44 = vor.u32 %v3889_v52, %v3888_v53  ;;  %v13007_v53 = vld [vmem:[#allocation7_spill] sm:$0xff] }
 0x494   :  { %v3673_v40 = vshrl.u32 %v13004_v17, %v13003_v39  ;;  %v3918_v59 = vsel %vm3904_vm11, %v3915_v63, %v3917_v22  ;;  %v3677_v23 = vshll.u32 %v10514_v2, 23  ;;  %vm4439_vm12 = vcmp.lt.s32.totalorder %v10653_v19, 0  ;;  %v13010_v39 = vld [vmem:[#allocation12_spill] sm:$0xff] }
 0x495   :  { %v4440_v57 = vsub.s32 0, %v10653_v19  ;;  %v10686_v60 = vshrl.u32 %v4590_v35, 30  ;;  %v10688_v20 = vshrl.u32 %v3815_v6, 30  ;;  %v3920_v7 = vand.u32 65535, %v10665_v10 }
 0x496   :  { %v3922_v30 = vand.u32 65535, %v3918_v59  ;;  %v3923_v45 = vshrl.u32 %v3918_v59, 16  ;;  %v3672_v56 = vshll.u32 %v13006_v50, %v10394_v0  ;;  %v6534_v42 = vadd.s32 4294967294, %v4132_v51  ;;  %v13013_v50 = vld [vmem:[#allocation5_spill] sm:$0xff] }
 0x497   :  { %13005 = vst [vmem:[#allocation21_spill] sm:$0xff] %v10686_v60  ;;  %v4287_v29 = vclz %v4286_v3  ;;  %v3921_v38 = vshrl.u32 %v10665_v10, 16  ;;  %v3817_v2 = vshll.u32 %v10688_v20, 30  ;;  %v3911_v41 = vsel %vm3903_vm8, %v10679_v44, %v10640_v48 }
 0x498   :  { %v3913_v26 = vsel %vm3905_vm1, %v10656_v14, %v3912_v1  ;;  %v10702_v11 = vmul.u32 %v3923_v45, %v3920_v7  ;;  %v13008_v0 = vsub.s32 4, %v13007_v53  ;;  %v4441_v35 = vsel %vm4439_vm12, %v4440_v57, %v10653_v19 }
 0x499   :  { %v4592_v16 = vshll.u32 %v10686_v60, 30  ;;  %v10715_v22 = vmul.u32 %v3922_v30, %v3921_v38  ;;  %v13011_v1 = vsub.s32 4, %v13010_v39  ;;  %v3674_v51 = vor.u32 %v3673_v40, %v3672_v56 }
 0x49a   :  { %v10709_v52 = vsel %vm3253_vm5, %v13008_v0, %v13007_v53  ;;  %v3678_v63 = vor.u32 4788187, %v3677_v23  ;;  %v3928_v3 = vshll.u32 %v10702_v11, 16  ;;  %vm6535_vm6 = vcmp.lt.s32.totalorder %v6534_v42, 0 }
 0x49b   :  { %13009 = vst [vmem:[#allocation19_spill] sm:$0xff] %v10709_v52  ;;  %v10722_v17 = vsel %vm3408_vm0, %v13011_v1, %v13010_v39  ;;  %v10725_v6 = vsub.s32 %v3814_v49, %v3817_v2  ;;  %v3914_v59 = vsel %vm3904_vm11, %v3911_v41, %v3913_v26  ;;  %v3924_v57 = vmul.u32 %v3922_v30, %v3920_v7  ;;  %v13015_v39 = vld [vmem:[#allocation18_spill] sm:$0xff] }
 0x49c   :  { %13012 = vst [vmem:[#allocation20_spill] sm:$0xff] %v10722_v17  ;;  %v13014_v53 = vxor.u32 2147483648, %v13013_v50  ;;  %v3528_v1 = vxor.u32 2147483648, %v13015_v39  ;;  %v6537_v40 = vadd.s32 4294967294, %v4287_v29  ;;  %v4442_v23 = vclz %v4441_v35 }
 0x49d   :  { %v10738_v56 = vsub.s32 %v10631_v54, %v4592_v16  ;;  %v3930_v49 = vshll.u32 %v10715_v22, 16  ;;  %vm3932_vm2 = vc.u32 %v3924_v57, %v3928_v3  ;;  %v3934_v2 = vadd.s32 %v3928_v3, %v3924_v57 }
 0x49e   :  { %v10734_v0 = vsel %vm3253_vm5, %v13014_v53, %v13013_v50  ;;  %v3679_v41 = vand.u32 2147483647, %v3678_v63  ;;  %v10741_v30 = vsel %vm6535_vm6, 0, %v6534_v42  ;;  %v3933_v26 = vsel %vm3932_vm2, 1, %v12903_v18 }
 0x49f   :  { %v3945_v21 = vshrl.u32 %v3914_v59, 16  ;;  %v3681_v43 = vcvt.s32.f32 %v3674_v51  ;;  %v3820_v50 = vsub.s32 0, %v10725_v6  ;;  %v3927_v53 = vmul.u32 %v3923_v45, %v3921_v38 }
 0x4a0   :  { %vm3936_vm9 = vc.u32 %v3934_v2, %v3930_v49  ;;  %vm6538_vm10 = vcmp.lt.s32.totalorder %v6537_v40, 0  ;;  %v6540_v29 = vadd.s32 4294967294, %v4442_v23  ;;  %vm3819_vm13 = vcmp.lt.s32.totalorder %v10725_v6, 0 }
 0x4a1   :  { %v3944_v54 = vand.u32 65535, %v3914_v59  ;;  %v10749_v35 = vsel %vm3408_vm0, %v3528_v1, %v13015_v39  ;;  %v4140_v42 = vsub.s32 4294967266, %v10741_v30  ;;  %v4595_v16 = vsub.s32 0, %v10738_v56 }
 0x4a2   :  { %v3935_v63 = vadd.s32 %v3933_v26, %v3927_v53  ;;  %v10753_v51 = vmul.f32 %v3681_v43, %v3679_v41  ;;  %vm4594_vm7 = vcmp.lt.s32.totalorder %v10738_v56, 0  ;;  %v3937_v45 = vsel %vm3936_vm9, 1, %v12903_v18 }
 0x4a3   :  { %v3947_v3 = vmul.u32 %v3945_v21, %v3920_v7  ;;  %v4120_v59 = vadd.s32 %v10185_v58, %v10192_v34  ;;  %v4136_v57 = vsub.s32 32, %v10741_v30  ;;  %v10760_v23 = vsel %vm6538_vm10, 0, %v6537_v40  ;;  %v3045_v40 = vpop.f32.mrf.mxu2 }
 0x4a4   :  { %v3821_v39 = vsel %vm3819_vm13, %v3820_v50, %v10725_v6  ;;  %vm6541_vm14 = vcmp.lt.s32.totalorder %v6540_v29, 0  ;;  %v3946_v1 = vmul.u32 %v3944_v54, %v3920_v7  ;;  %v3948_v49 = vmul.u32 %v3944_v54, %v3921_v38 }
 0x4a5   :  { %v3950_v2 = vshll.u32 %v3947_v3, 16  ;;  %v4141_v43 = vadd.s32 127, %v4140_v42  ;;  %v4275_v41 = vadd.s32 %v10382_v37, %v10377_v46  ;;  %v4596_v26 = vsel %vm4594_vm7, %v4595_v16, %v10738_v56 }
 0x4a6   :  { %v3939_v53 = vadd.s32 %v3937_v45, %v3935_v63  ;;  %v4295_v17 = vsub.s32 4294967266, %v10760_v23  ;;  %v3822_v58 = vclz %v3821_v39  ;;  %v3949_v34 = vmul.u32 %v3945_v21, %v3921_v38  ;;  %v13016_v45 = vld [vmem:[#allocation17_spill] sm:$0xff] }
 0x4a7   :  { %vm3954_vm15 = vc.u32 %v3946_v1, %v3950_v2  ;;  %v4138_v52 = vshrl.u32 %v4120_v59, %v4136_v57  ;;  %v10767_v12 = vsel %vm6541_vm14, 0, %v6540_v29  ;;  %v3929_v7 = vshrl.u32 %v10702_v11, 16 }
 0x4a8   :  { %v3955_v50 = vsel %vm3954_vm15, 1, %v12903_v18  ;;  %v4597_v54 = vclz %v4596_v26  ;;  %v3952_v42 = vshll.u32 %v3948_v49, 16  ;;  %v3956_v60 = vadd.s32 %v3950_v2, %v3946_v1 }
 0x4a9   :  { %v3957_v46 = vadd.s32 %v3955_v50, %v3949_v34  ;;  %v4142_v37 = vshll.u32 %v4141_v43, 23  ;;  %v3887_v16 = vshrl.u32 %v12908_v5, %v10165_v61  ;;  %v3940_v63 = vadd.s32 %v3939_v53, %v3929_v7 }
 0x4aa   :  { %v3046_v21 = vadd.f32 %v3045_v40, %v13016_v45  ;;  %v4296_v38 = vadd.s32 127, %v4295_v17  ;;  %v6528_v39 = vadd.s32 4294967294, %v3822_v58  ;;  %v3908_v29 = vsel %vm3906_vm3, %v10656_v14, 2102212464 }
 0x4ab   :  { %vm3958_vm5 = vc.u32 %v3956_v60, %v3952_v42  ;;  %v13017_v11 = vand.u32 2147483647, %v13001_v55  ;;  %v13018_v59 = vmov 0  ;;  %v4450_v57 = vsub.s32 4294967266, %v10767_v12 }
 0x4ac   :  { %v3931_v61 = vshrl.u32 %v10715_v22, 16  ;;  %v3959_v1 = vsel %vm3958_vm5, 1, %v12903_v18  ;;  %v10786_v2 = vmul.f32 30.0, %v3046_v21  ;;  %v4291_v17 = vsub.s32 32, %v10760_v23 }
 0x4ad   :  { %vm10779_vm0 = vcmp.le.f32.partialorder %v13017_v11, 0.7853982  ;;  %v6543_v43 = vadd.s32 4294967294, %v4597_v54  ;;  %v3951_v26 = vshrl.u32 %v3947_v3, 16  ;;  %v3961_v14 = vadd.s32 %v3959_v1, %v3957_v46 }
 0x4ae   :  { %v13019_v59 = vsel %vm10779_vm0, 4294967295, %v13018_v59  ;;  %13021 = vst [vmem:[#allocation12_spill] sm:$0xff] %v10786_v2  ;;  %v13022_v53 = vand.u32 2147483647, %v13002_v15  ;;  %v13023_v58 = vmov 0  ;;  %v3907_v34 = vsel %vm3903_vm8, %v3887_v16, %v10679_v44 }
 0x4af   :  { %13020 = vst [vmem:[#allocation7_spill] sm:$0xff] %v13019_v59  ;;  %v3909_v22 = vsel %vm3905_vm1, %v10640_v48, %v3908_v29  ;;  %v10801_v40 = vadd.s32 %v3940_v63, %v3931_v61  ;;  %v4649_v7 = vand.u32 2139095040, %v10786_v2  ;;  %v4297_v3 = vshll.u32 %v4296_v38, 23  ;;  %v13026_v38 = vld [vmem:[#allocation15_spill] sm:$0xff] }
 0x4b0   :  { %vm10791_vm3 = vcmp.le.f32.partialorder %v13022_v53, 0.7853982  ;;  %vm6529_vm12 = vcmp.lt.s32.totalorder %v6528_v39, 0  ;;  %v3953_v50 = vshrl.u32 %v3948_v49, 16  ;;  %v3962_v54 = vadd.s32 %v3961_v14, %v3951_v26 }
 0x4b1   :  { %v13024_v58 = vsel %vm10791_vm3, 4294967295, %v13023_v58  ;;  %v4137_v46 = vshll.u32 %v10415_v8, %v10741_v30  ;;  %v4143_v21 = vor.u32 4788187, %v4142_v37  ;;  %v4451_v11 = vadd.s32 127, %v4450_v57 }
 0x4b2   :  { %13025 = vst [vmem:[#allocation5_spill] sm:$0xff] %v13024_v58  ;;  %v10806_v1 = vadd.s32 %v3956_v60, %v3952_v42  ;;  %v4293_v44 = vshrl.u32 %v4275_v41, %v4291_v17  ;;  %vm6544_vm8 = vcmp.lt.s32.totalorder %v6543_v43, 0  ;;  %v3910_v48 = vsel %vm3904_vm11, %v3907_v34, %v3909_v22 }
 0x4b3   :  { %v3963_v16 = vadd.s32 %v3962_v54, %v3953_v50  ;;  %v4446_v63 = vsub.s32 32, %v10767_v12  ;;  %v10811_v29 = vsel %vm6529_vm12, 0, %v6528_v39  ;;  %v4650_v49 = vshrl.u32 %v4649_v7, 23 }
 0x4b4   :  { %vm3966_vm1 = vc.u32 %v10801_v40, %v10806_v1  ;;  %vm3563_vm6 = vcmp.lt.s32.totalorder %v13026_v38, 0  ;;  %v4139_v8 = vor.u32 %v4138_v52, %v4137_v46  ;;  %v4292_v60 = vshll.u32 %v10589_v36, %v10760_v23 }
 0x4b5   :  { %v4298_v30 = vor.u32 4788187, %v4297_v3  ;;  %v3967_v41 = vadd.s32 1, %v3963_v16  ;;  %v4430_v42 = vadd.s32 %v13027_v32, %v10461_v31  ;;  %v4452_v37 = vshll.u32 %v4451_v11, 23 }
 0x4b6   :  { %v10820_v57 = vsel %vm6544_vm8, 0, %v6543_v43  ;;  %v3964_v39 = vmul.u32 %v10665_v10, %v3910_v48  ;;  %v10827_v61 = vsel %vm10779_vm0, %v13001_v55, %v10734_v0  ;;  %v4144_v52 = vand.u32 2147483647, %v4143_v21  ;;  %v13035_v21 = vld [vmem:[#allocation8_spill] sm:$0xff] }
 0x4b7   :  { %13028 = vst [vmem:[#allocation18_spill] sm:$0xff] %v10827_v61  ;;  %v3830_v17 = vsub.s32 4294967266, %v10811_v29  ;;  %v3968_v36 = vsel %vm3966_vm1, %v3967_v41, %v3963_v16  ;;  %v13029_v23 = vand.u32 2147483647, %v13026_v38  ;;  %v13030_v26 = vmov 0  ;;  %v13038_v41 = vld [vmem:[#allocation10_spill] sm:$0xff] }
 0x4b8   :  { %v4294_v31 = vor.u32 %v4293_v44, %v4292_v60  ;;  %v4448_v43 = vshrl.u32 %v4430_v42, %v4446_v63  ;;  %v3969_v14 = vadd.s32 %v3968_v36, %v3964_v39  ;;  %v6545_v10 = vadd.s32 4294967169, %v4650_v49 }
 0x4b9   :  { %vm10832_vm11 = vcmp.le.f32.partialorder %v13029_v23, 0.7853982  ;;  %v10840_v0 = vsel %vm10791_vm3, %v13002_v15, %v10749_v35  ;;  %v3683_v53 = vxor.u32 2147483648, %v10753_v51  ;;  %v4146_v34 = vcvt.s32.f32 %v4139_v8 }
 0x4ba   :  { %v13031_v26 = vsel %vm10832_vm11, 4294967295, %v13030_v26  ;;  %13033 = vst [vmem:[#allocation25_spill] sm:$0xff] %v10840_v0  ;;  %v4605_v22 = vsub.s32 4294967266, %v10820_v57  ;;  %v4299_v7 = vand.u32 2147483647, %v4298_v30  ;;  %v4447_v3 = vshll.u32 %v10653_v19, %v10767_v12  ;;  %v13037_v12 = vld [vmem:[#allocation13_spill] sm:$0xff] }
 0x4bb   :  { %13032 = vst [vmem:[#allocation17_spill] sm:$0xff] %v13031_v26  ;;  %v4453_v50 = vor.u32 4788187, %v4452_v37  ;;  %v3970_v54 = vadd.s32 536870912, %v3969_v14  ;;  %v10848_v46 = vmul.f32 %v10827_v61, %v10827_v61  ;;  %v3685_v11 = vsub.s32 4, %v13035_v21 }
 0x4bc   :  { %v4147_v44 = vmul.f32 %v4146_v34, %v4144_v52  ;;  %v3831_v35 = vadd.s32 127, %v3830_v17  ;;  %v4301_v48 = vcvt.s32.f32 %v4294_v31  ;;  %v4449_v16 = vor.u32 %v4448_v43, %v4447_v3 }
 0x4bd   :  { %13034 = vst [vmem:[#allocation26_spill] sm:$0xff] %v10848_v46  ;;  %v10851_v63 = vshrl.u32 %v3970_v54, 30  ;;  %v4656_v49 = vadd.s32 1, %v6545_v10  ;;  %v10855_v8 = vmul.f32 %v10840_v0, %v10840_v0  ;;  %vm4028_vm2 = vcmp.lt.s32.totalorder %v13037_v12, 0  ;;  %v3074_v54 = vpop.f32.mrf.mxu3 }
 0x4be   :  { %v4606_v19 = vadd.s32 127, %v4605_v22  ;;  %v3826_v60 = vsub.s32 32, %v10811_v29  ;;  %v3684_v30 = vsel %vm3563_vm6, %v3683_v53, %v10753_v51  ;;  %vm4183_vm9 = vcmp.lt.s32.totalorder %v13038_v41, 0 }
 0x4bf   :  { %13036 = vst [vmem:[#allocation8_spill] sm:$0xff] %v10855_v8  ;;  %v4302_v32 = vmul.f32 %v4301_v48, %v4299_v7  ;;  %v4454_v42 = vand.u32 2147483647, %v4453_v50  ;;  %v3972_v37 = vshll.u32 %v10851_v63, 30  ;;  %v10867_v39 = vsel %vm3563_vm6, %v3685_v11, %v13035_v21 }
 0x4c0   :  { %13039 = vst [vmem:[#allocation13_spill] sm:$0xff] %v10867_v39  ;;  %v13040_v52 = vand.u32 2147483647, %v13037_v12  ;;  %v4601_v36 = vsub.s32 32, %v10820_v57  ;;  %v3810_v51 = vadd.s32 %v10626_v27, %v10624_v47  ;;  %v3832_v23 = vshll.u32 %v3831_v35, 23 }
 0x4c1   :  { %v4148_v31 = vxor.u32 2147483648, %v4147_v44  ;;  %v4456_v43 = vcvt.s32.f32 %v4449_v16  ;;  %v10878_v10 = vsub.s32 %v3969_v14, %v3972_v37  ;;  %vm4657_vm13 = vcmp.gt.s32.totalorder %v4656_v49, 0 }
 0x4c2   :  { %vm10871_vm10 = vcmp.le.f32.partialorder %v13040_v52, 0.7853982  ;;  %v10883_v53 = vsel %vm10832_vm11, %v13026_v38, %v3684_v30  ;;  %v13044_v34 = vand.u32 2147483647, %v13038_v41  ;;  %v4585_v47 = vadd.s32 %v10598_v62, %v10602_v24 }
 0x4c3   :  { %13043 = vst [vmem:[#allocation10_spill] sm:$0xff] %v10883_v53  ;;  %v4607_v27 = vshll.u32 %v4606_v19, 23  ;;  %v3828_v7 = vshrl.u32 %v3810_v51, %v3826_v60  ;;  %v4303_v3 = vxor.u32 2147483648, %v4302_v32  ;;  %v4457_v14 = vmul.f32 %v4456_v43, %v4454_v42 }
 0x4c4   :  { %vm10887_vm7 = vcmp.le.f32.partialorder %v13044_v34, 0.7853982  ;;  %vm3974_vm14 = vcmp.lt.s32.totalorder %v10878_v10, 0  ;;  %v3975_v50 = vsub.s32 0, %v10878_v10  ;;  %v4603_v21 = vshrl.u32 %v4585_v47, %v4601_v36 }
 0x4c5   :  { %v3827_v11 = vshll.u32 %v10725_v6, %v10811_v29  ;;  %v3833_v35 = vor.u32 4788187, %v3832_v23  ;;  %v4658_v48 = vsel %vm4657_vm13, %v4656_v49, 0  ;;  %v10899_v16 = vmul.f32 %v10883_v53, %v10883_v53  ;;  %v13048_v6 = vld [vmem:[#allocation22_spill] sm:$0xff]  ;;  %v13053_v23 = vld [vmem:[#allocation24_spill] sm:$0xff] }
 0x4c6   :  { %v4149_v62 = vsel %vm4028_vm2, %v4148_v31, %v4147_v44  ;;  %v4602_v24 = vshll.u32 %v10738_v56, %v10820_v57  ;;  %v3976_v19 = vsel %vm3974_vm14, %v3975_v50, %v10878_v10  ;;  %v4608_v60 = vor.u32 4788187, %v4607_v27 }
 0x4c7   :  { %13047 = vst [vmem:[#allocation27_spill] sm:$0xff] %v10899_v16  ;;  %v3829_v30 = vor.u32 %v3828_v7, %v3827_v11  ;;  %v3977_v42 = vclz %v3976_v19  ;;  %v3075_v37 = vadd.f32 %v3074_v54, %v13016_v45  ;;  %v13049_v29 = vand.u32 2147483647, %v13048_v6 }
 0x4c8   :  { %v13050_v49 = vmov 0  ;;  %vm4338_vm5 = vcmp.lt.s32.totalorder %v13048_v6, 0  ;;  %v4458_v52 = vxor.u32 2147483648, %v4457_v14  ;;  %v4660_v44 = vand.u32 31, %v4658_v48 }
 0x4c9   :  { %vm10909_vm15 = vcmp.le.f32.partialorder %v13049_v29, 0.7853982  ;;  %v4304_v56 = vsel %vm4183_vm9, %v4303_v3, %v4302_v32  ;;  %v4604_v57 = vor.u32 %v4603_v21, %v4602_v24  ;;  %v3834_v36 = vand.u32 2147483647, %v3833_v35 }
 0x4ca   :  { %v13051_v49 = vsel %vm10909_vm15, 4294967295, %v13050_v49  ;;  %v3840_v51 = vsub.s32 4, %v10688_v20  ;;  %v4150_v31 = vsub.s32 4, %v13053_v23  ;;  %v10921_v45 = vsel %vm10871_vm10, %v13037_v12, %v4149_v62 }
 0x4cb   :  { %13052 = vst [vmem:[#allocation28_spill] sm:$0xff] %v13051_v49  ;;  %v4305_v43 = vsub.s32 4, %v10516_v13  ;;  %vm3718_vm12 = vcmp.lt.s32.totalorder %v9852_v33, 0  ;;  %v4609_v34 = vand.u32 2147483647, %v4608_v60  ;;  %v3836_v47 = vcvt.s32.f32 %v3829_v30 }
 0x4cc   :  { %v6531_v27 = vadd.s32 4294967294, %v3977_v42  ;;  %v10925_v7 = vmul.f32 30.0, %v3075_v37  ;;  %v10930_v32 = vsel %vm10887_vm7, %v13038_v41, %v4304_v56  ;;  %v4459_v3 = vsel %vm4338_vm5, %v4458_v52, %v4457_v14  ;;  %v13058_v42 = vld [vmem:[#allocation23_spill] sm:$0xff] }
 0x4cd   :  { %v4460_v50 = vsub.s32 4, %v10591_v9  ;;  %v10935_v54 = vsub.s32 32, %v4660_v44  ;;  %v4611_v21 = vcvt.s32.f32 %v4604_v57  ;;  %v3837_v11 = vmul.f32 %v3836_v47, %v3834_v36 }
 0x4ce   :  { %13054 = vst [vmem:[#allocation24_spill] sm:$0xff] %v10925_v7  ;;  %v3841_v35 = vsel %vm3718_vm12, %v3840_v51, %v10688_v20  ;;  %v12816_v62 = vand.u32 2147483647, %v10786_v2  ;;  %v10944_v24 = vsel %vm4028_vm2, %v4150_v31, %v13053_v23  ;;  %v10948_v14 = vmul.f32 %v10921_v45, %v10921_v45 }
 0x4cf   :  { %v10953_v19 = vsel %vm4183_vm9, %v4305_v43, %v10516_v13  ;;  %v13055_v60 = vand.u32 2147483647, %v9852_v33  ;;  %v10963_v30 = vmul.f32 %v10930_v32, %v10930_v32  ;;  %vm12847_vm1 = vcmp.lt.s32.totalorder %v13058_v42, 0 }
 0x4d0   :  { %v4612_v37 = vmul.f32 %v4611_v21, %v4609_v34  ;;  %vm6532_vm6 = vcmp.lt.s32.totalorder %v6531_v27, 0  ;;  %v4804_v29 = vand.u32 2139095040, %v10925_v7  ;;  %v10970_v13 = vsel %vm4338_vm5, %v4460_v50, %v10591_v9 }
 0x4d1   :  { %vm10957_vm8 = vcmp.le.f32.partialorder %v13055_v60, 0.7853982  ;;  %13059 = vst [vmem:[#allocation23_spill] sm:$0xff] %v10970_v13  ;;  %v10975_v52 = vsel %vm10909_vm15, %v13048_v6, %v4459_v3  ;;  %v13061_v57 = vmov 920167782   ;;  %v3838_v51 = vxor.u32 2147483648, %v3837_v11 }
 0x4d2   :  { %13060 = vst [vmem:[#allocation29_spill] sm:$0xff] %v10975_v52  ;;  %v3843_v56 = vsel %vm10957_vm8, 0, %v3841_v35  ;;  %v4673_v36 = vshrl.u32 %v13061_v57, %v10935_v54  ;;  %v4653_v23 = vand.u32 8388607, %v12816_v62  ;;  %v4664_v31 = vshrl.u32 %v12907_v25, %v10935_v54 }
 0x4d3   :  { %v4667_v9 = vshrl.u32 %v12897_v28, %v10935_v54  ;;  %v10987_v43 = vsel %vm6532_vm6, 0, %v6531_v27  ;;  %v4670_v34 = vshrl.u32 %v12898_v4, %v10935_v54  ;;  %v4672_v47 = vshll.u32 %v12898_v4, %v4660_v44 }
 0x4d4   :  { %v13062_v3 = vmov 1326507024   ;;  %v13063_v21 = vand.u32 2147483647, %v13058_v42  ;;  %v13064_v35 = vmov 0  ;;  %v4613_v60 = vxor.u32 2147483648, %v4612_v37 }
 0x4d5   :  { %v4676_v50 = vshrl.u32 %v13062_v3, %v10935_v54  ;;  %v11000_v62 = vshrl.u32 %v4658_v48, 5  ;;  %v4663_v27 = vshll.u32 %v12908_v5, %v4660_v44  ;;  %v4805_v38 = vshrl.u32 %v4804_v29, 23 }
 0x4d6   :  { %vm10996_vm2 = vcmp.le.f32.partialorder %v13063_v21, 0.7853982  ;;  %v4666_v15 = vshll.u32 %v12907_v25, %v4660_v44  ;;  %v4669_v53 = vshll.u32 %v12897_v28, %v4660_v44  ;;  %v4674_v55 = vor.u32 %v4673_v36, %v4672_v47  ;;  %v13068_v36 = vld [vmem:[#allocation21_spill] sm:$0xff] }
 0x4d7   :  { %v13065_v35 = vsel %vm10996_vm2, 4294967295, %v13064_v35  ;;  %v4675_v0 = vshll.u32 %v13061_v57, %v4660_v44  ;;  %v11008_v61 = vmul.f32 %v10975_v52, %v10975_v52  ;;  %v3839_v21 = vsel %vm3718_vm12, %v3838_v51, %v3837_v11 }
 0x4d8   :  { %13066 = vst [vmem:[#allocation30_spill] sm:$0xff] %v13065_v35  ;;  %v3985_v48 = vsub.s32 4294967266, %v10987_v43  ;;  %v4654_v16 = vor.u32 8388608, %v4653_v23  ;;  %v11013_v26 = vor.u32 %v4664_v31, %v4663_v27  ;;  %v11015_v29 = vor.u32 %v4667_v9, %v4666_v15 }
 0x4d9   :  { %13067 = vst [vmem:[#allocation31_spill] sm:$0xff] %v11008_v61  ;;  %v11017_v39 = vor.u32 %v4670_v34, %v4669_v53  ;;  %v4677_v58 = vor.u32 %v4676_v50, %v4675_v0  ;;  %v3860_v44 = vadd.s32 3, %v3843_v56  ;;  %vm4681_vm9 = vcmp.lt.s32.totalorder %v11000_v62, 4 }
 0x4da   :  { %v6548_v59 = vadd.s32 4294967169, %v4805_v38  ;;  %v4614_v8 = vsel %vm12847_vm1, %v4613_v60, %v4612_v37  ;;  %v11026_v11 = vsel %vm10957_vm8, %v9852_v33, %v3839_v21  ;;  %v4687_v15 = vsel %vm4681_vm9, %v4674_v55, 920167782 }
 0x4db   :  { %v12828_v53 = vand.u32 2147483647, %v10925_v7  ;;  %v3986_v0 = vadd.s32 127, %v3985_v48  ;;  %vm4678_vm13 = vcmp.lt.s32.totalorder %v11000_v62, 1  ;;  %vm4680_vm14 = vcmp.lt.s32.totalorder %v11000_v62, 3 }
 0x4dc   :  { %v11033_v56 = vshll.u32 %v4654_v16, 8  ;;  %v4686_v38 = vsel %vm4678_vm13, %v11013_v26, %v11015_v29  ;;  %v4688_v20 = vsel %vm4680_vm14, %v11017_v39, %v4687_v15  ;;  %v4690_v37 = vsel %vm4678_vm13, %v11015_v29, %v11017_v39 }
 0x4dd   :  { %v4691_v51 = vsel %vm4681_vm9, %v4677_v58, 1326507024  ;;  %v11050_v16 = vmul.f32 %v11026_v11, %v11026_v11  ;;  %v11052_v23 = vand.u32 3, %v3860_v44  ;;  %v3981_v31 = vsub.s32 32, %v10987_v43 }
 0x4de   :  { %v4811_v9 = vadd.s32 1, %v6548_v59  ;;  %v11058_v34 = vsel %vm10996_vm2, %v13058_v42, %v4614_v8  ;;  %vm4679_vm5 = vcmp.lt.s32.totalorder %v11000_v62, 2  ;;  %v4692_v50 = vsel %vm4680_vm14, %v4674_v55, %v4691_v51 }
 0x4df   :  { %13069 = vst [vmem:[#allocation21_spill] sm:$0xff] %v11058_v34  ;;  %v11065_v58 = vand.u32 8388607, %v12828_v53  ;;  %v3965_v60 = vadd.s32 %v10806_v1, %v10801_v40  ;;  %v3987_v27 = vshll.u32 %v3986_v0, 23  ;;  %v4689_v59 = vsel %vm4679_vm5, %v4686_v38, %v4688_v20 }
 0x4e0   :  { %v4693_v8 = vsel %vm4679_vm5, %v4690_v37, %v4692_v50  ;;  %v4695_v21 = vand.u32 65535, %v11033_v56  ;;  %v4696_v48 = vshrl.u32 %v11033_v56, 16  ;;  %v3852_v15 = vmul.f32 -0.00019511016, %v11050_v16 }
 0x4e1   :  { %v4697_v44 = vand.u32 65535, %v4693_v8  ;;  %v4698_v55 = vshrl.u32 %v4693_v8, 16  ;;  %v3983_v51 = vshrl.u32 %v3965_v60, %v3981_v31  ;;  %v4153_v40 = vsel %vm10871_vm10, 0, %v10944_v24 }
 0x4e2   :  { %vm4812_vm12 = vcmp.gt.s32.totalorder %v4811_v9, 0  ;;  %v4720_v38 = vshrl.u32 %v4689_v59, 16  ;;  %v3982_v37 = vshll.u32 %v10878_v10, %v10987_v43  ;;  %v3988_v50 = vor.u32 4788187, %v3987_v27 }
 0x4e3   :  { %v4700_v1 = vmul.u32 %v4698_v55, %v4695_v21  ;;  %v4701_v0 = vmul.u32 %v4697_v44, %v4696_v48  ;;  %v4719_v53 = vand.u32 65535, %v4689_v59  ;;  %v11085_v31 = vadd.s32 3, %v4153_v40 }
 0x4e4   :  { %v4699_v60 = vmul.u32 %v4697_v44, %v4695_v21  ;;  %v4813_v24 = vsel %vm4812_vm12, %v4811_v9, 0  ;;  %v3853_v47 = vadd.f32 0.008332121, %v3852_v15  ;;  %v3984_v46 = vor.u32 %v3983_v51, %v3982_v37 }
 0x4e5   :  { %v4703_v17 = vshll.u32 %v4700_v1, 16  ;;  %v4662_v6 = vshrl.u32 %v12908_v5, %v10935_v54  ;;  %v4702_v20 = vmul.u32 %v4698_v55, %v4696_v48  ;;  %v4705_v52 = vshll.u32 %v4701_v0, 16 }
 0x4e6   :  { %v4722_v43 = vmul.u32 %v4720_v38, %v4695_v21  ;;  %v3989_v27 = vand.u32 2147483647, %v3988_v50  ;;  %v4162_v35 = vmul.f32 -0.00019511016, %v10948_v14  ;;  %v4723_v40 = vmul.u32 %v4719_v53, %v4696_v48 }
 0x4e7   :  { %vm4707_vm10 = vc.u32 %v4699_v60, %v4703_v17  ;;  %v4709_v10 = vadd.s32 %v4703_v17, %v4699_v60  ;;  %v4721_v44 = vmul.u32 %v4719_v53, %v4695_v21  ;;  %v3991_v15 = vcvt.s32.f32 %v3984_v46 }
 0x4e8   :  { %v4708_v59 = vsel %vm4707_vm10, 1, %v12903_v18  ;;  %v4725_v9 = vshll.u32 %v4722_v43, 16  ;;  %v4682_v54 = vsel %vm4678_vm13, %v4662_v6, %v11013_v26  ;;  %v4683_v55 = vsel %vm4681_vm9, %v11017_v39, 2102212464 }
 0x4e9   :  { %v4710_v8 = vadd.s32 %v4708_v59, %v4702_v20  ;;  %vm4711_vm8 = vc.u32 %v4709_v10, %v4705_v52  ;;  %v4704_v37 = vshrl.u32 %v4700_v1, 16  ;;  %v4724_v60 = vmul.u32 %v4720_v38, %v4696_v48  ;;  %v13070_v1 = vld [vmem:[#allocation9_spill] sm:$0xff] }
 0x4ea   :  { %v4712_v51 = vsel %vm4711_vm8, 1, %v12903_v18  ;;  %vm4729_vm6 = vc.u32 %v4721_v44, %v4725_v9  ;;  %v3992_v17 = vmul.f32 %v3991_v15, %v3989_v27  ;;  %v4727_v20 = vshll.u32 %v4723_v40, 16 }
 0x4eb   :  { %v4714_v50 = vadd.s32 %v4712_v51, %v4710_v8  ;;  %v4730_v52 = vsel %vm4729_vm6, 1, %v12903_v18  ;;  %v4731_v53 = vadd.s32 %v4725_v9, %v4721_v44  ;;  %v4684_v46 = vsel %vm4680_vm14, %v11015_v29, %v4683_v55 }
 0x4ec   :  { %v4732_v6 = vadd.s32 %v4730_v52, %v4724_v60  ;;  %v4815_v21 = vand.u32 31, %v4813_v24  ;;  %v3845_v39 = vmul.f32 -0.001358992, %v11050_v16  ;;  %v11104_v10 = vmul.f32 %v3853_v47, %v11050_v16 }
 0x4ed   :  { %v4715_v26 = vadd.s32 %v4714_v50, %v4704_v37  ;;  %vm3873_vm9 = vcmp.lt.s32.totalorder %v13070_v1, 0  ;;  %v11108_v48 = vmul.f32 -0.001358992, %v10948_v14  ;;  %vm4733_vm13 = vc.u32 %v4731_v53, %v4727_v20 }
 0x4ee   :  { %v4163_v38 = vadd.f32 0.008332121, %v4162_v35  ;;  %v4706_v8 = vshrl.u32 %v4701_v0, 16  ;;  %v4734_v27 = vsel %vm4733_vm13, 1, %v12903_v18  ;;  %v11111_v59 = vsub.s32 32, %v4815_v21 }
 0x4ef   :  { %v3993_v29 = vxor.u32 2147483648, %v3992_v17  ;;  %v4685_v44 = vsel %vm4679_vm5, %v4682_v54, %v4684_v46  ;;  %v4726_v9 = vshrl.u32 %v4722_v43, 16  ;;  %v4736_v15 = vadd.s32 %v4734_v27, %v4732_v6 }
 0x4f0   :  { %v11115_v47 = vadd.s32 %v4715_v26, %v4706_v8  ;;  %v11117_v55 = vshrl.u32 %v4813_v24, 5  ;;  %v4818_v51 = vshll.u32 %v12908_v5, %v4815_v21  ;;  %v4819_v35 = vshrl.u32 %v12907_v25, %v11111_v59 }
 0x4f1   :  { %v13071_v0 = vand.u32 2147483647, %v13070_v1  ;;  %v4728_v50 = vshrl.u32 %v4723_v40, 16  ;;  %v4737_v62 = vadd.s32 %v4736_v15, %v4726_v9  ;;  %v4821_v43 = vshll.u32 %v12907_v25, %v4815_v21 }
 0x4f2   :  { %v4822_v54 = vshrl.u32 %v12897_v28, %v11111_v59  ;;  %v11131_v24 = vadd.s32 %v4731_v53, %v4727_v20  ;;  %v11133_v60 = vor.u32 %v4819_v35, %v4818_v51  ;;  %v4824_v52 = vshll.u32 %v12897_v28, %v4815_v21 }
 0x4f3   :  { %vm11124_vm14 = vcmp.le.f32.partialorder %v13071_v0, 0.7853982  ;;  %v4825_v46 = vshrl.u32 %v12898_v4, %v11111_v59  ;;  %v4738_v26 = vadd.s32 %v4737_v62, %v4728_v50  ;;  %v4827_v40 = vshll.u32 %v12898_v4, %v4815_v21 }
 0x4f4   :  { %v11138_v6 = vor.u32 %v4822_v54, %v4821_v43  ;;  %v4828_v8 = vshrl.u32 %v13061_v57, %v11111_v59  ;;  %vm4741_vm5 = vc.u32 %v11115_v47, %v11131_v24  ;;  %v4830_v53 = vshll.u32 %v13061_v57, %v4815_v21 }
 0x4f5   :  { %v11145_v20 = vor.u32 %v4825_v46, %v4824_v52  ;;  %v4831_v27 = vshrl.u32 %v13062_v3, %v11111_v59  ;;  %v4739_v9 = vmul.u32 %v11033_v56, %v4685_v44  ;;  %v4742_v15 = vadd.s32 1, %v4738_v26 }
 0x4f6   :  { %v4829_v51 = vor.u32 %v4828_v8, %v4827_v40  ;;  %vm4833_vm12 = vcmp.lt.s32.totalorder %v11117_v55, 1  ;;  %v3994_v35 = vsel %vm3873_vm9, %v3993_v29, %v3992_v17  ;;  %vm4836_vm10 = vcmp.lt.s32.totalorder %v11117_v55, 4 }
 0x4f7   :  { %v4832_v0 = vor.u32 %v4831_v27, %v4830_v53  ;;  %v4841_v21 = vsel %vm4833_vm12, %v11133_v60, %v11138_v6  ;;  %v4743_v50 = vsel %vm4741_vm5, %v4742_v15, %v4738_v26  ;;  %vm4835_vm8 = vcmp.lt.s32.totalorder %v11117_v55, 3 }
 0x4f8   :  { %v4842_v56 = vsel %vm4836_vm10, %v4829_v51, 920167782  ;;  %v4845_v44 = vsel %vm4833_vm12, %v11138_v6, %v11145_v20  ;;  %v4744_v17 = vadd.s32 %v4743_v50, %v4739_v9  ;;  %vm4834_vm6 = vcmp.lt.s32.totalorder %v11117_v55, 2 }
 0x4f9   :  { %v4843_v29 = vsel %vm4835_vm8, %v11145_v20, %v4842_v56  ;;  %v4846_v62 = vsel %vm4836_vm10, %v4832_v0, 1326507024  ;;  %v4164_v43 = vmul.f32 %v4163_v38, %v10948_v14  ;;  %v13074_v46 = vor.u32 8388608, %v11065_v58 }
 0x4fa   :  { %v4844_v54 = vsel %vm4834_vm6, %v4841_v21, %v4843_v29  ;;  %v4847_v52 = vsel %vm4835_vm8, %v4829_v51, %v4846_v62  ;;  %v11184_v40 = vsel %vm11124_vm14, %v13070_v1, %v3994_v35  ;;  %v4745_v8 = vadd.s32 536870912, %v4744_v17 }
 0x4fb   :  { %v11179_v26 = vshll.u32 %v13074_v46, 8  ;;  %v4848_v53 = vsel %vm4834_vm6, %v4845_v44, %v4847_v52  ;;  %v4875_v38 = vshrl.u32 %v4844_v54, 16  ;;  %v11190_v0 = vadd.f32 0.041655596, %v3845_v39 }
 0x4fc   :  { %v4852_v15 = vand.u32 65535, %v4848_v53  ;;  %v4853_v51 = vshrl.u32 %v4848_v53, 16  ;;  %v4317_v58 = vmul.f32 -0.00019511016, %v10963_v30  ;;  %v11193_v21 = vshrl.u32 %v4745_v8, 30  ;;  %v2990_v53 = vpop.f32.mrf.mxu0 }
 0x4fd   :  { %v4850_v27 = vand.u32 65535, %v11179_v26  ;;  %v4851_v9 = vshrl.u32 %v11179_v26, 16  ;;  %v4874_v50 = vand.u32 65535, %v4844_v54  ;;  %v11196_v35 = vadd.f32 -0.16666654, %v11104_v10 }
 0x4fe   :  { %13075 = vst [vmem:[#allocation9_spill] sm:$0xff] %v11193_v21  ;;  %v13076_v56 = vsel %vm10887_vm7, 0, %v10953_v19  ;;  %v11206_v39 = vmul.f32 %v11184_v40, %v11184_v40  ;;  %v11209_v52 = vadd.f32 0.041655596, %v11108_v48  ;;  %v4747_v54 = vshll.u32 %v11193_v21, 30  ;;  %v11215_v48 = vpop.permute.xlu1 %2948 }
 0x4ff   :  { %v11202_v44 = vadd.s32 3, %v13076_v56  ;;  %v4855_v29 = vmul.u32 %v4853_v51, %v4850_v27  ;;  %v4856_v62 = vmul.u32 %v4852_v15, %v4851_v9  ;;  %v4877_v46 = vmul.u32 %v4875_v38, %v4850_v27 }
 0x500   :  { %v11212_v10 = vadd.f32 -0.16666654, %v4164_v43  ;;  %v4310_v22 = vmul.f32 -0.001358992, %v10963_v30  ;;  %v4854_v8 = vmul.u32 %v4852_v15, %v4850_v27  ;;  %v4318_v56 = vadd.f32 0.008332121, %v4317_v58 }
 0x501   :  { %v4858_v19 = vshll.u32 %v4855_v29, 16  ;;  %v4857_v49 = vmul.u32 %v4853_v51, %v4851_v9  ;;  %v4876_v13 = vmul.u32 %v4874_v50, %v4850_v27  ;;  %v4878_v61 = vmul.u32 %v4874_v50, %v4851_v9  ;;  %v5652_v43 = vld [vmem:[%s12716_s4 + $0x20] sm:$0x1] }
 0x502   :  { %v4860_v7 = vshll.u32 %v4856_v62, 16  ;;  %v4880_v4 = vshll.u32 %v4877_v46, 16  ;;  %v4007_v21 = vmul.f32 -0.00019511016, %v11206_v39  ;;  %v11221_v28 = vsub.s32 %v4744_v17, %v4747_v54  ;;  %5655 = vperm.xlu1 %6628, %v5652_v43   ;;  %5731 = vperm.xlu2 %6629, %v5652_v43  }
 0x503   :  { %vm4862_vm7 = vc.u32 %v4854_v8, %v4858_v19  ;;  %v4864_v25 = vadd.s32 %v4858_v19, %v4854_v8  ;;  %v2991_v51 = vadd.f32 %v2990_v53, %v11215_v48  ;;  %v4879_v58 = vmul.u32 %v4875_v38, %v4851_v9 }
 0x504   :  { %v4863_v15 = vsel %vm4862_vm7, 1, %v12903_v18  ;;  %vm4884_vm5 = vc.u32 %v4876_v13, %v4880_v4  ;;  %v4882_v8 = vshll.u32 %v4878_v61, 16  ;;  %v4886_v57 = vadd.s32 %v4880_v4, %v4876_v13 }
 0x505   :  { %v4865_v27 = vadd.s32 %v4863_v15, %v4857_v49  ;;  %vm4866_vm13 = vc.u32 %v4864_v25, %v4860_v7  ;;  %v4885_v19 = vsel %vm4884_vm5, 1, %v12903_v18  ;;  %v4311_v3 = vadd.f32 0.041655596, %v4310_v22 }
 0x506   :  { %v4867_v50 = vsel %vm4866_vm13, 1, %v12903_v18  ;;  %v4859_v2 = vshrl.u32 %v4855_v29, 16  ;;  %v4887_v54 = vadd.s32 %v4885_v19, %v4879_v58  ;;  %v4319_v34 = vmul.f32 %v4318_v56, %v10963_v30 }
 0x507   :  { %v4869_v17 = vadd.s32 %v4867_v50, %v4865_v27  ;;  %v4817_v53 = vshrl.u32 %v12908_v5, %v11111_v59  ;;  %v4838_v25 = vsel %vm4836_vm10, %v11145_v20, 2102212464  ;;  %vm4888_vm7 = vc.u32 %v4886_v57, %v4882_v8 }
 0x508   :  { %v4861_v49 = vshrl.u32 %v4856_v62, 16  ;;  %v4889_v38 = vsel %vm4888_vm7, 1, %v12903_v18  ;;  %v11234_v9 = vmul.f32 30.0, %v2991_v51  ;;  %v4008_v4 = vadd.f32 0.008332121, %v4007_v21 }
 0x509   :  { %v4870_v7 = vadd.s32 %v4869_v17, %v4859_v2  ;;  %v4750_v13 = vsub.s32 0, %v11221_v28  ;;  %v4881_v29 = vshrl.u32 %v4877_v46, 16  ;;  %v4891_v22 = vadd.s32 %v4889_v38, %v4887_v54 }
 0x50a   :  { %13077 = vst [vmem:[#allocation32_spill] sm:$0xff] %v11234_v9  ;;  %vm4749_vm13 = vcmp.lt.s32.totalorder %v11221_v28, 0  ;;  %v4837_v59 = vsel %vm4833_vm12, %v4817_v53, %v11133_v60  ;;  %v4839_v20 = vsel %vm4835_vm8, %v11138_v6, %v4838_v25  ;;  %v4000_v62 = vmul.f32 -0.001358992, %v11206_v39 }
 0x50b   :  { %v11244_v2 = vadd.s32 %v4870_v7, %v4861_v49  ;;  %v4320_v56 = vadd.f32 -0.16666654, %v4319_v34  ;;  %v4883_v21 = vshrl.u32 %v4878_v61, 16  ;;  %v4892_v43 = vadd.s32 %v4891_v22, %v4881_v29  ;;  %v3019_v34 = vpop.f32.mrf.mxu1 }
 0x50c   :  { %v3847_v46 = vmul.f32 %v11190_v0, %v11050_v16  ;;  %v3995_v15 = vsub.s32 4, %v10851_v63  ;;  %v11250_v51 = vadd.s32 %v4886_v57, %v4882_v8  ;;  %v4959_v60 = vand.u32 2139095040, %v11234_v9 }
 0x50d   :  { %v4009_v27 = vmul.f32 %v4008_v4, %v11206_v39  ;;  %v4751_v6 = vsel %vm4749_vm13, %v4750_v13, %v11221_v28  ;;  %v4840_v58 = vsel %vm4834_vm6, %v4837_v59, %v4839_v20  ;;  %v4893_v50 = vadd.s32 %v4892_v43, %v4883_v21 }
 0x50e   :  { %v3856_v61 = vmul.f32 %v11196_v35, %v11050_v16  ;;  %v4157_v0 = vmul.f32 %v11209_v52, %v10948_v14  ;;  %v4312_v57 = vmul.f32 %v4311_v3, %v10963_v30  ;;  %vm4896_vm12 = vc.u32 %v11244_v2, %v11250_v51 }
 0x50f   :  { %v4001_v8 = vadd.f32 0.041655596, %v4000_v62  ;;  %v4166_v19 = vmul.f32 %v11212_v10, %v10948_v14  ;;  %v4321_v55 = vmul.f32 %v4320_v56, %v10963_v30  ;;  %v4897_v17 = vadd.s32 1, %v4893_v50 }
 0x510   :  { %v4752_v54 = vclz %v4751_v6  ;;  %v4894_v53 = vmul.u32 %v11179_v26, %v4840_v58  ;;  %v4960_v25 = vshrl.u32 %v4959_v60, 23  ;;  %v3020_v35 = vadd.f32 %v3019_v34, %v11215_v48 }
 0x511   :  { %v3848_v49 = vadd.f32 -0.4999988, %v3847_v46  ;;  %v3996_v3 = vsel %vm3873_vm9, %v3995_v15, %v10851_v63  ;;  %v4010_v52 = vadd.f32 -0.16666654, %v4009_v27  ;;  %v4898_v7 = vsel %vm4896_vm12, %v4897_v17, %v4893_v50 }
 0x512   :  { %v3857_v38 = vadd.f32 1.0, %v3856_v61  ;;  %v4158_v4 = vadd.f32 -0.4999988, %v4157_v0  ;;  %v4313_v13 = vadd.f32 -0.4999988, %v4312_v57  ;;  %v4899_v10 = vadd.s32 %v4898_v7, %v4894_v53 }
 0x513   :  { %v4002_v29 = vmul.f32 %v4001_v8, %v11206_v39  ;;  %v4167_v22 = vadd.f32 1.0, %v4166_v19  ;;  %v11274_v59 = vand.u32 3, %v11085_v31  ;;  %v4322_v26 = vadd.f32 1.0, %v4321_v55 }
 0x514   :  { %v6546_v20 = vadd.s32 4294967294, %v4752_v54  ;;  %v4900_v62 = vadd.s32 536870912, %v4899_v10  ;;  %v6551_v56 = vadd.s32 4294967169, %v4960_v25  ;;  %v11276_v21 = vmul.f32 30.0, %v3020_v35 }
 0x515   :  { %v3849_v63 = vmul.f32 %v3848_v49, %v11050_v16  ;;  %vm3863_vm9 = vcmp.eq.s32.totalorder %v11052_v23, 0  ;;  %v3998_v43 = vsel %vm11124_vm14, 0, %v3996_v3  ;;  %v4011_v46 = vmul.f32 %v4010_v52, %v11206_v39 }
 0x516   :  { %13078 = vst [vmem:[#allocation33_spill] sm:$0xff] %v11276_v21  ;;  %v11284_v15 = vand.u32 3, %v11202_v44  ;;  %v3858_v31 = vmul.f32 %v3857_v38, %v11026_v11  ;;  %v4159_v60 = vmul.f32 %v4158_v4, %v10948_v14  ;;  %v4314_v27 = vmul.f32 %v4313_v13, %v10963_v30 }
 0x517   :  { %v11289_v6 = vshrl.u32 %v4900_v62, 30  ;;  %v4003_v58 = vadd.f32 -0.4999988, %v4002_v29  ;;  %v4168_v16 = vmul.f32 %v4167_v22, %v10921_v45  ;;  %vm4173_vm10 = vcmp.eq.s32.totalorder %v11274_v59, 0 }
 0x518   :  { %v4323_v37 = vmul.f32 %v4322_v26, %v10930_v32  ;;  %vm3866_vm14 = vcmp.eq.s32.totalorder %v11052_v23, 2  ;;  %vm6547_vm8 = vcmp.lt.s32.totalorder %v6546_v20, 0  ;;  %v4966_v50 = vadd.s32 1, %v6551_v56 }
 0x519   :  { %v4902_v44 = vshll.u32 %v11289_v6, 30  ;;  %v5114_v11 = vand.u32 2139095040, %v11276_v21  ;;  %v3850_v14 = vadd.f32 1.0, %v3849_v63  ;;  %vm3862_vm6 = vcmp.lt.s32.totalorder %v11052_v23, 2 }
 0x51a   :  { %v4012_v30 = vadd.f32 1.0, %v4011_v46  ;;  %v4015_v34 = vadd.s32 3, %v3998_v43  ;;  %v3864_v45 = vxor.u32 2147483648, %v3858_v31  ;;  %v4160_v61 = vadd.f32 1.0, %v4159_v60 }
 0x51b   :  { %v4315_v32 = vadd.f32 1.0, %v4314_v27  ;;  %v11301_v0 = vsub.s32 %v4899_v10, %v4902_v44  ;;  %v4004_v57 = vmul.f32 %v4003_v58, %v11206_v39  ;;  %v4174_v8 = vxor.u32 2147483648, %v4168_v16 }
 0x51c   :  { %v4329_v19 = vxor.u32 2147483648, %v4323_v37  ;;  %v11305_v55 = vsel %vm6547_vm8, 0, %v6546_v20  ;;  %vm4967_vm1 = vcmp.gt.s32.totalorder %v4966_v50, 0  ;;  %v5115_v54 = vshrl.u32 %v5114_v11, 23 }
 0x51d   :  { %vm4904_vm12 = vcmp.lt.s32.totalorder %v11301_v0, 0  ;;  %v4905_v17 = vsub.s32 0, %v11301_v0  ;;  %vm3859_vm7 = vweird.f32 %v9852_v33  ;;  %v3867_v53 = vxor.u32 2147483648, %v3850_v14 }
 0x51e   :  { %v4013_v25 = vmul.f32 %v4012_v30, %v11184_v40  ;;  %v4016_v35 = vand.u32 3, %v4015_v34  ;;  %vm4169_vm13 = vweird.f32 %v13037_v12  ;;  %vm4328_vm5 = vcmp.eq.s32.totalorder %v11284_v15, 0 }
 0x51f   :  { %v3865_v39 = vsel %vm3863_vm9, %v3850_v14, %v3864_v45  ;;  %v4177_v49 = vxor.u32 2147483648, %v4160_v61  ;;  %v4332_v3 = vxor.u32 2147483648, %v4315_v32  ;;  %v4906_v52 = vsel %vm4904_vm12, %v4905_v17, %v11301_v0 }
 0x520   :  { %v4005_v7 = vadd.f32 1.0, %v4004_v57  ;;  %v4760_v38 = vsub.s32 4294967266, %v11305_v55  ;;  %v4907_v4 = vclz %v4906_v52  ;;  %v4968_v13 = vsel %vm4967_vm1, %v4966_v50, 0 }
 0x521   :  { %v4175_v40 = vsel %vm4173_vm10, %v4160_v61, %v4174_v8  ;;  %v4330_v10 = vsel %vm4328_vm5, %v4315_v32, %v4329_v19  ;;  %vm4331_vm8 = vcmp.eq.s32.totalorder %v11284_v15, 2  ;;  %v6554_v29 = vadd.s32 4294967169, %v5115_v54  ;;  %v13090_v19 = vld [vmem:[#allocation12_spill] sm:$0xff] }
 0x522   :  { %v3868_v22 = vsel %vm3866_vm14, %v3867_v53, %v3858_v31  ;;  %vm4018_vm9 = vcmp.eq.s32.totalorder %v4016_v35, 0  ;;  %v4019_v26 = vxor.u32 2147483648, %v4013_v25  ;;  %v6549_v20 = vadd.s32 4294967294, %v4907_v4 }
 0x523   :  { %v3869_v62 = vsel %vm3862_vm6, %v3865_v39, %v3868_v22  ;;  %vm13079_vm12 = vcmp.eq.s32.totalorder %v11274_v59, 2  ;;  %v4333_v63 = vsel %vm4331_vm8, %v4332_v3, %v4323_v37  ;;  %v11326_v43 = vand.u32 31, %v4968_v13  ;;  %v13097_v22 = vld [vmem:[#allocation9_spill] sm:$0xff] }
 0x524   :  { %v4178_v56 = vsel %vm13079_vm12, %v4177_v49, %v4168_v16  ;;  %v4022_v46 = vxor.u32 2147483648, %v4005_v7  ;;  %vm13080_vm1 = vcmp.lt.s32.totalorder %v11274_v59, 2  ;;  %vm13081_vm10 = vcmp.lt.s32.totalorder %v11284_v15, 2 }
 0x525   :  { %v4179_v60 = vsel %vm13080_vm1, %v4175_v40, %v4178_v56  ;;  %v4334_v27 = vsel %vm13081_vm10, %v4330_v10, %v4333_v63  ;;  %v4761_v31 = vadd.s32 127, %v4760_v38  ;;  %v4756_v58 = vsub.s32 32, %v11305_v55 }
 0x526   :  { %vm6550_vm14 = vcmp.lt.s32.totalorder %v6549_v20, 0  ;;  %v12849_v23 = vand.u32 2147483647, %v11234_v9  ;;  %v5121_v44 = vadd.s32 1, %v6554_v29  ;;  %vm4017_vm6 = vcmp.lt.s32.totalorder %v4016_v35, 2 }
 0x527   :  { %v4020_v16 = vsel %vm4018_vm9, %v4005_v7, %v4019_v26  ;;  %vm4021_vm5 = vcmp.eq.s32.totalorder %v4016_v35, 2  ;;  %vm4324_vm8 = vweird.f32 %v13038_v41  ;;  %v11338_v59 = vsel %vm3859_vm7, nan, %v3869_v62  ;;  %v5588_v41 = vpop.permute.xlu0 %5587 }
 0x528   :  { %13082 = vst [vmem:[#allocation34_spill] sm:$0xff] %v11338_v59  ;;  %v11342_v15 = vsel %vm4169_vm13, nan, %v4179_v60  ;;  %v4740_v37 = vadd.s32 %v11131_v24, %v11115_v47  ;;  %v11347_v50 = vsub.s32 32, %v11326_v43  ;;  %v4023_v11 = vsel %vm4021_vm5, %v4022_v46, %v4013_v25  ;;  %v13087_v24 = vld [vmem:[#allocation21_spill] sm:$0xff] }
 0x529   :  { %13083 = vst [vmem:[#allocation35_spill] sm:$0xff] %v11342_v15  ;;  %v11349_v14 = vsel %vm4324_vm8, nan, %v4334_v27  ;;  %v4762_v30 = vshll.u32 %v4761_v31, 23  ;;  %v11351_v34 = vsel %vm6550_vm14, 0, %v6549_v20  ;;  %v4024_v33 = vsel %vm4017_vm6, %v4020_v16, %v4023_v11 }
 0x52a   :  { %13084 = vst [vmem:[#allocation36_spill] sm:$0xff] %v11349_v14  ;;  %v4758_v45 = vshrl.u32 %v4740_v37, %v4756_v58  ;;  %v4963_v12 = vand.u32 8388607, %v12849_v23  ;;  %vm5122_vm7 = vcmp.gt.s32.totalorder %v5121_v44, 0  ;;  %v13085_v61 = vsub.s32 4, %v13068_v36 }
 0x52b   :  { %vm13086_vm13 = vcmp.lt.s32.totalorder %v13058_v42, 0  ;;  %v11364_v32 = vmul.f32 %v13087_v24, %v13087_v24  ;;  %vm4014_vm9 = vweird.f32 %v13070_v1  ;;  %v11368_v57 = vmul.f32 %v5588_v41, %v11338_v59 }
 0x52c   :  { %v11360_v47 = vsel %vm13086_vm13, %v13085_v61, %v13068_v36  ;;  %v11371_v8 = vmul.f32 %v5588_v41, %v11342_v15  ;;  %vm4648_vm12 = vcmp.lt.s32.totalorder %v13090_v19, 0  ;;  %v4757_v17 = vshll.u32 %v11221_v28, %v11305_v55 }
 0x52d   :  { %13088 = vst [vmem:[#allocation21_spill] sm:$0xff] %v11368_v57  ;;  %v4915_v36 = vsub.s32 4294967266, %v11351_v34  ;;  %v13091_v54 = vmov 1326507024   ;;  %v11379_v25 = vsel %vm4014_vm9, nan, %v4024_v33  ;;  %v11382_v1 = vmul.f32 %v5588_v41, %v11349_v14 }
 0x52e   :  { %13089 = vst [vmem:[#allocation37_spill] sm:$0xff] %v11371_v8  ;;  %v4986_v53 = vshrl.u32 %v13091_v54, %v11347_v50  ;;  %v4763_v35 = vor.u32 4788187, %v4762_v30  ;;  %v5123_v39 = vsel %vm5122_vm7, %v5121_v44, 0  ;;  %v4759_v49 = vor.u32 %v4758_v45, %v4757_v17 }
 0x52f   :  { %13092 = vst [vmem:[#allocation12_spill] sm:$0xff] %v11379_v25  ;;  %v4964_v3 = vor.u32 8388608, %v4963_v12  ;;  %v13094_v52 = vmov 920167782   ;;  %v12848_v38 = vand.u32 2147483647, %v11276_v21  ;;  %v4895_v33 = vadd.s32 %v11250_v51, %v11244_v2 }
 0x530   :  { %13093 = vst [vmem:[#allocation38_spill] sm:$0xff] %v11382_v1  ;;  %v4985_v7 = vshll.u32 %v13094_v52, %v11326_v43  ;;  %v11387_v28 = vshrl.u32 %v4968_v13, 5  ;;  %v13095_v55 = vmov 2131351028   ;;  %v13096_v40 = vmov 2102212464  }
 0x531   :  { %v4977_v4 = vshrl.u32 %v13095_v55, %v11347_v50  ;;  %v4980_v10 = vshrl.u32 %v13096_v40, %v11347_v50  ;;  %v4983_v29 = vshrl.u32 %v13094_v52, %v11347_v50  ;;  %v4770_v26 = vsub.s32 4, %v13097_v22 }
 0x532   :  { %v4916_v20 = vadd.s32 127, %v4915_v36  ;;  %v4987_v62 = vor.u32 %v4986_v53, %v4985_v7  ;;  %v11396_v56 = vand.u32 31, %v5123_v39  ;;  %v4764_v63 = vand.u32 2147483647, %v4763_v35 }
 0x533   :  { %v13098_v46 = vmov 2475754826   ;;  %v4979_v60 = vshll.u32 %v13095_v55, %v11326_v43  ;;  %v4982_v27 = vshll.u32 %v13096_v40, %v11326_v43  ;;  %v4766_v31 = vcvt.s32.f32 %v4759_v49 }
 0x534   :  { %v4976_v13 = vshll.u32 %v13098_v46, %v11326_v43  ;;  %v4911_v58 = vsub.s32 32, %v11351_v34  ;;  %v11405_v44 = vshll.u32 %v4964_v3, 8  ;;  %v5118_v16 = vand.u32 8388607, %v12848_v38 }
 0x535   :  { %v4981_v11 = vor.u32 %v4980_v10, %v4979_v60  ;;  %v4984_v30 = vor.u32 %v4983_v29, %v4982_v27  ;;  %vm4991_vm1 = vcmp.lt.s32.totalorder %v11387_v28, 4  ;;  %v4917_v45 = vshll.u32 %v4916_v20, 23 }
 0x536   :  { %13099 = vst [vmem:[#allocation9_spill] sm:$0xff] %v11405_v44  ;;  %v4978_v37 = vor.u32 %v4977_v4, %v4976_v13  ;;  %v5001_v12 = vsel %vm4991_vm1, %v4987_v62, 1326507024  ;;  %v11415_v61 = vsub.s32 32, %v11396_v56  ;;  %v11418_v17 = vmul.f32 %v5588_v41, %v11379_v25  ;;  %v13104_v13 = vld [vmem:[#allocation24_spill] sm:$0xff] }
 0x537   :  { %v4767_v36 = vmul.f32 %v4766_v31, %v4764_v63  ;;  %v11423_v53 = vsel %vm4648_vm12, %v4770_v26, %v13097_v22  ;;  %v4974_v35 = vshrl.u32 %v13098_v46, %v11347_v50  ;;  %v4913_v2 = vshrl.u32 %v4895_v33, %v4911_v58 }
 0x538   :  { %13100 = vst [vmem:[#allocation39_spill] sm:$0xff] %v11418_v17  ;;  %vm4988_vm10 = vcmp.lt.s32.totalorder %v11387_v28, 1  ;;  %vm4990_vm14 = vcmp.lt.s32.totalorder %v11387_v28, 3  ;;  %v5119_v51 = vor.u32 8388608, %v5118_v16  ;;  %v4973_v49 = vshll.u32 %v12908_v5, %v11326_v43 }
 0x539   :  { %v5000_v41 = vsel %vm4988_vm10, %v4978_v37, %v4981_v11  ;;  %v5002_v3 = vsel %vm4990_vm14, %v4984_v30, %v5001_v12  ;;  %v11436_v7 = vand.u32 65535, %v11405_v44  ;;  %v13101_v4 = vand.u32 2147483647, %v13090_v19 }
 0x53a   :  { %v4912_v29 = vshll.u32 %v11301_v0, %v11351_v34  ;;  %v4918_v22 = vor.u32 4788187, %v4917_v45  ;;  %v11447_v43 = vshrl.u32 %v11405_v44, 16  ;;  %v5141_v26 = vshrl.u32 %v13091_v54, %v11415_v61 }
 0x53b   :  { %vm11440_vm6 = vcmp.le.f32.partialorder %v13101_v4, 0.7853982  ;;  %v4768_v20 = vxor.u32 2147483648, %v4767_v36  ;;  %v4972_v62 = vshrl.u32 %v12908_v5, %v11347_v50  ;;  %v4975_v63 = vor.u32 %v4974_v35, %v4973_v49 }
 0x53c   :  { %vm4989_vm5 = vcmp.lt.s32.totalorder %v11387_v28, 2  ;;  %vm4803_vm8 = vcmp.lt.s32.totalorder %v13104_v13, 0  ;;  %v4914_v60 = vor.u32 %v4913_v2, %v4912_v29  ;;  %v4997_v0 = vsel %vm4991_vm1, %v4984_v30, 920167782 }
 0x53d   :  { %v5003_v34 = vsel %vm4989_vm5, %v5000_v41, %v5002_v3  ;;  %v5140_v27 = vshll.u32 %v13094_v52, %v11396_v56  ;;  %v11461_v31 = vshrl.u32 %v5123_v39, 5  ;;  %v5132_v50 = vshrl.u32 %v13095_v55, %v11415_v61 }
 0x53e   :  { %v5135_v58 = vshrl.u32 %v13096_v40, %v11415_v61  ;;  %v5138_v16 = vshrl.u32 %v13094_v52, %v11415_v61  ;;  %v4919_v33 = vand.u32 2147483647, %v4918_v22  ;;  %v4925_v30 = vsub.s32 4, %v11289_v6 }
 0x53f   :  { %v4993_v45 = vsel %vm4991_vm1, %v4981_v11, 2102212464  ;;  %v5142_v12 = vor.u32 %v5141_v26, %v5140_v27  ;;  %v5008_v35 = vshrl.u32 %v5003_v34, 16  ;;  %v5131_v39 = vshll.u32 %v13098_v46, %v11396_v56 }
 0x540   :  { %v5134_v2 = vshll.u32 %v13095_v55, %v11396_v56  ;;  %v5137_v49 = vshll.u32 %v13096_v40, %v11396_v56  ;;  %v4769_v41 = vsel %vm4648_vm12, %v4768_v20, %v4767_v36  ;;  %v4921_v3 = vcvt.s32.f32 %v4914_v60 }
 0x541   :  { %v4996_v4 = vsel %vm4988_vm10, %v4975_v63, %v4978_v37  ;;  %v4998_v29 = vsel %vm4990_vm14, %v4981_v11, %v4997_v0  ;;  %v11484_v22 = vor.u32 %v5132_v50, %v5131_v39  ;;  %vm5146_vm7 = vcmp.lt.s32.totalorder %v11461_v31, 4 }
 0x542   :  { %v5136_v26 = vor.u32 %v5135_v58, %v5134_v2  ;;  %v5139_v27 = vor.u32 %v5138_v16, %v5137_v49  ;;  %v4922_v38 = vmul.f32 %v4921_v3, %v4919_v33  ;;  %v4992_v23 = vsel %vm4988_vm10, %v4972_v62, %v4975_v63  ;;  %v13109_v58 = vld [vmem:[#allocation31_spill] sm:$0xff] }
 0x543   :  { %v4994_v36 = vsel %vm4990_vm14, %v4978_v37, %v4993_v45  ;;  %v5156_v20 = vsel %vm5146_vm7, %v5142_v12, 1326507024  ;;  %v11496_v11 = vsel %vm11440_vm6, %v13090_v19, %v4769_v41  ;;  %v4999_v60 = vsel %vm4989_vm5, %v4996_v4, %v4998_v29 }
 0x544   :  { %v11501_v0 = vmul.u32 %v5008_v35, %v11436_v7  ;;  %v11503_v50 = vshll.u32 %v5119_v51, 8  ;;  %v13106_v62 = vand.u32 2147483647, %v13104_v13  ;;  %v5007_v63 = vand.u32 65535, %v5003_v34 }
 0x545   :  { %vm5143_vm9 = vcmp.lt.s32.totalorder %v11461_v31, 1  ;;  %vm5145_vm12 = vcmp.lt.s32.totalorder %v11461_v31, 3  ;;  %v4472_v16 = vmul.f32 -0.00019511016, %v13109_v58  ;;  %v11517_v33 = vsel %vm4803_vm8, %v4925_v30, %v11289_v6 }
 0x546   :  { %13105 = vst [vmem:[#allocation24_spill] sm:$0xff] %v11503_v50  ;;  %vm11507_vm13 = vcmp.le.f32.partialorder %v13106_v62, 0.7853982  ;;  %v11521_v51 = vsel %vm4989_vm5, %v4992_v23, %v4994_v36  ;;  %v5155_v45 = vsel %vm5143_vm9, %v11484_v22, %v5136_v26  ;;  %v5157_v34 = vsel %vm5145_vm12, %v5139_v27, %v5156_v20 }
 0x547   :  { %13110 = vst [vmem:[#allocation31_spill] sm:$0xff] %v11521_v51  ;;  %v11530_v12 = vmul.f32 %v11496_v11, %v11496_v11  ;;  %v4923_v39 = vxor.u32 2147483648, %v4922_v38  ;;  %v5029_v2 = vand.u32 65535, %v4999_v60  ;;  %v4627_v6 = vmul.f32 -0.00019511016, %v11364_v32 }
 0x548   :  { %v5013_v30 = vshll.u32 %v11501_v0, 16  ;;  %v5030_v28 = vshrl.u32 %v4999_v60, 16  ;;  %v5129_v23 = vshrl.u32 %v13098_v46, %v11415_v61  ;;  %vm5144_vm1 = vcmp.lt.s32.totalorder %v11461_v31, 2 }
 0x549   :  { %v11538_v49 = vmul.u32 %v5007_v63, %v11447_v43  ;;  %v11544_v3 = vsel %vm5144_vm1, %v5155_v45, %v5157_v34  ;;  %v4473_v4 = vadd.f32 0.008332121, %v4472_v16  ;;  %v5009_v29 = vmul.u32 %v5007_v63, %v11436_v7 }
 0x54a   :  { %v5012_v36 = vmul.u32 %v5008_v35, %v11447_v43  ;;  %v5128_v20 = vshll.u32 %v12908_v5, %v11396_v56  ;;  %v5160_v60 = vand.u32 65535, %v11503_v50  ;;  %v4924_v62 = vsel %vm4803_vm8, %v4923_v39, %v4922_v38 }
 0x54b   :  { %v11554_v1 = vmul.u32 %v5029_v2, %v11436_v7  ;;  %v4465_v41 = vmul.f32 -0.001358992, %v13109_v58  ;;  %v4628_v45 = vadd.f32 0.008332121, %v4627_v6  ;;  %vm5017_vm10 = vc.u32 %v5009_v29, %v5013_v30 }
 0x54c   :  { %v5130_v16 = vor.u32 %v5129_v23, %v5128_v20  ;;  %v5163_v63 = vshrl.u32 %v11544_v3, 16  ;;  %v4620_v35 = vmul.f32 -0.001358992, %v11364_v32  ;;  %v11561_v56 = vmul.u32 %v5030_v28, %v11436_v7 }
 0x54d   :  { %v5152_v38 = vsel %vm5146_vm7, %v5139_v27, 920167782  ;;  %v4474_v39 = vmul.f32 %v4473_v4, %v13109_v58  ;;  %v11569_v6 = vsel %vm11507_vm13, %v13104_v13, %v4924_v62  ;;  %v11572_v23 = vmul.u32 %v5029_v2, %v11447_v43 }
 0x54e   :  { %v5148_v20 = vsel %vm5146_vm7, %v5136_v26, 2102212464  ;;  %v4782_v34 = vmul.f32 -0.00019511016, %v11530_v12  ;;  %v5018_v7 = vsel %vm5017_vm10, 1, %v12903_v18  ;;  %v5127_v27 = vshrl.u32 %v12908_v5, %v11415_v61 }
 0x54f   :  { %v4466_v8 = vadd.f32 0.041655596, %v4465_v41  ;;  %v4629_v4 = vmul.f32 %v4628_v45, %v11364_v32  ;;  %v5151_v62 = vsel %vm5143_vm9, %v5130_v16, %v11484_v22  ;;  %v5153_v2 = vsel %vm5145_vm12, %v5136_v26, %v5152_v38 }
 0x550   :  { %v11586_v57 = vmul.u32 %v5163_v63, %v5160_v60  ;;  %v4621_v17 = vadd.f32 0.041655596, %v4620_v35  ;;  %v11590_v14 = vmul.f32 %v11569_v6, %v11569_v6  ;;  %v5147_v61 = vsel %vm5143_vm9, %v5127_v27, %v5130_v16 }
 0x551   :  { %v5149_v41 = vsel %vm5145_vm12, %v11484_v22, %v5148_v20  ;;  %v4475_v45 = vadd.f32 -0.16666654, %v4474_v39  ;;  %v11597_v15 = vadd.s32 %v5013_v30, %v5009_v29  ;;  %v11600_v25 = vmul.u32 %v5030_v28, %v11447_v43  ;;  %v13112_v29 = vld [vmem:[#allocation23_spill] sm:$0xff] }
 0x552   :  { %v5162_v26 = vand.u32 65535, %v11544_v3  ;;  %v4783_v35 = vadd.f32 0.008332121, %v4782_v34  ;;  %v11603_v38 = vadd.s32 %v5018_v7, %v5012_v36  ;;  %v5154_v59 = vsel %vm5144_vm1, %v5151_v62, %v5153_v2 }
 0x553   :  { %v4467_v16 = vmul.f32 %v4466_v8, %v13109_v58  ;;  %v4630_v27 = vadd.f32 -0.16666654, %v4629_v4  ;;  %v11610_v22 = vsel %vm5144_vm1, %v5147_v61, %v5149_v41  ;;  %v5168_v30 = vshll.u32 %v11586_v57, 16 }
 0x554   :  { %13111 = vst [vmem:[#allocation40_spill] sm:$0xff] %v11610_v22  ;;  %v4622_v43 = vmul.f32 %v4621_v17, %v11364_v32  ;;  %v4775_v28 = vmul.f32 -0.001358992, %v11530_v12  ;;  %v5161_v3 = vshrl.u32 %v11503_v50, 16  ;;  %v4463_v34 = vsel %vm10909_vm15, 0, %v13112_v29 }
 0x555   :  { %v4476_v39 = vmul.f32 %v4475_v45, %v13109_v58  ;;  %v4937_v8 = vmul.f32 -0.00019511016, %v11590_v14  ;;  %v5164_v20 = vmul.u32 %v5162_v26, %v5160_v60  ;;  %v5184_v31 = vand.u32 65535, %v5154_v59 }
 0x556   :  { %v5185_v7 = vshrl.u32 %v5154_v59, 16  ;;  %v4784_v4 = vmul.f32 %v4783_v35, %v11530_v12  ;;  %v11622_v62 = vmul.u32 %v5162_v26, %v5161_v3  ;;  %v4468_v2 = vadd.f32 -0.4999988, %v4467_v16 }
 0x557   :  { %v4631_v61 = vmul.f32 %v4630_v27, %v11364_v32  ;;  %vm5172_vm14 = vc.u32 %v5164_v20, %v5168_v30  ;;  %v4623_v41 = vadd.f32 -0.4999988, %v4622_v43  ;;  %v4776_v29 = vadd.f32 0.041655596, %v4775_v28 }
 0x558   :  { %v4930_v45 = vmul.f32 -0.001358992, %v11590_v14  ;;  %v5167_v36 = vmul.u32 %v5163_v63, %v5161_v3  ;;  %v4477_v21 = vadd.f32 1.0, %v4476_v39  ;;  %v4618_v59 = vsel %vm10996_vm2, 0, %v11360_v47 }
 0x559   :  { %v4938_v35 = vadd.f32 0.008332121, %v4937_v8  ;;  %v11631_v26 = vmul.u32 %v5184_v31, %v5160_v60  ;;  %v11633_v51 = vmul.u32 %v5185_v7, %v5160_v60  ;;  %v4480_v17 = vadd.s32 3, %v4463_v34  ;;  %v13115_v60 = vld [vmem:[#allocation29_spill] sm:$0xff] }
 0x55a   :  { %v4785_v16 = vadd.f32 -0.16666654, %v4784_v4  ;;  %v5173_v27 = vsel %vm5172_vm14, 1, %v12903_v18  ;;  %v11636_v22 = vmul.u32 %v5184_v31, %v5161_v3  ;;  %v4469_v43 = vmul.f32 %v4468_v2, %v13109_v58 }
 0x55b   :  { %v4632_v28 = vadd.f32 1.0, %v4631_v61  ;;  %v4624_v63 = vmul.f32 %v4623_v41, %v11364_v32  ;;  %v4635_v39 = vadd.s32 3, %v4618_v59  ;;  %v4777_v9 = vmul.f32 %v4776_v29, %v11530_v12  ;;  %v13116_v32 = vld [vmem:[#allocation4_spill] sm:$0xff] }
 0x55c   :  { %v4931_v47 = vadd.f32 0.041655596, %v4930_v45  ;;  %v11642_v50 = vmul.u32 %v5185_v7, %v5161_v3  ;;  %v4478_v34 = vmul.f32 %v4477_v21, %v13115_v60  ;;  %v4939_v4 = vmul.f32 %v4938_v35, %v11590_v14 }
 0x55d   :  { %v4481_v44 = vand.u32 3, %v4480_v17  ;;  %v4773_v58 = vsel %vm11440_vm6, 0, %v11423_v53  ;;  %v4786_v31 = vmul.f32 %v4785_v16, %v11530_v12  ;;  %v3232_v2 = vmul.f32 -0.00019511016, %v13116_v32  ;;  %v13117_v16 = vld [vmem:[#allocation22_spill] sm:$0xff] }
 0x55e   :  { %v11651_v61 = vadd.s32 %v5168_v30, %v5164_v20  ;;  %v11653_v41 = vadd.s32 %v5173_v27, %v5167_v36  ;;  %v4470_v29 = vadd.f32 1.0, %v4469_v43  ;;  %v4633_v3 = vmul.f32 %v4632_v28, %v13087_v24 }
 0x55f   :  { %v4625_v7 = vadd.f32 1.0, %v4624_v63  ;;  %v4636_v21 = vand.u32 3, %v4635_v39  ;;  %v4778_v45 = vadd.f32 -0.4999988, %v4777_v9  ;;  %v4932_v17 = vmul.f32 %v4931_v47, %v11590_v14 }
 0x560   :  { %v4484_v59 = vxor.u32 2147483648, %v4478_v34  ;;  %v4790_v35 = vadd.s32 3, %v4773_v58  ;;  %v4940_v10 = vadd.f32 -0.16666654, %v4939_v4  ;;  %v3225_v53 = vmul.f32 -0.001358992, %v13116_v32 }
 0x561   :  { %vm4479_vm15 = vweird.f32 %v13117_v16  ;;  %vm4482_vm2 = vcmp.lt.s32.totalorder %v4481_v44, 2  ;;  %vm4483_vm6 = vcmp.eq.s32.totalorder %v4481_v44, 0  ;;  %v4787_v30 = vadd.f32 1.0, %v4786_v31  ;;  %v13118_v31 = vld [vmem:[#allocation26_spill] sm:$0xff] }
 0x562   :  { %v3233_v20 = vadd.f32 0.008332121, %v3232_v2  ;;  %vm4486_vm5 = vcmp.eq.s32.totalorder %v4481_v44, 2  ;;  %v4487_v36 = vxor.u32 2147483648, %v4470_v29  ;;  %v4639_v27 = vxor.u32 2147483648, %v4633_v3 }
 0x563   :  { %v4928_v24 = vsel %vm11507_vm13, 0, %v11517_v33  ;;  %vm4634_vm8 = vweird.f32 %v13058_v42  ;;  %vm4637_vm7 = vcmp.lt.s32.totalorder %v4636_v21, 2  ;;  %v4642_v43 = vxor.u32 2147483648, %v4625_v7 }
 0x564   :  { %v4779_v28 = vmul.f32 %v4778_v45, %v11530_v12  ;;  %v4933_v63 = vadd.f32 -0.4999988, %v4932_v17  ;;  %v4485_v39 = vsel %vm4483_vm6, %v4470_v29, %v4484_v59  ;;  %v4791_v9 = vand.u32 3, %v4790_v35  ;;  %v3048_v59 = vpop.f32.mrf.mxu2 }
 0x565   :  { %v4941_v47 = vmul.f32 %v4940_v10, %v11590_v14  ;;  %v3226_v60 = vadd.f32 0.041655596, %v3225_v53  ;;  %vm4638_vm9 = vcmp.eq.s32.totalorder %v4636_v21, 0  ;;  %v4788_v4 = vmul.f32 %v4787_v30, %v11496_v11 }
 0x566   :  { %v3234_v58 = vmul.f32 %v3233_v20, %v13116_v32  ;;  %v3380_v37 = vmul.f32 -0.001358992, %v13118_v31  ;;  %v4488_v33 = vsel %vm4486_vm5, %v4487_v36, %v4478_v34  ;;  %v4640_v2 = vsel %vm4638_vm9, %v4625_v7, %v4639_v27 }
 0x567   :  { %vm4641_vm13 = vcmp.eq.s32.totalorder %v4636_v21, 2  ;;  %v3387_v8 = vmul.f32 -0.00019511016, %v13118_v31  ;;  %v4489_v12 = vsel %vm4482_vm2, %v4485_v39, %v4488_v33  ;;  %v4780_v29 = vadd.f32 1.0, %v4779_v28  ;;  %v3077_v28 = vpop.f32.mrf.mxu3 }
 0x568   :  { %v4934_v45 = vmul.f32 %v4933_v63, %v11590_v14  ;;  %v4945_v17 = vadd.s32 3, %v4928_v24  ;;  %v4643_v35 = vsel %vm4641_vm13, %v4642_v43, %v4633_v3  ;;  %vm4792_vm12 = vcmp.lt.s32.totalorder %v4791_v9, 2  ;;  %v13120_v24 = vld [vmem:[#allocation3_spill] sm:$0xff]  ;;  %v11683_v63 = vpop.permute.xlu0 %5592 }
 0x569   :  { %v4942_v11 = vadd.f32 1.0, %v4941_v47  ;;  %v3227_v10 = vmul.f32 %v3226_v60, %v13116_v32  ;;  %v4644_v53 = vsel %vm4637_vm7, %v4640_v2, %v4643_v35  ;;  %v4794_v30 = vxor.u32 2147483648, %v4788_v4  ;;  %13122 = vst [vmem:[#allocation28_spill] sm:$0xff] %v11683_v63 }
 0x56a   :  { %v3235_v34 = vadd.f32 -0.16666654, %v3234_v58  ;;  %v3381_v7 = vadd.f32 0.041655596, %v3380_v37  ;;  %v11676_v20 = vsel %vm4479_vm15, nan, %v4489_v12  ;;  %vm4789_vm1 = vweird.f32 %v13090_v19 }
 0x56b   :  { %13119 = vst [vmem:[#allocation23_spill] sm:$0xff] %v11676_v20  ;;  %vm4793_vm10 = vcmp.eq.s32.totalorder %v4791_v9, 0  ;;  %v3388_v14 = vadd.f32 0.008332121, %v3387_v8  ;;  %v3049_v44 = vadd.f32 %v3048_v59, %v11215_v48  ;;  %v4797_v3 = vxor.u32 2147483648, %v4780_v29 }
 0x56c   :  { %v4935_v36 = vadd.f32 1.0, %v4934_v45  ;;  %v4946_v27 = vand.u32 3, %v4945_v17  ;;  %v3223_v21 = vsel %vm9960_vm4, 0, %v13120_v24  ;;  %v11687_v16 = vsel %vm4634_vm8, nan, %v4644_v53 }
 0x56d   :  { %13123 = vst [vmem:[#allocation30_spill] sm:$0xff] %v11687_v16  ;;  %vm4796_vm14 = vcmp.eq.s32.totalorder %v4791_v9, 2  ;;  %v4943_v39 = vmul.f32 %v4942_v11, %v11569_v6  ;;  %v3228_v8 = vadd.f32 -0.4999988, %v3227_v10  ;;  %v4795_v47 = vsel %vm4793_vm10, %v4780_v29, %v4794_v30  ;;  %v13127_v11 = vld [vmem:[#allocation8_spill] sm:$0xff]  ;;  %v13128_v30 = vld [vmem:[#allocation19_spill] sm:$0xff] }
 0x56e   :  { %v11692_v60 = vmul.f32 %v11683_v63, %v11676_v20  ;;  %v3236_v58 = vmul.f32 %v3235_v34, %v13116_v32  ;;  %v3382_v37 = vmul.f32 %v3381_v7, %v13118_v31  ;;  %v3240_v33 = vadd.s32 3, %v3223_v21 }
 0x56f   :  { %v3389_v2 = vmul.f32 %v3388_v14, %v13118_v31  ;;  %v11697_v12 = vmul.f32 30.0, %v3049_v44  ;;  %v3078_v42 = vadd.f32 %v3077_v28, %v11215_v48  ;;  %v4798_v45 = vsel %vm4796_vm14, %v4797_v3, %v4788_v4 }
 0x570   :  { %13124 = vst [vmem:[#allocation29_spill] sm:$0xff] %v11692_v60  ;;  %vm4947_vm4 = vcmp.lt.s32.totalorder %v4946_v27, 2  ;;  %v4952_v6 = vxor.u32 2147483648, %v4935_v36  ;;  %v11702_v29 = vmul.f32 %v11683_v63, %v11687_v16  ;;  %v4799_v17 = vsel %vm4792_vm12, %v4795_v47, %v4798_v45  ;;  %v13132_v47 = vld [vmem:[#allocation2_spill] sm:$0xff] }
 0x571   :  { %13125 = vst [vmem:[#allocation4_spill] sm:$0xff] %v11697_v12  ;;  %v4949_v59 = vxor.u32 2147483648, %v4943_v39  ;;  %v3229_v35 = vmul.f32 %v3228_v8, %v13116_v32  ;;  %v3535_v10 = vmul.f32 -0.001358992, %v13127_v11  ;;  %v3237_v53 = vadd.f32 1.0, %v3236_v58 }
 0x572   :  { %13126 = vst [vmem:[#allocation22_spill] sm:$0xff] %v11702_v29  ;;  %v3378_v7 = vsel %vm10779_vm0, 0, %v13128_v30  ;;  %v3383_v48 = vadd.f32 -0.4999988, %v3382_v37  ;;  %v5269_v4 = vand.u32 2139095040, %v11697_v12  ;;  %vm4944_vm15 = vweird.f32 %v13104_v13  ;;  %v13134_v30 = vld [vmem:[#allocation20_spill] sm:$0xff] }
 0x573   :  { %v11712_v14 = vand.u32 3, %v3240_v33  ;;  %v3390_v44 = vadd.f32 -0.16666654, %v3389_v2  ;;  %v3542_v9 = vmul.f32 -0.00019511016, %v13127_v11  ;;  %v11715_v3 = vmul.f32 30.0, %v3078_v42 }
 0x574   :  { %v11719_v32 = vsel %vm4789_vm1, nan, %v4799_v17  ;;  %vm4948_vm2 = vcmp.eq.s32.totalorder %v4946_v27, 0  ;;  %vm4951_vm6 = vcmp.eq.s32.totalorder %v4946_v27, 2  ;;  %v5270_v24 = vshrl.u32 %v5269_v4, 23 }
 0x575   :  { %13130 = vst [vmem:[#allocation26_spill] sm:$0xff] %v11715_v3  ;;  %v4950_v43 = vsel %vm4948_vm2, %v4935_v36, %v4949_v59  ;;  %v3230_v21 = vadd.f32 1.0, %v3229_v35  ;;  %v3395_v28 = vadd.s32 3, %v3378_v7  ;;  %v3536_v8 = vadd.f32 0.041655596, %v3535_v10 }
 0x576   :  { %13131 = vst [vmem:[#allocation3_spill] sm:$0xff] %v11719_v32  ;;  %v3238_v58 = vmul.f32 %v3237_v53, %v13132_v47  ;;  %v3384_v37 = vmul.f32 %v3383_v48, %v13118_v31  ;;  %v6557_v33 = vadd.s32 4294967169, %v5270_v24  ;;  %v5424_v2 = vand.u32 2139095040, %v11715_v3 }
 0x577   :  { %v4953_v42 = vsel %vm4951_vm6, %v4952_v6, %v4943_v39  ;;  %vm3243_vm0 = vcmp.eq.s32.totalorder %v11712_v14, 0  ;;  %v3391_v19 = vmul.f32 %v3390_v44, %v13118_v31  ;;  %v3543_v45 = vadd.f32 0.008332121, %v3542_v9 }
 0x578   :  { %v4954_v17 = vsel %vm4947_vm4, %v4950_v43, %v4953_v42  ;;  %v11729_v36 = vmul.f32 %v11683_v63, %v11719_v32  ;;  %v5276_v59 = vadd.s32 1, %v6557_v33  ;;  %v5425_v35 = vshrl.u32 %v5424_v2, 23  ;;  %v13139_v42 = vld [vmem:[#allocation27_spill] sm:$0xff] }
 0x579   :  { %v3247_v10 = vxor.u32 2147483648, %v3230_v21  ;;  %v11731_v53 = vand.u32 3, %v3395_v28  ;;  %v3533_v39 = vsel %vm10791_vm3, 0, %v13134_v30  ;;  %v3537_v6 = vmul.f32 %v3536_v8, %v13127_v11 }
 0x57a   :  { %13133 = vst [vmem:[#allocation11_spill] sm:$0xff] %v11729_v36  ;;  %v3244_v7 = vxor.u32 2147483648, %v3238_v58  ;;  %v11737_v31 = vadd.f32 1.0, %v3384_v37  ;;  %vm5277_vm5 = vcmp.gt.s32.totalorder %v5276_v59, 0  ;;  %v6560_v27 = vadd.s32 4294967169, %v5425_v35  ;;  %v13137_v37 = vld [vmem:[#allocation13_spill] sm:$0xff] }
 0x57b   :  { %v3392_v48 = vadd.f32 1.0, %v3391_v19  ;;  %v3544_v4 = vmul.f32 %v3543_v45, %v13127_v11  ;;  %v12862_v44 = vand.u32 2147483647, %v11697_v12  ;;  %v5278_v9 = vsel %vm5277_vm5, %v5276_v59, 0  ;;  %v13140_v35 = vld [vmem:[#allocation18_spill] sm:$0xff] }
 0x57c   :  { %v11743_v24 = vsel %vm4944_vm15, nan, %v4954_v17  ;;  %vm3246_vm8 = vcmp.eq.s32.totalorder %v11712_v14, 2  ;;  %v3550_v43 = vadd.s32 3, %v3533_v39  ;;  %v5280_v28 = vand.u32 31, %v5278_v9 }
 0x57d   :  { %13136 = vst [vmem:[#allocation8_spill] sm:$0xff] %v11743_v24  ;;  %v3248_v8 = vsel %vm3246_vm8, %v3247_v10, %v3238_v58  ;;  %v3538_v47 = vadd.f32 -0.4999988, %v3537_v6  ;;  %v3688_v2 = vsel %vm10832_vm11, 0, %v13137_v37  ;;  %v3690_v19 = vmul.f32 -0.001358992, %v13139_v42 }
 0x57e   :  { %v3245_v45 = vsel %vm3243_vm0, %v3230_v21, %v3244_v7  ;;  %v3402_v59 = vxor.u32 2147483648, %v11737_v31  ;;  %v11753_v13 = vsub.s32 32, %v5280_v28  ;;  %v5431_v17 = vadd.s32 1, %v6560_v27 }
 0x57f   :  { %v3393_v30 = vmul.f32 %v3392_v48, %v13140_v35  ;;  %vm3398_vm3 = vcmp.eq.s32.totalorder %v11731_v53, 0  ;;  %v3545_v58 = vadd.f32 -0.16666654, %v3544_v4  ;;  %v5273_v10 = vand.u32 8388607, %v12862_v44 }
 0x580   :  { %v11759_v34 = vshrl.u32 %v5278_v9, 5  ;;  %v5286_v39 = vshll.u32 %v13098_v46, %v5280_v28  ;;  %v5287_v21 = vshrl.u32 %v13095_v55, %v11753_v13  ;;  %v5289_v6 = vshll.u32 %v13095_v55, %v5280_v28 }
 0x581   :  { %v5290_v7 = vshrl.u32 %v13096_v40, %v11753_v13  ;;  %vm3242_vm11 = vcmp.lt.s32.totalorder %v11712_v14, 2  ;;  %vm3401_vm7 = vcmp.eq.s32.totalorder %v11731_v53, 2  ;;  %v5292_v27 = vshll.u32 %v13096_v40, %v5280_v28 }
 0x582   :  { %v5293_v48 = vshrl.u32 %v13094_v52, %v11753_v13  ;;  %v5295_v4 = vshll.u32 %v13094_v52, %v5280_v28  ;;  %v5296_v9 = vshrl.u32 %v13091_v54, %v11753_v13  ;;  %v3539_v37 = vmul.f32 %v3538_v47, %v13127_v11 }
 0x583   :  { %v11776_v33 = vor.u32 %v5287_v21, %v5286_v39  ;;  %v11778_v35 = vor.u32 %v5290_v7, %v5289_v6  ;;  %vm5432_vm9 = vcmp.gt.s32.totalorder %v5431_v17, 0  ;;  %vm3397_vm13 = vcmp.lt.s32.totalorder %v11731_v53, 2 }
 0x584   :  { %v3697_v44 = vmul.f32 -0.00019511016, %v13139_v42  ;;  %v5294_v36 = vor.u32 %v5293_v48, %v5292_v27  ;;  %v5297_v63 = vor.u32 %v5296_v9, %v5295_v4  ;;  %v5433_v60 = vsel %vm5432_vm9, %v5431_v17, 0 }
 0x585   :  { %v3399_v29 = vxor.u32 2147483648, %v3393_v30  ;;  %v3546_v24 = vmul.f32 %v3545_v58, %v13127_v11  ;;  %v5274_v32 = vor.u32 8388608, %v5273_v10  ;;  %vm5301_vm12 = vcmp.lt.s32.totalorder %v11759_v34, 4 }
 0x586   :  { %vm5298_vm1 = vcmp.lt.s32.totalorder %v11759_v34, 1  ;;  %vm5300_vm10 = vcmp.lt.s32.totalorder %v11759_v34, 3  ;;  %v5311_v47 = vsel %vm5301_vm12, %v5297_v63, 1326507024  ;;  %v12866_v39 = vand.u32 2147483647, %v11715_v3 }
 0x587   :  { %v11789_v21 = vadd.f32 1.0, %v3539_v37  ;;  %v5310_v17 = vsel %vm5298_vm1, %v11776_v33, %v11778_v35  ;;  %v5312_v11 = vsel %vm5300_vm10, %v5294_v36, %v5311_v47  ;;  %v5435_v58 = vand.u32 31, %v5433_v60 }
 0x588   :  { %v3691_v10 = vadd.f32 0.041655596, %v3690_v19  ;;  %v3698_v6 = vadd.f32 0.008332121, %v3697_v44  ;;  %v3705_v7 = vadd.s32 3, %v3688_v2  ;;  %v5284_v27 = vshrl.u32 %v13098_v46, %v11753_v13 }
 0x589   :  { %v3400_v63 = vsel %vm3398_vm3, %v11737_v31, %v3399_v29  ;;  %v3547_v48 = vadd.f32 1.0, %v3546_v24  ;;  %v11802_v4 = vand.u32 3, %v3550_v43  ;;  %vm5299_vm14 = vcmp.lt.s32.totalorder %v11759_v34, 2 }
 0x58a   :  { %v5283_v9 = vshll.u32 %v12908_v5, %v5280_v28  ;;  %v11808_v37 = vsel %vm5299_vm14, %v5310_v17, %v5312_v11  ;;  %v11810_v44 = vshll.u32 %v5274_v32, 8  ;;  %v5428_v2 = vand.u32 8388607, %v12866_v39 }
 0x58b   :  { %v11816_v19 = vsel %vm3242_vm11, %v3245_v45, %v3248_v8  ;;  %v3403_v29 = vsel %vm3401_vm7, %v3402_v59, %v3393_v30  ;;  %v11821_v24 = vsub.s32 32, %v5435_v58  ;;  %v11824_v43 = vmul.f32 %v3691_v10, %v13139_v42  ;;  %v13141_v8 = vld [vmem:[#allocation25_spill] sm:$0xff] }
 0x58c   :  { %v11827_v32 = vmul.f32 %v3698_v6, %v13139_v42  ;;  %v11829_v28 = vand.u32 3, %v3705_v7  ;;  %v5285_v47 = vor.u32 %v5284_v27, %v5283_v9  ;;  %v11833_v14 = vsel %vm3397_vm13, %v3400_v63, %v3403_v29 }
 0x58d   :  { %v11836_v45 = vmul.f32 %v3547_v48, %v13141_v8  ;;  %v5318_v59 = vshrl.u32 %v11808_v37, 16  ;;  %v5315_v17 = vand.u32 65535, %v11810_v44  ;;  %v11842_v11 = vshrl.u32 %v11810_v44, 16 }
 0x58e   :  { %v5429_v10 = vor.u32 8388608, %v5428_v2  ;;  %v5282_v53 = vshrl.u32 %v12908_v5, %v11753_v13  ;;  %v5307_v7 = vsel %vm5301_vm12, %v5294_v36, 920167782  ;;  %v5448_v27 = vshrl.u32 %v13094_v52, %v11821_v24 }
 0x58f   :  { %v5035_v63 = vshll.u32 %v11561_v56, 16  ;;  %v5306_v48 = vsel %vm5298_vm1, %v5285_v47, %v11776_v33  ;;  %v11855_v9 = vshrl.u32 %v5433_v60, 5  ;;  %v5442_v2 = vshrl.u32 %v13095_v55, %v11821_v24 }
 0x590   :  { %v5445_v13 = vshrl.u32 %v13096_v40, %v11821_v24  ;;  %v11861_v29 = vmul.u32 %v5318_v59, %v5315_v17  ;;  %v5447_v36 = vshll.u32 %v13096_v40, %v5435_v58  ;;  %v5450_v8 = vshll.u32 %v13094_v52, %v5435_v58 }
 0x591   :  { %v5451_v39 = vshrl.u32 %v13091_v54, %v11821_v24  ;;  %v5308_v60 = vsel %vm5300_vm10, %v11778_v35, %v5307_v7  ;;  %v5439_v31 = vshrl.u32 %v13098_v46, %v11821_v24  ;;  %v5441_v6 = vshll.u32 %v13098_v46, %v5435_v58 }
 0x592   :  { %v5444_v30 = vshll.u32 %v13095_v55, %v5435_v58  ;;  %v5303_v40 = vsel %vm5301_vm12, %v11778_v35, 2102212464  ;;  %v5317_v52 = vand.u32 65535, %v11808_v37  ;;  %v5449_v16 = vor.u32 %v5448_v27, %v5447_v36 }
 0x593   :  { %v5452_v20 = vor.u32 %v5451_v39, %v5450_v8  ;;  %v5438_v54 = vshll.u32 %v12908_v5, %v5435_v58  ;;  %v11879_v3 = vor.u32 %v5442_v2, %v5441_v6  ;;  %vm5456_vm4 = vcmp.lt.s32.totalorder %v11855_v9, 4 }
 0x594   :  { %v11881_v7 = vor.u32 %v5445_v13, %v5444_v30  ;;  %v5309_v46 = vsel %vm5299_vm14, %v5306_v48, %v5308_v60  ;;  %v5323_v55 = vshll.u32 %v11861_v29, 16  ;;  %v11889_v12 = vshll.u32 %v5429_v10, 8 }
 0x595   :  { %v5466_v35 = vsel %vm5456_vm4, %v5452_v20, 1326507024  ;;  %v5302_v39 = vsel %vm5298_vm1, %v5282_v53, %v5285_v47  ;;  %v5304_v58 = vsel %vm5300_vm10, %v11776_v33, %v5303_v40  ;;  %v11896_v37 = vor.u32 %v5439_v31, %v5438_v54 }
 0x596   :  { %v13142_v30 = vshll.u32 %v11538_v49, 16  ;;  %v5319_v27 = vmul.u32 %v5317_v52, %v5315_v17  ;;  %vm5453_vm2 = vcmp.lt.s32.totalorder %v11855_v9, 1  ;;  %vm5455_vm6 = vcmp.lt.s32.totalorder %v11855_v9, 3 }
 0x597   :  { %v5462_v20 = vsel %vm5456_vm4, %v5449_v16, 920167782  ;;  %v5339_v47 = vand.u32 65535, %v5309_v46  ;;  %v5340_v10 = vshrl.u32 %v5309_v46, 16  ;;  %v5465_v54 = vsel %vm5453_vm2, %v11879_v3, %v11881_v7 }
 0x598   :  { %vm11901_vm15 = vc.u32 %v11597_v15, %v13142_v30  ;;  %v5467_v15 = vsel %vm5455_vm6, %v5449_v16, %v5466_v35  ;;  %vm5327_vm0 = vc.u32 %v5319_v27, %v5323_v55  ;;  %v11916_v40 = vand.u32 65535, %v11889_v12 }
 0x599   :  { %v11919_v33 = vshrl.u32 %v11889_v12, 16  ;;  %v5036_v31 = vshrl.u32 %v11561_v56, 16  ;;  %vm5454_vm5 = vcmp.lt.s32.totalorder %v11855_v9, 2  ;;  %v5461_v46 = vsel %vm5453_vm2, %v11896_v37, %v11879_v3 }
 0x59a   :  { %v5463_v16 = vsel %vm5455_vm6, %v11881_v7, %v5462_v20  ;;  %v5022_v53 = vsel %vm11901_vm15, 1, %v12903_v18  ;;  %v11935_v48 = vsel %vm5299_vm14, %v5302_v39, %v5304_v58  ;;  %v11938_v56 = vmul.u32 %v5317_v52, %v11842_v11 }
 0x59b   :  { %v11942_v2 = vsel %vm5454_vm5, %v5465_v54, %v5467_v15  ;;  %v5037_v13 = vshll.u32 %v11572_v23, 16  ;;  %v5322_v36 = vmul.u32 %v5318_v59, %v11842_v11  ;;  %v5328_v8 = vsel %vm5327_vm0, 1, %v12903_v18 }
 0x59c   :  { %v5341_v60 = vmul.u32 %v5339_v47, %v5315_v17  ;;  %v11947_v35 = vmul.u32 %v5340_v10, %v5315_v17  ;;  %v11951_v34 = vsel %vm5454_vm5, %v5461_v46, %v5463_v16  ;;  %v5024_v52 = vadd.s32 %v5022_v53, %v11603_v38 }
 0x59d   :  { %vm5039_vm8 = vc.u32 %v11554_v1, %v5035_v63  ;;  %v5041_v39 = vadd.s32 %v5035_v63, %v11554_v1  ;;  %v11957_v58 = vmul.u32 %v5339_v47, %v11842_v11  ;;  %v5344_v59 = vmul.u32 %v5340_v10, %v11842_v11 }
 0x59e   :  { %v5473_v30 = vshrl.u32 %v11942_v2, 16  ;;  %v5040_v17 = vsel %vm5039_vm8, 1, %v12903_v18  ;;  %v5325_v6 = vshll.u32 %v11938_v56, 16  ;;  %v13145_v20 = vshrl.u32 %v11501_v0, 16 }
 0x59f   :  { %v5042_v38 = vadd.s32 %v5040_v17, %v11600_v25  ;;  %vm5043_vm3 = vc.u32 %v5041_v39, %v5037_v13  ;;  %v5329_v15 = vadd.s32 %v5323_v55, %v5319_v27  ;;  %v5330_v46 = vadd.s32 %v5328_v8, %v5322_v36 }
 0x5a0   :  { %v5025_v54 = vadd.s32 %v5024_v52, %v13145_v20  ;;  %v5494_v1 = vand.u32 65535, %v11951_v34  ;;  %v5044_v63 = vsel %vm5043_vm3, 1, %v12903_v18  ;;  %v5495_v11 = vshrl.u32 %v11951_v34, 16 }
 0x5a1   :  { %v5046_v47 = vadd.s32 %v5044_v63, %v5042_v38  ;;  %v13146_v10 = vshll.u32 %v11622_v62, 16  ;;  %v5190_v16 = vshll.u32 %v11633_v51, 16  ;;  %v5472_v0 = vand.u32 65535, %v11942_v2 }
 0x5a2   :  { %v11977_v25 = vmul.u32 %v5473_v30, %v11916_v40  ;;  %v13147_v55 = vshrl.u32 %v11538_v49, 16  ;;  %v5038_v36 = vshrl.u32 %v11572_v23, 16  ;;  %v11987_v17 = vadd.s32 %v5041_v39, %v5037_v13 }
 0x5a3   :  { %vm5176_vm11 = vc.u32 %v11651_v61, %v13146_v10  ;;  %v5047_v8 = vadd.s32 %v5046_v47, %v5036_v31  ;;  %v5169_v61 = vshrl.u32 %v11586_v57, 16  ;;  %v5192_v20 = vshll.u32 %v11636_v22, 16 }
 0x5a4   :  { %v11981_v27 = vadd.s32 %v5025_v54, %v13147_v55  ;;  %v5177_v53 = vsel %vm5176_vm11, 1, %v12903_v18  ;;  %vm5194_vm7 = vc.u32 %v11631_v26, %v5190_v16  ;;  %v5196_v38 = vadd.s32 %v5190_v16, %v11631_v26 }
 0x5a5   :  { %v5179_v52 = vadd.s32 %v5177_v53, %v11653_v41  ;;  %v5048_v49 = vadd.s32 %v5047_v8, %v5038_v36  ;;  %v5195_v63 = vsel %vm5194_vm7, 1, %v12903_v18  ;;  %vm5331_vm9 = vc.u32 %v5329_v15, %v5325_v6  ;;  %v13148_v53 = vld [vmem:[#allocation9_spill] sm:$0xff]  ;;  %v13149_v36 = vld [vmem:[#allocation31_spill] sm:$0xff] }
 0x5a6   :  { %vm5051_vm13 = vc.u32 %v11981_v27, %v11987_v17  ;;  %v5197_v57 = vadd.s32 %v5195_v63, %v11642_v50  ;;  %vm5198_vm12 = vc.u32 %v5196_v38, %v5192_v20  ;;  %v5332_v23 = vsel %vm5331_vm9, 1, %v12903_v18 }
 0x5a7   :  { %v5180_v54 = vadd.s32 %v5179_v52, %v5169_v61  ;;  %v12000_v41 = vmul.u32 %v5495_v11, %v11916_v40  ;;  %v5052_v31 = vadd.s32 1, %v5048_v49  ;;  %v5171_v26 = vshrl.u32 %v11622_v62, 16 }
 0x5a8   :  { %v5199_v13 = vsel %vm5198_vm12, 1, %v12903_v18  ;;  %v5191_v39 = vshrl.u32 %v11633_v51, 16  ;;  %v5334_v15 = vadd.s32 %v5332_v23, %v5330_v46  ;;  %v5345_v47 = vshll.u32 %v11947_v35, 16 }
 0x5a9   :  { %v5201_v6 = vadd.s32 %v5199_v13, %v5197_v57  ;;  %v5478_v50 = vshll.u32 %v11977_v25, 16  ;;  %v5053_v10 = vsel %vm5051_vm13, %v5052_v31, %v5048_v49  ;;  %v12007_v16 = vadd.s32 %v5180_v54, %v5171_v26 }
 0x5aa   :  { %v5193_v55 = vshrl.u32 %v11636_v22, 16  ;;  %v13150_v8 = vmul.u32 %v13148_v53, %v13149_v36  ;;  %v5324_v52 = vshrl.u32 %v11861_v29, 16  ;;  %vm5349_vm1 = vc.u32 %v5341_v60, %v5345_v47 }
 0x5ab   :  { %v5202_v62 = vadd.s32 %v5201_v6, %v5191_v39  ;;  %v12014_v51 = vadd.s32 %v5196_v38, %v5192_v20  ;;  %v5347_v46 = vshll.u32 %v11957_v58, 16  ;;  %v5350_v63 = vsel %vm5349_vm1, 1, %v12903_v18 }
 0x5ac   :  { %v5054_v61 = vadd.s32 %v5053_v10, %v13150_v8  ;;  %v5351_v57 = vadd.s32 %v5345_v47, %v5341_v60  ;;  %v5335_v23 = vadd.s32 %v5334_v15, %v5324_v52  ;;  %v5352_v31 = vadd.s32 %v5350_v63, %v5344_v59 }
 0x5ad   :  { %v5203_v54 = vadd.s32 %v5202_v62, %v5193_v55  ;;  %v5474_v22 = vmul.u32 %v5472_v0, %v11916_v40  ;;  %v12020_v26 = vmul.u32 %v5472_v0, %v11919_v33  ;;  %vm5206_vm10 = vc.u32 %v12007_v16, %v12014_v51  ;;  %v13154_v55 = vld [vmem:[#allocation40_spill] sm:$0xff] }
 0x5ae   :  { %v5055_v49 = vadd.s32 536870912, %v5054_v61  ;;  %vm5353_vm14 = vc.u32 %v5351_v57, %v5347_v46  ;;  %v5326_v38 = vshrl.u32 %v11938_v56, 16  ;;  %v5496_v59 = vmul.u32 %v5494_v1, %v11916_v40  ;;  %v13153_v56 = vld [vmem:[#allocation24_spill] sm:$0xff] }
 0x5af   :  { %v5207_v20 = vadd.s32 1, %v5203_v54  ;;  %v5354_v60 = vsel %vm5353_vm14, 1, %v12903_v18  ;;  %vm12028_vm15 = vc.u32 %v5474_v22, %v5478_v50  ;;  %v5346_v0 = vshrl.u32 %v11947_v35, 16 }
 0x5b0   :  { %v12024_v29 = vshrl.u32 %v5055_v49, 30  ;;  %v5356_v39 = vadd.s32 %v5354_v60, %v5352_v31  ;;  %v5484_v6 = vadd.s32 %v5478_v50, %v5474_v22  ;;  %v12037_v10 = vadd.s32 %v5335_v23, %v5326_v38 }
 0x5b1   :  { %v5208_v47 = vsel %vm5206_vm10, %v5207_v20, %v5203_v54  ;;  %v13155_v53 = vmul.u32 %v13153_v56, %v13154_v55  ;;  %v5348_v8 = vshrl.u32 %v11957_v58, 16  ;;  %v5500_v52 = vshll.u32 %v12000_v41, 16 }
 0x5b2   :  { %v5057_v15 = vshll.u32 %v12024_v29, 30  ;;  %v5357_v62 = vadd.s32 %v5356_v39, %v5346_v0  ;;  %v5480_v40 = vshll.u32 %v12020_v26, 16  ;;  %v12048_v35 = vmul.u32 %v5494_v1, %v11919_v33 }
 0x5b3   :  { %v5209_v36 = vadd.s32 %v5208_v47, %v13155_v53  ;;  %v12050_v63 = vadd.s32 %v5351_v57, %v5347_v46  ;;  %v5477_v49 = vmul.u32 %v5473_v30, %v11919_v33  ;;  %v5483_v58 = vsel %vm12028_vm15, 1, %v12903_v18 }
 0x5b4   :  { %v5058_v50 = vsub.s32 %v5054_v61, %v5057_v15  ;;  %v5358_v23 = vadd.s32 %v5357_v62, %v5348_v8  ;;  %vm5486_vm3 = vc.u32 %v5484_v6, %v5480_v40  ;;  %v5359_v1 = vmul.u32 %v11810_v44, %v11935_v48 }
 0x5b5   :  { %v5210_v54 = vadd.s32 536870912, %v5209_v36  ;;  %vm5361_vm8 = vc.u32 %v12037_v10, %v12050_v63  ;;  %vm5504_vm11 = vc.u32 %v5496_v59, %v5500_v52  ;;  %v5437_v2 = vshrl.u32 %v12908_v5, %v11821_v24 }
 0x5b6   :  { %vm5059_vm0 = vcmp.lt.s32.totalorder %v5058_v50, 0  ;;  %v5060_v31 = vsub.s32 0, %v5058_v50  ;;  %v5362_v46 = vadd.s32 1, %v5358_v23  ;;  %v5485_v30 = vadd.s32 %v5483_v58, %v5477_v49 }
 0x5b7   :  { %v12062_v61 = vshrl.u32 %v5210_v54, 30  ;;  %v5506_v22 = vadd.s32 %v5500_v52, %v5496_v59  ;;  %v5487_v13 = vsel %vm5486_vm3, 1, %v12903_v18  ;;  %v3700_v0 = vadd.f32 -0.16666654, %v11827_v32  ;;  %v13156_v54 = vld [vmem:[#allocation14_spill] sm:$0xff] }
 0x5b8   :  { %v5061_v57 = vsel %vm5059_vm0, %v5060_v31, %v5058_v50  ;;  %v5363_v60 = vsel %vm5361_vm8, %v5362_v46, %v5358_v23  ;;  %v5502_v44 = vshll.u32 %v12048_v35, 16  ;;  %v5505_v48 = vsel %vm5504_vm11, 1, %v12903_v18 }
 0x5b9   :  { %v5062_v20 = vclz %v5061_v57  ;;  %v5212_v38 = vshll.u32 %v12062_v61, 30  ;;  %v5364_v39 = vadd.s32 %v5363_v60, %v5359_v1  ;;  %v5457_v24 = vsel %vm5453_vm2, %v5437_v2, %v11896_v37 }
 0x5ba   :  { %v5499_v59 = vmul.u32 %v5495_v11, %v11919_v33  ;;  %v5458_v32 = vsel %vm5456_vm4, %v11881_v7, 2102212464  ;;  %v5489_v56 = vadd.s32 %v5487_v13, %v5485_v30  ;;  %vm5508_vm7 = vc.u32 %v5506_v22, %v5502_v44 }
 0x5bb   :  { %v6552_v6 = vadd.s32 4294967294, %v5062_v20  ;;  %v12077_v15 = vsub.s32 %v5209_v36, %v5212_v38  ;;  %v5365_v47 = vadd.s32 536870912, %v5364_v39  ;;  %v5479_v33 = vshrl.u32 %v11977_v25, 16  ;;  %v13157_v38 = vld [vmem:[#allocation32_spill] sm:$0xff] }
 0x5bc   :  { %v5507_v37 = vadd.s32 %v5505_v48, %v5499_v59  ;;  %v5509_v34 = vsel %vm5508_vm7, 1, %v12903_v18  ;;  %v5050_v11 = vadd.s32 %v11987_v17, %v11981_v27  ;;  %v5459_v52 = vsel %vm5455_vm6, %v11879_v3, %v5458_v32 }
 0x5bd   :  { %vm6553_vm9 = vcmp.lt.s32.totalorder %v6552_v6, 0  ;;  %vm5214_vm13 = vcmp.lt.s32.totalorder %v12077_v15, 0  ;;  %v5215_v55 = vsub.s32 0, %v12077_v15  ;;  %v12084_v8 = vshrl.u32 %v5365_v47, 30 }
 0x5be   :  { %v5065_v53 = vsel %vm6553_vm9, 0, %v6552_v6  ;;  %v5490_v58 = vadd.s32 %v5489_v56, %v5479_v33  ;;  %vm3394_vm4 = vweird.f32 %v13156_v54  ;;  %v5511_v1 = vadd.s32 %v5509_v34, %v5507_v37 }
 0x5bf   :  { %v5066_v7 = vsub.s32 32, %v5065_v53  ;;  %v5070_v36 = vsub.s32 4294967266, %v5065_v53  ;;  %v5216_v62 = vsel %vm5214_vm13, %v5215_v55, %v12077_v15  ;;  %v5367_v49 = vshll.u32 %v12084_v8, 30 }
 0x5c0   :  { %v5217_v40 = vclz %v5216_v62  ;;  %v5067_v25 = vshll.u32 %v5058_v50, %v5065_v53  ;;  %v3693_v27 = vadd.f32 -0.4999988, %v11824_v43  ;;  %v3701_v17 = vmul.f32 %v3700_v0, %v13139_v42 }
 0x5c1   :  { %v5068_v23 = vshrl.u32 %v5050_v11, %v5066_v7  ;;  %v5071_v31 = vadd.s32 127, %v5070_v36  ;;  %v5501_v2 = vshrl.u32 %v12000_v41, 16  ;;  %v12099_v3 = vsub.s32 %v5364_v39, %v5367_v49  ;;  %v6570_v7 = vld [vmem:[%s12717_s5 + $0x20] ss:$8 sm:$0xf] }
 0x5c2   :  { %v6555_v46 = vadd.s32 4294967294, %v5217_v40  ;;  %v5481_v20 = vshrl.u32 %v12020_v26, 16  ;;  %vm4958_vm2 = vcmp.lt.s32.totalorder %v13157_v38, 0  ;;  %v5460_v50 = vsel %vm5454_vm5, %v5457_v24, %v5459_v52  ;;  %v13158_v36 = vld [vmem:[#allocation33_spill] sm:$0xff] }
 0x5c3   :  { %v5069_v30 = vor.u32 %v5068_v23, %v5067_v25  ;;  %v5072_v57 = vshll.u32 %v5071_v31, 23  ;;  %v5503_v60 = vshrl.u32 %v12048_v35, 16  ;;  %v5512_v43 = vadd.s32 %v5511_v1, %v5501_v2  ;;  %v6563_v35 = vld [vmem:[%s12717_s5 + $0x1] ss:$8 sm:$0xf] }
 0x5c4   :  { %vm6556_vm6 = vcmp.lt.s32.totalorder %v6555_v46, 0  ;;  %vm5369_vm12 = vcmp.lt.s32.totalorder %v12099_v3, 0  ;;  %v12107_v41 = vadd.s32 %v5490_v58, %v5481_v20  ;;  %v5205_v39 = vadd.s32 %v12014_v51, %v12007_v16  ;;  %v6564_v16 = vld [vmem:[%s12717_s5 + $0x2] ss:$8 sm:$0xf] }
 0x5c5   :  { %v5073_v13 = vor.u32 4788187, %v5072_v57  ;;  %v5220_v0 = vsel %vm6556_vm6, 0, %v6555_v46  ;;  %v5370_v59 = vsub.s32 0, %v12099_v3  ;;  %v5076_v9 = vcvt.s32.f32 %v5069_v30  ;;  %v13162_v1 = vld [vmem:[#allocation10_spill] sm:$0xff] }
 0x5c6   :  { %v5221_v48 = vsub.s32 32, %v5220_v0  ;;  %v5225_v26 = vsub.s32 4294967266, %v5220_v0  ;;  %v12112_v24 = vadd.s32 %v5506_v22, %v5502_v44  ;;  %v5513_v32 = vadd.s32 %v5512_v43, %v5503_v60  ;;  %v6569_v44 = vld [vmem:[%s12717_s5 + $0x7] ss:$8 sm:$0xf] }
 0x5c7   :  { %v5074_v6 = vand.u32 2147483647, %v5073_v13  ;;  %v5222_v47 = vshll.u32 %v12077_v15, %v5220_v0  ;;  %v5371_v37 = vsel %vm5369_vm12, %v5370_v59, %v12099_v3  ;;  %v12130_v15 = vsel %vm3394_vm4, nan, %v11833_v14 }
 0x5c8   :  { %v5223_v56 = vshrl.u32 %v5205_v39, %v5221_v48  ;;  %v5226_v55 = vadd.s32 127, %v5225_v26  ;;  %v5372_v53 = vclz %v5371_v37  ;;  %vm5516_vm5 = vc.u32 %v12107_v41, %v12112_v24  ;;  %v13163_v39 = vld [vmem:[#allocation16_spill] sm:$0xff] }
 0x5c9   :  { %v5077_v51 = vmul.f32 %v5076_v9, %v5074_v6  ;;  %v5517_v22 = vadd.s32 1, %v5513_v32  ;;  %v3702_v33 = vadd.f32 1.0, %v3701_v17  ;;  %vm5113_vm1 = vcmp.lt.s32.totalorder %v13158_v36, 0 }
 0x5ca   :  { %v5224_v34 = vor.u32 %v5223_v56, %v5222_v47  ;;  %v5227_v11 = vshll.u32 %v5226_v55, 23  ;;  %v3694_v62 = vmul.f32 %v3693_v27, %v13139_v42  ;;  %v5514_v52 = vmul.u32 %v11889_v12, %v5460_v50  ;;  %v13164_v47 = vld [vmem:[#allocation6_spill] sm:$0xff]  ;;  %v12175_v55 = vpop.permute.xlu2 %5582 }
 0x5cb   :  { %v5078_v40 = vxor.u32 2147483648, %v5077_v51  ;;  %v6558_v49 = vadd.s32 4294967294, %v5372_v53  ;;  %vm3553_vm10 = vcmp.eq.s32.totalorder %v11802_v4, 0  ;;  %v13159_v14 = vand.u32 2147483647, %v13157_v38 }
 0x5cc   :  { %v5228_v54 = vor.u32 4788187, %v5227_v11  ;;  %v5518_v25 = vsel %vm5516_vm5, %v5517_v22, %v5513_v32  ;;  %v5759_v23 = vmul.f32 %v6569_v44, %v6563_v35  ;;  %v5760_v31 = vmul.f32 %v6570_v7, %v6564_v16  ;;  %v6568_v35 = vld [vmem:[%s12717_s5 + $0x6] ss:$8 sm:$0xf] }
 0x5cd   :  { %vm12141_vm14 = vcmp.le.f32.partialorder %v13159_v14, 0.7853982  ;;  %v5079_v42 = vsel %vm4958_vm2, %v5078_v40, %v5077_v51  ;;  %vm6559_vm15 = vcmp.lt.s32.totalorder %v6558_v49, 0  ;;  %v5519_v12 = vadd.s32 %v5518_v25, %v5514_v52 }
 0x5ce   :  { %vm3556_vm0 = vcmp.eq.s32.totalorder %v11802_v4, 2  ;;  %v3703_v27 = vmul.f32 %v3702_v33, %v13162_v1  ;;  %v5229_v17 = vand.u32 2147483647, %v5228_v54  ;;  %v5231_v46 = vcvt.s32.f32 %v5224_v34 }
 0x5cf   :  { %v5375_v2 = vsel %vm6559_vm15, 0, %v6558_v49  ;;  %vm3552_vm8 = vcmp.lt.s32.totalorder %v11802_v4, 2  ;;  %v12156_v30 = vsel %vm12141_vm14, %v13157_v38, %v5079_v42  ;;  %v5360_v57 = vadd.s32 %v12050_v63, %v12037_v10  ;;  %v6567_v49 = vld [vmem:[%s12717_s5 + $0x5] ss:$8 sm:$0xf] }
 0x5d0   :  { %v5376_v20 = vsub.s32 32, %v5375_v2  ;;  %v5380_v50 = vsub.s32 4294967266, %v5375_v2  ;;  %v3554_v60 = vxor.u32 2147483648, %v11836_v45  ;;  %v3695_v43 = vadd.f32 1.0, %v3694_v62 }
 0x5d1   :  { %v5232_v13 = vmul.f32 %v5231_v46, %v5229_v17  ;;  %v5520_v0 = vadd.s32 536870912, %v5519_v12  ;;  %vm3239_vm3 = vweird.f32 %v13163_v39  ;;  %v5377_v48 = vshll.u32 %v12099_v3, %v5375_v2  ;;  %v13169_v2 = vld [vmem:[#allocation15_spill] sm:$0xff] }
 0x5d2   :  { %v5378_v26 = vshrl.u32 %v5360_v57, %v5376_v20  ;;  %v5381_v59 = vadd.s32 127, %v5380_v50  ;;  %v5761_v6 = vadd.f32 %v5760_v31, %v5759_v23  ;;  %v3709_v9 = vxor.u32 2147483648, %v3703_v27  ;;  %v5664_v20 = vpop.permute.xlu1 %5663 }
 0x5d3   :  { %v12165_v32 = vmul.f32 %v12156_v30, %v12156_v30  ;;  %v5233_v10 = vxor.u32 2147483648, %v5232_v13  ;;  %v12167_v63 = vshrl.u32 %v5520_v0, 30  ;;  %vm3549_vm11 = vweird.f32 %v13164_v47 }
 0x5d4   :  { %vm3707_vm7 = vcmp.lt.s32.totalorder %v11829_v28, 2  ;;  %vm3708_vm9 = vcmp.eq.s32.totalorder %v11829_v28, 0  ;;  %v5379_v3 = vor.u32 %v5378_v26, %v5377_v48  ;;  %v5382_v56 = vshll.u32 %v5381_v59, 23 }
 0x5d5   :  { %v3712_v37 = vxor.u32 2147483648, %v3695_v43  ;;  %v13165_v16 = vand.u32 2147483647, %v13158_v36  ;;  %v5234_v53 = vsel %vm5113_vm1, %v5233_v10, %v5232_v13  ;;  %v5522_v22 = vshll.u32 %v12167_v63, 30  ;;  %v5668_v13 = vpop.permute.xlu2 %5667 }
 0x5d6   :  { %v3555_v44 = vsel %vm3553_vm10, %v11789_v21, %v3554_v60  ;;  %v5383_v34 = vor.u32 4788187, %v5382_v56  ;;  %v5762_v11 = vmul.f32 %v6568_v35, %v5761_v6  ;;  %v3710_v7 = vsel %vm3708_vm9, %v3695_v43, %v3709_v9 }
 0x5d7   :  { %vm12179_vm13 = vcmp.le.f32.partialorder %v13165_v16, 0.7853982  ;;  %v5092_v62 = vmul.f32 -0.00019511016, %v12165_v32  ;;  %v12199_v40 = vsub.s32 %v5519_v12, %v5522_v22  ;;  %v13168_v14 = vxor.u32 2147483648, %v11789_v21 }
 0x5d8   :  { %v12192_v33 = vsel %vm12179_vm13, %v13158_v36, %v5234_v53  ;;  %vm3711_vm4 = vcmp.eq.s32.totalorder %v11829_v28, 2  ;;  %v5384_v25 = vand.u32 2147483647, %v5383_v34  ;;  %v5386_v23 = vcvt.s32.f32 %v5379_v3  ;;  %v13170_v28 = vld [vmem:[#allocation4_spill] sm:$0xff] }
 0x5d9   :  { %v12197_v52 = vmul.f32 %v12192_v33, %v12192_v33  ;;  %v3558_v54 = vsel %vm3556_vm0, %v13168_v14, %v11836_v45  ;;  %v3713_v31 = vsel %vm3711_vm4, %v3712_v37, %v3703_v27  ;;  %vm5524_vm6 = vcmp.lt.s32.totalorder %v12199_v40, 0  ;;  %v13174_v37 = vld [vmem:[#allocation34_spill] sm:$0xff]  ;;  %v13175_v14 = vld [vmem:[#allocation12_spill] sm:$0xff] }
 0x5da   :  { %v3559_v42 = vsel %vm3552_vm8, %v3555_v44, %v3558_v54  ;;  %v5525_v12 = vsub.s32 0, %v12199_v40  ;;  %v3714_v1 = vsel %vm3707_vm7, %v3710_v7, %v3713_v31  ;;  %v5387_v17 = vmul.f32 %v5386_v23, %v5384_v25  ;;  %v13176_v25 = vld [vmem:[#allocation35_spill] sm:$0xff]  ;;  %v12285_v58 = vpop.permute.xlu1 %5671 }
 0x5db   :  { %v5247_v21 = vmul.f32 -0.00019511016, %v12197_v52  ;;  %v5763_v46 = vadd.f32 %v6567_v49, %v5762_v11  ;;  %v12220_v45 = vsel %vm3239_vm3, nan, %v11816_v19  ;;  %vm3704_vm12 = vweird.f32 %v13169_v2 }
 0x5dc   :  { %v5093_v4 = vadd.f32 0.008332121, %v5092_v62  ;;  %v5526_v27 = vsel %vm5524_vm6, %v5525_v12, %v12199_v40  ;;  %v12226_v57 = vmul.f32 %v12175_v55, %v12130_v15  ;;  %vm5268_vm5 = vcmp.lt.s32.totalorder %v13170_v28, 0  ;;  %v13177_v12 = vld [vmem:[#allocation36_spill] sm:$0xff] }
 0x5dd   :  { %v5388_v50 = vxor.u32 2147483648, %v5387_v17  ;;  %v5527_v60 = vclz %v5526_v27  ;;  %v12231_v43 = vsel %vm3549_vm11, nan, %v3559_v42  ;;  %v12233_v19 = vsel %vm3704_vm12, nan, %v3714_v1 }
 0x5de   :  { %v5080_v0 = vsub.s32 4, %v12024_v29  ;;  %v5085_v39 = vmul.f32 -0.001358992, %v12165_v32  ;;  %v5248_v48 = vadd.f32 0.008332121, %v5247_v21  ;;  %v5764_v6 = vmul.f32 0.5, %v5763_v46 }
 0x5df   :  { %v5389_v26 = vsel %vm5268_vm5, %v5388_v50, %v5387_v17  ;;  %v6561_v59 = vadd.s32 4294967294, %v5527_v60  ;;  %v5678_v9 = vmul.f32 %v5664_v20, %v12220_v45  ;;  %v5679_v10 = vmul.f32 %v5664_v20, %v12130_v15 }
 0x5e0   :  { %v5094_v35 = vmul.f32 %v5093_v4, %v12165_v32  ;;  %v13171_v47 = vand.u32 2147483647, %v13170_v28  ;;  %v5680_v56 = vmul.f32 %v5664_v20, %v12231_v43  ;;  %v5682_v16 = vmul.f32 %v5668_v13, %v13174_v37 }
 0x5e1   :  { %v5240_v53 = vmul.f32 -0.001358992, %v12197_v52  ;;  %vm6562_vm15 = vcmp.lt.s32.totalorder %v6561_v59, 0  ;;  %v5681_v22 = vmul.f32 %v5664_v20, %v12233_v19  ;;  %v5081_v15 = vsel %vm4958_vm2, %v5080_v0, %v12024_v29  ;;  %v5738_v29 = vld [vmem:[%s12717_s5] ss:$8 sm:$0xf] }
 0x5e2   :  { %vm12244_vm10 = vcmp.le.f32.partialorder %v13171_v47, 0.7853982  ;;  %v5530_v34 = vsel %vm6562_vm15, 0, %v6561_v59  ;;  %v5086_v11 = vadd.f32 0.041655596, %v5085_v39  ;;  %v5249_v7 = vmul.f32 %v5248_v48, %v12197_v52 }
 0x5e3   :  { %v12258_v44 = vsel %vm12244_vm10, %v13170_v28, %v5389_v26  ;;  %v5531_v62 = vsub.s32 32, %v5530_v34  ;;  %v5765_v49 = vmul.f32 -0.5, %v5764_v6  ;;  %v5683_v54 = vmul.f32 %v5668_v13, %v13175_v14 }
 0x5e4   :  { %v5684_v23 = vmul.f32 %v5668_v13, %v13176_v25  ;;  %v5095_v42 = vadd.f32 -0.16666654, %v5094_v35  ;;  %v5515_v31 = vadd.s32 %v12112_v24, %v12107_v41  ;;  %v5685_v1 = vmul.f32 %v5668_v13, %v13177_v12  ;;  %v6572_v25 = vld [vmem:[%s12717_s5 + $0x22] ss:$8 sm:$0xf] }
 0x5e5   :  { %v12269_v21 = vadd.f32 %v5682_v16, %v5678_v9  ;;  %v5241_v17 = vadd.f32 0.041655596, %v5240_v53  ;;  %v12273_v46 = vmul.f32 %v12258_v44, %v12258_v44  ;;  %v5083_v2 = vsel %vm12141_vm14, 0, %v5081_v15  ;;  %v13178_v16 = vld [vmem:[#allocation26_spill] sm:$0xff] }
 0x5e6   :  { %v5235_v4 = vsub.s32 4, %v12062_v61  ;;  %v5533_v27 = vshrl.u32 %v5515_v31, %v5531_v62  ;;  %v5535_v41 = vsub.s32 4294967266, %v5530_v34  ;;  %v5087_v24 = vmul.f32 %v5086_v11, %v12165_v32  ;;  %v6565_v53 = vld [vmem:[%s12717_s5 + $0x3] ss:$8 sm:$0xf] }
 0x5e7   :  { %v5250_v20 = vadd.f32 -0.16666654, %v5249_v7  ;;  %v5766_v50 = vmul.f32 0.01968697, %v5765_v49  ;;  %v5768_v60 = vmul.f32 51.503937, %v5738_v29  ;;  %v12279_v13 = vadd.f32 %v5683_v54, %v5679_v10 }
 0x5e8   :  { %v5096_v0 = vmul.f32 %v5095_v42, %v12165_v32  ;;  %v5532_v39 = vshll.u32 %v12199_v40, %v5530_v34  ;;  %v5536_v48 = vadd.s32 127, %v5535_v41  ;;  %v12283_v26 = vadd.f32 %v5684_v23, %v5680_v56  ;;  %v6566_v15 = vld [vmem:[%s12717_s5 + $0x4] ss:$8 sm:$0xf] }
 0x5e9   :  { %v5100_v59 = vadd.s32 3, %v5083_v2  ;;  %v5242_v6 = vmul.f32 %v5241_v17, %v12197_v52  ;;  %v5402_v9 = vmul.f32 -0.00019511016, %v12273_v46  ;;  %v5236_v35 = vsel %vm5113_vm1, %v5235_v4, %v12062_v61  ;;  %v6571_v61 = vld [vmem:[%s12717_s5 + $0x21] ss:$8 sm:$0xf] }
 0x5ea   :  { %v5395_v10 = vmul.f32 -0.001358992, %v12273_v46  ;;  %v5534_v47 = vor.u32 %v5533_v27, %v5532_v39  ;;  %v5537_v37 = vshll.u32 %v5536_v48, 23  ;;  %vm5423_vm2 = vcmp.lt.s32.totalorder %v13178_v16, 0  ;;  %v13179_v62 = vld [vmem:[#allocation23_spill] sm:$0xff]  ;;  %v13180_v23 = vld [vmem:[#allocation30_spill] sm:$0xff] }
 0x5eb   :  { %v5088_v40 = vadd.f32 -0.4999988, %v5087_v24  ;;  %v5251_v56 = vmul.f32 %v5250_v20, %v12197_v52  ;;  %v5767_v34 = vmul.f32 %v5766_v50, %v5738_v29  ;;  %v5769_v11 = vmul.f32 %v5768_v60, %v5738_v29  ;;  %v13181_v39 = vld [vmem:[#allocation3_spill] sm:$0xff] }
 0x5ec   :  { %v12304_v7 = vadd.f32 %v5685_v1, %v5681_v22  ;;  %v12308_v49 = vmul.f32 %v12285_v58, %v13179_v62  ;;  %v5097_v14 = vadd.f32 1.0, %v5096_v0  ;;  %v5538_v54 = vor.u32 4788187, %v5537_v37 }
 0x5ed   :  { %v12315_v42 = vmul.f32 %v12285_v58, %v13180_v23  ;;  %v12317_v31 = vand.u32 3, %v5100_v59  ;;  %v5243_v12 = vadd.f32 -0.4999988, %v5242_v6  ;;  %v5403_v29 = vadd.f32 0.008332121, %v5402_v9 }
 0x5ee   :  { %v5238_v22 = vsel %vm12179_vm13, 0, %v5236_v35  ;;  %v5396_v1 = vadd.f32 0.041655596, %v5395_v10  ;;  %v5539_v17 = vand.u32 2147483647, %v5538_v54  ;;  %v5541_v2 = vcvt.s32.f32 %v5534_v47 }
 0x5ef   :  { %v5089_v4 = vmul.f32 %v5088_v40, %v12165_v32  ;;  %v5252_v27 = vadd.f32 1.0, %v5251_v56  ;;  %v5390_v41 = vsub.s32 4, %v12084_v8  ;;  %v5770_v24 = vadd.f32 %v5769_v11, %v5767_v34 }
 0x5f0   :  { %v5098_v20 = vmul.f32 %v5097_v14, %v12156_v30  ;;  %v5542_v50 = vmul.f32 %v5541_v2, %v5539_v17  ;;  %v6084_v60 = vmul.f32 %v6571_v61, %v6565_v53  ;;  %v6085_v0 = vmul.f32 %v6572_v25, %v6566_v15 }
 0x5f1   :  { %v12326_v48 = vmul.f32 %v12285_v58, %v13181_v39  ;;  %v5244_v51 = vmul.f32 %v5243_v12, %v12197_v52  ;;  %v5404_v59 = vmul.f32 %v5403_v29, %v12273_v46  ;;  %v5545_v6 = vsub.s32 4, %v12167_v63 }
 0x5f2   :  { %v5255_v32 = vadd.s32 3, %v5238_v22  ;;  %v5397_v9 = vmul.f32 %v5396_v1, %v12273_v46  ;;  %v13182_v35 = vand.u32 2147483647, %v13178_v16  ;;  %v5543_v10 = vxor.u32 2147483648, %v5542_v50 }
 0x5f3   :  { %v5090_v47 = vadd.f32 1.0, %v5089_v4  ;;  %vm5102_vm14 = vcmp.lt.s32.totalorder %v12317_v31, 2  ;;  %v5253_v37 = vmul.f32 %v5252_v27, %v12192_v33  ;;  %v12340_v52 = vmul.f32 6.2831855, %v5770_v24 }
 0x5f4   :  { %vm12334_vm1 = vcmp.le.f32.partialorder %v13182_v35, 0.7853982  ;;  %v5104_v40 = vxor.u32 2147483648, %v5098_v20  ;;  %v5391_v56 = vsel %vm5268_vm5, %v5390_v41, %v12084_v8  ;;  %v5544_v53 = vsel %vm5423_vm2, %v5543_v10, %v5542_v50  ;;  %v13186_v10 = vld [vmem:[#allocation8_spill] sm:$0xff] }
 0x5f5   :  { %v6086_v15 = vadd.f32 %v6085_v0, %v6084_v60  ;;  %v5245_v61 = vadd.f32 1.0, %v5244_v51  ;;  %v5405_v34 = vadd.f32 -0.16666654, %v5404_v59  ;;  %v5546_v11 = vsel %vm5423_vm2, %v5545_v6, %v12167_v63 }
 0x5f6   :  { %v12353_v33 = vsel %vm12334_vm1, %v13178_v16, %v5544_v53  ;;  %vm5103_vm0 = vcmp.eq.s32.totalorder %v12317_v31, 0  ;;  %v5256_v62 = vand.u32 3, %v5255_v32  ;;  %v5398_v14 = vadd.f32 -0.4999988, %v5397_v9 }
 0x5f7   :  { %v12358_v8 = vmul.f32 %v12353_v33, %v12353_v33  ;;  %vm5099_vm8 = vweird.f32 %v13157_v38  ;;  %v5107_v54 = vxor.u32 2147483648, %v5090_v47  ;;  %v5259_v25 = vxor.u32 2147483648, %v5253_v37 }
 0x5f8   :  { %v5393_v63 = vsel %vm12244_vm10, 0, %v5391_v56  ;;  %v5775_v23 = vand.u32 2139095040, %v12340_v52  ;;  %v5105_v12 = vsel %vm5103_vm0, %v5090_v47, %v5104_v40  ;;  %vm5106_vm3 = vcmp.eq.s32.totalorder %v12317_v31, 2 }
 0x5f9   :  { %vm5254_vm11 = vweird.f32 %v13158_v36  ;;  %v5548_v29 = vsel %vm12334_vm1, 0, %v5546_v11  ;;  %v12368_v22 = vmul.f32 -6.2831855, %v6086_v15  ;;  %v5262_v1 = vxor.u32 2147483648, %v5245_v61 }
 0x5fa   :  { %v5406_v17 = vmul.f32 %v5405_v34, %v12273_v46  ;;  %v12879_v2 = vand.u32 2147483647, %v12340_v52  ;;  %v5776_v4 = vshrl.u32 %v5775_v23, 23  ;;  %vm5258_vm7 = vcmp.eq.s32.totalorder %v5256_v62, 0 }
 0x5fb   :  { %13185 = vst [vmem:[#allocation19_spill] sm:$0xff] %v12368_v22  ;;  %v5399_v3 = vmul.f32 %v5398_v14, %v12273_v46  ;;  %v5410_v27 = vadd.s32 3, %v5393_v63  ;;  %v5557_v41 = vmul.f32 -0.00019511016, %v12358_v8  ;;  %v5108_v24 = vsel %vm5106_vm3, %v5107_v54, %v5098_v20 }
 0x5fc   :  { %v5260_v50 = vsel %vm5258_vm7, %v5245_v61, %v5259_v25  ;;  %v5565_v60 = vadd.s32 3, %v5548_v29  ;;  %v6573_v0 = vadd.s32 4294967169, %v5776_v4  ;;  %v5109_v39 = vsel %vm5102_vm14, %v5105_v12, %v5108_v24 }
 0x5fd   :  { %vm5257_vm9 = vcmp.lt.s32.totalorder %v5256_v62, 2  ;;  %vm5261_vm13 = vcmp.eq.s32.totalorder %v5256_v62, 2  ;;  %v6091_v51 = vand.u32 2139095040, %v12368_v22  ;;  %v5407_v6 = vadd.f32 1.0, %v5406_v17 }
 0x5fe   :  { %v5263_v59 = vsel %vm5261_vm13, %v5262_v1, %v5253_v37  ;;  %v5779_v32 = vand.u32 8388607, %v12879_v2  ;;  %v5782_v46 = vadd.s32 1, %v6573_v0  ;;  %v12379_v35 = vadd.f32 1.0, %v5399_v3 }
 0x5ff   :  { %v5264_v9 = vsel %vm5257_vm9, %v5260_v50, %v5263_v59  ;;  %v5550_v20 = vmul.f32 -0.001358992, %v12358_v8  ;;  %v5558_v30 = vadd.f32 0.008332121, %v5557_v41  ;;  %v12384_v31 = vmul.f32 %v12285_v58, %v13186_v10 }
 0x600   :  { %v12386_v47 = vand.u32 3, %v5410_v27  ;;  %v12388_v40 = vand.u32 3, %v5565_v60  ;;  %vm5783_vm4 = vcmp.gt.s32.totalorder %v5782_v46, 0  ;;  %v12392_v37 = vsel %vm5099_vm8, nan, %v5109_v39 }
 0x601   :  { %v5784_v56 = vsel %vm5783_vm4, %v5782_v46, 0  ;;  %v12878_v53 = vand.u32 2147483647, %v12368_v22  ;;  %v6092_v15 = vshrl.u32 %v6091_v51, 23  ;;  %v12397_v61 = vsel %vm5254_vm11, nan, %v5264_v9 }
 0x602   :  { %v12400_v58 = vmul.f32 %v5407_v6, %v12258_v44  ;;  %v5780_v34 = vor.u32 8388608, %v5779_v32  ;;  %v5786_v11 = vand.u32 31, %v5784_v56  ;;  %v5551_v14 = vadd.f32 0.041655596, %v5550_v20 }
 0x603   :  { %v5559_v38 = vmul.f32 %v5558_v30, %v12358_v8  ;;  %v5785_v54 = vshrl.u32 %v5784_v56, 5  ;;  %v13187_v23 = vmov 2475754826   ;;  %v13188_v29 = vmov 2131351028  }
 0x604   :  { %v5787_v25 = vsub.s32 32, %v5786_v11  ;;  %v5789_v63 = vshll.u32 %v12908_v5, %v5786_v11  ;;  %v5792_v12 = vshll.u32 %v13187_v23, %v5786_v11  ;;  %v5795_v36 = vshll.u32 %v13188_v29, %v5786_v11 }
 0x605   :  { %v13189_v1 = vmov 2102212464   ;;  %v13190_v4 = vmov 920167782   ;;  %v6579_v3 = vadd.s32 4294967169, %v6092_v15  ;;  %v12414_v60 = vshll.u32 %v5780_v34, 8 }
 0x606   :  { %v5798_v17 = vshll.u32 %v13189_v1, %v5786_v11  ;;  %v5801_v44 = vshll.u32 %v13190_v4, %v5786_v11  ;;  %v6095_v27 = vand.u32 8388607, %v12878_v53  ;;  %v5790_v41 = vshrl.u32 %v13187_v23, %v5787_v25 }
 0x607   :  { %v5793_v24 = vshrl.u32 %v13188_v29, %v5787_v25  ;;  %v5796_v50 = vshrl.u32 %v13189_v1, %v5787_v25  ;;  %v5552_v0 = vmul.f32 %v5551_v14, %v12358_v8  ;;  %v5560_v39 = vadd.f32 -0.16666654, %v5559_v38 }
 0x608   :  { %v5799_v51 = vshrl.u32 %v13190_v4, %v5787_v25  ;;  %v13191_v59 = vmov 1326507024   ;;  %v5791_v32 = vor.u32 %v5790_v41, %v5789_v63  ;;  %vm5804_vm6 = vcmp.lt.s32.totalorder %v5785_v54, 1 }
 0x609   :  { %v5802_v6 = vshrl.u32 %v13191_v59, %v5787_v25  ;;  %v5794_v46 = vor.u32 %v5793_v24, %v5792_v12  ;;  %v5797_v9 = vor.u32 %v5796_v50, %v5795_v36  ;;  %v6096_v56 = vor.u32 8388608, %v6095_v27 }
 0x60a   :  { %v5800_v20 = vor.u32 %v5799_v51, %v5798_v17  ;;  %v6098_v15 = vadd.s32 1, %v6579_v3  ;;  %v5788_v11 = vshrl.u32 %v12908_v5, %v5787_v25  ;;  %vm5805_vm12 = vcmp.lt.s32.totalorder %v5785_v54, 2 }
 0x60b   :  { %v5803_v30 = vor.u32 %v5802_v6, %v5801_v44  ;;  %vm5806_vm5 = vcmp.lt.s32.totalorder %v5785_v54, 3  ;;  %vm5807_vm10 = vcmp.lt.s32.totalorder %v5785_v54, 4  ;;  %v5553_v34 = vadd.f32 -0.4999988, %v5552_v0 }
 0x60c   :  { %v5809_v14 = vsel %vm5807_vm10, %v5797_v9, 2102212464  ;;  %v5812_v38 = vsel %vm5804_vm6, %v5791_v32, %v5794_v46  ;;  %v5813_v53 = vsel %vm5807_vm10, %v5800_v20, 920167782  ;;  %v5561_v2 = vmul.f32 %v5560_v39, %v12358_v8 }
 0x60d   :  { %v5814_v63 = vsel %vm5806_vm5, %v5797_v9, %v5813_v53  ;;  %v5821_v12 = vand.u32 65535, %v12414_v60  ;;  %v5822_v36 = vshrl.u32 %v12414_v60, 16  ;;  %v5816_v25 = vsel %vm5804_vm6, %v5794_v46, %v5797_v9 }
 0x60e   :  { %v5815_v17 = vsel %vm5805_vm12, %v5812_v38, %v5814_v63  ;;  %v5817_v44 = vsel %vm5807_vm10, %v5803_v30, 1326507024  ;;  %vm6099_vm15 = vcmp.gt.s32.totalorder %v6098_v15, 0  ;;  %v5808_v3 = vsel %vm5804_vm6, %v5788_v11, %v5791_v32 }
 0x60f   :  { %v5810_v27 = vsel %vm5806_vm5, %v5794_v46, %v5809_v14  ;;  %v5818_v41 = vsel %vm5806_vm5, %v5800_v20, %v5817_v44  ;;  %v5845_v24 = vand.u32 65535, %v5815_v17  ;;  %v12431_v50 = vmul.f32 %v5553_v34, %v12358_v8 }
 0x610   :  { %v5819_v53 = vsel %vm5805_vm12, %v5816_v25, %v5818_v41  ;;  %v5846_v0 = vshrl.u32 %v5815_v17, 16  ;;  %v12434_v39 = vshll.u32 %v6096_v56, 8  ;;  %v5562_v51 = vadd.f32 1.0, %v5561_v2 }
 0x611   :  { %v5823_v6 = vand.u32 65535, %v5819_v53  ;;  %v5824_v9 = vshrl.u32 %v5819_v53, 16  ;;  %v6100_v30 = vsel %vm6099_vm15, %v6098_v15, 0  ;;  %v12437_v38 = vsel %vm5805_vm12, %v5808_v3, %v5810_v27 }
 0x612   :  { %v5847_v32 = vmul.u32 %v5845_v24, %v5821_v12  ;;  %v5848_v46 = vmul.u32 %v5846_v0, %v5821_v12  ;;  %v5849_v11 = vmul.u32 %v5845_v24, %v5822_v36  ;;  %v12439_v8 = vshrl.u32 %v6100_v30, 5 }
 0x613   :  { %v5825_v20 = vmul.u32 %v5823_v6, %v5821_v12  ;;  %v5826_v14 = vmul.u32 %v5824_v9, %v5821_v12  ;;  %v5827_v63 = vmul.u32 %v5823_v6, %v5822_v36  ;;  %v5828_v34 = vmul.u32 %v5824_v9, %v5822_v36 }
 0x614   :  { %v5850_v25 = vmul.u32 %v5846_v0, %v5822_v36  ;;  %v5851_v17 = vshll.u32 %v5848_v46, 16  ;;  %v5853_v56 = vshll.u32 %v5849_v11, 16  ;;  %v5852_v53 = vshrl.u32 %v5848_v46, 16 }
 0x615   :  { %v5829_v44 = vshll.u32 %v5826_v14, 16  ;;  %v5830_v2 = vshrl.u32 %v5826_v14, 16  ;;  %v5831_v41 = vshll.u32 %v5827_v63, 16  ;;  %v5832_v15 = vshrl.u32 %v5827_v63, 16 }
 0x616   :  { %vm5855_vm2 = vc.u32 %v5847_v32, %v5851_v17  ;;  %v5857_v54 = vadd.s32 %v5851_v17, %v5847_v32  ;;  %v6102_v3 = vand.u32 31, %v6100_v30  ;;  %v5854_v24 = vshrl.u32 %v5849_v11, 16 }
 0x617   :  { %vm5833_vm1 = vc.u32 %v5825_v20, %v5829_v44  ;;  %v5835_v27 = vadd.s32 %v5829_v44, %v5825_v20  ;;  %v5856_v12 = vsel %vm5855_vm2, 1, %v12903_v18  ;;  %vm6120_vm0 = vcmp.lt.s32.totalorder %v12439_v8, 1 }
 0x618   :  { %v5834_v6 = vsel %vm5833_vm1, 1, %v12903_v18  ;;  %v5858_v62 = vadd.s32 %v5856_v12, %v5850_v25  ;;  %vm5859_vm14 = vc.u32 %v5857_v54, %v5853_v56  ;;  %v12445_v9 = vsub.s32 32, %v6102_v3 }
 0x619   :  { %v5836_v36 = vadd.s32 %v5834_v6, %v5828_v34  ;;  %vm5837_vm8 = vc.u32 %v5835_v27, %v5831_v41  ;;  %v5860_v0 = vsel %vm5859_vm14, 1, %v12903_v18  ;;  %v6105_v46 = vshll.u32 %v12908_v5, %v6102_v3 }
 0x61a   :  { %v5838_v32 = vsel %vm5837_vm8, 1, %v12903_v18  ;;  %v5862_v30 = vadd.s32 %v5860_v0, %v5858_v62  ;;  %v6108_v11 = vshll.u32 %v13187_v23, %v6102_v3  ;;  %v12450_v14 = vadd.s32 %v5857_v54, %v5853_v56 }
 0x61b   :  { %v5840_v20 = vadd.s32 %v5838_v32, %v5836_v36  ;;  %v6106_v63 = vshrl.u32 %v13187_v23, %v12445_v9  ;;  %v6109_v34 = vshrl.u32 %v13188_v29, %v12445_v9  ;;  %v6111_v17 = vshll.u32 %v13188_v29, %v6102_v3 }
 0x61c   :  { %v5863_v25 = vadd.s32 %v5862_v30, %v5852_v53  ;;  %v6112_v44 = vshrl.u32 %v13189_v1, %v12445_v9  ;;  %v6114_v62 = vshll.u32 %v13189_v1, %v6102_v3  ;;  %v6115_v56 = vshrl.u32 %v13190_v4, %v12445_v9 }
 0x61d   :  { %v5841_v41 = vadd.s32 %v5840_v20, %v5830_v2  ;;  %v12460_v27 = vor.u32 %v6106_v63, %v6105_v46  ;;  %v12462_v12 = vor.u32 %v6109_v34, %v6108_v11  ;;  %v6117_v53 = vshll.u32 %v13190_v4, %v6102_v3 }
 0x61e   :  { %v5864_v23 = vadd.s32 %v5863_v25, %v5854_v24  ;;  %v12466_v54 = vor.u32 %v6112_v44, %v6111_v17  ;;  %v6118_v29 = vshrl.u32 %v13191_v59, %v12445_v9  ;;  %vm5413_vm3 = vcmp.eq.s32.totalorder %v12386_v47, 0 }
 0x61f   :  { %v5563_v1 = vmul.f32 %v5562_v51, %v12353_v33  ;;  %v12473_v2 = vadd.s32 %v5841_v41, %v5832_v15  ;;  %v5865_v6 = vmul.u32 %v12414_v60, %v12437_v38  ;;  %v6116_v36 = vor.u32 %v6115_v56, %v6114_v62  ;;  %v12497_v15 = vpop.permute.xlu0 %5675 }
 0x620   :  { %vm5416_vm11 = vcmp.eq.s32.totalorder %v12386_v47, 2  ;;  %vm5568_vm7 = vcmp.eq.s32.totalorder %v12388_v40, 0  ;;  %v5868_v24 = vadd.s32 1, %v5864_v23  ;;  %v6119_v0 = vor.u32 %v6118_v29, %v6117_v53 }
 0x621   :  { %vm6122_vm9 = vcmp.lt.s32.totalorder %v12439_v8, 3  ;;  %vm6123_vm13 = vcmp.lt.s32.totalorder %v12439_v8, 4  ;;  %v5414_v4 = vxor.u32 2147483648, %v12400_v58  ;;  %vm5867_vm4 = vc.u32 %v12473_v2, %v12450_v14 }
 0x622   :  { %vm6121_vm6 = vcmp.lt.s32.totalorder %v12439_v8, 2  ;;  %v6128_v33 = vsel %vm6120_vm0, %v12460_v27, %v12462_v12  ;;  %vm5412_vm12 = vcmp.lt.s32.totalorder %v12386_v47, 2  ;;  %v5555_v60 = vadd.f32 1.0, %v12431_v50 }
 0x623   :  { %v5869_v59 = vsel %vm5867_vm4, %v5868_v24, %v5864_v23  ;;  %v6129_v51 = vsel %vm6123_vm13, %v6116_v36, 920167782  ;;  %v6132_v38 = vsel %vm6120_vm0, %v12462_v12, %v12466_v54  ;;  %vm5567_vm5 = vcmp.lt.s32.totalorder %v12388_v40, 2 }
 0x624   :  { %v5569_v3 = vxor.u32 2147483648, %v5563_v1  ;;  %v5870_v32 = vadd.s32 %v5869_v59, %v5865_v6  ;;  %v6130_v30 = vsel %vm6122_vm9, %v12466_v54, %v6129_v51  ;;  %v6133_v50 = vsel %vm6123_vm13, %v6119_v0, 1326507024 }
 0x625   :  { %v6131_v46 = vsel %vm6121_vm6, %v6128_v33, %v6130_v30  ;;  %v6134_v11 = vsel %vm6122_vm9, %v6116_v36, %v6133_v50  ;;  %v6137_v20 = vand.u32 65535, %v12434_v39  ;;  %v6138_v63 = vshrl.u32 %v12434_v39, 16 }
 0x626   :  { %v5871_v34 = vadd.s32 536870912, %v5870_v32  ;;  %v6135_v25 = vsel %vm6121_vm6, %v6132_v38, %v6134_v11  ;;  %v6161_v17 = vand.u32 65535, %v6131_v46  ;;  %v6162_v44 = vshrl.u32 %v6131_v46, 16 }
 0x627   :  { %vm5571_vm10 = vcmp.eq.s32.totalorder %v12388_v40, 2  ;;  %v12516_v62 = vmul.f32 %v12497_v15, %v12392_v37  ;;  %v6139_v41 = vand.u32 65535, %v6135_v25  ;;  %v6140_v56 = vshrl.u32 %v6135_v25, 16 }
 0x628   :  { %v5572_v23 = vxor.u32 2147483648, %v5555_v60  ;;  %v5691_v53 = vmul.f32 %v12497_v15, %v12397_v61  ;;  %v12520_v29 = vshrl.u32 %v5871_v34, 30  ;;  %v6164_v6 = vmul.u32 %v6162_v44, %v6137_v20 }
 0x629   :  { %v5415_v36 = vsel %vm5413_vm3, %v12379_v35, %v5414_v4  ;;  %v6141_v24 = vmul.u32 %v6139_v41, %v6137_v20  ;;  %v6142_v0 = vmul.u32 %v6140_v56, %v6137_v20  ;;  %v6143_v33 = vmul.u32 %v6139_v41, %v6138_v63 }
 0x62a   :  { %v13192_v59 = vxor.u32 2147483648, %v12379_v35  ;;  %v5570_v38 = vsel %vm5568_vm7, %v5555_v60, %v5569_v3  ;;  %v5873_v30 = vshll.u32 %v12520_v29, 30  ;;  %v12533_v50 = vmul.u32 %v6161_v17, %v6138_v63 }
 0x62b   :  { %vm5409_vm15 = vweird.f32 %v13170_v28  ;;  %vm5564_vm2 = vweird.f32 %v13178_v16  ;;  %v6144_v4 = vmul.u32 %v6140_v56, %v6138_v63  ;;  %v6145_v46 = vshll.u32 %v6142_v0, 16 }
 0x62c   :  { %v5418_v51 = vsel %vm5416_vm11, %v13192_v59, %v12400_v58  ;;  %v6147_v11 = vshll.u32 %v6143_v33, 16  ;;  %v6163_v34 = vmul.u32 %v6161_v17, %v6137_v20  ;;  %v5573_v58 = vsel %vm5571_vm10, %v5572_v23, %v5563_v1 }
 0x62d   :  { %v5419_v35 = vsel %vm5412_vm12, %v5415_v36, %v5418_v51  ;;  %v5874_v25 = vsub.s32 %v5870_v32, %v5873_v30  ;;  %v6167_v60 = vshll.u32 %v6164_v6, 16  ;;  %v5574_v3 = vsel %vm5567_vm5, %v5570_v38, %v5573_v58 }
 0x62e   :  { %vm6149_vm1 = vc.u32 %v6141_v24, %v6145_v46  ;;  %v6151_v41 = vadd.s32 %v6145_v46, %v6141_v24  ;;  %v6166_v59 = vmul.u32 %v6162_v44, %v6138_v63  ;;  %v6169_v20 = vshll.u32 %v12533_v50, 16 }
 0x62f   :  { %vm5875_vm14 = vcmp.lt.s32.totalorder %v5874_v25, 0  ;;  %v5876_v22 = vsub.s32 0, %v5874_v25  ;;  %v6150_v56 = vsel %vm6149_vm1, 1, %v12903_v18  ;;  %v6146_v17 = vshrl.u32 %v6142_v0, 16 }
 0x630   :  { %v6152_v47 = vadd.s32 %v6150_v56, %v6144_v4  ;;  %vm6153_vm8 = vc.u32 %v6151_v41, %v6147_v11  ;;  %vm6171_vm3 = vc.u32 %v6163_v34, %v6167_v60  ;;  %v6173_v40 = vadd.s32 %v6167_v60, %v6163_v34 }
 0x631   :  { %v5877_v36 = vsel %vm5875_vm14, %v5876_v22, %v5874_v25  ;;  %v6154_v1 = vsel %vm6153_vm8, 1, %v12903_v18  ;;  %v6172_v32 = vsel %vm6171_vm3, 1, %v12903_v18  ;;  %v6104_v63 = vshrl.u32 %v12908_v5, %v12445_v9 }
 0x632   :  { %v5878_v23 = vclz %v5877_v36  ;;  %v6156_v44 = vadd.s32 %v6154_v1, %v6152_v47  ;;  %v6174_v24 = vadd.s32 %v6172_v32, %v6166_v59  ;;  %v5704_v51 = vadd.f32 %v12279_v13, %v12315_v42 }
 0x633   :  { %v6125_v0 = vsel %vm6123_vm13, %v12466_v54, 2102212464  ;;  %v6168_v38 = vshrl.u32 %v6164_v6, 16  ;;  %vm6175_vm11 = vc.u32 %v6173_v40, %v6169_v20  ;;  %v6148_v30 = vshrl.u32 %v6143_v33, 16 }
 0x634   :  { %v6574_v22 = vadd.s32 4294967294, %v5878_v23  ;;  %v6157_v4 = vadd.s32 %v6156_v44, %v6146_v17  ;;  %v6176_v46 = vsel %vm6175_vm11, 1, %v12903_v18  ;;  %v5420_v11 = vsel %vm5409_vm15, nan, %v5419_v35 }
 0x635   :  { %v12559_v5 = vsel %vm5564_vm2, nan, %v5574_v3  ;;  %v5705_v9 = vadd.f32 %v5704_v51, %v5691_v53  ;;  %v6178_v13 = vadd.s32 %v6176_v46, %v6174_v24  ;;  %v5866_v42 = vadd.s32 %v12450_v14, %v12473_v2  ;;  %v12585_v3 = vpop.permute.xlu2 %5597  ;;  %v13196_v24 = vld [vmem:[#allocation37_spill] sm:$0xff] }
 0x636   :  { %vm6575_vm7 = vcmp.lt.s32.totalorder %v6574_v22, 0  ;;  %v6124_v54 = vsel %vm6120_vm0, %v6104_v63, %v12460_v27  ;;  %v6126_v18 = vsel %vm6122_vm9, %v12462_v12, %v6125_v0  ;;  %v6170_v6 = vshrl.u32 %v12533_v50, 16  ;;  %v13193_v50 = vld [vmem:[#allocation39_spill] sm:$0xff]  ;;  %v13195_v63 = vld [vmem:[#allocation21_spill] sm:$0xff] }
 0x637   :  { %v5881_v28 = vsel %vm6575_vm7, 0, %v6574_v22  ;;  %v12570_v16 = vadd.s32 %v6173_v40, %v6169_v20  ;;  %v6179_v33 = vadd.s32 %v6178_v13, %v6168_v38  ;;  %v12572_v58 = vadd.s32 %v6157_v4, %v6148_v30  ;;  %v13197_v4 = vld [vmem:[#allocation29_spill] sm:$0xff] }
 0x638   :  { %v5882_v53 = vsub.s32 32, %v5881_v28  ;;  %v5883_v34 = vshll.u32 %v5874_v25, %v5881_v28  ;;  %v5886_v35 = vsub.s32 4294967266, %v5881_v28  ;;  %v5692_v14 = vmul.f32 %v12497_v15, %v5420_v11 }
 0x639   :  { %v5693_v27 = vmul.f32 %v12497_v15, %v12559_v5  ;;  %v5695_v2 = vadd.f32 %v12269_v21, %v12308_v49  ;;  %v6127_v12 = vsel %vm6121_vm6, %v6124_v54, %v6126_v18  ;;  %v5625_v60 = vadd.f32 %v13193_v50, %v12226_v57 }
 0x63a   :  { %v5713_v25 = vadd.f32 %v12283_v26, %v12326_v48  ;;  %v5884_v41 = vshrl.u32 %v5866_v42, %v5882_v53  ;;  %v5887_v59 = vadd.s32 127, %v5886_v35  ;;  %v5706_v20 = vrot.slane %v5705_v9, 4 }
 0x63b   :  { %v5696_v56 = vadd.f32 %v5695_v2, %v12516_v62  ;;  %v5722_v15 = vadd.f32 %v12304_v7, %v12384_v31  ;;  %v6180_v21 = vadd.s32 %v6179_v33, %v6170_v6  ;;  %v6181_v17 = vmul.u32 %v12434_v39, %v6127_v12  ;;  %v13194_v39 = vld [vmem:[#allocation22_spill] sm:$0xff]  ;;  %v13202_v2 = vld [vmem:[#allocation11_spill] sm:$0xff] }
 0x63c   :  { %v5885_v49 = vor.u32 %v5884_v41, %v5883_v34  ;;  %v5888_v8 = vshll.u32 %v5887_v59, 23  ;;  %vm6183_vm0 = vc.u32 %v12572_v58, %v12570_v16  ;;  %v5714_v57 = vadd.f32 %v5713_v25, %v5692_v14 }
 0x63d   :  { %v5723_v26 = vadd.f32 %v5722_v15, %v5693_v27  ;;  %v5613_v48 = vmul.f32 %v12585_v3, %v12397_v61  ;;  %v6184_v47 = vadd.s32 1, %v6180_v21  ;;  %v5600_v62 = vmul.f32 %v12175_v55, %v12220_v45 }
 0x63e   :  { %v5602_v7 = vmul.f32 %v12175_v55, %v12231_v43  ;;  %v5889_v31 = vor.u32 4788187, %v5888_v8  ;;  %v5892_v36 = vcvt.s32.f32 %v5885_v49  ;;  %v5697_v1 = vrot.slane %v5696_v56, 4 }
 0x63f   :  { %v5707_v32 = vadd.f32 %v5706_v20, %v5705_v9  ;;  %v5626_v40 = vadd.f32 %v5625_v60, %v13194_v39  ;;  %v6185_v23 = vsel %vm6183_vm0, %v6184_v47, %v6180_v21  ;;  %v5616_v44 = vadd.f32 %v13195_v63, %v5600_v62  ;;  %v13203_v60 = vld [vmem:[#allocation38_spill] sm:$0xff] }
 0x640   :  { %v5634_v51 = vadd.f32 %v13196_v24, %v5602_v7  ;;  %v5890_v0 = vand.u32 2147483647, %v5889_v31  ;;  %v6186_v61 = vadd.s32 %v6185_v23, %v6181_v17  ;;  %v5715_v38 = vrot.slane %v5714_v57, 4 }
 0x641   :  { %v5724_v22 = vrot.slane %v5723_v26, 4  ;;  %v5627_v30 = vadd.f32 %v5626_v40, %v5613_v48  ;;  %v5896_v45 = vsub.s32 4, %v12520_v29  ;;  %v5603_v43 = vmul.f32 %v12175_v55, %v12233_v19 }
 0x642   :  { %v5617_v46 = vadd.f32 %v5616_v44, %v13197_v4  ;;  %v5893_v9 = vmul.f32 %v5892_v36, %v5890_v0  ;;  %v6187_v13 = vadd.s32 536870912, %v6186_v61  ;;  %v5698_v42 = vadd.f32 %v5697_v1, %v5696_v56 }
 0x643   :  { %v5612_v54 = vmul.f32 %v12585_v3, %v12392_v37  ;;  %vm5774_vm9 = vcmp.lt.s32.totalorder %v12340_v52, 0  ;;  %v5708_v18 = vrot.slane %v5707_v32, 2  ;;  %v5614_v28 = vmul.f32 %v12585_v3, %v5420_v11  ;;  %v13201_v37 = vld [vmem:[#allocation28_spill] sm:$0xff] }
 0x644   :  { %v13198_v6 = vand.u32 2147483647, %v12340_v52  ;;  %v5894_v55 = vxor.u32 2147483648, %v5893_v9  ;;  %v12616_v19 = vshrl.u32 %v6187_v13, 30  ;;  %v5716_v53 = vadd.f32 %v5715_v38, %v5714_v57 }
 0x645   :  { %v5725_v34 = vadd.f32 %v5724_v22, %v5723_v26  ;;  %v5628_v35 = vrot.slane %v5627_v30, 4  ;;  %v5897_v14 = vsel %vm5774_vm9, %v5896_v45, %v12520_v29  ;;  %v5611_v27 = vmul.f32 %v13201_v37, %v13186_v10 }
 0x646   :  { %vm12612_vm13 = vcmp.le.f32.partialorder %v13198_v6, 0.7853982  ;;  %v5635_v12 = vadd.f32 %v5634_v51, %v13202_v2  ;;  %v5895_v11 = vsel %vm5774_vm9, %v5894_v55, %v5893_v9  ;;  %v6189_v50 = vshll.u32 %v12616_v19, 30  ;;  %v5732_v9 = vpop.permute.xlu2 %5731 }
 0x647   :  { %v5643_v25 = vadd.f32 %v13203_v60, %v5603_v43  ;;  %v5618_v41 = vadd.f32 %v5617_v46, %v5612_v54  ;;  %v12627_v59 = vsel %vm12612_vm13, %v12340_v52, %v5895_v11  ;;  %v5709_v56 = vadd.f32 %v5708_v18, %v5707_v32  ;;  %v13204_v11 = vld [vmem:[#allocation19_spill] sm:$0xff] }
 0x648   :  { %v5636_v20 = vadd.f32 %v5635_v12, %v5614_v28  ;;  %v5899_v29 = vsel %vm12612_vm13, 0, %v5897_v14  ;;  %v5900_v10 = vmul.f32 %v12627_v59, %v12627_v59  ;;  %v6190_v15 = vsub.s32 %v6186_v61, %v6189_v50 }
 0x649   :  { %v5699_v21 = vrot.slane %v5698_v42, 2  ;;  %v5717_v49 = vrot.slane %v5716_v53, 2  ;;  %v5726_v8 = vrot.slane %v5725_v34, 2  ;;  %v5629_v17 = vadd.f32 %v5628_v35, %v5627_v30 }
 0x64a   :  { %v5901_v57 = vmul.f32 -0.001358992, %v5900_v10  ;;  %v5908_v26 = vmul.f32 -0.00019511016, %v5900_v10  ;;  %vm6191_vm4 = vcmp.lt.s32.totalorder %v6190_v15, 0  ;;  %v6192_v48 = vsub.s32 0, %v6190_v15 }
 0x64b   :  { %v5615_v47 = vmul.f32 %v12585_v3, %v12559_v5  ;;  %v5916_v62 = vadd.s32 3, %v5899_v29  ;;  %v5710_v7 = vrot.slane %v5709_v56, 1  ;;  %v5718_v31 = vadd.f32 %v5717_v49, %v5716_v53 }
 0x64c   :  { %v5902_v36 = vadd.f32 0.041655596, %v5901_v57  ;;  %v5909_v1 = vadd.f32 0.008332121, %v5908_v26  ;;  %v6193_v32 = vsel %vm6191_vm4, %v6192_v48, %v6190_v15  ;;  %v5727_v39 = vadd.f32 %v5726_v8, %v5725_v34 }
 0x64d   :  { %v5619_v40 = vrot.slane %v5618_v41, 4  ;;  %v5644_v23 = vadd.f32 %v5643_v25, %v5611_v27  ;;  %v6194_v63 = vclz %v6193_v32  ;;  %v5719_v44 = vrot.slane %v5718_v31, 1 }
 0x64e   :  { %v5903_v24 = vmul.f32 %v5902_v36, %v5900_v10  ;;  %v5910_v51 = vmul.f32 %v5909_v1, %v5900_v10  ;;  %v5700_v0 = vadd.f32 %v5699_v21, %v5698_v42  ;;  %v5630_v61 = vrot.slane %v5629_v17, 2 }
 0x64f   :  { %v5637_v38 = vrot.slane %v5636_v20, 4  ;;  %v5645_v22 = vadd.f32 %v5644_v23, %v5615_v47  ;;  %v12635_v30 = vand.u32 3, %v5916_v62  ;;  %v6580_v5 = vadd.s32 4294967294, %v6194_v63 }
 0x650   :  { %v5904_v3 = vadd.f32 -0.4999988, %v5903_v24  ;;  %v5911_v45 = vadd.f32 -0.16666654, %v5910_v51  ;;  %v5711_v43 = vadd.f32 %v5710_v7, %v5709_v56  ;;  %v5728_v4 = vrot.slane %v5727_v39, 1 }
 0x651   :  { %v6182_v46 = vadd.s32 %v12570_v16, %v12572_v58  ;;  %vm6581_vm6 = vcmp.lt.s32.totalorder %v6580_v5, 0  ;;  %v5720_v13 = vadd.f32 %v5719_v44, %v5718_v31  ;;  %v5620_v54 = vadd.f32 %v5619_v40, %v5618_v41 }
 0x652   :  { %v5912_v18 = vmul.f32 %v5911_v45, %v5900_v10  ;;  %v6197_v28 = vsel %vm6581_vm6, 0, %v6580_v5  ;;  %v5701_v42 = vrot.slane %v5700_v0, 1  ;;  %v5631_v6 = vadd.f32 %v5630_v61, %v5629_v17  ;;  %v5656_v5 = vpop.permute.xlu1 %5655 }
 0x653   :  { %v5646_v33 = vrot.slane %v5645_v22, 4  ;;  %v6198_v55 = vsub.s32 32, %v6197_v28  ;;  %v6199_v53 = vshll.u32 %v6190_v15, %v6197_v28  ;;  %v6202_v34 = vsub.s32 4294967266, %v6197_v28 }
 0x654   :  { %v5905_v35 = vmul.f32 %v5904_v3, %v5900_v10  ;;  %v5913_v14 = vadd.f32 1.0, %v5912_v18  ;;  %v5729_v37 = vadd.f32 %v5728_v4, %v5727_v39  ;;  %v5735_v27 = vadd.f32 %v5732_v9, %v5711_v43 }
 0x655   :  { %v12639_v2 = vand.u32 3, %v5899_v29  ;;  %v6200_v12 = vshrl.u32 %v6182_v46, %v6198_v55  ;;  %v6203_v16 = vadd.s32 127, %v6202_v34  ;;  %v5736_v58 = vadd.f32 %v5732_v9, %v5720_v13 }
 0x656   :  { %vm5919_vm12 = vcmp.eq.s32.totalorder %v12635_v30, 0  ;;  %vm6090_vm5 = vcmp.lt.s32.totalorder %v13204_v11, 0  ;;  %v5702_v50 = vadd.f32 %v5701_v42, %v5700_v0  ;;  %v5621_v60 = vrot.slane %v5620_v54, 2 }
 0x657   :  { %v5632_v25 = vrot.slane %v5631_v6, 1  ;;  %v5638_v41 = vadd.f32 %v5637_v38, %v5636_v20  ;;  %v6201_v56 = vor.u32 %v6200_v12, %v6199_v53  ;;  %v6204_v15 = vshll.u32 %v6203_v16, 23 }
 0x658   :  { %vm6404_vm10 = vcmask 1040384   ;;  %v6424_v10 = vlaneseq  ;;  %v5906_v21 = vadd.f32 1.0, %v5905_v35  ;;  %v5914_v49 = vmul.f32 %v5913_v14, %v12627_v59 }
 0x659   :  { %v5737_v29 = vadd.f32 %v5732_v9, %v5729_v37  ;;  %v6416_v8 = vrot.slane %v5735_v27, 7  ;;  %v6205_v17 = vor.u32 4788187, %v6204_v15  ;;  %v6208_v57 = vcvt.s32.f32 %v6201_v56 }
 0x65a   :  { %vm6406_vm15 = vcmask 1042434   ;;  %v6417_v26 = vrot.slane %v5736_v58, 6  ;;  %vm6408_vm2 = vcmask 1041408   ;;  %v5734_v48 = vadd.f32 %v5732_v9, %v5702_v50 }
 0x65b   :  { %v6418_v47 = vrot.slane %v5737_v29, 5  ;;  %v5639_v62 = vrot.slane %v5638_v41, 2  ;;  %v6206_v7 = vand.u32 2147483647, %v6205_v17  ;;  %vm12644_vm1 = vcmp.lt.s32.totalorder %v6424_v10, 512 }
 0x65c   :  { %v5622_v31 = vadd.f32 %v5621_v60, %v5620_v54  ;;  %v5647_v36 = vadd.f32 %v5646_v33, %v5645_v22  ;;  %v6212_v1 = vsub.s32 4, %v12616_v19  ;;  %v6419_v59 = vsel %vm6404_vm10, %v5734_v48, %v6416_v8 }
 0x65d   :  { %v6420_v32 = vsel %vm6406_vm15, %v6417_v26, %v6418_v47  ;;  %v5640_v39 = vadd.f32 %v5639_v62, %v5638_v41  ;;  %v5920_v40 = vxor.u32 2147483648, %v5914_v49  ;;  %v5923_v23 = vxor.u32 2147483648, %v5906_v21 }
 0x65e   :  { %v6209_v63 = vmul.f32 %v6208_v57, %v6206_v7  ;;  %v12652_v44 = vsel %vm6408_vm2, %v6419_v59, %v6420_v32  ;;  %vm5922_vm14 = vcmp.eq.s32.totalorder %v12635_v30, 2  ;;  %v5633_v24 = vadd.f32 %v5632_v25, %v5631_v6 }
 0x65f   :  { %6585 = vst.msk [vmem:[%s12718_s6 + $0x1] ss:$4 sm:$0xf] %vm12644_vm1, %v12652_v44  ;;  %v5641_v51 = vrot.slane %v5640_v39, 1  ;;  %v5648_v0 = vrot.slane %v5647_v36, 2  ;;  %vm5918_vm8 = vcmp.lt.s32.totalorder %v12635_v30, 2  ;;  %v5921_v4 = vsel %vm5919_vm12, %v5906_v21, %v5920_v40 }
 0x660   :  { %vm6074_vm3 = vcmp.eq.s32.totalorder %v12639_v2, 0  ;;  %v13207_v61 = vand.u32 2147483647, %v13204_v11  ;;  %v6210_v22 = vxor.u32 2147483648, %v6209_v63  ;;  %vm6077_vm7 = vcmp.eq.s32.totalorder %v12639_v2, 2 }
 0x661   :  { %v5623_v3 = vrot.slane %v5622_v31, 1  ;;  %v5642_v45 = vadd.f32 %v5641_v51, %v5640_v39  ;;  %v5649_v43 = vadd.f32 %v5648_v0, %v5647_v36  ;;  %v5924_v46 = vsel %vm5922_vm14, %v5923_v23, %v5914_v49 }
 0x662   :  { %vm12665_vm11 = vcmp.le.f32.partialorder %v13207_v61, 0.7853982  ;;  %v6211_v9 = vsel %vm6090_vm5, %v6210_v22, %v6209_v63  ;;  %v6213_v13 = vsel %vm6090_vm5, %v6212_v1, %v12616_v19  ;;  %v5659_v28 = vadd.f32 %v5656_v5, %v5633_v24 }
 0x663   :  { %v6214_v54 = vsel %vm12665_vm11, %v13204_v11, %v6211_v9  ;;  %v5650_v18 = vrot.slane %v5649_v43, 1  ;;  %v5660_v42 = vadd.f32 %v5656_v5, %v5642_v45  ;;  %vm6073_vm0 = vcmp.lt.s32.totalorder %v12639_v2, 2 }
 0x664   :  { %v6076_v6 = vsel %vm6074_vm3, %v5906_v21, %v5920_v40  ;;  %v6079_v33 = vsel %vm6077_vm7, %v5923_v23, %v5914_v49  ;;  %v6216_v55 = vmul.f32 %v6214_v54, %v6214_v54  ;;  %vm5915_vm9 = vweird.f32 %v12340_v52 }
 0x665   :  { %v5624_v53 = vadd.f32 %v5623_v3, %v5622_v31  ;;  %v5651_v34 = vadd.f32 %v5650_v18, %v5649_v43  ;;  %v5925_v19 = vsel %vm5918_vm8, %v5921_v4, %v5924_v46  ;;  %v6215_v35 = vsel %vm12665_vm11, 0, %v6213_v13 }
 0x666   :  { %v6217_v14 = vmul.f32 -0.001358992, %v6216_v55  ;;  %v6224_v37 = vmul.f32 -0.00019511016, %v6216_v55  ;;  %v6080_v27 = vsel %vm6073_vm0, %v6076_v6, %v6079_v33  ;;  %v6401_v16 = vrot.slane %v5659_v28, 7 }
 0x667   :  { %v5661_v12 = vadd.f32 %v5656_v5, %v5651_v34  ;;  %v6402_v58 = vrot.slane %v5660_v42, 6  ;;  %v5926_v60 = vsel %vm5915_vm9, nan, %v5925_v19  ;;  %v6386_v25 = vadd.s32 3, %v6215_v35 }
 0x668   :  { %v6218_v2 = vadd.f32 0.041655596, %v6217_v14  ;;  %v6225_v50 = vadd.f32 0.008332121, %v6224_v37  ;;  %v5658_v41 = vadd.f32 %v5656_v5, %v5624_v53  ;;  %v6081_v30 = vsel %vm5915_vm9, nan, %v6080_v27 }
 0x669   :  { %v6403_v56 = vrot.slane %v5661_v12, 5  ;;  %v6232_v21 = vand.u32 3, %v6215_v35  ;;  %v5927_v8 = vmul.f32 0.9949874, %v5926_v60  ;;  %v6082_v48 = vmul.f32 0.1, %v6081_v30 }
 0x66a   :  { %v6219_v15 = vmul.f32 %v6218_v2, %v6216_v55  ;;  %v6226_v10 = vmul.f32 %v6225_v50, %v6216_v55  ;;  %v6405_v49 = vsel %vm6404_vm10, %v5658_v41, %v6401_v16  ;;  %v6387_v47 = vand.u32 3, %v6386_v25 }
 0x66b   :  { %v6407_v29 = vsel %vm6406_vm15, %v6402_v58, %v6403_v56  ;;  %v6083_v36 = vadd.f32 %v6082_v48, %v5927_v8  ;;  %vm6237_vm13 = vcmp.eq.s32.totalorder %v6232_v21, 2  ;;  %vm6233_vm6 = vcmp.lt.s32.totalorder %v6232_v21, 2 }
 0x66c   :  { %v6220_v17 = vadd.f32 -0.4999988, %v6219_v15  ;;  %v6227_v57 = vadd.f32 -0.16666654, %v6226_v10  ;;  %v6409_v26 = vsel %vm6408_vm2, %v6405_v49, %v6407_v29  ;;  %vm6392_vm4 = vcmp.eq.s32.totalorder %v6387_v47, 2 }
 0x66d   :  { %6428 = vst.msk [vmem:[%s12718_s6] ss:$4 sm:$0xf] %vm12644_vm1, %v6409_v26  ;;  %vm6234_vm12 = vcmp.eq.s32.totalorder %v6232_v21, 0  ;;  %vm6389_vm5 = vcmp.eq.s32.totalorder %v6387_v47, 0  ;;  %vm6388_vm10 = vcmp.lt.s32.totalorder %v6387_v47, 2  ;;  %vm6231_vm15 = vweird.f32 %v13204_v11 }
 0x66e   :  { %v6221_v52 = vmul.f32 %v6220_v17, %v6216_v55  ;;  %v6228_v62 = vmul.f32 %v6227_v57, %v6216_v55  ;;  %v6423_v23 = vmul.f32 %v12652_v44, %v6083_v36  ;;  %v6411_v63 = vmul.f32 %v6409_v26, %v6083_v36 }
 0x670   :  { %v6222_v7 = vadd.f32 1.0, %v6221_v52  ;;  %v6229_v31 = vadd.f32 1.0, %v6228_v62 }
 0x672   :  { %v6230_v1 = vmul.f32 %v6229_v31, %v6214_v54  ;;  %v6238_v59 = vxor.u32 2147483648, %v6222_v7 }
 0x674   :  { %v6235_v32 = vxor.u32 2147483648, %v6230_v1  ;;  %v6239_v39 = vsel %vm6237_vm13, %v6238_v59, %v6230_v1  ;;  %v6394_v40 = vsel %vm6392_vm4, %v6238_v59, %v6230_v1 }
 0x676   :  { %v6236_v24 = vsel %vm6234_vm12, %v6222_v7, %v6235_v32  ;;  %v6391_v51 = vsel %vm6389_vm5, %v6222_v7, %v6235_v32 }
 0x677   :  { %v6240_v0 = vsel %vm6233_vm6, %v6236_v24, %v6239_v39  ;;  %v6395_v61 = vsel %vm6388_vm10, %v6391_v51, %v6394_v40 }
 0x678   :  { %v6241_v38 = vsel %vm6231_vm15, nan, %v6240_v0  ;;  %v6396_v22 = vsel %vm6231_vm15, nan, %v6395_v61 }
 0x679   :  { %v6432_v5 = vmul.f32 %v6423_v23, %v6396_v22  ;;  %v6437_v3 = vmul.f32 %v6423_v23, %v6241_v38  ;;  %v6431_v45 = vmul.f32 %v6411_v63, %v6241_v38  ;;  %v6436_v43 = vmul.f32 %v6411_v63, %v6396_v22 }
 0x67b   :  { %v6433_v4 = vsub.f32 %v6431_v45, %v6432_v5  ;;  %v6438_v46 = vadd.f32 %v6437_v3, %v6436_v43 }
 0x67d   :  { %6586 = vst.msk [vmem:[%s12718_s6 + $0x2] ss:$4 sm:$0xf] %vm12644_vm1, %v6433_v4 }
 0x67e   :  { %6587 = vst.msk [vmem:[%s12718_s6 + $0x3] ss:$4 sm:$0xf] %vm12644_vm1, %v6438_v46 }

</bundles_post_ra>
